<compile_context>
chip_gen: v7x
topology: tpu7x:2x2x1
jax: 0.10.0
libtpu: 0.0.40
codegen_flags: <defaults>
</compile_context>

<pallas_src>
import jax
import jax.numpy as jnp
from jax.experimental import pallas as pl
from jax.experimental.pallas import tpu as pltpu


# ------------------------------- helpers ------------------------------------

def _rup(x, m):
    return (x + m - 1) // m * m


def _pad_to(a, shape):
    return jnp.pad(a, [(0, t - s) for s, t in zip(a.shape, shape)])


def _pick_tile_s(Sp, Bp, Hp, budget_bytes=12 * 1024 * 1024):
    """Largest S tile that divides Sp and keeps enc double-buffer + temporaries in budget."""
    for c in (512, 256, 128):
        if Sp % c:
            continue
        # 2x double-buffered bf16 enc block + ~3 f32 block-shaped temporaries (e_proj/energy/p*enc)
        need = Bp * c * Hp * (2 * 2 + 3 * 4)
        if need <= budget_bytes or c == 128:
            return c
    return Sp


def _pick_tile_v(Vp, Hp, budget_bytes=8 * 1024 * 1024):
    """Largest vocab tile that divides Vp and keeps the fused bf16 weight double-buffer in budget."""
    for c in (2048, 1024, 512, 256, 128):
        if Vp % c:
            continue
        need = 2 * (2 * Hp) * c * 2      # 2 buffers x (2Hp, TILE_V) bf16
        if need <= budget_bytes or c == 128:
            return c
    return Vp


def _vmem_limit_bytes(requested):
    """Explicit scoped-VMEM limit, clamped to the current generation's capacity."""
    try:
        cap = int(pltpu.get_tpu_info().vmem_capacity_bytes)
    except Exception:
        cap = 128 * 1024 * 1024
    lo = 16 * 1024 * 1024
    hi = max(int(0.75 * cap), lo)
    return int(min(max(int(requested), lo), hi))


# --------------------- kernel 1: additive attention + GRU -------------------

def attn_gru_kernel(emb_ref, h_ref, enc_ref, bias_ref,
                    wa_h_ref, wa_e_ref, ba_ref, v_ref,
                    gru_w_hbm, b_ih_ref, b_hh_ref,
                    hnew_ref, hc_ref, attn_ref,
                    gru_w_vmem, gru_sem, hproj_sc, m_sc, l_sc, ctx_sc):
    s = pl.program_id(0)
    n_s = pl.num_programs(0)
    Bp, TS, Hp = enc_ref.shape
    Ep = emb_ref.shape[1]
    Hg = h_ref.shape[1]

    # GRU weights: fetched once, consumed only on the last S block -> the DMA overlaps
    # the whole attention stream instead of serializing in front of block 0.
    gru_dma = pltpu.make_async_copy(gru_w_hbm, gru_w_vmem, gru_sem)

    @pl.when(s == 0)
    def _init():
        gru_dma.start()
        # h-projection of the additive attention: computed ONCE per call.
        hproj_sc[...] = (jnp.dot(h_ref[...], wa_h_ref[...],
                                 preferred_element_type=jnp.float32) + ba_ref[...])
        m_sc[...] = jnp.full_like(m_sc, -jnp.inf)
        l_sc[...] = jnp.zeros_like(l_sc)
        ctx_sc[...] = jnp.zeros_like(ctx_sc)

    enc_bf = enc_ref[...]                                            # (Bp, TS, Hp) bf16
    e_proj = jnp.dot(enc_bf.reshape(Bp * TS, Hp), wa_e_ref[...],     # bf16 MXU, f32 acc
                     preferred_element_type=jnp.float32).reshape(Bp, TS, Hp)
    energy = jnp.tanh(e_proj + hproj_sc[...][:, None, :])            # (Bp, TS, Hp) f32
    # scores = v^T energy via VPU multiply + lane reduce; mask folded as additive bias.
    scores = jnp.sum(energy * v_ref[...][None, :, :], axis=-1) + bias_ref[...]   # (Bp, TS)

    # Stage raw (biased) scores in the VMEM-resident attention output; normalized
    # in place on the last S block.
    attn_ref[:, pl.ds(pl.multiple_of(s * TS, TS), TS)] = scores

    # Online-softmax running statistics + running (unnormalized) context.
    m_prev = m_sc[...]
    m_new = jnp.maximum(m_prev, jnp.max(scores, axis=-1, keepdims=True))
    alpha = jnp.exp(m_prev - m_new)
    p = jnp.exp(scores - m_new)                                      # (Bp, TS)
    l_sc[...] = alpha * l_sc[...] + jnp.sum(p, axis=-1, keepdims=True)
    ctx_sc[...] = alpha * ctx_sc[...] + jnp.sum(
        p[:, :, None] * enc_bf.astype(jnp.float32), axis=1)
    m_sc[...] = m_new

    @pl.when(s == n_s - 1)
    def _finalize():
        gru_dma.wait()
        inv_l = pl.reciprocal(l_sc[...], approx=True)                # EUP slot, ~free
        attn_ref[...] = jnp.exp(attn_ref[...] - m_sc[...]) * inv_l
        context = ctx_sc[...] * inv_l                                # (Bp, Hp) f32

        # Single-step GRU cell (PyTorch gate order r, z, n); weight-split input matmuls.
        h = h_ref[...]
        w = gru_w_vmem                                               # (Ep+2Hp, 3Hp) f32
        gi = (jnp.dot(emb_ref[...], w[:Ep, :], preferred_element_type=jnp.float32)
              + jnp.dot(context, w[Ep:Ep + Hg, :], preferred_element_type=jnp.float32)
              + b_ih_ref[...])
        gh = jnp.dot(h, w[Ep + Hg:, :], preferred_element_type=jnp.float32) + b_hh_ref[...]
        r = jax.nn.sigmoid(gi[:, :Hg] + gh[:, :Hg])
        z = jax.nn.sigmoid(gi[:, Hg:2 * Hg] + gh[:, Hg:2 * Hg])
        n = jnp.tanh(gi[:, 2 * Hg:] + r * gh[:, 2 * Hg:])
        h_new = (1.0 - z) * n + z * h
        hnew_ref[...] = h_new
        # Pre-concatenated bf16 activation for fc_out (single fused weight there).
        hc_ref[:, :Hg] = h_new.astype(hc_ref.dtype)
        hc_ref[:, Hg:] = context.astype(hc_ref.dtype)


# --------------------- kernel 2: fc_out, tiled over vocab -------------------

def fc_out_kernel(hc_ref, fcw_ref, fcb_ref, pred_ref):
    pred_ref[...] = (jnp.dot(hc_ref[...], fcw_ref[...],
                             preferred_element_type=jnp.float32) + fcb_ref[...])


# --------------------------- parameter preparation --------------------------

def init_params(key, output_dim, emb_dim, hidden_dim):
    """Original (PyTorch-layout) parameters, weights pre-transposed for x @ W."""
    ks = jax.random.split(key, 10)
    s = 0.1
    nrm = lambda k, shp: (s * jax.random.normal(k, shp, jnp.float32))
    E, H, V = emb_dim, hidden_dim, output_dim
    return {
        "embedding": nrm(ks[0], (V, E)),
        # attention: Linear(2H -> H) + v: Linear(H -> 1, no bias)
        "attn_w": nrm(ks[1], (2 * H, H)),
        "attn_b": nrm(ks[2], (1, H)),
        "attn_v": nrm(ks[3], (H, 1)),
        # GRU (input size E+H, hidden H), stored transposed: x @ W
        "w_ih": nrm(ks[4], (E + H, 3 * H)),
        "w_hh": nrm(ks[5], (H, 3 * H)),
        "b_ih": nrm(ks[6], (1, 3 * H)),
        "b_hh": nrm(ks[7], (1, 3 * H)),
        # fc_out: Linear(2H -> V)
        "fc_w": nrm(ks[8], (2 * H, V)),
        "fc_b": nrm(ks[9], (1, V)),
    }


def prepare_params(params, emb_dim, hidden_dim, output_dim):
    """Split concat-weights per operand, fuse fc_out weight, pad to lane multiples, cast
    the streamed heavy weights to bf16 (MXU still accumulates f32)."""
    E, H, V = emb_dim, hidden_dim, output_dim
    Ep, Hp, Vp = _rup(E, 128), _rup(H, 128), _rup(V, 128)

    def pad_gates(w, rows_p):  # (rows, 3H) -> (rows_p, 3*Hp), padded per gate block
        gs = [_pad_to(w[:, g * H:(g + 1) * H], (rows_p, Hp)) for g in range(3)]
        return jnp.concatenate(gs, axis=1)

    aw = params["attn_w"]       # (2H, H):  rows [0:H]=h part, [H:2H]=enc part
    wih = params["w_ih"]        # (E+H, 3H): rows [0:E]=embedded, [E:E+H]=context
    fcw = params["fc_w"]        # (2H, V):  rows [0:H]=h_new,    [H:2H]=context

    # GRU weights packed into ONE HBM array; DMA'd in-kernel once (overlaps the S stream):
    #   rows [0:Ep]       : x embedded
    #   rows [Ep:Ep+Hp]   : x context
    #   rows [Ep+Hp:]     : x hidden
    gru_w = jnp.concatenate([pad_gates(wih[:E], Ep),
                             pad_gates(wih[E:], Hp),
                             pad_gates(params["w_hh"], Hp)], axis=0)

    # fc_out weight fused for the [h_new || context] activation, stored bf16 (streamed).
    fc_w = jnp.concatenate([_pad_to(fcw[:H], (Hp, Vp)),
                            _pad_to(fcw[H:], (Hp, Vp))], axis=0).astype(jnp.bfloat16)

    return {
        "embedding": _pad_to(params["embedding"], (V, Ep)),
        "wa_h": _pad_to(aw[:H], (Hp, Hp)),
        "wa_e": _pad_to(aw[H:], (Hp, Hp)).astype(jnp.bfloat16),
        "ba":   _pad_to(params["attn_b"], (1, Hp)),
        "v":    _pad_to(params["attn_v"].T, (1, Hp)),
        "gru_w": gru_w,
        "b_ih": pad_gates(params["b_ih"], 1),
        "b_hh": pad_gates(params["b_hh"], 1),
        "fc_w": fc_w,
        "fc_b": _pad_to(params["fc_b"], (1, Vp)),
    }


# ------------------------------- forward ------------------------------------

@jax.jit
def decoder_forward(prep, input_char, hidden, encoder_outputs, src_mask):
    """input_char: (B,) int32; hidden: (num_layers=1, B, H); encoder_outputs: (B, S, H);
    src_mask: (B, S) with 1.0 = valid.  Returns (prediction (B,V), hidden (1,B,H), attn (B,S))."""
    B = input_char.shape[0]
    S = encoder_outputs.shape[1]
    H = hidden.shape[-1]
    V = prep["embedding"].shape[0]
    Ep = prep["embedding"].shape[1]
    Hp = prep["wa_h"].shape[0]
    Vp = prep["fc_b"].shape[1]
    Bp = _rup(B, 8)
    Sp = _rup(S, 128)

    # Embedding lookup (gather) stays in plain JAX glue.
    ids = jnp.pad(input_char, (0, Bp - B))
    emb = jnp.take(prep["embedding"], ids, axis=0)                     # (Bp, Ep) f32

    h_top = _pad_to(hidden[-1].astype(jnp.float32), (Bp, Hp))          # (Bp, Hp) f32
    enc = _pad_to(encoder_outputs.astype(jnp.float32),
                  (Bp, Sp, Hp)).astype(jnp.bfloat16)                   # (Bp, Sp, Hp) bf16
    mask_p = _pad_to(src_mask.astype(jnp.float32), (Bp, Sp))
    bias = jnp.where(mask_p > 0.0, 0.0, -1e10).astype(jnp.float32)     # additive mask bias

    vmem = pl.BlockSpec(memory_space=pltpu.MemorySpace.VMEM)           # whole-array, single copy

    # ---- kernel 1: attention (streamed over S) + GRU step -------------------
    TILE_S = _pick_tile_s(Sp, Bp, Hp)
    k1_vmem = (
        Bp * Ep * 4 + Bp * Hp * 4                          # emb, h
        + 2 * Bp * TILE_S * Hp * 2                         # enc blocks (double buffered, bf16)
        + 2 * Bp * TILE_S * 4                              # bias blocks
        + Hp * Hp * 4 + Hp * Hp * 2 + 2 * Hp * 4           # wa_h, wa_e(bf16), ba, v
        + (Ep + 2 * Hp) * 3 * Hp * 4 + 2 * 3 * Hp * 4      # GRU weight scratch + biases
        + Bp * Hp * 4 + Bp * 2 * Hp * 2 + Bp * Sp * 4      # outputs h_new, hc(bf16), attn
        + 3 * Bp * Hp * 4 + 2 * Bp * 4                     # hproj / ctx / m / l scratch
        + 4 * Bp * TILE_S * Hp * 4                         # compiler temporaries headroom
    )
    h_new, hc, attn = pl.pallas_call(
        attn_gru_kernel,
        grid=(Sp // TILE_S,),
        in_specs=[vmem,                                                 # emb
                  vmem,                                                 # h
                  pl.BlockSpec((Bp, TILE_S, Hp), lambda s: (0, s, 0)),  # enc (streamed, bf16)
                  pl.BlockSpec((Bp, TILE_S), lambda s: (0, s)),         # mask bias (streamed)
                  vmem, vmem, vmem, vmem,                               # wa_h, wa_e, ba, v
                  pl.BlockSpec(memory_space=pl.ANY),                    # packed GRU weights (HBM)
                  vmem, vmem],                                          # b_ih, b_hh
        out_specs=(vmem, vmem, vmem),
        out_shape=(jax.ShapeDtypeStruct((Bp, Hp), jnp.float32),        # h_new
                   jax.ShapeDtypeStruct((Bp, 2 * Hp), jnp.bfloat16),   # [h_new || context]
                   jax.ShapeDtypeStruct((Bp, Sp), jnp.float32)),       # attention weights
        scratch_shapes=[pltpu.VMEM((Ep + 2 * Hp, 3 * Hp), jnp.float32),  # GRU weights landing
                        pltpu.SemaphoreType.DMA(()),                     # GRU weight DMA sem
                        pltpu.VMEM((Bp, Hp), jnp.float32),               # h-projection (+bias)
                        pltpu.VMEM((Bp, 1), jnp.float32),                # running max
                        pltpu.VMEM((Bp, 1), jnp.float32),                # running sum
                        pltpu.VMEM((Bp, Hp), jnp.float32)],              # running context
        compiler_params=pltpu.CompilerParams(
            dimension_semantics=("arbitrary",),
            vmem_limit_bytes=_vmem_limit_bytes(k1_vmem)),
    )(emb, h_top, enc, bias,
      prep["wa_h"], prep["wa_e"], prep["ba"], prep["v"],
      prep["gru_w"], prep["b_ih"], prep["b_hh"])

    # ---- kernel 2: fc_out, tiled over the vocab axis (parallel / megacore) ---
    TILE_V = _pick_tile_v(Vp, Hp)
    k2_vmem = (
        Bp * 2 * Hp * 2                                    # hc (bf16, resident)
        + 2 * 2 * Hp * TILE_V * 2                          # fused weight blocks (double buf, bf16)
        + 2 * TILE_V * 4                                   # bias blocks
        + 2 * Bp * TILE_V * 4                              # output blocks
        + 2 * Bp * TILE_V * 4                              # headroom
    )
    pred = pl.pallas_call(
        fc_out_kernel,
        grid=(Vp // TILE_V,),
        in_specs=[vmem,                                                  # hc (bf16)
                  pl.BlockSpec((2 * Hp, TILE_V), lambda j: (0, j)),      # fused fc weight block
                  pl.BlockSpec((1, TILE_V), lambda j: (0, j))],          # fc_b block
        out_specs=pl.BlockSpec((Bp, TILE_V), lambda j: (0, j)),
        out_shape=jax.ShapeDtypeStruct((Bp, Vp), jnp.float32),
        compiler_params=pltpu.CompilerParams(
            dimension_semantics=("parallel",),
            vmem_limit_bytes=_vmem_limit_bytes(k2_vmem)),
    )(hc, prep["fc_w"], prep["fc_b"])

    return pred[:B, :V], h_new[:B, :H][None], attn[:B, :S]


# ------------------------------- reference ----------------------------------

def decoder_reference(params, input_char, hidden, encoder_outputs, src_mask):
    """Pure-JAX reference of the same forward pass (uses the original params)."""
    emb = jnp.take(params["embedding"], input_char, axis=0)
    h = hidden[-1]
    B, S, H = encoder_outputs.shape
    h_rep = jnp.broadcast_to(h[:, None, :], (B, S, H))
    concat = jnp.concatenate([h_rep, encoder_outputs], axis=-1).reshape(B * S, 2 * H)
    energy = jnp.tanh(concat @ params["attn_w"] + params["attn_b"])
    scores = (energy @ params["attn_v"]).reshape(B, S)
    scores = jnp.where(src_mask > 0.0, scores, -1e10)
    attn = jax.nn.softmax(scores, axis=-1)
    context = jnp.einsum("bs,bsh->bh", attn, encoder_outputs)
    x = jnp.concatenate([emb, context], axis=1)
    gi = x @ params["w_ih"] + params["b_ih"]
    gh = h @ params["w_hh"] + params["b_hh"]
    r = jax.nn.sigmoid(gi[:, :H] + gh[:, :H])
    z = jax.nn.sigmoid(gi[:, H:2 * H] + gh[:, H:2 * H])
    n = jnp.tanh(gi[:, 2 * H:] + r * gh[:, 2 * H:])
    h_new = (1.0 - z) * n + z * h
    pred = jnp.concatenate([h_new, context], axis=1) @ params["fc_w"] + params["fc_b"]
    return pred, h_new[None], attn


# --------------------------------- demo --------------------------------------

if __name__ == "__main__":
    # small shapes: batch=2, src_len=8, emb_dim=16, hidden_dim=32, vocab(output_dim)=32
    B, S, E, H, V = 2, 8, 16, 32, 32

    key = jax.random.PRNGKey(0)
    kp, k1, k2, k3 = jax.random.split(key, 4)
    params = init_params(kp, output_dim=V, emb_dim=E, hidden_dim=H)
    prep = prepare_params(params, emb_dim=E, hidden_dim=H, output_dim=V)

    input_char = jax.random.randint(k1, (B,), 0, V, dtype=jnp.int32)
    hidden = 0.1 * jax.random.normal(k2, (1, B, H), jnp.float32)      # num_layers = 1
    encoder_outputs = 0.1 * jax.random.normal(k3, (B, S, H), jnp.float32)
    lengths = jnp.array([S, 5], dtype=jnp.int32)
    src_mask = (jnp.arange(S)[None, :] < lengths[:, None]).astype(jnp.float32)

    pred, new_hidden, attn = decoder_forward(prep, input_char, hidden,
                                             encoder_outputs, src_mask)
    jax.block_until_ready((pred, new_hidden, attn))

    pred_r, hid_r, attn_r = decoder_reference(params, input_char, hidden,
                                              encoder_outputs, src_mask)
    assert pred.shape == (B, V) and new_hidden.shape == (1, B, H) and attn.shape == (B, S)
    assert jnp.allclose(pred, pred_r, atol=2e-2, rtol=2e-2)
    assert jnp.allclose(new_hidden, hid_r, atol=2e-2, rtol=2e-2)
    assert jnp.allclose(attn, attn_r, atol=2e-2, rtol=2e-2)

    print("KERNEL_OK")
</pallas_src>

<mosaic_0001>
module attributes {stable_mosaic.version = 11 : i64} {
  func.func @fc_out_kernel(%arg0: i32, %arg1: memref<8x256xbf16, #tpu.memory_space<vmem>>, %arg2: memref<256x128xbf16, #tpu.memory_space<vmem>>, %arg3: memref<1x128xf32, #tpu.memory_space<vmem>>, %arg4: memref<8x128xf32, #tpu.memory_space<vmem>>) attributes {dimension_semantics = [#tpu.dimension_semantics<parallel>], iteration_bounds = array<i64: 1>, scalar_prefetch = 0 : i64, scratch_operands = 0 : i64, tpu.core_type = #tpu.core_type<tc>, window_params = [{pipeline_mode = #tpu.pipeline_mode<synchronous>, transform_indices = @transform_0, window_bounds = array<i64: 8, 256>}, {transform_indices = @transform_1, window_bounds = array<i64: 256, 128>}, {transform_indices = @transform_2, window_bounds = array<i64: 1, 128>}, {transform_indices = @transform_3, window_bounds = array<i64: 8, 128>}]} {
    %c0 = arith.constant 0 : index
    %c0_0 = arith.constant 0 : index
    %0 = vector.load %arg1[%c0, %c0_0] : memref<8x256xbf16, #tpu.memory_space<vmem>>, vector<8x256xbf16>
    %c0_1 = arith.constant 0 : index
    %c0_2 = arith.constant 0 : index
    %1 = vector.load %arg2[%c0_1, %c0_2] : memref<256x128xbf16, #tpu.memory_space<vmem>>, vector<256x128xbf16>
    %cst = arith.constant dense<0.000000e+00> : vector<8x128xf32>
    %2 = tpu.matmul %0, %1, %cst {dimension_numbers = #tpu.dot_dimension_numbers<[1], [0], [0], [1], [0, 0, 1, 1], [], []>} : vector<8x256xbf16>, vector<256x128xbf16>, vector<8x128xf32> -> vector<8x128xf32>
    %c0_3 = arith.constant 0 : index
    %c0_4 = arith.constant 0 : index
    %3 = vector.load %arg3[%c0_3, %c0_4] : memref<1x128xf32, #tpu.memory_space<vmem>>, vector<1x128xf32>
    %4 = vector.broadcast %3 : vector<1x128xf32> to vector<8x128xf32>
    %5 = arith.addf %2, %4 : vector<8x128xf32>
    %c0_5 = arith.constant 0 : index
    %c0_6 = arith.constant 0 : index
    %6 = vector.load %arg4[%c0_5, %c0_6] : memref<8x128xf32, #tpu.memory_space<vmem>>, vector<8x128xf32>
    tpu.vector_store %arg4[%c0_5, %c0_6], %5 {strides = array<i32>} : memref<8x128xf32, #tpu.memory_space<vmem>>, vector<8x128xf32>,
    return
  }
  func.func @transform_0(%arg0: i32) -> (i32, i32) {
    %c0_i32 = arith.constant 0 : i32
    %c0_i32_0 = arith.constant 0 : i32
    %c0_i32_1 = arith.constant 0 : i32
    return %c0_i32, %c0_i32_0 : i32, i32
  }
  func.func @transform_1(%arg0: i32) -> (i32, i32) {
    %c0_i32 = arith.constant 0 : i32
    %c0_i32_0 = arith.constant 0 : i32
    return %c0_i32, %arg0 : i32, i32
  }
  func.func @transform_2(%arg0: i32) -> (i32, i32) {
    %c0_i32 = arith.constant 0 : i32
    %c0_i32_0 = arith.constant 0 : i32
    return %c0_i32, %arg0 : i32, i32
  }
  func.func @transform_3(%arg0: i32) -> (i32, i32) {
    %c0_i32 = arith.constant 0 : i32
    %c0_i32_0 = arith.constant 0 : i32
    return %c0_i32, %arg0 : i32, i32
  }
}

module attributes {stable_mosaic.version = 11 : i64} {
  func.func @attn_gru_kernel(%arg0: i32, %arg1: memref<8x128xf32, #tpu.memory_space<vmem>>, %arg2: memref<8x128xf32, #tpu.memory_space<vmem>>, %arg3: memref<8x128x128xbf16, #tpu.memory_space<vmem>>, %arg4: memref<8x128xf32, #tpu.memory_space<vmem>>, %arg5: memref<128x128xf32, #tpu.memory_space<vmem>>, %arg6: memref<128x128xbf16, #tpu.memory_space<vmem>>, %arg7: memref<1x128xf32, #tpu.memory_space<vmem>>, %arg8: memref<1x128xf32, #tpu.memory_space<vmem>>, %arg9: memref<384x384xf32, #tpu.memory_space<any>>, %arg10: memref<1x384xf32, #tpu.memory_space<vmem>>, %arg11: memref<1x384xf32, #tpu.memory_space<vmem>>, %arg12: memref<8x128xf32, #tpu.memory_space<vmem>>, %arg13: memref<8x256xbf16, #tpu.memory_space<vmem>>, %arg14: memref<8x128xf32, #tpu.memory_space<vmem>>, %arg15: memref<384x384xf32, #tpu.memory_space<vmem>>, %arg16: memref<!tpu.dma_semaphore, #tpu.memory_space<semaphore_mem>>, %arg17: memref<8x128xf32, #tpu.memory_space<vmem>>, %arg18: memref<8x1xf32, #tpu.memory_space<vmem>>, %arg19: memref<8x1xf32, #tpu.memory_space<vmem>>, %arg20: memref<8x128xf32, #tpu.memory_space<vmem>>) attributes {dimension_semantics = [#tpu.dimension_semantics<arbitrary>], iteration_bounds = array<i64: 1>, scalar_prefetch = 0 : i64, scratch_operands = 6 : i64, tpu.core_type = #tpu.core_type<tc>, window_params = [{pipeline_mode = #tpu.pipeline_mode<synchronous>, transform_indices = @transform_0, window_bounds = array<i64: 8, 128>}, {pipeline_mode = #tpu.pipeline_mode<synchronous>, transform_indices = @transform_1, window_bounds = array<i64: 8, 128>}, {transform_indices = @transform_2, window_bounds = array<i64: 8, 128, 128>}, {transform_indices = @transform_3, window_bounds = array<i64: 8, 128>}, {pipeline_mode = #tpu.pipeline_mode<synchronous>, transform_indices = @transform_4, window_bounds = array<i64: 128, 128>}, {pipeline_mode = #tpu.pipeline_mode<synchronous>, transform_indices = @transform_5, window_bounds = array<i64: 128, 128>}, {pipeline_mode = #tpu.pipeline_mode<synchronous>, transform_indices = @transform_6, window_bounds = array<i64: 1, 128>}, {pipeline_mode = #tpu.pipeline_mode<synchronous>, transform_indices = @transform_7, window_bounds = array<i64: 1, 128>}, {}, {pipeline_mode = #tpu.pipeline_mode<synchronous>, transform_indices = @transform_9, window_bounds = array<i64: 1, 384>}, {pipeline_mode = #tpu.pipeline_mode<synchronous>, transform_indices = @transform_10, window_bounds = array<i64: 1, 384>}, {pipeline_mode = #tpu.pipeline_mode<synchronous>, transform_indices = @transform_11, window_bounds = array<i64: 8, 128>}, {pipeline_mode = #tpu.pipeline_mode<synchronous>, transform_indices = @transform_12, window_bounds = array<i64: 8, 256>}, {pipeline_mode = #tpu.pipeline_mode<synchronous>, transform_indices = @transform_13, window_bounds = array<i64: 8, 128>}]} {
    %c0_i32 = arith.constant 0 : i32
    %0 = arith.cmpi eq, %arg0, %c0_i32 : i32
    %1 = arith.extui %0 : i1 to i32
    %c0_i32_0 = arith.constant 0 : i32
    %2 = arith.cmpi ne, %1, %c0_i32_0 : i32
    scf.if %2 {
      tpu.enqueue_dma source(%arg9 : memref<384x384xf32, #tpu.memory_space<any>>) target(%arg15 : memref<384x384xf32, #tpu.memory_space<vmem>>) target_semaphore(%arg16 : memref<!tpu.dma_semaphore, #tpu.memory_space<semaphore_mem>>)
      %c0_30 = arith.constant 0 : index
      %c0_31 = arith.constant 0 : index
      %53 = vector.load %arg2[%c0_30, %c0_31] : memref<8x128xf32, #tpu.memory_space<vmem>>, vector<8x128xf32>
      %c0_32 = arith.constant 0 : index
      %c0_33 = arith.constant 0 : index
      %54 = vector.load %arg5[%c0_32, %c0_33] : memref<128x128xf32, #tpu.memory_space<vmem>>, vector<128x128xf32>
      %cst_34 = arith.constant dense<0.000000e+00> : vector<8x128xf32>
      %55 = tpu.matmul %53, %54, %cst_34 {dimension_numbers = #tpu.dot_dimension_numbers<[1], [0], [0], [1], [0, 0, 1, 1], [], []>} : vector<8x128xf32>, vector<128x128xf32>, vector<8x128xf32> -> vector<8x128xf32>
      %c0_35 = arith.constant 0 : index
      %c0_36 = arith.constant 0 : index
      %56 = vector.load %arg7[%c0_35, %c0_36] : memref<1x128xf32, #tpu.memory_space<vmem>>, vector<1x128xf32>
      %57 = vector.broadcast %56 : vector<1x128xf32> to vector<8x128xf32>
      %58 = arith.addf %55, %57 : vector<8x128xf32>
      %c0_37 = arith.constant 0 : index
      %c0_38 = arith.constant 0 : index
      %59 = vector.load %arg17[%c0_37, %c0_38] : memref<8x128xf32, #tpu.memory_space<vmem>>, vector<8x128xf32>
      tpu.vector_store %arg17[%c0_37, %c0_38], %58 {strides = array<i32>} : memref<8x128xf32, #tpu.memory_space<vmem>>, vector<8x128xf32>,
      %cst_39 = arith.constant 0xFF800000 : f32
      %60 = vector.broadcast %cst_39 : f32 to vector<8x1xf32>
      %c0_40 = arith.constant 0 : index
      %c0_41 = arith.constant 0 : index
      %61 = vector.load %arg18[%c0_40, %c0_41] : memref<8x1xf32, #tpu.memory_space<vmem>>, vector<8x1xf32>
      tpu.vector_store %arg18[%c0_40, %c0_41], %60 {strides = array<i32>} : memref<8x1xf32, #tpu.memory_space<vmem>>, vector<8x1xf32>,
      %cst_42 = arith.constant 0.000000e+00 : f32
      %62 = vector.broadcast %cst_42 : f32 to vector<8x1xf32>
      %c0_43 = arith.constant 0 : index
      %c0_44 = arith.constant 0 : index
      %63 = vector.load %arg19[%c0_43, %c0_44] : memref<8x1xf32, #tpu.memory_space<vmem>>, vector<8x1xf32>
      tpu.vector_store %arg19[%c0_43, %c0_44], %62 {strides = array<i32>} : memref<8x1xf32, #tpu.memory_space<vmem>>, vector<8x1xf32>,
      %cst_45 = arith.constant 0.000000e+00 : f32
      %64 = vector.broadcast %cst_45 : f32 to vector<8x128xf32>
      %c0_46 = arith.constant 0 : index
      %c0_47 = arith.constant 0 : index
      %65 = vector.load %arg20[%c0_46, %c0_47] : memref<8x128xf32, #tpu.memory_space<vmem>>, vector<8x128xf32>
      tpu.vector_store %arg20[%c0_46, %c0_47], %64 {strides = array<i32>} : memref<8x128xf32, #tpu.memory_space<vmem>>, vector<8x128xf32>,
    } else {
    }
    %c0 = arith.constant 0 : index
    %c0_1 = arith.constant 0 : index
    %c0_2 = arith.constant 0 : index
    %3 = vector.load %arg3[%c0, %c0_1, %c0_2] : memref<8x128x128xbf16, #tpu.memory_space<vmem>>, vector<8x128x128xbf16>
    %4 = vector.shape_cast %3 : vector<8x128x128xbf16> to vector<1024x128xbf16>
    %c0_3 = arith.constant 0 : index
    %c0_4 = arith.constant 0 : index
    %5 = vector.load %arg6[%c0_3, %c0_4] : memref<128x128xbf16, #tpu.memory_space<vmem>>, vector<128x128xbf16>
    %cst = arith.constant dense<0.000000e+00> : vector<1024x128xf32>
    %6 = tpu.matmul %4, %5, %cst {dimension_numbers = #tpu.dot_dimension_numbers<[1], [0], [0], [1], [0, 0, 1, 1], [], []>} : vector<1024x128xbf16>, vector<128x128xbf16>, vector<1024x128xf32> -> vector<1024x128xf32>
    %7 = vector.shape_cast %6 : vector<1024x128xf32> to vector<8x128x128xf32>
    %c0_5 = arith.constant 0 : index
    %c0_6 = arith.constant 0 : index
    %8 = vector.load %arg17[%c0_5, %c0_6] : memref<8x128xf32, #tpu.memory_space<vmem>>, vector<8x128xf32>
    %9 = vector.shape_cast %8 : vector<8x128xf32> to vector<8x1x128xf32>
    %10 = vector.broadcast %9 : vector<8x1x128xf32> to vector<8x128x128xf32>
    %11 = arith.addf %7, %10 : vector<8x128x128xf32>
    %12 = math.tanh %11 : vector<8x128x128xf32>
    %c0_7 = arith.constant 0 : index
    %c0_8 = arith.constant 0 : index
    %13 = vector.load %arg8[%c0_7, %c0_8] : memref<1x128xf32, #tpu.memory_space<vmem>>, vector<1x128xf32>
    %14 = vector.shape_cast %13 : vector<1x128xf32> to vector<1x1x128xf32>
    %15 = vector.broadcast %14 : vector<1x1x128xf32> to vector<8x128x128xf32>
    %16 = arith.mulf %12, %15 : vector<8x128x128xf32>
    %cst_9 = arith.constant dense<0.000000e+00> : vector<8x128xf32>
    %17 = vector.multi_reduction <add>, %16, %cst_9 [2] : vector<8x128x128xf32> to vector<8x128xf32>
    %c0_10 = arith.constant 0 : index
    %c0_11 = arith.constant 0 : index
    %18 = vector.load %arg4[%c0_10, %c0_11] : memref<8x128xf32, #tpu.memory_space<vmem>>, vector<8x128xf32>
    %19 = arith.addf %17, %18 : vector<8x128xf32>
    %c128_i32 = arith.constant 128 : i32
    %20 = arith.muli %arg0, %c128_i32 : i32
    %21 = tpu.assume_multiple %20, 128 : i32
    %c0_12 = arith.constant 0 : index
    %22 = arith.index_cast %21 : i32 to index
    %23 = vector.load %arg14[%c0_12, %22] : memref<8x128xf32, #tpu.memory_space<vmem>>, vector<8x128xf32>
    tpu.vector_store %arg14[%c0_12, %22], %19 {strides = array<i32>} : memref<8x128xf32, #tpu.memory_space<vmem>>, vector<8x128xf32>,
    %c0_13 = arith.constant 0 : index
    %c0_14 = arith.constant 0 : index
    %24 = vector.load %arg18[%c0_13, %c0_14] : memref<8x1xf32, #tpu.memory_space<vmem>>, vector<8x1xf32>
    %cst_15 = arith.constant dense<0xFF800000> : vector<8xf32>
    %25 = vector.multi_reduction <maximumf>, %19, %cst_15 [1] : vector<8x128xf32> to vector<8xf32>
    %26 = vector.shape_cast %25 : vector<8xf32> to vector<8x1xf32>
    %27 = arith.maximumf %24, %26 : vector<8x1xf32>
    %28 = arith.subf %24, %27 : vector<8x1xf32>
    %29 = math.exp %28 : vector<8x1xf32>
    %30 = vector.broadcast %27 : vector<8x1xf32> to vector<8x128xf32>
    %31 = arith.subf %19, %30 : vector<8x128xf32>
    %32 = math.exp %31 : vector<8x128xf32>
    %c0_16 = arith.constant 0 : index
    %c0_17 = arith.constant 0 : index
    %33 = vector.load %arg19[%c0_16, %c0_17] : memref<8x1xf32, #tpu.memory_space<vmem>>, vector<8x1xf32>
    %34 = arith.mulf %29, %33 : vector<8x1xf32>
    %cst_18 = arith.constant dense<0.000000e+00> : vector<8xf32>
    %35 = vector.multi_reduction <add>, %32, %cst_18 [1] : vector<8x128xf32> to vector<8xf32>
    %36 = vector.shape_cast %35 : vector<8xf32> to vector<8x1xf32>
    %37 = arith.addf %34, %36 : vector<8x1xf32>
    %c0_19 = arith.constant 0 : index
    %c0_20 = arith.constant 0 : index
    %38 = vector.load %arg19[%c0_19, %c0_20] : memref<8x1xf32, #tpu.memory_space<vmem>>, vector<8x1xf32>
    tpu.vector_store %arg19[%c0_19, %c0_20], %37 {strides = array<i32>} : memref<8x1xf32, #tpu.memory_space<vmem>>, vector<8x1xf32>,
    %c0_21 = arith.constant 0 : index
    %c0_22 = arith.constant 0 : index
    %39 = vector.load %arg20[%c0_21, %c0_22] : memref<8x128xf32, #tpu.memory_space<vmem>>, vector<8x128xf32>
    %40 = vector.broadcast %29 : vector<8x1xf32> to vector<8x128xf32>
    %41 = arith.mulf %40, %39 : vector<8x128xf32>
    %42 = vector.shape_cast %32 : vector<8x128xf32> to vector<8x128x1xf32>
    %43 = arith.extf %3 : vector<8x128x128xbf16> to vector<8x128x128xf32>
    %44 = vector.broadcast %42 : vector<8x128x1xf32> to vector<8x128x128xf32>
    %45 = arith.mulf %44, %43 : vector<8x128x128xf32>
    %cst_23 = arith.constant dense<0.000000e+00> : vector<8x128xf32>
    %46 = vector.multi_reduction <add>, %45, %cst_23 [1] : vector<8x128x128xf32> to vector<8x128xf32>
    %47 = arith.addf %41, %46 : vector<8x128xf32>
    %c0_24 = arith.constant 0 : index
    %c0_25 = arith.constant 0 : index
    %48 = vector.load %arg20[%c0_24, %c0_25] : memref<8x128xf32, #tpu.memory_space<vmem>>, vector<8x128xf32>
    tpu.vector_store %arg20[%c0_24, %c0_25], %47 {strides = array<i32>} : memref<8x128xf32, #tpu.memory_space<vmem>>, vector<8x128xf32>,
    %c0_26 = arith.constant 0 : index
    %c0_27 = arith.constant 0 : index
    %49 = vector.load %arg18[%c0_26, %c0_27] : memref<8x1xf32, #tpu.memory_space<vmem>>, vector<8x1xf32>
    tpu.vector_store %arg18[%c0_26, %c0_27], %27 {strides = array<i32>} : memref<8x1xf32, #tpu.memory_space<vmem>>, vector<8x1xf32>,
    %c0_i32_28 = arith.constant 0 : i32
    %50 = arith.cmpi eq, %arg0, %c0_i32_28 : i32
    %51 = arith.extui %50 : i1 to i32
    %c0_i32_29 = arith.constant 0 : i32
    %52 = arith.cmpi ne, %51, %c0_i32_29 : i32
    scf.if %52 {
      tpu.wait_dma2 semaphore(%arg16 : memref<!tpu.dma_semaphore, #tpu.memory_space<semaphore_mem>>) src(%arg9 : memref<384x384xf32, #tpu.memory_space<any>>) dst(%arg15 : memref<384x384xf32, #tpu.memory_space<vmem>>)
      %c0_30 = arith.constant 0 : index
      %c0_31 = arith.constant 0 : index
      %53 = vector.load %arg19[%c0_30, %c0_31] : memref<8x1xf32, #tpu.memory_space<vmem>>, vector<8x1xf32>
      %54 = tpu.reciprocal %53 {approx = true} : vector<8x1xf32> -> vector<8x1xf32>
      %c0_32 = arith.constant 0 : index
      %c0_33 = arith.constant 0 : index
      %55 = vector.load %arg14[%c0_32, %c0_33] : memref<8x128xf32, #tpu.memory_space<vmem>>, vector<8x128xf32>
      %c0_34 = arith.constant 0 : index
      %c0_35 = arith.constant 0 : index
      %56 = vector.load %arg18[%c0_34, %c0_35] : memref<8x1xf32, #tpu.memory_space<vmem>>, vector<8x1xf32>
      %57 = vector.broadcast %56 : vector<8x1xf32> to vector<8x128xf32>
      %58 = arith.subf %55, %57 : vector<8x128xf32>
      %59 = math.exp %58 : vector<8x128xf32>
      %60 = vector.broadcast %54 : vector<8x1xf32> to vector<8x128xf32>
      %61 = arith.mulf %59, %60 : vector<8x128xf32>
      %c0_36 = arith.constant 0 : index
      %c0_37 = arith.constant 0 : index
      %62 = vector.load %arg14[%c0_36, %c0_37] : memref<8x128xf32, #tpu.memory_space<vmem>>, vector<8x128xf32>
      tpu.vector_store %arg14[%c0_36, %c0_37], %61 {strides = array<i32>} : memref<8x128xf32, #tpu.memory_space<vmem>>, vector<8x128xf32>,
      %c0_38 = arith.constant 0 : index
      %c0_39 = arith.constant 0 : index
      %63 = vector.load %arg20[%c0_38, %c0_39] : memref<8x128xf32, #tpu.memory_space<vmem>>, vector<8x128xf32>
      %64 = vector.broadcast %54 : vector<8x1xf32> to vector<8x128xf32>
      %65 = arith.mulf %63, %64 : vector<8x128xf32>
      %c0_40 = arith.constant 0 : index
      %c0_41 = arith.constant 0 : index
      %66 = vector.load %arg2[%c0_40, %c0_41] : memref<8x128xf32, #tpu.memory_space<vmem>>, vector<8x128xf32>
      %c0_42 = arith.constant 0 : index
      %c0_43 = arith.constant 0 : index
      %67 = vector.load %arg1[%c0_42, %c0_43] : memref<8x128xf32, #tpu.memory_space<vmem>>, vector<8x128xf32>
      %c0_44 = arith.constant 0 : index
      %c0_45 = arith.constant 0 : index
      %68 = vector.load %arg15[%c0_44, %c0_45] : memref<384x384xf32, #tpu.memory_space<vmem>>, vector<128x384xf32>
      %cst_46 = arith.constant dense<0.000000e+00> : vector<8x384xf32>
      %69 = tpu.matmul %67, %68, %cst_46 {dimension_numbers = #tpu.dot_dimension_numbers<[1], [0], [0], [1], [0, 0, 1, 1], [], []>} : vector<8x128xf32>, vector<128x384xf32>, vector<8x384xf32> -> vector<8x384xf32>
      %c128 = arith.constant 128 : index
      %c0_47 = arith.constant 0 : index
      %70 = vector.load %arg15[%c128, %c0_47] : memref<384x384xf32, #tpu.memory_space<vmem>>, vector<128x384xf32>
      %cst_48 = arith.constant dense<0.000000e+00> : vector<8x384xf32>
      %71 = tpu.matmul %65, %70, %cst_48 {dimension_numbers = #tpu.dot_dimension_numbers<[1], [0], [0], [1], [0, 0, 1, 1], [], []>} : vector<8x128xf32>, vector<128x384xf32>, vector<8x384xf32> -> vector<8x384xf32>
      %72 = arith.addf %69, %71 : vector<8x384xf32>
      %c0_49 = arith.constant 0 : index
      %c0_50 = arith.constant 0 : index
      %73 = vector.load %arg10[%c0_49, %c0_50] : memref<1x384xf32, #tpu.memory_space<vmem>>, vector<1x384xf32>
      %74 = vector.broadcast %73 : vector<1x384xf32> to vector<8x384xf32>
      %75 = arith.addf %72, %74 : vector<8x384xf32>
      %c256 = arith.constant 256 : index
      %c0_51 = arith.constant 0 : index
      %76 = vector.load %arg15[%c256, %c0_51] : memref<384x384xf32, #tpu.memory_space<vmem>>, vector<128x384xf32>
      %cst_52 = arith.constant dense<0.000000e+00> : vector<8x384xf32>
      %77 = tpu.matmul %66, %76, %cst_52 {dimension_numbers = #tpu.dot_dimension_numbers<[1], [0], [0], [1], [0, 0, 1, 1], [], []>} : vector<8x128xf32>, vector<128x384xf32>, vector<8x384xf32> -> vector<8x384xf32>
      %c0_53 = arith.constant 0 : index
      %c0_54 = arith.constant 0 : index
      %78 = vector.load %arg11[%c0_53, %c0_54] : memref<1x384xf32, #tpu.memory_space<vmem>>, vector<1x384xf32>
      %79 = vector.broadcast %78 : vector<1x384xf32> to vector<8x384xf32>
      %80 = arith.addf %77, %79 : vector<8x384xf32>
      %81 = vector.extract_strided_slice %75 {offsets = [0, 0], sizes = [8, 128], strides = [1, 1]} : vector<8x384xf32> to vector<8x128xf32>
      %82 = vector.extract_strided_slice %80 {offsets = [0, 0], sizes = [8, 128], strides = [1, 1]} : vector<8x384xf32> to vector<8x128xf32>
      %83 = arith.addf %81, %82 : vector<8x128xf32>
      %84 = arith.negf %83 : vector<8x128xf32>
      %85 = math.exp %84 : vector<8x128xf32>
      %cst_55 = arith.constant 1.000000e+00 : f32
      %86 = vector.broadcast %cst_55 : f32 to vector<8x128xf32>
      %87 = arith.addf %86, %85 : vector<8x128xf32>
      %88 = arith.divf %86, %87 : vector<8x128xf32>
      %89 = vector.extract_strided_slice %75 {offsets = [0, 128], sizes = [8, 128], strides = [1, 1]} : vector<8x384xf32> to vector<8x128xf32>
      %90 = vector.extract_strided_slice %80 {offsets = [0, 128], sizes = [8, 128], strides = [1, 1]} : vector<8x384xf32> to vector<8x128xf32>
      %91 = arith.addf %89, %90 : vector<8x128xf32>
      %92 = arith.negf %91 : vector<8x128xf32>
      %93 = math.exp %92 : vector<8x128xf32>
      %cst_56 = arith.constant 1.000000e+00 : f32
      %94 = vector.broadcast %cst_56 : f32 to vector<8x128xf32>
      %95 = arith.addf %94, %93 : vector<8x128xf32>
      %96 = arith.divf %94, %95 : vector<8x128xf32>
      %97 = vector.extract_strided_slice %75 {offsets = [0, 256], sizes = [8, 128], strides = [1, 1]} : vector<8x384xf32> to vector<8x128xf32>
      %98 = vector.extract_strided_slice %80 {offsets = [0, 256], sizes = [8, 128], strides = [1, 1]} : vector<8x384xf32> to vector<8x128xf32>
      %99 = arith.mulf %88, %98 : vector<8x128xf32>
      %100 = arith.addf %97, %99 : vector<8x128xf32>
      %101 = math.tanh %100 : vector<8x128xf32>
      %cst_57 = arith.constant 1.000000e+00 : f32
      %102 = vector.broadcast %cst_57 : f32 to vector<8x128xf32>
      %103 = arith.subf %102, %96 : vector<8x128xf32>
      %104 = arith.mulf %103, %101 : vector<8x128xf32>
      %105 = arith.mulf %96, %66 : vector<8x128xf32>
      %106 = arith.addf %104, %105 : vector<8x128xf32>
      %c0_58 = arith.constant 0 : index
      %c0_59 = arith.constant 0 : index
      %107 = vector.load %arg12[%c0_58, %c0_59] : memref<8x128xf32, #tpu.memory_space<vmem>>, vector<8x128xf32>
      tpu.vector_store %arg12[%c0_58, %c0_59], %106 {strides = array<i32>} : memref<8x128xf32, #tpu.memory_space<vmem>>, vector<8x128xf32>,
      %108 = arith.truncf %106 : vector<8x128xf32> to vector<8x128xbf16>
      %c0_60 = arith.constant 0 : index
      %c0_61 = arith.constant 0 : index
      %109 = vector.load %arg13[%c0_60, %c0_61] : memref<8x256xbf16, #tpu.memory_space<vmem>>, vector<8x128xbf16>
      tpu.vector_store %arg13[%c0_60, %c0_61], %108 {strides = array<i32>} : memref<8x256xbf16, #tpu.memory_space<vmem>>, vector<8x128xbf16>,
      %110 = arith.truncf %65 : vector<8x128xf32> to vector<8x128xbf16>
      %c0_62 = arith.constant 0 : index
      %c128_63 = arith.constant 128 : index
      %111 = vector.load %arg13[%c0_62, %c128_63] : memref<8x256xbf16, #tpu.memory_space<vmem>>, vector<8x128xbf16>
      tpu.vector_store %arg13[%c0_62, %c128_63], %110 {strides = array<i32>} : memref<8x256xbf16, #tpu.memory_space<vmem>>, vector<8x128xbf16>,
    } else {
    }
    return
  }
  func.func @transform_0(%arg0: i32) -> (i32, i32) {
    %c0_i32 = arith.constant 0 : i32
    %c0_i32_0 = arith.constant 0 : i32
    %c0_i32_1 = arith.constant 0 : i32
    return %c0_i32, %c0_i32_0 : i32, i32
  }
  func.func @transform_1(%arg0: i32) -> (i32, i32) {
    %c0_i32 = arith.constant 0 : i32
    %c0_i32_0 = arith.constant 0 : i32
    %c0_i32_1 = arith.constant 0 : i32
    return %c0_i32, %c0_i32_0 : i32, i32
  }
  func.func @transform_2(%arg0: i32) -> (i32, i32, i32) {
    %c0_i32 = arith.constant 0 : i32
    %c0_i32_0 = arith.constant 0 : i32
    %c0_i32_1 = arith.constant 0 : i32
    return %c0_i32, %arg0, %c0_i32_0 : i32, i32, i32
  }
  func.func @transform_3(%arg0: i32) -> (i32, i32) {
    %c0_i32 = arith.constant 0 : i32
    %c0_i32_0 = arith.constant 0 : i32
    return %c0_i32, %arg0 : i32, i32
  }
  func.func @transform_4(%arg0: i32) -> (i32, i32) {
    %c0_i32 = arith.constant 0 : i32
    %c0_i32_0 = arith.constant 0 : i32
    %c0_i32_1 = arith.constant 0 : i32
    return %c0_i32, %c0_i32_0 : i32, i32
  }
  func.func @transform_5(%arg0: i32) -> (i32, i32) {
    %c0_i32 = arith.constant 0 : i32
    %c0_i32_0 = arith.constant 0 : i32
    %c0_i32_1 = arith.constant 0 : i32
    return %c0_i32, %c0_i32_0 : i32, i32
  }
  func.func @transform_6(%arg0: i32) -> (i32, i32) {
    %c0_i32 = arith.constant 0 : i32
    %c0_i32_0 = arith.constant 0 : i32
    %c0_i32_1 = arith.constant 0 : i32
    return %c0_i32, %c0_i32_0 : i32, i32
  }
  func.func @transform_7(%arg0: i32) -> (i32, i32) {
    %c0_i32 = arith.constant 0 : i32
    %c0_i32_0 = arith.constant 0 : i32
    %c0_i32_1 = arith.constant 0 : i32
    return %c0_i32, %c0_i32_0 : i32, i32
  }
  func.func @transform_9(%arg0: i32) -> (i32, i32) {
    %c0_i32 = arith.constant 0 : i32
    %c0_i32_0 = arith.constant 0 : i32
    %c0_i32_1 = arith.constant 0 : i32
    return %c0_i32, %c0_i32_0 : i32, i32
  }
  func.func @transform_10(%arg0: i32) -> (i32, i32) {
    %c0_i32 = arith.constant 0 : i32
    %c0_i32_0 = arith.constant 0 : i32
    %c0_i32_1 = arith.constant 0 : i32
    return %c0_i32, %c0_i32_0 : i32, i32
  }
  func.func @transform_11(%arg0: i32) -> (i32, i32) {
    %c0_i32 = arith.constant 0 : i32
    %c0_i32_0 = arith.constant 0 : i32
    %c0_i32_1 = arith.constant 0 : i32
    return %c0_i32, %c0_i32_0 : i32, i32
  }
  func.func @transform_12(%arg0: i32) -> (i32, i32) {
    %c0_i32 = arith.constant 0 : i32
    %c0_i32_0 = arith.constant 0 : i32
    %c0_i32_1 = arith.constant 0 : i32
    return %c0_i32, %c0_i32_0 : i32, i32
  }
  func.func @transform_13(%arg0: i32) -> (i32, i32) {
    %c0_i32 = arith.constant 0 : i32
    %c0_i32_0 = arith.constant 0 : i32
    %c0_i32_1 = arith.constant 0 : i32
    return %c0_i32, %c0_i32_0 : i32, i32
  }
}

</mosaic_0001>

<bundles_post_ra>
// kernel: decoder_forward.3
= control target key start
LH: loop header
LB: loop body
LE: loop exit
PB: predicated region body
PF: predicated region fallthrough
CT: control target
= control target key end

     0   :  { %s339_s1 = inlined_call_operand.vmem [shape: bf16[256,128], index: 1, kind: input, shape index: {}]   ;;  %s340_s0 = inlined_call_operand.vmem [shape: bf16[8,256], index: 0, kind: input, shape index: {}]   ;;  %s341_s2 = inlined_call_operand.vmem [shape: f32[1,128], index: 2, kind: input, shape index: {}]   ;;  %s342_s3 = inlined_call_operand.vmem [shape: f32[8,128], index: 3, kind: output, shape index: {}]  }
   0x1   :  { %v244_v0 = vld [vmem:[%s339_s1 + $0x40] sm:$0xff]   ;;  %v246_v2 = vld [vmem:[%s339_s1 + $0x48] sm:$0xff]   ;;  %v248_v4 = vld [vmem:[%s339_s1 + $0x50] sm:$0xff]  }
   0x2   :  { %v245_v1 = vld [vmem:[%s339_s1] sm:$0xff]   ;;  %222 = vmatprep.subr.bf16.mxu0 %v244_v0  ;;  %v247_v3 = vld [vmem:[%s339_s1 + $0x8] sm:$0xff]   ;;  %v249_v5 = vld [vmem:[%s339_s1 + $0x10] sm:$0xff]  }
   0x3   :  { %223 = vmatpush3.bf16.msra.mxu0 %v245_v1  ;;  %v250_v6 = vld [vmem:[%s339_s1 + $0x58] sm:$0xff]   ;;  %v252_v8 = vld [vmem:[%s339_s1 + $0x60] sm:$0xff]   ;;  %v254_v10 = vld [vmem:[%s339_s1 + $0x68] sm:$0xff]  }
   0x4   :  { %224 = vmatprep.subr.bf16.mxu0 %v246_v2  ;;  %v251_v7 = vld [vmem:[%s339_s1 + $0x18] sm:$0xff]   ;;  %v253_v9 = vld [vmem:[%s339_s1 + $0x20] sm:$0xff]   ;;  %v255_v13 = vld [vmem:[%s339_s1 + $0x28] sm:$0xff]  }
   0x5   :  { %v15_v11 = vld [vmem:[%s340_s0] sm:$0xff]  ;;  %v256_v14 = vld [vmem:[%s339_s1 + $0x70] sm:$0xff]   ;;  %v258_v16 = vld [vmem:[%s339_s1 + $0x78] sm:$0xff]  }
   0x6   :  { %v205_v12 = vcombine.high %v15_v11, %v15_v11  ;;  %v257_v15 = vld [vmem:[%s339_s1 + $0x30] sm:$0xff]   ;;  %v259_v17 = vld [vmem:[%s339_s1 + $0x38] sm:$0xff]   ;;  %v204_v18 = vcombine.low %v15_v11, %v15_v11  ;;  %v203_v20 = vld [vmem:[%s341_s2] ss:$0 sm:$0xff] }
   0x7   :  { %225 = vmatpush3.bf16.msra.mxu0 %v247_v3 }
   0x8   :  { %226 = vmatprep.subr.bf16.mxu0 %v248_v4  ;;  %190 = vmatprep.mubr.bf16.mxu0 %v205_v12 }
   0xb   :  { %227 = vmatpush3.bf16.msra.mxu0 %v249_v5 }
   0xc   :  { %228 = vmatprep.subr.bf16.mxu0 %v250_v6 }
   0xf   :  { %229 = vmatpush3.bf16.msra.mxu0 %v251_v7 }
  0x10   :  { %230 = vmatprep.subr.bf16.mxu0 %v252_v8 }
  0x13   :  { %231 = vmatpush3.bf16.msra.mxu0 %v253_v9 }
  0x14   :  { %232 = vmatprep.subr.bf16.mxu0 %v254_v10 }
  0x17   :  { %233 = vmatpush3.bf16.msra.mxu0 %v255_v13 }
  0x18   :  { %234 = vmatprep.subr.bf16.mxu0 %v256_v14 }
  0x1b   :  { %235 = vmatpush3.bf16.msra.mxu0 %v257_v15 }
  0x1c   :  { %236 = vmatprep.subr.bf16.mxu0 %v258_v16 }
  0x1f   :  { %237 = vmatpush3.bf16.msra.mxu0 %v259_v17 }
  0x22   :  { %191 = vmatmul.mubr.bf16.vlgmr.msra.gmra.mrb[0].mxu0 %v204_v18 }
  0xf5   :  { %v238_v19 = vpop.f32.mrb[0].mxu0 }
  0xf6   :  { %v239_v21 = vpop.f32.mrb[1].mxu0 }
  0xf7   :  { %v240_v22 = vadd.f32 %v239_v21, %v238_v19  ;;  %v241_v23 = vpop.f32.mrb[2].mxu0 }
  0xf8   :  { %v242_v24 = vpop.f32.mrb[3].mxu0 }
  0xf9   :  { %v193_v25 = vadd.f32 %v240_v22, %v203_v20 }
  0xfb   :  { %198 = vst [vmem:[%s342_s3] sm:$0xff] %v193_v25 }

// kernel: decoder_forward.2
= control target key start
LH: loop header
LB: loop body
LE: loop exit
PB: predicated region body
PF: predicated region fallthrough
CT: control target
= control target key end

     0   :  { %v12693_v0 = vlaneseq  ;;  %v12685_v2 = vmov 0.0|0.0   ;;  %vm12833_vm0 = vmmov 0   ;;  %v12687_v3 = vmov 0.0   ;;  %s12671_s5 = inlined_call_operand.vmem [shape: bf16[128,128], index: 5, kind: input, shape index: {}]   ;;  %s12672_s3 = inlined_call_operand.vmem [shape: f32[8,128], index: 3, kind: input, shape index: {}]   ;;  %s12673_s4 = inlined_call_operand.vmem [shape: f32[128,128], index: 4, kind: input, shape index: {}]   ;;  %s12674_s2 = inlined_call_operand.vmem [shape: bf16[8,128,128], index: 2, kind: input, shape index: {}]   ;;  %s12675_s1 = inlined_call_operand.vmem [shape: f32[8,128], index: 1, kind: input, shape index: {}]   ;;  %s12676_s6 = inlined_call_operand.vmem [shape: f32[1,128], index: 6, kind: input, shape index: {}]   ;;  %s12677_s7 = inlined_call_operand.vmem [shape: f32[1,128], index: 7, kind: input, shape index: {}]   ;;  %s12678_s13 = inlined_call_operand.vmem [shape: f32[8,128], index: 13, kind: output, shape index: {2}]   ;;  %s12679_s0 = inlined_call_operand.vmem [shape: f32[8,128], index: 0, kind: input, shape index: {}]   ;;  %s12680_s8 = inlined_call_operand.hbm [shape: f32[384,384], index: 8, kind: input, shape index: {}]   ;;  %s12681_s9 = inlined_call_operand.vmem [shape: f32[1,384], index: 9, kind: input, shape index: {}]   ;;  %s12682_s10 = inlined_call_operand.vmem [shape: f32[1,384], index: 10, kind: input, shape index: {}]   ;;  %s12683_s11 = inlined_call_operand.vmem [shape: f32[8,128], index: 11, kind: output, shape index: {0}]   ;;  %s12684_s12 = inlined_call_operand.vmem [shape: bf16[8,256], index: 12, kind: output, shape index: {1}]  }
   0x1   :  { %v7569_v1 = vld [vmem:[%s12671_s5] sm:$0xff]   ;;  %7360 = vmatprep.subr.bf16.mxu0 %v12685_v2  ;;  %7108 = vmatprep.mubr.msk.f32.mxu0 %vm12833_vm0, %v12687_v3  ;;  %vm12919_vm1 = vcmask 7168   ;;  %v7570_v4 = vld [vmem:[%s12671_s5 + $0x8] sm:$0xff]   ;;  %v8326_v11 = vmov -inf   ;;  %v58_v12 = vld [vmem:[%s12673_s4 + $0x10] sm:$0xff]  ;;  %vm3331_vm2 = vcmask 130112  }
   0x2   :  { %v8410_v5 = vshrl.u32 %v12693_v0, 7  ;;  %152 = vst.msk [vmem:[#allocation6] sm:$0xff] %vm12919_vm1, %v12687_v3  ;;  %7111 = vmatprep.subr.bf16.mxu1 %v7569_v1  ;;  %v8417_v6 = vld [vmem:[%s12672_s3] sm:$0xff]  ;;  %v57_v8 = vld [vmem:[%s12673_s4 + $0x8] sm:$0xff]  ;;  %151 = vst.msk [vmem:[#allocation5] sm:$0xff] %vm12919_vm1, %v8326_v11  ;;  %vm3338_vm3 = vcmask 195712  }
   0x3   :  { %v56_v7 = vld [vmem:[%s12673_s4] sm:$0xff]  ;;  %7112 = vmatpush3.bf16.msra.mxu1 %v7569_v1  ;;  %v59_v13 = vld [vmem:[%s12673_s4 + $0x18] sm:$0xff]  ;;  %v7571_v15 = vld [vmem:[%s12671_s5 + $0x10] sm:$0xff]   ;;  %vm12838_vm4 = vcmask 261312   ;;  %vm12835_vm5 = vcmask 326912   ;;  %vm12836_vm6 = vcmask 392512  }
   0x4   :  { %12928 = vst [vmem:[#allocation13_spill] sm:$0xff] %v8410_v5  ;;  %v8426_v9 = vsub.s32 0, %v8410_v5  ;;  %v7361_v10 = vpack.c.bf16 %v57_v8, %v56_v7  ;;  %7113 = vmatprep.subr.bf16.mxu1 %v7570_v4  ;;  %v7364_v16 = vpack.c.bf16 %v59_v13, %v58_v12  ;;  %v60_v17 = vld [vmem:[%s12673_s4 + $0x20] sm:$0xff]  ;;  %v61_v18 = vld [vmem:[%s12673_s4 + $0x28] sm:$0xff]  ;;  %v7572_v19 = vld [vmem:[%s12671_s5 + $0x18] sm:$0xff]   ;;  %v8515_v40 = vsub.s32 1, %v8410_v5 }
   0x5   :  { %v7367_v20 = vpack.c.bf16 %v61_v18, %v60_v17  ;;  %v62_v21 = vld [vmem:[%s12673_s4 + $0x30] sm:$0xff]  ;;  %v63_v22 = vld [vmem:[%s12673_s4 + $0x38] sm:$0xff]  ;;  %v7573_v23 = vld [vmem:[%s12671_s5 + $0x20] sm:$0xff]   ;;  %v8552_v52 = vsub.s32 2, %v8410_v5  ;;  %v12692_v62 = vsub.s32 3, %v8410_v5  ;;  %vm12837_vm7 = vcmask 458112  }
   0x6   :  { %12929 = vst [vmem:[#allocation14_spill] sm:$0xff] %v8426_v9  ;;  %v8437_v14 = vrot.slane %v8417_v6, %v8426_v9  ;;  %7362 = vmatpush3.bf16.msra.mxu0 %v7361_v10  ;;  %v7370_v24 = vpack.c.bf16 %v63_v22, %v62_v21  ;;  %v154_v25 = vld [vmem:[%s12674_s2] sm:$0xff]   ;;  %v65_v27 = vld [vmem:[%s12673_s4 + $0x48] sm:$0xff]  ;;  %v66_v30 = vld [vmem:[%s12673_s4 + $0x50] sm:$0xff]  ;;  %v2085_v44 = vrot.slane %v8417_v6, %v8515_v40  ;;  %vm3373_vm8 = vcmask 523712   ;;  %s8299_s17 = scalar_lea.hbm %s12680_s8, 18432 }
   0x7   :  { %7363 = vmatprep.subr.bf16.mxu0 %v12685_v2  ;;  %7114 = vmatpush3.bf16.msra.mxu1 %v7570_v4  ;;  %v64_v26 = vld [vmem:[%s12673_s4 + $0x40] sm:$0xff]  ;;  %v7574_v28 = vld [vmem:[%s12671_s5 + $0x28] sm:$0xff]   ;;  %v67_v31 = vld [vmem:[%s12673_s4 + $0x58] sm:$0xff]  ;;  %12930 = vst [vmem:[#allocation15_spill] sm:$0xff] %v8515_v40  ;;  %v2152_v55 = vrot.slane %v8417_v6, %v8552_v52  ;;  %v2219_v4 = vrot.slane %v8417_v6, %v12692_v62  ;;  %vm3380_vm9 = vcmask 589312   ;;  %vm3387_vm10 = vcmask 654912   ;;  %p8300_p0 = scmp.ne.s32.totalorder %s12680_s8, %s8299_s17  ;;  %p8303_p1 = scmp.lt.u32.totalorder %s8299_s17, %s12680_s8 }
   0x8   :  { %2024 = vbcast.lane.b32.xlu1 %v8437_v14, 264  ;;  %2020 = vbcast.lane.b32.xlu0 %v8437_v14, 256  ;;  %v7373_v29 = vpack.c.bf16 %v65_v27, %v64_v26  ;;  %v7575_v32 = vld [vmem:[%s12671_s5 + $0x30] sm:$0xff]   ;;  %v7376_v33 = vpack.c.bf16 %v67_v31, %v66_v30  ;;  %v68_v34 = vld [vmem:[%s12673_s4 + $0x60] sm:$0xff]  ;;  %v69_v35 = vld [vmem:[%s12673_s4 + $0x68] sm:$0xff]  ;;  %12931 = vst [vmem:[#allocation16_spill] sm:$0xff] %v8552_v52 }
   0x9   :  { %7115 = vmatprep.subr.bf16.mxu1 %v7571_v15  ;;  %7127 = vmatprep.mubr.bf16.mxu1 %v154_v25  ;;  %v7576_v36 = vld [vmem:[%s12671_s5 + $0x38] sm:$0xff]   ;;  %v7379_v37 = vpack.c.bf16 %v69_v35, %v68_v34  ;;  %v70_v38 = vld [vmem:[%s12673_s4 + $0x70] sm:$0xff]  ;;  %v156_v41 = vld [vmem:[%s12674_s2 + $0x8] sm:$0xff]   ;;  %vm3394_vm11 = vcmask 720512   ;;  %vm12839_vm12 = vcmask 786112   ;;  %vm3408_vm13 = vcmask 851712   ;;  %p8305_p2 = pnand %p8303_p1, %p8300_p0 }
   0xa   :  { %7365 = vmatpush3.bf16.msra.mxu0 %v7364_v16  ;;  %v71_v39 = vld [vmem:[%s12673_s4 + $0x78] sm:$0xff]  ;;  %v158_v43 = vld [vmem:[%s12674_s2 + $0x10] sm:$0xff]   ;;  %v55_v45 = vld [vmem:[%s12675_s1] sm:$0xff]  ;;  %v12691_v16 = vsub.s32 4, %v8410_v5  ;;  %vm3415_vm14 = vcmask 917312   ;;  %vm3422_vm15 = vcmask 982912  }
   0xb   :  { %7366 = vmatprep.subr.bf16.mxu0 %v12685_v2  ;;  %7116 = vmatpush3.bf16.msra.mxu1 %v7571_v15  ;;  %v7382_v42 = vpack.c.bf16 %v71_v39, %v70_v38  ;;  %v160_v46 = vld [vmem:[%s12674_s2 + $0x18] sm:$0xff]   ;;  %v162_v47 = vld [vmem:[%s12674_s2 + $0x20] sm:$0xff]   ;;  %v164_v48 = vld [vmem:[%s12674_s2 + $0x28] sm:$0xff]   ;;  %vm3429_vm0 = vcmask 1048512  }
   0xc   :  { %2028 = vbcast.lane.b32.xlu1 %v8437_v14, 272  ;;  %2036 = vbcast.lane.b32.xlu0 %v8437_v14, 288  ;;  %v166_v49 = vld [vmem:[%s12674_s2 + $0x30] sm:$0xff]   ;;  %v168_v50 = vld [vmem:[%s12674_s2 + $0x38] sm:$0xff]   ;;  %v170_v51 = vld [vmem:[%s12674_s2 + $0x40] sm:$0xff]   ;;  %v2286_v21 = vrot.slane %v8417_v6, %v12691_v16 }
   0xd   :  { %7117 = vmatprep.subr.bf16.mxu1 %v7572_v19  ;;  %v172_v53 = vld [vmem:[%s12674_s2 + $0x48] sm:$0xff]   ;;  %v174_v54 = vld [vmem:[%s12674_s2 + $0x50] sm:$0xff]   ;;  %v176_v56 = vld [vmem:[%s12674_s2 + $0x58] sm:$0xff]  }
   0xe   :  { %7368 = vmatpush3.bf16.msra.mxu0 %v7367_v20  ;;  %v178_v57 = vld [vmem:[%s12674_s2 + $0x60] sm:$0xff]   ;;  %v180_v58 = vld [vmem:[%s12674_s2 + $0x68] sm:$0xff]   ;;  %v182_v59 = vld [vmem:[%s12674_s2 + $0x70] sm:$0xff]  }
   0xf   :  { %7369 = vmatprep.subr.bf16.mxu0 %v12685_v2  ;;  %7118 = vmatpush3.bf16.msra.mxu1 %v7572_v19  ;;  %v184_v60 = vld [vmem:[%s12674_s2 + $0x78] sm:$0xff]   ;;  %v186_v61 = vld [vmem:[%s12674_s2 + $0x80] sm:$0xff]   ;;  %v188_v63 = vld [vmem:[%s12674_s2 + $0x88] sm:$0xff]  }
  0x10   :  { %2032 = vbcast.lane.b32.xlu1 %v8437_v14, 280  ;;  %2044 = vbcast.lane.b32.xlu0 %v8437_v14, 304  ;;  %v190_v1 = vld [vmem:[%s12674_s2 + $0x90] sm:$0xff]   ;;  %v192_v7 = vld [vmem:[%s12674_s2 + $0x98] sm:$0xff]   ;;  %v194_v8 = vld [vmem:[%s12674_s2 + $0xa0] sm:$0xff]  }
  0x11   :  { %7119 = vmatprep.subr.bf16.mxu1 %v7573_v23  ;;  %v196_v10 = vld [vmem:[%s12674_s2 + $0xa8] sm:$0xff]   ;;  %v198_v11 = vld [vmem:[%s12674_s2 + $0xb0] sm:$0xff]   ;;  %v200_v12 = vld [vmem:[%s12674_s2 + $0xb8] sm:$0xff]  }
  0x12   :  { %7371 = vmatpush3.bf16.msra.mxu0 %v7370_v24  ;;  %v202_v13 = vld [vmem:[%s12674_s2 + $0xc0] sm:$0xff]   ;;  %v204_v18 = vld [vmem:[%s12674_s2 + $0xc8] sm:$0xff]   ;;  %v206_v20 = vld [vmem:[%s12674_s2 + $0xd0] sm:$0xff]  }
  0x13   :  { %7372 = vmatprep.subr.bf16.mxu0 %v12685_v2  ;;  %7120 = vmatpush3.bf16.msra.mxu1 %v7573_v23  ;;  %v208_v25 = vld [vmem:[%s12674_s2 + $0xd8] sm:$0xff]   ;;  %v210_v27 = vld [vmem:[%s12674_s2 + $0xe0] sm:$0xff]   ;;  %v212_v31 = vld [vmem:[%s12674_s2 + $0xe8] sm:$0xff]  }
  0x14   :  { %2040 = vbcast.lane.b32.xlu1 %v8437_v14, 296  ;;  %2052 = vbcast.lane.b32.xlu0 %v8437_v14, 320  ;;  %v218_v39 = vld [vmem:[%s12674_s2 + $0x100] sm:$0xff]   ;;  %v254_v62 = vld [vmem:[%s12674_s2 + $0x190] sm:$0xff]   ;;  %v256_v40 = vld [vmem:[%s12674_s2 + $0x198] sm:$0xff]  }
  0x15   :  { %7121 = vmatprep.subr.bf16.mxu1 %v7574_v28 }
  0x16   :  { %7374 = vmatpush3.bf16.msra.mxu0 %v7373_v29 }
  0x17   :  { %7375 = vmatprep.subr.bf16.mxu0 %v12685_v2  ;;  %7122 = vmatpush3.bf16.msra.mxu1 %v7574_v28 }
  0x18   :  { %2048 = vbcast.lane.b32.xlu1 %v8437_v14, 312  ;;  %2060 = vbcast.lane.b32.xlu0 %v8437_v14, 336 }
  0x19   :  { %7123 = vmatprep.subr.bf16.mxu1 %v7575_v32 }
  0x1a   :  { %7377 = vmatpush3.bf16.msra.mxu0 %v7376_v33  ;;  %v214_v33 = vld [vmem:[%s12674_s2 + $0xf0] sm:$0xff]  }
  0x1b   :  { %7378 = vmatprep.subr.bf16.mxu0 %v12685_v2  ;;  %7124 = vmatpush3.bf16.msra.mxu1 %v7575_v32 }
  0x1c   :  { %2056 = vbcast.lane.b32.xlu1 %v8437_v14, 328  ;;  %2068 = vbcast.lane.b32.xlu0 %v8437_v14, 352 }
  0x1d   :  { %7125 = vmatprep.subr.bf16.mxu1 %v7576_v36 }
  0x1e   :  { %7380 = vmatpush3.bf16.msra.mxu0 %v7379_v37  ;;  %v216_v37 = vld [vmem:[%s12674_s2 + $0xf8] sm:$0xff]  }
  0x1f   :  { %7381 = vmatprep.subr.bf16.mxu0 %v12685_v2  ;;  %7126 = vmatpush3.bf16.msra.mxu1 %v7576_v36  ;;  %v250_v2 = vld [vmem:[%s12674_s2 + $0x180] sm:$0xff]  }
  0x20   :  { %2064 = vbcast.lane.b32.xlu1 %v8437_v14, 344  ;;  %2076 = vbcast.lane.b32.xlu0 %v8437_v14, 368 }
  0x22   :  { %7383 = vmatpush3.bf16.msra.mxu0 %v7382_v42  ;;  %7128 = vmatmul.mubr.bf16.vlgmr.msra.gmra.mrb[0].mxu1 %v156_v41 }
  0x23   :  { %7131 = vmatprep.mubr.bf16.mxu1 %v158_v43  ;;  %v12690_v43 = vsub.s32 5, %v8410_v5 }
  0x24   :  { %2072 = vbcast.lane.b32.xlu1 %v8437_v14, 360  ;;  %2087 = vbcast.lane.b32.xlu0 %v2085_v44, 256 }
  0x25   :  { %7109 = vmatmul.mubr.f32.vlgmr.msra.gmra.mrb[0].mxu0 %v55_v45  ;;  %v220_v45 = vld [vmem:[%s12674_s2 + $0x108] sm:$0xff]  }
  0x28   :  { %2080 = vbcast.lane.b32.xlu1 %v8437_v14, 376  ;;  %2095 = vbcast.lane.b32.xlu0 %v2085_v44, 272 }
  0x2a   :  { %7132 = vmatmul.mubr.bf16.gmra.mrb[4].mxu1 %v160_v46 }
  0x2b   :  { %7135 = vmatprep.mubr.bf16.mxu1 %v162_v47  ;;  %v222_v47 = vld [vmem:[%s12674_s2 + $0x110] sm:$0xff]  }
  0x2c   :  { %2091 = vbcast.lane.b32.xlu1 %v2085_v44, 264  ;;  %2103 = vbcast.lane.b32.xlu0 %v2085_v44, 288 }
  0x30   :  { %2099 = vbcast.lane.b32.xlu1 %v2085_v44, 280  ;;  %2111 = vbcast.lane.b32.xlu0 %v2085_v44, 304 }
  0x32   :  { %7136 = vmatmul.mubr.bf16.gmra.mrb[8].mxu1 %v164_v48  ;;  %v2353_v48 = vrot.slane %v8417_v6, %v12690_v43  ;;  %v252_v43 = vld [vmem:[%s12674_s2 + $0x188] sm:$0xff]  }
  0x33   :  { %7139 = vmatprep.mubr.bf16.mxu1 %v166_v49 }
  0x34   :  { %2107 = vbcast.lane.b32.xlu1 %v2085_v44, 296  ;;  %2119 = vbcast.lane.b32.xlu0 %v2085_v44, 320 }
  0x38   :  { %2115 = vbcast.lane.b32.xlu1 %v2085_v44, 312  ;;  %2127 = vbcast.lane.b32.xlu0 %v2085_v44, 336 }
  0x3a   :  { %7140 = vmatmul.mubr.bf16.gmra.mrb[12].mxu1 %v168_v50 }
  0x3b   :  { %7143 = vmatprep.mubr.bf16.mxu1 %v170_v51 }
  0x3c   :  { %2123 = vbcast.lane.b32.xlu1 %v2085_v44, 328  ;;  %2135 = vbcast.lane.b32.xlu0 %v2085_v44, 352 }
  0x40   :  { %2131 = vbcast.lane.b32.xlu1 %v2085_v44, 344  ;;  %2143 = vbcast.lane.b32.xlu0 %v2085_v44, 368 }
  0x42   :  { %7144 = vmatmul.mubr.bf16.gmra.mrb[16].mxu1 %v172_v53  ;;  %v224_v53 = vld [vmem:[%s12674_s2 + $0x118] sm:$0xff]  }
  0x43   :  { %7147 = vmatprep.mubr.bf16.mxu1 %v174_v54 }
  0x44   :  { %2139 = vbcast.lane.b32.xlu1 %v2085_v44, 360  ;;  %2154 = vbcast.lane.b32.xlu0 %v2152_v55, 256 }
  0x48   :  { %2147 = vbcast.lane.b32.xlu1 %v2085_v44, 376  ;;  %2162 = vbcast.lane.b32.xlu0 %v2152_v55, 272 }
  0x4a   :  { %7148 = vmatmul.mubr.bf16.gmra.mrb[20].mxu1 %v176_v56 }
  0x4b   :  { %7151 = vmatprep.mubr.bf16.mxu1 %v178_v57 }
  0x4c   :  { %2158 = vbcast.lane.b32.xlu1 %v2152_v55, 264  ;;  %2170 = vbcast.lane.b32.xlu0 %v2152_v55, 288 }
  0x50   :  { %2166 = vbcast.lane.b32.xlu1 %v2152_v55, 280  ;;  %2178 = vbcast.lane.b32.xlu0 %v2152_v55, 304 }
  0x52   :  { %7152 = vmatmul.mubr.bf16.gmra.mrb[24].mxu1 %v180_v58 }
  0x53   :  { %7155 = vmatprep.mubr.bf16.mxu1 %v182_v59  ;;  %v228_v59 = vld [vmem:[%s12674_s2 + $0x128] sm:$0xff]  }
  0x54   :  { %2174 = vbcast.lane.b32.xlu1 %v2152_v55, 296  ;;  %2186 = vbcast.lane.b32.xlu0 %v2152_v55, 320 }
  0x58   :  { %2182 = vbcast.lane.b32.xlu1 %v2152_v55, 312  ;;  %2194 = vbcast.lane.b32.xlu0 %v2152_v55, 336 }
  0x5a   :  { %7156 = vmatmul.mubr.bf16.gmra.mrb[28].mxu1 %v184_v60 }
  0x5b   :  { %7159 = vmatprep.mubr.bf16.mxu1 %v186_v61  ;;  %v230_v61 = vld [vmem:[%s12674_s2 + $0x130] sm:$0xff]  }
  0x5c   :  { %2190 = vbcast.lane.b32.xlu1 %v2152_v55, 328  ;;  %2202 = vbcast.lane.b32.xlu0 %v2152_v55, 352 }
  0x60   :  { %2198 = vbcast.lane.b32.xlu1 %v2152_v55, 344  ;;  %2210 = vbcast.lane.b32.xlu0 %v2152_v55, 368 }
  0x62   :  { %7160 = vmatmul.mubr.bf16.gmra.mrb[32].mxu1 %v188_v63 }
  0x63   :  { %7163 = vmatprep.mubr.bf16.mxu1 %v190_v1 }
  0x64   :  { %2206 = vbcast.lane.b32.xlu1 %v2152_v55, 360  ;;  %2221 = vbcast.lane.b32.xlu0 %v2219_v4, 256 }
  0x68   :  { %2214 = vbcast.lane.b32.xlu1 %v2152_v55, 376  ;;  %2229 = vbcast.lane.b32.xlu0 %v2219_v4, 272  ;;  %v226_v55 = vld [vmem:[%s12674_s2 + $0x120] sm:$0xff]  }
  0x6a   :  { %7164 = vmatmul.mubr.bf16.gmra.mrb[36].mxu1 %v192_v7  ;;  %v232_v7 = vld [vmem:[%s12674_s2 + $0x138] sm:$0xff]  }
  0x6b   :  { %7167 = vmatprep.mubr.bf16.mxu1 %v194_v8 }
  0x6c   :  { %2225 = vbcast.lane.b32.xlu1 %v2219_v4, 264  ;;  %2237 = vbcast.lane.b32.xlu0 %v2219_v4, 288 }
  0x70   :  { %2233 = vbcast.lane.b32.xlu1 %v2219_v4, 280  ;;  %2245 = vbcast.lane.b32.xlu0 %v2219_v4, 304 }
  0x72   :  { %7168 = vmatmul.mubr.bf16.gmra.mrb[40].mxu1 %v196_v10  ;;  %v234_v10 = vld [vmem:[%s12674_s2 + $0x140] sm:$0xff]  }
  0x73   :  { %7171 = vmatprep.mubr.bf16.mxu1 %v198_v11 }
  0x74   :  { %2241 = vbcast.lane.b32.xlu1 %v2219_v4, 296  ;;  %2253 = vbcast.lane.b32.xlu0 %v2219_v4, 320 }
  0x78   :  { %2249 = vbcast.lane.b32.xlu1 %v2219_v4, 312  ;;  %2261 = vbcast.lane.b32.xlu0 %v2219_v4, 336 }
  0x7a   :  { %v8608_v14 = vpop.permute.xlu1 %2024  ;;  %v8610_v15 = vpop.permute.xlu0 %2020  ;;  %7172 = vmatmul.mubr.bf16.gmra.mrb[44].mxu1 %v200_v12 }
  0x7b   :  { %7175 = vmatprep.mubr.bf16.mxu1 %v202_v13  ;;  %v12689_v13 = vsub.s32 6, %v8410_v5 }
  0x7c   :  { %2257 = vbcast.lane.b32.xlu1 %v2219_v4, 328  ;;  %2269 = vbcast.lane.b32.xlu0 %v2219_v4, 352 }
  0x7e   :  { %v8613_v17 = vpop.permute.xlu1 %2028  ;;  %v8618_v19 = vpop.permute.xlu0 %2036 }
  0x80   :  { %2265 = vbcast.lane.b32.xlu1 %v2219_v4, 344  ;;  %2277 = vbcast.lane.b32.xlu0 %v2219_v4, 368 }
  0x82   :  { %v8626_v22 = vpop.permute.xlu1 %2032  ;;  %v8628_v23 = vpop.permute.xlu0 %2044  ;;  %7176 = vmatmul.mubr.bf16.gmra.mrb[48].mxu1 %v204_v18 }
  0x83   :  { %7179 = vmatprep.mubr.bf16.mxu1 %v206_v20  ;;  %v236_v20 = vld [vmem:[%s12674_s2 + $0x148] sm:$0xff]  }
  0x84   :  { %2273 = vbcast.lane.b32.xlu1 %v2219_v4, 360  ;;  %2288 = vbcast.lane.b32.xlu0 %v2286_v21, 256 }
  0x86   :  { %v8630_v24 = vpop.permute.xlu1 %2040  ;;  %v8635_v26 = vpop.permute.xlu0 %2052 }
  0x88   :  { %2281 = vbcast.lane.b32.xlu1 %v2219_v4, 376  ;;  %2296 = vbcast.lane.b32.xlu0 %v2286_v21, 272 }
  0x8a   :  { %v8640_v28 = vpop.permute.xlu1 %2048  ;;  %v8642_v29 = vpop.permute.xlu0 %2060  ;;  %7180 = vmatmul.mubr.bf16.gmra.mrb[52].mxu1 %v208_v25  ;;  %v238_v25 = vld [vmem:[%s12674_s2 + $0x150] sm:$0xff]  }
  0x8b   :  { %7183 = vmatprep.mubr.bf16.mxu1 %v210_v27  ;;  %v2420_v27 = vrot.slane %v8417_v6, %v12689_v13 }
  0x8c   :  { %2292 = vbcast.lane.b32.xlu1 %v2286_v21, 264  ;;  %2304 = vbcast.lane.b32.xlu0 %v2286_v21, 288 }
  0x8e   :  { %v8644_v30 = vpop.permute.xlu1 %2056  ;;  %v8649_v32 = vpop.permute.xlu0 %2068 }
  0x90   :  { %2300 = vbcast.lane.b32.xlu1 %v2286_v21, 280  ;;  %2312 = vbcast.lane.b32.xlu0 %v2286_v21, 304 }
  0x92   :  { %v8654_v34 = vpop.permute.xlu1 %2064  ;;  %v8656_v35 = vpop.permute.xlu0 %2076  ;;  %7184 = vmatmul.mubr.bf16.gmra.mrb[56].mxu1 %v212_v31 }
  0x93   :  { %7187 = vmatprep.mubr.bf16.mxu1 %v214_v33 }
  0x94   :  { %2308 = vbcast.lane.b32.xlu1 %v2286_v21, 296  ;;  %2320 = vbcast.lane.b32.xlu0 %v2286_v21, 320 }
  0x96   :  { %v8658_v36 = vpop.permute.xlu1 %2072  ;;  %v8663_v38 = vpop.permute.xlu0 %2087 }
  0x97   :  { %12932 = vst [vmem:[#allocation17_spill] sm:$0xff] %v8663_v38 }
  0x98   :  { %2316 = vbcast.lane.b32.xlu1 %v2286_v21, 312  ;;  %2328 = vbcast.lane.b32.xlu0 %v2286_v21, 336 }
  0x9a   :  { %v8668_v41 = vpop.permute.xlu1 %2080  ;;  %v8670_v42 = vpop.permute.xlu0 %2095  ;;  %7188 = vmatmul.mubr.bf16.gmra.mrb[60].mxu1 %v216_v37 }
  0x9b   :  { %12933 = vst [vmem:[#allocation18_spill] sm:$0xff] %v8670_v42  ;;  %7191 = vmatprep.mubr.bf16.mxu1 %v218_v39  ;;  %v240_v39 = vld [vmem:[%s12674_s2 + $0x158] sm:$0xff]  }
  0x9c   :  { %2324 = vbcast.lane.b32.xlu1 %v2286_v21, 328  ;;  %2336 = vbcast.lane.b32.xlu0 %v2286_v21, 352 }
  0x9e   :  { %v8673_v44 = vpop.permute.xlu1 %2091  ;;  %v8678_v46 = vpop.permute.xlu0 %2103 }
  0x9f   :  { %12934 = vst [vmem:[#allocation19_spill] sm:$0xff] %v8678_v46 }
  0xa0   :  { %2332 = vbcast.lane.b32.xlu1 %v2286_v21, 344  ;;  %2344 = vbcast.lane.b32.xlu0 %v2286_v21, 368 }
  0xa2   :  { %v8686_v49 = vpop.permute.xlu1 %2099  ;;  %v8688_v50 = vpop.permute.xlu0 %2111  ;;  %7192 = vmatmul.mubr.bf16.gmra.mrb[64].mxu1 %v220_v45 }
  0xa3   :  { %12935 = vst [vmem:[#allocation20_spill] sm:$0xff] %v8688_v50  ;;  %7195 = vmatprep.mubr.bf16.mxu1 %v222_v47  ;;  %v242_v47 = vld [vmem:[%s12674_s2 + $0x160] sm:$0xff]  }
  0xa4   :  { %2340 = vbcast.lane.b32.xlu1 %v2286_v21, 360  ;;  %2355 = vbcast.lane.b32.xlu0 %v2353_v48, 256 }
  0xa6   :  { %v8690_v51 = vpop.permute.xlu1 %2107  ;;  %v8695_v54 = vpop.permute.xlu0 %2119 }
  0xa7   :  { %12936 = vst [vmem:[#allocation21_spill] sm:$0xff] %v8690_v51  ;;  %12937 = vst [vmem:[#allocation22_spill] sm:$0xff] %v8695_v54 }
  0xa8   :  { %2348 = vbcast.lane.b32.xlu1 %v2286_v21, 376  ;;  %2363 = vbcast.lane.b32.xlu0 %v2353_v48, 272 }
  0xaa   :  { %v8700_v56 = vpop.permute.xlu1 %2115  ;;  %v8702_v57 = vpop.permute.xlu0 %2127  ;;  %7196 = vmatmul.mubr.bf16.gmra.mrb[68].mxu1 %v224_v53 }
  0xab   :  { %12938 = vst [vmem:[#allocation23_spill] sm:$0xff] %v8700_v56  ;;  %12939 = vst [vmem:[#allocation24_spill] sm:$0xff] %v8702_v57  ;;  %7199 = vmatprep.mubr.bf16.mxu1 %v226_v55 }
  0xac   :  { %2359 = vbcast.lane.b32.xlu1 %v2353_v48, 264  ;;  %2371 = vbcast.lane.b32.xlu0 %v2353_v48, 288 }
  0xae   :  { %v8704_v58 = vpop.permute.xlu1 %2123  ;;  %v8709_v60 = vpop.permute.xlu0 %2135 }
  0xaf   :  { %12940 = vst [vmem:[#allocation25_spill] sm:$0xff] %v8704_v58  ;;  %12941 = vst [vmem:[#allocation26_spill] sm:$0xff] %v8709_v60 }
  0xb0   :  { %2367 = vbcast.lane.b32.xlu1 %v2353_v48, 280  ;;  %2379 = vbcast.lane.b32.xlu0 %v2353_v48, 304 }
  0xb2   :  { %v8714_v63 = vpop.permute.xlu1 %2131  ;;  %v8716_v1 = vpop.permute.xlu0 %2143  ;;  %7200 = vmatmul.mubr.bf16.gmra.mrb[72].mxu1 %v228_v59 }
  0xb3   :  { %12942 = vst [vmem:[#allocation27_spill] sm:$0xff] %v8714_v63  ;;  %12943 = vst [vmem:[#allocation28_spill] sm:$0xff] %v8716_v1  ;;  %7203 = vmatprep.mubr.bf16.mxu1 %v230_v61  ;;  %v244_v61 = vld [vmem:[%s12674_s2 + $0x168] sm:$0xff]  }
  0xb4   :  { %2375 = vbcast.lane.b32.xlu1 %v2353_v48, 296  ;;  %2387 = vbcast.lane.b32.xlu0 %v2353_v48, 320 }
  0xb6   :  { %v8718_v4 = vpop.permute.xlu1 %2139  ;;  %v8723_v8 = vpop.permute.xlu0 %2154 }
  0xb7   :  { %12944 = vst [vmem:[#allocation29_spill] sm:$0xff] %v8718_v4  ;;  %12945 = vst [vmem:[#allocation30_spill] sm:$0xff] %v8723_v8 }
  0xb8   :  { %2383 = vbcast.lane.b32.xlu1 %v2353_v48, 312  ;;  %2395 = vbcast.lane.b32.xlu0 %v2353_v48, 336 }
  0xba   :  { %v8728_v11 = vpop.permute.xlu1 %2147  ;;  %v8730_v12 = vpop.permute.xlu0 %2162  ;;  %7204 = vmatmul.mubr.bf16.gmra.mrb[76].mxu1 %v232_v7 }
  0xbb   :  { %12946 = vst [vmem:[#allocation31_spill] sm:$0xff] %v8728_v11  ;;  %12947 = vst [vmem:[#allocation32_spill] sm:$0xff] %v8730_v12  ;;  %7207 = vmatprep.mubr.bf16.mxu1 %v234_v10 }
  0xbc   :  { %2391 = vbcast.lane.b32.xlu1 %v2353_v48, 328  ;;  %2403 = vbcast.lane.b32.xlu0 %v2353_v48, 352 }
  0xbe   :  { %v8733_v18 = vpop.permute.xlu1 %2158  ;;  %v8738_v21 = vpop.permute.xlu0 %2170 }
  0xbf   :  { %12948 = vst [vmem:[#allocation33_spill] sm:$0xff] %v8733_v18  ;;  %12949 = vst [vmem:[#allocation34_spill] sm:$0xff] %v8738_v21 }
  0xc0   :  { %2399 = vbcast.lane.b32.xlu1 %v2353_v48, 344  ;;  %2411 = vbcast.lane.b32.xlu0 %v2353_v48, 368 }
  0xc2   :  { %v8746_v31 = vpop.permute.xlu1 %2166  ;;  %v8748_v33 = vpop.permute.xlu0 %2178  ;;  %7208 = vmatmul.mubr.bf16.gmra.mrb[80].mxu1 %v236_v20 }
  0xc3   :  { %12950 = vst [vmem:[#allocation35_spill] sm:$0xff] %v8746_v31  ;;  %12951 = vst [vmem:[#allocation36_spill] sm:$0xff] %v8748_v33  ;;  %7211 = vmatprep.mubr.bf16.mxu1 %v238_v25 }
  0xc4   :  { %2407 = vbcast.lane.b32.xlu1 %v2353_v48, 360  ;;  %2422 = vbcast.lane.b32.xlu0 %v2420_v27, 256 }
  0xc6   :  { %v8750_v37 = vpop.permute.xlu1 %2174  ;;  %v8755_v45 = vpop.permute.xlu0 %2186 }
  0xc7   :  { %12952 = vst [vmem:[#allocation37_spill] sm:$0xff] %v8750_v37  ;;  %12953 = vst [vmem:[#allocation38_spill] sm:$0xff] %v8755_v45 }
  0xc8   :  { %2415 = vbcast.lane.b32.xlu1 %v2353_v48, 376  ;;  %2430 = vbcast.lane.b32.xlu0 %v2420_v27, 272  ;;  %v246_v48 = vld [vmem:[%s12674_s2 + $0x170] sm:$0xff]  }
  0xca   :  { %v8760_v53 = vpop.permute.xlu1 %2182  ;;  %v8762_v55 = vpop.permute.xlu0 %2194  ;;  %7212 = vmatmul.mubr.bf16.gmra.mrb[84].mxu1 %v240_v39  ;;  %v248_v39 = vld [vmem:[%s12674_s2 + $0x178] sm:$0xff]  }
  0xcb   :  { %12954 = vst [vmem:[#allocation39_spill] sm:$0xff] %v8760_v53  ;;  %12955 = vst [vmem:[#allocation40_spill] sm:$0xff] %v8762_v55  ;;  %7215 = vmatprep.mubr.bf16.mxu1 %v242_v47 }
  0xcc   :  { %2426 = vbcast.lane.b32.xlu1 %v2420_v27, 264  ;;  %2438 = vbcast.lane.b32.xlu0 %v2420_v27, 288 }
  0xce   :  { %v8764_v59 = vpop.permute.xlu1 %2190  ;;  %v8769_v7 = vpop.permute.xlu0 %2202 }
  0xcf   :  { %12956 = vst [vmem:[#allocation41_spill] sm:$0xff] %v8764_v59  ;;  %12957 = vst [vmem:[#allocation42_spill] sm:$0xff] %v8769_v7 }
  0xd0   :  { %2434 = vbcast.lane.b32.xlu1 %v2420_v27, 280  ;;  %2446 = vbcast.lane.b32.xlu0 %v2420_v27, 304 }
  0xd2   :  { %v8774_v10 = vpop.permute.xlu1 %2198  ;;  %v8776_v20 = vpop.permute.xlu0 %2210  ;;  %7216 = vmatmul.mubr.bf16.gmra.mrb[88].mxu1 %v244_v61  ;;  %v12698_v61 = vsub.s32 7, %v8410_v5 }
  0xd3   :  { %12958 = vst [vmem:[#allocation43_spill] sm:$0xff] %v8774_v10  ;;  %12959 = vst [vmem:[#allocation44_spill] sm:$0xff] %v8776_v20  ;;  %7219 = vmatprep.mubr.bf16.mxu1 %v246_v48 }
  0xd4   :  { %2442 = vbcast.lane.b32.xlu1 %v2420_v27, 296  ;;  %2454 = vbcast.lane.b32.xlu0 %v2420_v27, 320  ;;  %v8806_v0 = vrot.slane %v8417_v6, %v12698_v61  ;;  %v258_v6 = vld [vmem:[%s12674_s2 + $0x1a0] sm:$0xff]  }
  0xd6   :  { %v8778_v25 = vpop.permute.xlu1 %2206  ;;  %v8783_v47 = vpop.permute.xlu0 %2221 }
  0xd7   :  { %12960 = vst [vmem:[#allocation45_spill] sm:$0xff] %v8778_v25  ;;  %12961 = vst [vmem:[#allocation46_spill] sm:$0xff] %v8783_v47 }
  0xd8   :  { %2450 = vbcast.lane.b32.xlu1 %v2420_v27, 312  ;;  %2462 = vbcast.lane.b32.xlu0 %v2420_v27, 336 }
  0xda   :  { %v8788_v3 = vpop.permute.xlu1 %2214  ;;  %v8790_v13 = vpop.permute.xlu0 %2229  ;;  %7220 = vmatmul.mubr.bf16.gmra.mrb[92].mxu1 %v248_v39 }
  0xdb   :  { %12962 = vst [vmem:[#allocation47_spill] sm:$0xff] %v8788_v3  ;;  %12963 = vst [vmem:[#allocation48_spill] sm:$0xff] %v8790_v13  ;;  %7223 = vmatprep.mubr.bf16.mxu1 %v250_v2 }
  0xdc   :  { %2458 = vbcast.lane.b32.xlu1 %v2420_v27, 328  ;;  %2470 = vbcast.lane.b32.xlu0 %v2420_v27, 352 }
  0xde   :  { %v8793_v48 = vpop.permute.xlu1 %2225  ;;  %v8798_v16 = vpop.permute.xlu0 %2237 }
  0xdf   :  { %12964 = vst [vmem:[#allocation49_spill] sm:$0xff] %v8793_v48  ;;  %12965 = vst [vmem:[#allocation50_spill] sm:$0xff] %v8798_v16 }
  0xe0   :  { %2466 = vbcast.lane.b32.xlu1 %v2420_v27, 344  ;;  %2478 = vbcast.lane.b32.xlu0 %v2420_v27, 368 }
  0xe2   :  { %v8808_v39 = vpop.permute.xlu1 %2233  ;;  %v8810_v2 = vpop.permute.xlu0 %2245  ;;  %7224 = vmatmul.mubr.bf16.gmra.mrb[96].mxu1 %v252_v43  ;;  %v260_v43 = vld [vmem:[%s12674_s2 + $0x1a8] sm:$0xff]  }
  0xe3   :  { %12966 = vst [vmem:[#allocation51_spill] sm:$0xff] %v8808_v39  ;;  %12967 = vst [vmem:[#allocation52_spill] sm:$0xff] %v8810_v2  ;;  %7227 = vmatprep.mubr.bf16.mxu1 %v254_v62 }
  0xe4   :  { %2474 = vbcast.lane.b32.xlu1 %v2420_v27, 360  ;;  %2489 = vbcast.lane.b32.xlu0 %v8806_v0, 256 }
  0xe6   :  { %v8813_v52 = vpop.permute.xlu1 %2241  ;;  %v8818_v16 = vpop.permute.xlu0 %2253 }
  0xe7   :  { %12968 = vst [vmem:[#allocation53_spill] sm:$0xff] %v8813_v52  ;;  %12969 = vst [vmem:[#allocation54_spill] sm:$0xff] %v8818_v16 }
  0xe8   :  { %2482 = vbcast.lane.b32.xlu1 %v2420_v27, 376  ;;  %2497 = vbcast.lane.b32.xlu0 %v8806_v0, 272  ;;  %v8327_v27 = vmov 1966171168  }
  0xe9   :  { %v1279_v13 = vunpack.c.l.s4 %v8327_v27  ;;  %v6854_v27 = vld [vmem:[%s12676_s6] ss:$0 sm:$0xff] }
  0xea   :  { %v8824_v61 = vpop.permute.xlu1 %2249  ;;  %v8826_v2 = vpop.permute.xlu0 %2261  ;;  %7228 = vmatmul.mubr.bf16.gmra.mrb[100].mxu1 %v256_v40 }
  0xeb   :  { %12970 = vst [vmem:[#allocation55_spill] sm:$0xff] %v8824_v61  ;;  %12971 = vst [vmem:[#allocation56_spill] sm:$0xff] %v8826_v2  ;;  %7231 = vmatprep.mubr.bf16.mxu1 %v258_v6  ;;  %v262_v2 = vld [vmem:[%s12674_s2 + $0x1b0] sm:$0xff]   ;;  %v1280_v6 = vunpack.c.0.s8 %v1279_v13  ;;  %v264_v61 = vld [vmem:[%s12674_s2 + $0x1b8] sm:$0xff]  }
  0xec   :  { %2493 = vbcast.lane.b32.xlu1 %v8806_v0, 264  ;;  %2505 = vbcast.lane.b32.xlu0 %v8806_v0, 288 }
  0xed   :  { %v8859_v13 = vsub.s32 %v1280_v6, %v8410_v5 }
  0xee   :  { %v8830_v62 = vpop.permute.xlu1 %2257  ;;  %v8835_v16 = vpop.permute.xlu0 %2269 }
  0xef   :  { %12972 = vst [vmem:[#allocation57_spill] sm:$0xff] %v8830_v62  ;;  %12973 = vst [vmem:[#allocation58_spill] sm:$0xff] %v8835_v16 }
  0xf0   :  { %2501 = vbcast.lane.b32.xlu1 %v8806_v0, 280  ;;  %2513 = vbcast.lane.b32.xlu0 %v8806_v0, 304 }
  0xf2   :  { %v8842_v40 = vpop.permute.xlu1 %2265  ;;  %v8844_v62 = vpop.permute.xlu0 %2277  ;;  %7232 = vmatmul.mubr.bf16.gmra.mrb[104].mxu1 %v260_v43  ;;  %v266_v43 = vld [vmem:[%s12674_s2 + $0x1c0] sm:$0xff]  }
  0xf3   :  { %12974 = vst [vmem:[#allocation59_spill] sm:$0xff] %v8842_v40  ;;  %12975 = vst [vmem:[#allocation60_spill] sm:$0xff] %v8844_v62  ;;  %7235 = vmatprep.mubr.bf16.mxu1 %v262_v2 }
  0xf4   :  { %2509 = vbcast.lane.b32.xlu1 %v8806_v0, 296  ;;  %2521 = vbcast.lane.b32.xlu0 %v8806_v0, 320 }
  0xf6   :  { %v8848_v16 = vpop.permute.xlu1 %2273  ;;  %v8856_v40 = vpop.permute.xlu0 %2288 }
  0xf7   :  { %12976 = vst [vmem:[#allocation61_spill] sm:$0xff] %v8848_v16  ;;  %12977 = vst [vmem:[#allocation62_spill] sm:$0xff] %v8856_v40  ;;  %v7129_v16 = vpop.f32.mrb[0].mxu1 }
  0xf8   :  { %2517 = vbcast.lane.b32.xlu1 %v8806_v0, 312  ;;  %v145_v62 = vpop.f32.mrb[0].mxu0  ;;  %v764_v47 = vpop.f32.mrb[1].mxu1 }
  0xf9   :  { %v146_v52 = vadd.f32 %v6854_v27, %v145_v62  ;;  %v7110_v2 = vpop.f32.mrb[1].mxu0  ;;  %v7130_v6 = vpop.f32.mrb[2].mxu1  ;;  %v268_v62 = vld [vmem:[%s12674_s2 + $0x1c8] sm:$0xff]  }
  0xfa   :  { %v8865_v39 = vpop.permute.xlu0 %2296  ;;  %v8867_v20 = vpop.permute.xlu1 %2281  ;;  %7236 = vmatmul.mubr.bf16.gmra.mrb[108].mxu1 %v264_v61  ;;  %v270_v2 = vld [vmem:[%s12674_s2 + $0x1d0] sm:$0xff]  }
  0xfb   :  { %12978 = vst [vmem:[#allocation63_spill] sm:$0xff] %v8865_v39  ;;  %12979 = vst [vmem:[#allocation64_spill] sm:$0xff] %v8867_v20  ;;  %v1277_v48 = vcombine.high %v146_v52, %v146_v52  ;;  %v8870_v40 = vrot.slane %v146_v52, %v8859_v13  ;;  %v767_v5 = vpop.f32.mrb[3].mxu1  ;;  %7239 = vmatprep.mubr.bf16.mxu1 %v266_v43 }
  0xfc   :  { %2525 = vbcast.lane.b32.xlu1 %v8806_v0, 328 }
  0xfd   :  { %v1291_v7 = vrot.slane %v1277_v48, %v8859_v13  ;;  %v8876_v3 = vrot.slane %v8870_v40, %v8859_v13  ;;  %v7133_v39 = vpop.f32.mrb[4].mxu1 }
  0xfe   :  { %v8889_v20 = vpop.permute.xlu0 %2304  ;;  %v8894_v43 = vpop.permute.xlu1 %2292 }
  0xff   :  { %v1293_v27 = vcombine.high %v1291_v7, %v1291_v7  ;;  %v8882_v52 = vrot.slane %v1291_v7, %v8859_v13  ;;  %v1329_v48 = vrot.slane %v8876_v3, %v8426_v9  ;;  %12980 = vst [vmem:[#allocation65_spill] sm:$0xff] %v8889_v20  ;;  %12981 = vst [vmem:[#allocation66_spill] sm:$0xff] %v8894_v43  ;;  %v780_v55 = vpop.f32.mrb[5].mxu1 }
 0x100   :  { %v7134_v7 = vpop.f32.mrb[6].mxu1 }
 0x101   :  { %v8892_v61 = vrot.slane %v1293_v27, %v8859_v13  ;;  %v1368_v25 = vadd.f32 %v7129_v16, %v1329_v48  ;;  %v1366_v45 = vadd.f32 %v1329_v48, %v764_v47  ;;  %v783_v10 = vpop.f32.mrb[7].mxu1  ;;  %v1369_v33 = vadd.f32 %v7130_v6, %v1329_v48  ;;  %v272_v27 = vld [vmem:[%s12674_s2 + $0x1d8] sm:$0xff]  }
 0x102   :  { %v1367_v59 = vadd.f32 %v1329_v48, %v767_v5  ;;  %v1372_v21 = vadd.f32 %v7133_v39, %v1329_v48  ;;  %7240 = vmatmul.mubr.bf16.gmra.mrb[112].mxu1 %v268_v62  ;;  %v1370_v53 = vadd.f32 %v1329_v48, %v780_v55  ;;  %v1373_v12 = vadd.f32 %v7134_v7, %v1329_v48  ;;  %v8898_v20 = vpop.permute.xlu0 %2312  ;;  %v8903_v16 = vpop.permute.xlu1 %2300  ;;  %v274_v5 = vld [vmem:[%s12674_s2 + $0x1e0] sm:$0xff]  }
 0x103   :  { %7705 = vtanh.f32 %v1366_v45  ;;  %v8896_v37 = vadd.f32 %v1329_v48, %v783_v10  ;;  %7243 = vmatprep.mubr.bf16.mxu1 %v270_v2  ;;  %12982 = vst [vmem:[#allocation67_spill] sm:$0xff] %v8898_v20  ;;  %12983 = vst [vmem:[#allocation68_spill] sm:$0xff] %v8903_v16 }
 0x104   :  { %7707 = vtanh.f32 %v1367_v59  ;;  %v8919_v59 = vld [vmem:[%s12677_s7] ss:$0 sm:$0xff] }
 0x105   :  { %v7137_v45 = vpop.f32.mrb[8].mxu1  ;;  %7709 = vtanh.f32 %v1372_v21  ;;  %v276_v21 = vld [vmem:[%s12674_s2 + $0x1e8] sm:$0xff]  }
 0x106   :  { %v1376_v47 = vadd.f32 %v7137_v45, %v1329_v48  ;;  %v796_v55 = vpop.f32.mrb[9].mxu1  ;;  %v8912_v7 = vpop.permute.xlu0 %2320  ;;  %7711 = vtanh.f32 %v1370_v53 }
 0x107   :  { %v1374_v10 = vadd.f32 %v1329_v48, %v796_v55  ;;  %v7138_v39 = vpop.f32.mrb[10].mxu1  ;;  %12984 = vst [vmem:[#allocation69_spill] sm:$0xff] %v8912_v7  ;;  %v8914_v20 = vpop.permute.xlu1 %2308  ;;  %v1292_v55 = vcombine.high %v8870_v40, %v8870_v40  ;;  %7713 = vtanh.f32 %v1368_v25 }
 0x108   :  { %v8908_v6 = vadd.f32 %v7138_v39, %v1329_v48  ;;  %v799_v62 = vpop.f32.mrb[11].mxu1  ;;  %12985 = vst [vmem:[#allocation70_spill] sm:$0xff] %v8914_v20  ;;  %v278_v39 = vld [vmem:[%s12674_s2 + $0x1f0] sm:$0xff]   ;;  %7715 = vtanh.f32 %v1376_v47 }
 0x109   :  { %v8910_v2 = vadd.f32 %v1329_v48, %v799_v62  ;;  %v8933_v31 = vrot.slane %v1292_v55, %v8859_v13  ;;  %7717 = vtanh.f32 %v1369_v33  ;;  %v280_v13 = vld [vmem:[%s12674_s2 + $0x1f8] sm:$0xff]  }
 0x10a   :  { %7244 = vmatmul.mubr.bf16.gmra.mrb[116].mxu1 %v272_v27  ;;  %v8930_v8 = vpop.permute.xlu0 %2328  ;;  %7719 = vtanh.f32 %v1374_v10 }
 0x10b   :  { %7247 = vmatprep.mubr.bf16.mxu1 %v274_v5  ;;  %12986 = vst [vmem:[#allocation71_spill] sm:$0xff] %v8930_v8  ;;  %v8935_v40 = vpop.permute.xlu1 %2316  ;;  %v8947_v55 = vrot.slane %v8933_v31, %v8426_v9  ;;  %7721 = vtanh.f32 %v1373_v12 }
 0x10c   :  { %12987 = vst [vmem:[#allocation72_spill] sm:$0xff] %v8935_v40 }
 0x10d   :  { %v7706_v45 = vpop.eup %7705  ;;  %v7141_v27 = vpop.f32.mrb[12].mxu1 }
 0x10e   :  { %v1629_v62 = vmul.f32 %v7706_v45, %v8919_v59  ;;  %v7708_v7 = vpop.eup %7707  ;;  %v1380_v20 = vadd.f32 %v7141_v27, %v1329_v48  ;;  %v812_v5 = vpop.f32.mrb[13].mxu1 }
 0x10f   :  { %v1378_v16 = vadd.f32 %v1329_v48, %v812_v5  ;;  %v7142_v43 = vpop.f32.mrb[14].mxu1  ;;  %v1630_v53 = vmul.f32 %v7708_v7, %v8919_v59  ;;  %v7710_v45 = vpop.eup %7709 }
 0x110   :  { %v8937_v1 = vadd.f32 %v7142_v43, %v1329_v48  ;;  %v815_v18 = vpop.f32.mrb[15].mxu1  ;;  %v1635_v43 = vmul.f32 %v7710_v45, %v8919_v59  ;;  %v8950_v27 = vpop.permute.xlu0 %2336  ;;  %7723 = vtanh.f32 %v1380_v20 }
 0x111   :  { %v8940_v25 = vadd.f32 %v1329_v48, %v815_v18  ;;  %12988 = vst [vmem:[#allocation73_spill] sm:$0xff] %v8950_v27  ;;  %v8952_v18 = vpop.permute.xlu1 %2324  ;;  %v7712_v47 = vpop.eup %7711  ;;  %7725 = vtanh.f32 %v8896_v37 }
 0x112   :  { %7248 = vmatmul.mubr.bf16.gmra.mrb[120].mxu1 %v276_v21  ;;  %12989 = vst [vmem:[#allocation74_spill] sm:$0xff] %v8952_v18  ;;  %v1633_v12 = vmul.f32 %v7712_v47, %v8919_v59  ;;  %7727 = vtanh.f32 %v1378_v16  ;;  %v12701_v18 = vmov 0  }
 0x113   :  { %1757 = vadd.xlane.f32.xlu0 %v1629_v62  ;;  %7251 = vmatprep.mubr.bf16.mxu1 %v278_v39  ;;  %v7714_v62 = vpop.eup %7713  ;;  %7729 = vtanh.f32 %v8908_v6 }
 0x114   :  { %v7716_v45 = vpop.eup %7715  ;;  %7568 = vset.pattern.permute.xlu1 %v12701_v18  ;;  %7567 = vset.pattern.permute.xlu0 %v12701_v18 }
 0x115   :  { %v7145_v7 = vpop.f32.mrb[16].mxu1  ;;  %v7718_v27 = vpop.eup %7717 }
 0x116   :  { %v1384_v33 = vadd.f32 %v7145_v7, %v8947_v55  ;;  %v828_v48 = vpop.f32.mrb[17].mxu1  ;;  %v8964_v7 = vpop.permute.xlu0 %2344 }
 0x117   :  { %1759 = vadd.xlane.f32.xlu0 %v1630_v53  ;;  %v1382_v21 = vadd.f32 %v8947_v55, %v828_v48  ;;  %v7146_v39 = vpop.f32.mrb[18].mxu1  ;;  %12990 = vst [vmem:[#allocation75_spill] sm:$0xff] %v8964_v7  ;;  %v1631_v48 = vmul.f32 %v7714_v62, %v8919_v59  ;;  %v8967_v8 = vpop.permute.xlu1 %2332  ;;  %v1632_v62 = vmul.f32 %v7718_v27, %v8919_v59 }
 0x118   :  { %v8957_v5 = vadd.f32 %v7146_v39, %v8947_v55  ;;  %v831_v53 = vpop.f32.mrb[19].mxu1  ;;  %12991 = vst [vmem:[#allocation76_spill] sm:$0xff] %v8967_v8  ;;  %v7720_v47 = vpop.eup %7719  ;;  %7731 = vtanh.f32 %v1384_v33 }
 0x119   :  { %v8960_v10 = vadd.f32 %v8947_v55, %v831_v53  ;;  %v7722_v7 = vpop.eup %7721  ;;  %7733 = vtanh.f32 %v8910_v2 }
 0x11a   :  { %7252 = vmatmul.mubr.bf16.gmra.mrb[124].mxu1 %v280_v13  ;;  %v1639_v13 = vmul.f32 %v7716_v45, %v8919_v59  ;;  %v7724_v27 = vpop.eup %7723  ;;  %7735 = vtanh.f32 %v1382_v21 }
 0x11b   :  { %1769 = vadd.xlane.f32.xlu0 %v1635_v43  ;;  %v8983_v45 = vpop.permute.xlu1 %2340  ;;  %7737 = vtanh.f32 %v8937_v1 }
 0x11c   :  { %12993 = vst [vmem:[#allocation78_spill] sm:$0xff] %v8983_v45 }
 0x11d   :  { %v7149_v43 = vpop.f32.mrb[20].mxu1 }
 0x11e   :  { %v1388_v20 = vadd.f32 %v7149_v43, %v8947_v55  ;;  %v844_v37 = vpop.f32.mrb[21].mxu1  ;;  %v1636_v43 = vmul.f32 %v7722_v7, %v8919_v59 }
 0x11f   :  { %1765 = vadd.xlane.f32.xlu0 %v1633_v12  ;;  %v1386_v39 = vadd.f32 %v8947_v55, %v844_v37  ;;  %v7150_v53 = vpop.f32.mrb[22].mxu1  ;;  %v8977_v12 = vpop.permute.xlu0 %2355 }
 0x120   :  { %1761 = vadd.xlane.f32.xlu1 %v1631_v48  ;;  %v8975_v8 = vadd.f32 %v7150_v53, %v8947_v55  ;;  %v847_v16 = vpop.f32.mrb[23].mxu1  ;;  %12992 = vst [vmem:[#allocation77_spill] sm:$0xff] %v8977_v12  ;;  %v1637_v48 = vmul.f32 %v7720_v47, %v8919_v59  ;;  %v7726_v37 = vpop.eup %7725  ;;  %7739 = vtanh.f32 %v1388_v20 }
 0x121   :  { %v8980_v6 = vadd.f32 %v8947_v55, %v847_v16  ;;  %v7728_v2 = vpop.eup %7727  ;;  %v1634_v7 = vmul.f32 %v7726_v37, %v8919_v59  ;;  %7741 = vtanh.f32 %v8940_v25 }
 0x122   :  { %v7730_v45 = vpop.eup %7729  ;;  %7743 = vtanh.f32 %v1386_v39 }
 0x123   :  { %1777 = vadd.xlane.f32.xlu0 %v1639_v13  ;;  %v8990_v16 = vpop.permute.xlu0 %2363  ;;  %v1640_v37 = vmul.f32 %v7730_v45, %v8919_v59  ;;  %7745 = vtanh.f32 %v8957_v5 }
 0x124   :  { %1763 = vadd.xlane.f32.xlu1 %v1632_v62  ;;  %v1643_v62 = vmul.f32 %v7724_v27, %v8919_v59  ;;  %12994 = vst [vmem:[#allocation79_spill] sm:$0xff] %v8990_v16  ;;  %v1641_v27 = vmul.f32 %v7728_v2, %v8919_v59 }
 0x125   :  { %v7153_v13 = vpop.f32.mrb[24].mxu1 }
 0x126   :  { %v1392_v33 = vadd.f32 %v7153_v13, %v8947_v55  ;;  %v860_v53 = vpop.f32.mrb[25].mxu1  ;;  %v7732_v13 = vpop.eup %7731 }
 0x127   :  { %1773 = vadd.xlane.f32.xlu0 %v1637_v48  ;;  %v1390_v47 = vadd.f32 %v8947_v55, %v860_v53  ;;  %v7154_v12 = vpop.f32.mrb[26].mxu1  ;;  %v8994_v48 = vpop.permute.xlu1 %2348  ;;  %v1647_v25 = vmul.f32 %v7732_v13, %v8919_v59 }
 0x128   :  { %1771 = vadd.xlane.f32.xlu1 %v1636_v43  ;;  %12995 = vst [vmem:[#allocation80_spill] sm:$0xff] %v8994_v48  ;;  %v8997_v21 = vadd.f32 %v7154_v12, %v8947_v55  ;;  %v863_v1 = vpop.f32.mrb[27].mxu1  ;;  %v7734_v53 = vpop.eup %7733  ;;  %7747 = vtanh.f32 %v1392_v33 }
 0x129   :  { %v9000_v43 = vadd.f32 %v8947_v55, %v863_v1  ;;  %v9005_v16 = vpop.permute.xlu0 %2371  ;;  %v7736_v2 = vpop.eup %7735  ;;  %7749 = vtanh.f32 %v8960_v10 }
 0x12a   :  { %12996 = vst [vmem:[#allocation81_spill] sm:$0xff] %v9005_v16  ;;  %v7738_v39 = vpop.eup %7737  ;;  %v1322_v16 = vcombine.high %v8876_v3, %v8876_v3  ;;  %v1645_v13 = vmul.f32 %v7736_v2, %v8919_v59  ;;  %7751 = vtanh.f32 %v1390_v47 }
 0x12b   :  { %1785 = vadd.xlane.f32.xlu0 %v1643_v62  ;;  %v9008_v20 = vpop.permute.xlu1 %2359  ;;  %7753 = vtanh.f32 %v8975_v8 }
 0x12c   :  { %1767 = vadd.xlane.f32.xlu1 %v1634_v7  ;;  %12997 = vst [vmem:[#allocation82_spill] sm:$0xff] %v9008_v20  ;;  %v1644_v20 = vmul.f32 %v7738_v39, %v8919_v59 }
 0x12d   :  { %v7157_v12 = vpop.f32.mrb[28].mxu1 }
 0x12e   :  { %v1396_v62 = vadd.f32 %v7157_v12, %v8947_v55  ;;  %v876_v7 = vpop.f32.mrb[29].mxu1 }
 0x12f   :  { %1781 = vadd.xlane.f32.xlu0 %v1641_v27  ;;  %v1394_v1 = vadd.f32 %v8947_v55, %v876_v7  ;;  %v7158_v45 = vpop.f32.mrb[30].mxu1  ;;  %v1638_v27 = vmul.f32 %v7734_v53, %v8919_v59  ;;  %v7740_v7 = vpop.eup %7739 }
 0x130   :  { %1779 = vadd.xlane.f32.xlu1 %v1640_v37  ;;  %v9017_v37 = vadd.f32 %v7158_v45, %v8947_v55  ;;  %v879_v5 = vpop.f32.mrb[31].mxu1  ;;  %v9024_v53 = vpop.permute.xlu0 %2379  ;;  %v9028_v45 = vrot.slane %v1322_v16, %v8426_v9  ;;  %7755 = vtanh.f32 %v1396_v62 }
 0x131   :  { %v9020_v12 = vadd.f32 %v8947_v55, %v879_v5  ;;  %12998 = vst [vmem:[#allocation83_spill] sm:$0xff] %v9024_v53  ;;  %v7742_v3 = vpop.eup %7741  ;;  %v9030_v48 = vpop.permute.xlu1 %2367  ;;  %7757 = vtanh.f32 %v8980_v6 }
 0x132   :  { %12999 = vst [vmem:[#allocation84_spill] sm:$0xff] %v9030_v48  ;;  %v7744_v2 = vpop.eup %7743  ;;  %v1642_v16 = vmul.f32 %v7742_v3, %v8919_v59  ;;  %7759 = vtanh.f32 %v1394_v1 }
 0x133   :  { %1793 = vadd.xlane.f32.xlu0 %v1647_v25  ;;  %v1651_v25 = vmul.f32 %v7740_v7, %v8919_v59  ;;  %v7746_v5 = vpop.eup %7745  ;;  %v1649_v7 = vmul.f32 %v7744_v2, %v8919_v59  ;;  %7761 = vtanh.f32 %v8997_v21 }
 0x134   :  { %1775 = vadd.xlane.f32.xlu1 %v1638_v27  ;;  %v7748_v3 = vpop.eup %7747 }
 0x135   :  { %v7161_v55 = vpop.f32.mrb[32].mxu1 }
 0x136   :  { %v1400_v10 = vadd.f32 %v7161_v55, %v9028_v45  ;;  %v892_v33 = vpop.f32.mrb[33].mxu1  ;;  %v1648_v55 = vmul.f32 %v7746_v5, %v8919_v59 }
 0x137   :  { %1789 = vadd.xlane.f32.xlu0 %v1645_v13  ;;  %v1398_v27 = vadd.f32 %v9028_v45, %v892_v33  ;;  %v7162_v39 = vpop.f32.mrb[34].mxu1  ;;  %v9046_v13 = vpop.permute.xlu1 %2375 }
 0x138   :  { %1787 = vadd.xlane.f32.xlu1 %v1644_v20  ;;  %v9038_v53 = vadd.f32 %v7162_v39, %v9028_v45  ;;  %v895_v47 = vpop.f32.mrb[35].mxu1  ;;  %v9040_v20 = vpop.permute.xlu0 %2387  ;;  %13001 = vst [vmem:[#allocation86_spill] sm:$0xff] %v9046_v13  ;;  %7763 = vtanh.f32 %v1400_v10 }
 0x139   :  { %13000 = vst [vmem:[#allocation85_spill] sm:$0xff] %v9040_v20  ;;  %v9043_v8 = vadd.f32 %v9028_v45, %v895_v47  ;;  %v7750_v33 = vpop.eup %7749  ;;  %7765 = vtanh.f32 %v9000_v43 }
 0x13a   :  { %v7752_v6 = vpop.eup %7751  ;;  %v1646_v5 = vmul.f32 %v7750_v33, %v8919_v59  ;;  %7767 = vtanh.f32 %v1398_v27 }
 0x13b   :  { %1801 = vadd.xlane.f32.xlu0 %v1651_v25  ;;  %v7754_v13 = vpop.eup %7753  ;;  %7769 = vtanh.f32 %v9017_v37 }
 0x13c   :  { %1783 = vadd.xlane.f32.xlu1 %v1642_v16  ;;  %v1655_v16 = vmul.f32 %v7748_v3, %v8919_v59  ;;  %v9053_v47 = vpop.permute.xlu0 %2395  ;;  %v1653_v3 = vmul.f32 %v7752_v6, %v8919_v59  ;;  %v1652_v33 = vmul.f32 %v7754_v13, %v8919_v59 }
 0x13d   :  { %v7165_v25 = vpop.f32.mrb[36].mxu1  ;;  %13002 = vst [vmem:[#allocation87_spill] sm:$0xff] %v9053_v47 }
 0x13e   :  { %v1404_v62 = vadd.f32 %v7165_v25, %v9028_v45  ;;  %v908_v39 = vpop.f32.mrb[37].mxu1  ;;  %v7756_v25 = vpop.eup %7755 }
 0x13f   :  { %1797 = vadd.xlane.f32.xlu0 %v1649_v7  ;;  %v1402_v2 = vadd.f32 %v9028_v45, %v908_v39  ;;  %v7166_v20 = vpop.f32.mrb[38].mxu1  ;;  %v9057_v7 = vpop.permute.xlu1 %2383  ;;  %v1659_v43 = vmul.f32 %v7756_v25, %v8919_v59 }
 0x140   :  { %1795 = vadd.xlane.f32.xlu1 %v1648_v55  ;;  %13003 = vst [vmem:[#allocation88_spill] sm:$0xff] %v9057_v7  ;;  %v9060_v1 = vadd.f32 %v7166_v20, %v9028_v45  ;;  %v911_v21 = vpop.f32.mrb[39].mxu1  ;;  %v7758_v39 = vpop.eup %7757  ;;  %7771 = vtanh.f32 %v1404_v62 }
 0x141   :  { %v9063_v55 = vadd.f32 %v9028_v45, %v911_v21  ;;  %v9068_v47 = vpop.permute.xlu0 %2403  ;;  %v7760_v6 = vpop.eup %7759  ;;  %7773 = vtanh.f32 %v9020_v12 }
 0x142   :  { %13004 = vst [vmem:[#allocation89_spill] sm:$0xff] %v9068_v47  ;;  %v7762_v7 = vpop.eup %7761  ;;  %v1657_v25 = vmul.f32 %v7760_v6, %v8919_v59  ;;  %7775 = vtanh.f32 %v1402_v2 }
 0x143   :  { %1809 = vadd.xlane.f32.xlu0 %v1655_v16  ;;  %v9070_v16 = vpop.permute.xlu1 %2391  ;;  %7777 = vtanh.f32 %v9038_v53 }
 0x144   :  { %1791 = vadd.xlane.f32.xlu1 %v1646_v5  ;;  %13005 = vst [vmem:[#allocation90_spill] sm:$0xff] %v9070_v16 }
 0x145   :  { %v7169_v20 = vpop.f32.mrb[40].mxu1 }
 0x146   :  { %v1408_v10 = vadd.f32 %v7169_v20, %v9028_v45  ;;  %v924_v5 = vpop.f32.mrb[41].mxu1  ;;  %v7764_v20 = vpop.eup %7763 }
 0x147   :  { %1805 = vadd.xlane.f32.xlu0 %v1653_v3  ;;  %v1406_v21 = vadd.f32 %v9028_v45, %v924_v5  ;;  %v7170_v13 = vpop.f32.mrb[42].mxu1  ;;  %v1650_v3 = vmul.f32 %v7758_v39, %v8919_v59  ;;  %v9085_v5 = vpop.permute.xlu0 %2411  ;;  %v1656_v39 = vmul.f32 %v7762_v7, %v8919_v59  ;;  %v1663_v12 = vmul.f32 %v7764_v20, %v8919_v59 }
 0x148   :  { %1803 = vadd.xlane.f32.xlu1 %v1652_v33  ;;  %v9078_v27 = vadd.f32 %v7170_v13, %v9028_v45  ;;  %v927_v33 = vpop.f32.mrb[43].mxu1  ;;  %13006 = vst [vmem:[#allocation91_spill] sm:$0xff] %v9085_v5  ;;  %v7766_v47 = vpop.eup %7765  ;;  %7779 = vtanh.f32 %v1408_v10 }
 0x149   :  { %v9081_v37 = vadd.f32 %v9028_v45, %v927_v33  ;;  %v9088_v16 = vpop.permute.xlu1 %2399  ;;  %v7768_v6 = vpop.eup %7767  ;;  %v1654_v7 = vmul.f32 %v7766_v47, %v8919_v59  ;;  %7781 = vtanh.f32 %v9043_v8 }
 0x14a   :  { %13007 = vst [vmem:[#allocation92_spill] sm:$0xff] %v9088_v16  ;;  %v7770_v5 = vpop.eup %7769  ;;  %v1661_v47 = vmul.f32 %v7768_v6, %v8919_v59  ;;  %7783 = vtanh.f32 %v1406_v21 }
 0x14b   :  { %1817 = vadd.xlane.f32.xlu0 %v1659_v43  ;;  %v9100_v53 = vpop.permute.xlu0 %2422  ;;  %7785 = vtanh.f32 %v9060_v1 }
 0x14c   :  { %1799 = vadd.xlane.f32.xlu1 %v1650_v3  ;;  %13008 = vst [vmem:[#allocation93_spill] sm:$0xff] %v9100_v53 }
 0x14d   :  { %v7173_v43 = vpop.f32.mrb[44].mxu1 }
 0x14e   :  { %v1412_v62 = vadd.f32 %v7173_v43, %v9028_v45  ;;  %v940_v13 = vpop.f32.mrb[45].mxu1  ;;  %v9105_v43 = vpop.permute.xlu1 %2407 }
 0x14f   :  { %1813 = vadd.xlane.f32.xlu0 %v1657_v25  ;;  %v1410_v3 = vadd.f32 %v9028_v45, %v940_v13  ;;  %v7174_v33 = vpop.f32.mrb[46].mxu1  ;;  %v1324_v25 = vcombine.high %v8933_v31, %v8933_v31  ;;  %13009 = vst [vmem:[#allocation94_spill] sm:$0xff] %v9105_v43  ;;  %v7772_v13 = vpop.eup %7771  ;;  %v1660_v31 = vmul.f32 %v7770_v5, %v8919_v59 }
 0x150   :  { %1811 = vadd.xlane.f32.xlu1 %v1656_v39  ;;  %v9098_v2 = vadd.f32 %v7174_v33, %v9028_v45  ;;  %v943_v39 = vpop.f32.mrb[47].mxu1  ;;  %v7774_v33 = vpop.eup %7773  ;;  %v1667_v8 = vmul.f32 %v7772_v13, %v8919_v59  ;;  %7787 = vtanh.f32 %v1412_v62 }
 0x151   :  { %v9103_v20 = vadd.f32 %v9028_v45, %v943_v39  ;;  %v9111_v16 = vrot.slane %v1324_v25, %v8426_v9  ;;  %v9116_v6 = vpop.permute.xlu0 %2430  ;;  %v1658_v25 = vmul.f32 %v7774_v33, %v8919_v59  ;;  %7789 = vtanh.f32 %v9063_v55 }
 0x152   :  { %13010 = vst [vmem:[#allocation95_spill] sm:$0xff] %v9116_v6  ;;  %7791 = vtanh.f32 %v1410_v3 }
 0x153   :  { %1825 = vadd.xlane.f32.xlu0 %v1663_v12  ;;  %7793 = vtanh.f32 %v9078_v27 }
 0x154   :  { %1807 = vadd.xlane.f32.xlu1 %v1654_v7  ;;  %v7776_v7 = vpop.eup %7775 }
 0x155   :  { %v7177_v10 = vpop.f32.mrb[48].mxu1  ;;  %v7778_v53 = vpop.eup %7777  ;;  %v1665_v13 = vmul.f32 %v7776_v7, %v8919_v59 }
 0x156   :  { %v1416_v45 = vadd.f32 %v7177_v10, %v9111_v16  ;;  %v956_v12 = vpop.f32.mrb[49].mxu1  ;;  %v7780_v10 = vpop.eup %7779  ;;  %v1664_v33 = vmul.f32 %v7778_v53, %v8919_v59 }
 0x157   :  { %1821 = vadd.xlane.f32.xlu0 %v1661_v47  ;;  %v1414_v5 = vadd.f32 %v9111_v16, %v956_v12  ;;  %v7178_v39 = vpop.f32.mrb[50].mxu1  ;;  %v9120_v47 = vpop.permute.xlu1 %2415  ;;  %v1671_v55 = vmul.f32 %v7780_v10, %v8919_v59 }
 0x158   :  { %1819 = vadd.xlane.f32.xlu1 %v1660_v31  ;;  %13011 = vst [vmem:[#allocation96_spill] sm:$0xff] %v9120_v47  ;;  %v9123_v21 = vadd.f32 %v7178_v39, %v9111_v16  ;;  %v959_v1 = vpop.f32.mrb[51].mxu1  ;;  %v7782_v12 = vpop.eup %7781  ;;  %7795 = vtanh.f32 %v1416_v45 }
 0x159   :  { %v9126_v31 = vadd.f32 %v9111_v16, %v959_v1  ;;  %v9131_v6 = vpop.permute.xlu0 %2438  ;;  %v7784_v7 = vpop.eup %7783  ;;  %7797 = vtanh.f32 %v9081_v37 }
 0x15a   :  { %13012 = vst [vmem:[#allocation97_spill] sm:$0xff] %v9131_v6  ;;  %v7786_v47 = vpop.eup %7785  ;;  %v1669_v10 = vmul.f32 %v7784_v7, %v8919_v59  ;;  %7799 = vtanh.f32 %v1414_v5 }
 0x15b   :  { %1833 = vadd.xlane.f32.xlu0 %v1667_v8  ;;  %v9133_v8 = vpop.permute.xlu1 %2426  ;;  %7801 = vtanh.f32 %v9098_v2 }
 0x15c   :  { %1815 = vadd.xlane.f32.xlu1 %v1658_v25  ;;  %13013 = vst [vmem:[#allocation98_spill] sm:$0xff] %v9133_v8 }
 0x15d   :  { %v7181_v39 = vpop.f32.mrb[52].mxu1 }
 0x15e   :  { %v1420_v62 = vadd.f32 %v7181_v39, %v9111_v16  ;;  %v972_v25 = vpop.f32.mrb[53].mxu1  ;;  %v7788_v39 = vpop.eup %7787 }
 0x15f   :  { %1829 = vadd.xlane.f32.xlu0 %v1665_v13  ;;  %v1418_v1 = vadd.f32 %v9111_v16, %v972_v25  ;;  %v7182_v53 = vpop.f32.mrb[54].mxu1  ;;  %v1662_v13 = vmul.f32 %v7782_v12, %v8919_v59  ;;  %v9148_v25 = vpop.permute.xlu0 %2446  ;;  %v1668_v12 = vmul.f32 %v7786_v47, %v8919_v59  ;;  %v1675_v37 = vmul.f32 %v7788_v39, %v8919_v59 }
 0x160   :  { %1827 = vadd.xlane.f32.xlu1 %v1664_v33  ;;  %v9141_v3 = vadd.f32 %v7182_v53, %v9111_v16  ;;  %v975_v33 = vpop.f32.mrb[55].mxu1  ;;  %13014 = vst [vmem:[#allocation99_spill] sm:$0xff] %v9148_v25  ;;  %v7790_v6 = vpop.eup %7789  ;;  %7803 = vtanh.f32 %v1420_v62 }
 0x161   :  { %v9144_v27 = vadd.f32 %v9111_v16, %v975_v33  ;;  %v9151_v8 = vpop.permute.xlu1 %2434  ;;  %v7792_v7 = vpop.eup %7791  ;;  %v1666_v47 = vmul.f32 %v7790_v6, %v8919_v59  ;;  %7805 = vtanh.f32 %v9103_v20 }
 0x162   :  { %13015 = vst [vmem:[#allocation100_spill] sm:$0xff] %v9151_v8  ;;  %v7794_v25 = vpop.eup %7793  ;;  %7807 = vtanh.f32 %v1418_v1 }
 0x163   :  { %1841 = vadd.xlane.f32.xlu0 %v1671_v55  ;;  %v7796_v6 = vpop.eup %7795  ;;  %7809 = vtanh.f32 %v9123_v21 }
 0x164   :  { %1823 = vadd.xlane.f32.xlu1 %v1662_v13 }
 0x165   :  { %v7185_v55 = vpop.f32.mrb[56].mxu1  ;;  %v9166_v39 = vpop.permute.xlu1 %2442 }
 0x166   :  { %v1424_v45 = vadd.f32 %v7185_v55, %v9111_v16  ;;  %v988_v53 = vpop.f32.mrb[57].mxu1  ;;  %13017 = vst [vmem:[#allocation102_spill] sm:$0xff] %v9166_v39  ;;  %v1672_v55 = vmul.f32 %v7794_v25, %v8919_v59 }
 0x167   :  { %1837 = vadd.xlane.f32.xlu0 %v1669_v10  ;;  %v1422_v13 = vadd.f32 %v9111_v16, %v988_v53  ;;  %v7186_v33 = vpop.f32.mrb[58].mxu1  ;;  %v9161_v10 = vpop.permute.xlu0 %2454 }
 0x168   :  { %1835 = vadd.xlane.f32.xlu1 %v1668_v12  ;;  %v9159_v8 = vadd.f32 %v7186_v33, %v9111_v16  ;;  %v991_v5 = vpop.f32.mrb[59].mxu1  ;;  %13016 = vst [vmem:[#allocation101_spill] sm:$0xff] %v9161_v10  ;;  %v1673_v12 = vmul.f32 %v7792_v7, %v8919_v59  ;;  %v7798_v53 = vpop.eup %7797  ;;  %7811 = vtanh.f32 %v1424_v45 }
 0x169   :  { %v9164_v2 = vadd.f32 %v9111_v16, %v991_v5  ;;  %v7800_v5 = vpop.eup %7799  ;;  %v1670_v25 = vmul.f32 %v7798_v53, %v8919_v59  ;;  %7813 = vtanh.f32 %v9126_v31 }
 0x16a   :  { %v7802_v39 = vpop.eup %7801  ;;  %7815 = vtanh.f32 %v1422_v13 }
 0x16b   :  { %1849 = vadd.xlane.f32.xlu0 %v1675_v37  ;;  %v9174_v10 = vpop.permute.xlu0 %2462  ;;  %v1676_v53 = vmul.f32 %v7802_v39, %v8919_v59  ;;  %7817 = vtanh.f32 %v9141_v3 }
 0x16c   :  { %1831 = vadd.xlane.f32.xlu1 %v1666_v47  ;;  %v1679_v47 = vmul.f32 %v7796_v6, %v8919_v59  ;;  %13018 = vst [vmem:[#allocation103_spill] sm:$0xff] %v9174_v10  ;;  %v1677_v6 = vmul.f32 %v7800_v5, %v8919_v59  ;;  %v9191_v10 = vrot.slane %v8882_v52, %v8426_v9 }
 0x16d   :  { %v7189_v37 = vpop.f32.mrb[60].mxu1 }
 0x16e   :  { %v1428_v62 = vadd.f32 %v7189_v37, %v9111_v16  ;;  %v1004_v33 = vpop.f32.mrb[61].mxu1  ;;  %v7804_v37 = vpop.eup %7803 }
 0x16f   :  { %1845 = vadd.xlane.f32.xlu0 %v1673_v12  ;;  %v1426_v20 = vadd.f32 %v9111_v16, %v1004_v33  ;;  %v7190_v7 = vpop.f32.mrb[62].mxu1  ;;  %v9178_v12 = vpop.permute.xlu1 %2450  ;;  %v1683_v39 = vmul.f32 %v7804_v37, %v8919_v59 }
 0x170   :  { %1843 = vadd.xlane.f32.xlu1 %v1672_v55  ;;  %13019 = vst [vmem:[#allocation104_spill] sm:$0xff] %v9178_v12  ;;  %v9181_v1 = vadd.f32 %v7190_v7, %v9111_v16  ;;  %v1007_v21 = vpop.f32.mrb[63].mxu1  ;;  %v7806_v33 = vpop.eup %7805  ;;  %7819 = vtanh.f32 %v1428_v62 }
 0x171   :  { %v9184_v55 = vadd.f32 %v9111_v16, %v1007_v21  ;;  %v9193_v7 = vpop.permute.xlu0 %2470  ;;  %v7808_v5 = vpop.eup %7807  ;;  %7821 = vtanh.f32 %v9144_v27 }
 0x172   :  { %13020 = vst [vmem:[#allocation105_spill] sm:$0xff] %v9193_v7  ;;  %v7810_v12 = vpop.eup %7809  ;;  %v1681_v37 = vmul.f32 %v7808_v5, %v8919_v59  ;;  %7823 = vtanh.f32 %v1426_v20 }
 0x173   :  { %1857 = vadd.xlane.f32.xlu0 %v1679_v47  ;;  %v9195_v16 = vpop.permute.xlu1 %2458  ;;  %7825 = vtanh.f32 %v9159_v8 }
 0x174   :  { %1839 = vadd.xlane.f32.xlu1 %v1670_v25  ;;  %13021 = vst [vmem:[#allocation106_spill] sm:$0xff] %v9195_v16 }
 0x175   :  { %v7193_v45 = vpop.f32.mrb[64].mxu1 }
 0x176   :  { %v1432_v31 = vadd.f32 %v7193_v45, %v9191_v10  ;;  %v1020_v47 = vpop.f32.mrb[65].mxu1  ;;  %v7812_v45 = vpop.eup %7811 }
 0x177   :  { %1853 = vadd.xlane.f32.xlu0 %v1677_v6  ;;  %v1430_v25 = vadd.f32 %v9191_v10, %v1020_v47  ;;  %v7194_v21 = vpop.f32.mrb[66].mxu1  ;;  %v1674_v6 = vmul.f32 %v7806_v33, %v8919_v59  ;;  %v9210_v47 = vpop.permute.xlu0 %2478  ;;  %v1680_v33 = vmul.f32 %v7810_v12, %v8919_v59  ;;  %v1687_v27 = vmul.f32 %v7812_v45, %v8919_v59 }
 0x178   :  { %1851 = vadd.xlane.f32.xlu1 %v1676_v53  ;;  %v9203_v13 = vadd.f32 %v7194_v21, %v9191_v10  ;;  %v1023_v53 = vpop.f32.mrb[67].mxu1  ;;  %13022 = vst [vmem:[#allocation107_spill] sm:$0xff] %v9210_v47  ;;  %v7814_v7 = vpop.eup %7813  ;;  %7827 = vtanh.f32 %v1432_v31 }
 0x179   :  { %v9206_v3 = vadd.f32 %v9191_v10, %v1023_v53  ;;  %v9213_v16 = vpop.permute.xlu1 %2466  ;;  %v7816_v5 = vpop.eup %7815  ;;  %v1678_v12 = vmul.f32 %v7814_v7, %v8919_v59  ;;  %7829 = vtanh.f32 %v9164_v2 }
 0x17a   :  { %13023 = vst [vmem:[#allocation108_spill] sm:$0xff] %v9213_v16  ;;  %v7818_v47 = vpop.eup %7817  ;;  %7831 = vtanh.f32 %v1430_v25 }
 0x17b   :  { %1865 = vadd.xlane.f32.xlu0 %v1683_v39  ;;  %v7820_v7 = vpop.eup %7819  ;;  %7833 = vtanh.f32 %v9181_v1 }
 0x17c   :  { %1847 = vadd.xlane.f32.xlu1 %v1674_v6 }
 0x17d   :  { %v7197_v39 = vpop.f32.mrb[68].mxu1  ;;  %v9228_v45 = vpop.permute.xlu1 %2474 }
 0x17e   :  { %v1436_v62 = vadd.f32 %v7197_v39, %v9191_v10  ;;  %v1036_v21 = vpop.f32.mrb[69].mxu1  ;;  %13025 = vst [vmem:[#allocation110_spill] sm:$0xff] %v9228_v45  ;;  %v1684_v39 = vmul.f32 %v7818_v47, %v8919_v59 }
 0x17f   :  { %1861 = vadd.xlane.f32.xlu0 %v1681_v37  ;;  %v1434_v6 = vadd.f32 %v9191_v10, %v1036_v21  ;;  %v7198_v53 = vpop.f32.mrb[70].mxu1  ;;  %v9223_v37 = vpop.permute.xlu0 %2489 }
 0x180   :  { %1859 = vadd.xlane.f32.xlu1 %v1680_v33  ;;  %v9221_v16 = vadd.f32 %v7198_v53, %v9191_v10  ;;  %v1039_v20 = vpop.f32.mrb[71].mxu1  ;;  %13024 = vst [vmem:[#allocation109_spill] sm:$0xff] %v9223_v37  ;;  %v1685_v33 = vmul.f32 %v7816_v5, %v8919_v59  ;;  %v7822_v21 = vpop.eup %7821  ;;  %7835 = vtanh.f32 %v1436_v62 }
 0x181   :  { %v9226_v8 = vadd.f32 %v9191_v10, %v1039_v20  ;;  %v7824_v20 = vpop.eup %7823  ;;  %v1682_v47 = vmul.f32 %v7822_v21, %v8919_v59  ;;  %7837 = vtanh.f32 %v9184_v55 }
 0x182   :  { %v7826_v45 = vpop.eup %7825  ;;  %7839 = vtanh.f32 %v1434_v6 }
 0x183   :  { %1873 = vadd.xlane.f32.xlu0 %v1687_v27  ;;  %v9236_v37 = vpop.permute.xlu0 %2497  ;;  %v1688_v21 = vmul.f32 %v7826_v45, %v8919_v59  ;;  %7841 = vtanh.f32 %v9203_v13 }
 0x184   :  { %1855 = vadd.xlane.f32.xlu1 %v1678_v12  ;;  %v1691_v12 = vmul.f32 %v7820_v7, %v8919_v59  ;;  %13026 = vst [vmem:[#allocation111_spill] sm:$0xff] %v9236_v37  ;;  %v1689_v7 = vmul.f32 %v7824_v20, %v8919_v59 }
 0x185   :  { %v7201_v27 = vpop.f32.mrb[72].mxu1 }
 0x186   :  { %v1440_v31 = vadd.f32 %v7201_v27, %v9191_v10  ;;  %v1052_v53 = vpop.f32.mrb[73].mxu1  ;;  %v7828_v27 = vpop.eup %7827 }
 0x187   :  { %1869 = vadd.xlane.f32.xlu0 %v1685_v33  ;;  %v1438_v2 = vadd.f32 %v9191_v10, %v1052_v53  ;;  %v7202_v5 = vpop.f32.mrb[74].mxu1  ;;  %v9240_v33 = vpop.permute.xlu1 %2482  ;;  %v1695_v55 = vmul.f32 %v7828_v27, %v8919_v59 }
 0x188   :  { %1867 = vadd.xlane.f32.xlu1 %v1684_v39  ;;  %13027 = vst [vmem:[#allocation112_spill] sm:$0xff] %v9240_v33  ;;  %v9243_v25 = vadd.f32 %v7202_v5, %v9191_v10  ;;  %v1055_v1 = vpop.f32.mrb[75].mxu1  ;;  %v7830_v53 = vpop.eup %7829  ;;  %7843 = vtanh.f32 %v1440_v31 }
 0x189   :  { %v9246_v39 = vadd.f32 %v9191_v10, %v1055_v1  ;;  %v9251_v37 = vpop.permute.xlu0 %2505  ;;  %v7832_v20 = vpop.eup %7831  ;;  %7845 = vtanh.f32 %v9206_v3 }
 0x18a   :  { %13028 = vst [vmem:[#allocation113_spill] sm:$0xff] %v9251_v37  ;;  %v7834_v33 = vpop.eup %7833  ;;  %v1693_v27 = vmul.f32 %v7832_v20, %v8919_v59  ;;  %7847 = vtanh.f32 %v1438_v2 }
 0x18b   :  { %1881 = vadd.xlane.f32.xlu0 %v1691_v12  ;;  %v9253_v12 = vpop.permute.xlu1 %2493  ;;  %7849 = vtanh.f32 %v9221_v16 }
 0x18c   :  { %1863 = vadd.xlane.f32.xlu1 %v1682_v47  ;;  %13029 = vst [vmem:[#allocation114_spill] sm:$0xff] %v9253_v12 }
 0x18d   :  { %v7205_v5 = vpop.f32.mrb[76].mxu1 }
 0x18e   :  { %v1444_v62 = vadd.f32 %v7205_v5, %v9191_v10  ;;  %v1068_v47 = vpop.f32.mrb[77].mxu1  ;;  %v7836_v5 = vpop.eup %7835 }
 0x18f   :  { %1877 = vadd.xlane.f32.xlu0 %v1689_v7  ;;  %v1442_v1 = vadd.f32 %v9191_v10, %v1068_v47  ;;  %v7206_v45 = vpop.f32.mrb[78].mxu1  ;;  %v1686_v7 = vmul.f32 %v7830_v53, %v8919_v59  ;;  %v9268_v47 = vpop.permute.xlu0 %2513  ;;  %v1692_v53 = vmul.f32 %v7834_v33, %v8919_v59  ;;  %v1699_v20 = vmul.f32 %v7836_v5, %v8919_v59 }
 0x190   :  { %1875 = vadd.xlane.f32.xlu1 %v1688_v21  ;;  %v9261_v6 = vadd.f32 %v7206_v45, %v9191_v10  ;;  %v1071_v21 = vpop.f32.mrb[79].mxu1  ;;  %13030 = vst [vmem:[#allocation115_spill] sm:$0xff] %v9268_v47  ;;  %v7838_v37 = vpop.eup %7837  ;;  %v9273_v45 = vrot.slane %v8892_v61, %v8426_v9  ;;  %7851 = vtanh.f32 %v1444_v62 }
 0x191   :  { %v9264_v13 = vadd.f32 %v9191_v10, %v1071_v21  ;;  %v1690_v47 = vmul.f32 %v7838_v37, %v8919_v59  ;;  %7853 = vtanh.f32 %v9226_v8 }
 0x192   :  { %7855 = vtanh.f32 %v1442_v1 }
 0x193   :  { %1889 = vadd.xlane.f32.xlu0 %v1695_v55  ;;  %v9275_v55 = vpop.permute.xlu1 %2501  ;;  %7857 = vtanh.f32 %v9243_v25 }
 0x194   :  { %1871 = vadd.xlane.f32.xlu1 %v1686_v7  ;;  %13031 = vst [vmem:[#allocation116_spill] sm:$0xff] %v9275_v55  ;;  %v7840_v7 = vpop.eup %7839 }
 0x195   :  { %v7209_v10 = vpop.f32.mrb[80].mxu1  ;;  %v7842_v12 = vpop.eup %7841 }
 0x196   :  { %v1448_v3 = vadd.f32 %v7209_v10, %v9273_v45  ;;  %v1084_v31 = vpop.f32.mrb[81].mxu1  ;;  %v7844_v37 = vpop.eup %7843  ;;  %v1696_v10 = vmul.f32 %v7842_v12, %v8919_v59 }
 0x197   :  { %1885 = vadd.xlane.f32.xlu0 %v1693_v27  ;;  %v1446_v33 = vadd.f32 %v9273_v45, %v1084_v31  ;;  %v7210_v21 = vpop.f32.mrb[82].mxu1  ;;  %v9285_v27 = vpop.permute.xlu0 %2521 }
 0x198   :  { %1883 = vadd.xlane.f32.xlu1 %v1692_v53  ;;  %v9283_v55 = vadd.f32 %v7210_v21, %v9273_v45  ;;  %v1087_v2 = vpop.f32.mrb[83].mxu1  ;;  %13032 = vst [vmem:[#allocation117_spill] sm:$0xff] %v9285_v27  ;;  %v9290_v5 = vpop.permute.xlu1 %2509  ;;  %v1697_v53 = vmul.f32 %v7840_v7, %v8919_v59  ;;  %7859 = vtanh.f32 %v1448_v3 }
 0x199   :  { %v9288_v16 = vadd.f32 %v9273_v45, %v1087_v2  ;;  %13033 = vst [vmem:[#allocation118_spill] sm:$0xff] %v9290_v5  ;;  %v7846_v31 = vpop.eup %7845  ;;  %v1703_v2 = vmul.f32 %v7844_v37, %v8919_v59  ;;  %7861 = vtanh.f32 %v9246_v39 }
 0x19a   :  { %v7848_v8 = vpop.eup %7847  ;;  %v1694_v12 = vmul.f32 %v7846_v31, %v8919_v59  ;;  %v9316_v59 = vld [vmem:[%s12677_s7] ss:$0 sm:$0xff]  ;;  %7863 = vtanh.f32 %v1446_v33 }
 0x19b   :  { %1897 = vadd.xlane.f32.xlu0 %v1699_v20  ;;  %v7850_v5 = vpop.eup %7849  ;;  %v1701_v37 = vmul.f32 %v9316_v59, %v7848_v8  ;;  %7865 = vtanh.f32 %v9261_v6 }
 0x19c   :  { %1879 = vadd.xlane.f32.xlu1 %v1690_v47  ;;  %v1700_v31 = vmul.f32 %v9316_v59, %v7850_v5 }
 0x19d   :  { %v7213_v20 = vpop.f32.mrb[84].mxu1 }
 0x19e   :  { %v1452_v62 = vadd.f32 %v7213_v20, %v9273_v45  ;;  %v1100_v47 = vpop.f32.mrb[85].mxu1 }
 0x19f   :  { %1893 = vadd.xlane.f32.xlu0 %v1697_v53  ;;  %v1450_v7 = vadd.f32 %v9273_v45, %v1100_v47  ;;  %v7214_v27 = vpop.f32.mrb[86].mxu1  ;;  %v9302_v53 = vpop.permute.xlu1 %2517 }
 0x1a0   :  { %v9295_v21 = vpop.xlane.xlu0 %1757  ;;  %1891 = vadd.xlane.f32.xlu1 %v1696_v10  ;;  %13034 = vst [vmem:[#allocation119_spill] sm:$0xff] %v9302_v53  ;;  %v9305_v1 = vadd.f32 %v7214_v27, %v9273_v45  ;;  %v1103_v10 = vpop.f32.mrb[87].mxu1  ;;  %7867 = vtanh.f32 %v1452_v62 }
 0x1a1   :  { %v9308_v25 = vadd.f32 %v9273_v45, %v1103_v10  ;;  %v7852_v27 = vpop.eup %7851  ;;  %7869 = vtanh.f32 %v9264_v13 }
 0x1a2   :  { %v7854_v47 = vpop.eup %7853  ;;  %v1707_v53 = vmul.f32 %v9316_v59, %v7852_v27  ;;  %7871 = vtanh.f32 %v1450_v7 }
 0x1a3   :  { %1905 = vadd.xlane.f32.xlu0 %v1703_v2  ;;  %v7856_v8 = vpop.eup %7855  ;;  %7873 = vtanh.f32 %v9283_v55 }
 0x1a4   :  { %v9310_v20 = vpop.xlane.xlu0 %1759  ;;  %1887 = vadd.xlane.f32.xlu1 %v1694_v12  ;;  %v9322_v12 = vpop.permute.xlu1 %2525 }
 0x1a5   :  { %v7217_v3 = vpop.f32.mrb[88].mxu1  ;;  %13035 = vst [vmem:[#allocation120_spill] sm:$0xff] %v9322_v12  ;;  %v7858_v33 = vpop.eup %7857 }
 0x1a6   :  { %v1456_v39 = vadd.f32 %v7217_v3, %v9273_v45  ;;  %v1116_v10 = vpop.f32.mrb[89].mxu1  ;;  %v1704_v12 = vmul.f32 %v9316_v59, %v7858_v33 }
 0x1a7   :  { %1901 = vadd.xlane.f32.xlu0 %v1701_v37  ;;  %v1454_v43 = vadd.f32 %v9273_v45, %v1116_v10  ;;  %v7218_v5 = vpop.f32.mrb[90].mxu1  ;;  %v1698_v37 = vmul.f32 %v9316_v59, %v7854_v47  ;;  %v1705_v10 = vmul.f32 %v9316_v59, %v7856_v8  ;;  %v7860_v47 = vpop.eup %7859 }
 0x1a8   :  { %v9320_v2 = vpop.xlane.xlu0 %1769  ;;  %1899 = vadd.xlane.f32.xlu1 %v1700_v31  ;;  %v9330_v48 = vadd.f32 %v7218_v5, %v9273_v45  ;;  %v1119_v31 = vpop.f32.mrb[91].mxu1  ;;  %v1711_v33 = vmul.f32 %v9316_v59, %v7860_v47  ;;  %7875 = vtanh.f32 %v1456_v39 }
 0x1a9   :  { %v9333_v6 = vadd.f32 %v9273_v45, %v1119_v31  ;;  %v7862_v5 = vpop.eup %7861  ;;  %7877 = vtanh.f32 %v9288_v16 }
 0x1aa   :  { %v7864_v31 = vpop.eup %7863  ;;  %v1702_v7 = vmul.f32 %v9316_v59, %v7862_v5  ;;  %7879 = vtanh.f32 %v1454_v43 }
 0x1ab   :  { %1913 = vadd.xlane.f32.xlu0 %v1707_v53  ;;  %v7866_v60 = vpop.eup %7865  ;;  %v1709_v5 = vmul.f32 %v9316_v59, %v7864_v31  ;;  %7881 = vtanh.f32 %v9305_v1 }
 0x1ac   :  { %v9335_v3 = vpop.xlane.xlu0 %1765  ;;  %1895 = vadd.xlane.f32.xlu1 %v1698_v37  ;;  %v7868_v11 = vpop.eup %7867 }
 0x1ad   :  { %v9338_v27 = vpop.xlane.xlu1 %1761  ;;  %v7221_v62 = vpop.f32.mrb[92].mxu1  ;;  %v1715_v31 = vmul.f32 %v9316_v59, %v7868_v11 }
 0x1ae   :  { %v1460_v13 = vadd.f32 %v7221_v62, %v9273_v45  ;;  %v1132_v8 = vpop.f32.mrb[93].mxu1 }
 0x1af   :  { %1909 = vadd.xlane.f32.xlu0 %v1705_v10  ;;  %v1458_v10 = vadd.f32 %v9273_v45, %v1132_v8  ;;  %v7222_v40 = vpop.f32.mrb[94].mxu1 }
 0x1b0   :  { %v9343_v53 = vpop.xlane.xlu0 %1777  ;;  %1907 = vadd.xlane.f32.xlu1 %v1704_v12  ;;  %v1323_v12 = vcombine.high %v8882_v52, %v8882_v52  ;;  %v9356_v18 = vadd.f32 %v7222_v40, %v9273_v45  ;;  %v1135_v55 = vpop.f32.mrb[95].mxu1  ;;  %v1708_v52 = vmul.f32 %v9316_v59, %v7866_v60  ;;  %7883 = vtanh.f32 %v1460_v13 }
 0x1b1   :  { %v9348_v37 = vpop.xlane.xlu1 %1763  ;;  %v9359_v62 = vadd.f32 %v9273_v45, %v1135_v55  ;;  %v7870_v40 = vpop.eup %7869  ;;  %7885 = vtanh.f32 %v9308_v25 }
 0x1b2   :  { %v9369_v57 = vrot.slane %v1323_v12, %v8426_v9  ;;  %v7872_v60 = vpop.eup %7871  ;;  %7887 = vtanh.f32 %v1458_v10 }
 0x1b3   :  { %1921 = vadd.xlane.f32.xlu0 %v1711_v33  ;;  %v7874_v43 = vpop.eup %7873  ;;  %7889 = vtanh.f32 %v9330_v48 }
 0x1b4   :  { %v9361_v47 = vpop.xlane.xlu0 %1773  ;;  %1903 = vadd.xlane.f32.xlu1 %v1702_v7  ;;  %v1712_v54 = vmul.f32 %v9316_v59, %v7874_v43 }
 0x1b5   :  { %v9364_v8 = vpop.xlane.xlu1 %1771  ;;  %v7225_v45 = vpop.f32.mrb[96].mxu1 }
 0x1b6   :  { %v1464_v16 = vadd.f32 %v7225_v45, %v9369_v57  ;;  %v1148_v33 = vpop.f32.mrb[97].mxu1 }
 0x1b7   :  { %1917 = vadd.xlane.f32.xlu0 %v1709_v5  ;;  %v1462_v55 = vadd.f32 %v9369_v57, %v1148_v33  ;;  %v7226_v12 = vpop.f32.mrb[98].mxu1  ;;  %v1706_v5 = vmul.f32 %v9316_v59, %v7870_v40  ;;  %v1713_v33 = vmul.f32 %v9316_v59, %v7872_v60  ;;  %v7876_v40 = vpop.eup %7875 }
 0x1b8   :  { %v9371_v39 = vpop.xlane.xlu0 %1785  ;;  %1915 = vadd.xlane.f32.xlu1 %v1708_v52  ;;  %v9381_v4 = vadd.f32 %v7226_v12, %v9369_v57  ;;  %v1151_v52 = vpop.f32.mrb[99].mxu1  ;;  %v1719_v63 = vmul.f32 %v9316_v59, %v7876_v40  ;;  %7891 = vtanh.f32 %v1464_v16 }
 0x1b9   :  { %v9375_v7 = vpop.xlane.xlu1 %1767  ;;  %v9384_v1 = vadd.f32 %v9369_v57, %v1151_v52  ;;  %v7878_v12 = vpop.eup %7877  ;;  %7893 = vtanh.f32 %v9333_v6 }
 0x1ba   :  { %v7880_v60 = vpop.eup %7879  ;;  %7895 = vtanh.f32 %v1462_v55 }
 0x1bb   :  { %1929 = vadd.xlane.f32.xlu0 %v1715_v31  ;;  %v7882_v10 = vpop.eup %7881  ;;  %7897 = vtanh.f32 %v9356_v18 }
 0x1bc   :  { %v9386_v45 = vpop.xlane.xlu0 %1781  ;;  %1911 = vadd.xlane.f32.xlu1 %v1706_v5  ;;  %v1716_v46 = vmul.f32 %v9316_v59, %v7882_v10 }
 0x1bd   :  { %v9389_v11 = vpop.xlane.xlu1 %1779  ;;  %v7229_v31 = vpop.f32.mrb[100].mxu1 }
 0x1be   :  { %v1468_v5 = vadd.f32 %v7229_v31, %v9369_v57  ;;  %v1164_v52 = vpop.f32.mrb[101].mxu1 }
 0x1bf   :  { %1925 = vadd.xlane.f32.xlu0 %v1713_v33  ;;  %v1466_v50 = vadd.f32 %v9369_v57, %v1164_v52  ;;  %v7230_v43 = vpop.f32.mrb[102].mxu1  ;;  %v1710_v33 = vmul.f32 %v9316_v59, %v7878_v12  ;;  %v1717_v52 = vmul.f32 %v9316_v59, %v7880_v60  ;;  %v7884_v12 = vpop.eup %7883 }
 0x1c0   :  { %v9393_v13 = vpop.xlane.xlu0 %1793  ;;  %1923 = vadd.xlane.f32.xlu1 %v1712_v54  ;;  %v9403_v58 = vadd.f32 %v7230_v43, %v9369_v57  ;;  %v1167_v54 = vpop.f32.mrb[103].mxu1  ;;  %v1723_v56 = vmul.f32 %v9316_v59, %v7884_v12  ;;  %7899 = vtanh.f32 %v1468_v5 }
 0x1c1   :  { %13036 = vst [vmem:[#allocation121_spill] sm:$0xff] %v9393_v13  ;;  %v9397_v25 = vpop.xlane.xlu1 %1775  ;;  %v9406_v48 = vadd.f32 %v9369_v57, %v1167_v54  ;;  %v7886_v43 = vpop.eup %7885  ;;  %7901 = vtanh.f32 %v9359_v62 }
 0x1c2   :  { %v7888_v60 = vpop.eup %7887  ;;  %7903 = vtanh.f32 %v1466_v50 }
 0x1c3   :  { %1937 = vadd.xlane.f32.xlu0 %v1719_v63  ;;  %v7890_v55 = vpop.eup %7889  ;;  %7905 = vtanh.f32 %v9381_v4 }
 0x1c4   :  { %v9408_v31 = vpop.xlane.xlu0 %1789  ;;  %1919 = vadd.xlane.f32.xlu1 %v1710_v33 }
 0x1c5   :  { %13037 = vst [vmem:[#allocation122_spill] sm:$0xff] %v9408_v31  ;;  %v9411_v40 = vpop.xlane.xlu1 %1787  ;;  %v7233_v63 = vpop.f32.mrb[104].mxu1 }
 0x1c6   :  { %v1472_v33 = vadd.f32 %v7233_v63, %v9369_v57  ;;  %v1180_v54 = vpop.f32.mrb[105].mxu1 }
 0x1c7   :  { %1933 = vadd.xlane.f32.xlu0 %v1717_v52  ;;  %v1470_v42 = vadd.f32 %v9369_v57, %v1180_v54  ;;  %v7234_v10 = vpop.f32.mrb[106].mxu1  ;;  %v1714_v52 = vmul.f32 %v9316_v59, %v7886_v43  ;;  %v1721_v54 = vmul.f32 %v9316_v59, %v7888_v60  ;;  %v7892_v43 = vpop.eup %7891 }
 0x1c8   :  { %v9415_v16 = vpop.xlane.xlu0 %1801  ;;  %1931 = vadd.xlane.f32.xlu1 %v1716_v46  ;;  %v9425_v13 = vadd.f32 %v7234_v10, %v9369_v57  ;;  %v1183_v46 = vpop.f32.mrb[107].mxu1  ;;  %7907 = vtanh.f32 %v1472_v33 }
 0x1c9   :  { %13038 = vst [vmem:[#allocation123_spill] sm:$0xff] %v9415_v16  ;;  %v9419_v6 = vpop.xlane.xlu1 %1783  ;;  %v9428_v18 = vadd.f32 %v9369_v57, %v1183_v46  ;;  %v1720_v16 = vmul.f32 %v9316_v59, %v7890_v55  ;;  %v7894_v10 = vpop.eup %7893  ;;  %7909 = vtanh.f32 %v9384_v1 }
 0x1ca   :  { %v7896_v60 = vpop.eup %7895  ;;  %7911 = vtanh.f32 %v1470_v42 }
 0x1cb   :  { %1945 = vadd.xlane.f32.xlu0 %v1723_v56  ;;  %v7898_v50 = vpop.eup %7897  ;;  %7913 = vtanh.f32 %v9403_v58 }
 0x1cc   :  { %v9430_v63 = vpop.xlane.xlu0 %1797  ;;  %1927 = vadd.xlane.f32.xlu1 %v1714_v52  ;;  %v7900_v38 = vpop.eup %7899 }
 0x1cd   :  { %13039 = vst [vmem:[#allocation124_spill] sm:$0xff] %v9430_v63  ;;  %v9433_v12 = vpop.xlane.xlu1 %1795  ;;  %v7237_v56 = vpop.f32.mrb[108].mxu1  ;;  %v1727_v63 = vmul.f32 %v9316_v59, %v7892_v43 }
 0x1ce   :  { %v1476_v52 = vadd.f32 %v7237_v56, %v9369_v57  ;;  %v1196_v46 = vpop.f32.mrb[109].mxu1 }
 0x1cf   :  { %1941 = vadd.xlane.f32.xlu0 %v1721_v54  ;;  %v1474_v51 = vadd.f32 %v9369_v57, %v1196_v46  ;;  %v7238_v55 = vpop.f32.mrb[110].mxu1  ;;  %v1718_v54 = vmul.f32 %v9316_v59, %v7894_v10  ;;  %v1725_v10 = vmul.f32 %v9316_v59, %v7896_v60  ;;  %v1731_v60 = vmul.f32 %v9316_v59, %v7900_v38 }
 0x1d0   :  { %v9437_v5 = vpop.xlane.xlu0 %1809  ;;  %1939 = vadd.xlane.f32.xlu1 %v1720_v16  ;;  %v9449_v16 = vadd.f32 %v7238_v55, %v9369_v57  ;;  %v1199_v4 = vpop.f32.mrb[111].mxu1  ;;  %7915 = vtanh.f32 %v1476_v52 }
 0x1d1   :  { %13040 = vst [vmem:[#allocation125_spill] sm:$0xff] %v9437_v5  ;;  %v9441_v62 = vpop.xlane.xlu1 %1791  ;;  %v1325_v5 = vcombine.high %v8892_v61, %v8892_v61  ;;  %v9452_v56 = vadd.f32 %v9369_v57, %v1199_v4  ;;  %v1724_v61 = vmul.f32 %v9316_v59, %v7898_v50  ;;  %v7902_v55 = vpop.eup %7901  ;;  %7917 = vtanh.f32 %v9406_v48 }
 0x1d2   :  { %v7904_v50 = vpop.eup %7903  ;;  %7919 = vtanh.f32 %v1474_v51 }
 0x1d3   :  { %1953 = vadd.xlane.f32.xlu0 %v1727_v63  ;;  %v9462_v31 = vrot.slane %v1325_v5, %v8426_v9  ;;  %v7906_v42 = vpop.eup %7905  ;;  %7921 = vtanh.f32 %v9425_v13 }
 0x1d4   :  { %v9454_v43 = vpop.xlane.xlu0 %1805  ;;  %1935 = vadd.xlane.f32.xlu1 %v1718_v54 }
 0x1d5   :  { %13041 = vst [vmem:[#allocation126_spill] sm:$0xff] %v9454_v43  ;;  %v9457_v46 = vpop.xlane.xlu1 %1803  ;;  %v7241_v57 = vpop.f32.mrb[112].mxu1 }
 0x1d6   :  { %v1480_v1 = vadd.f32 %v7241_v57, %v9462_v31  ;;  %v1212_v63 = vpop.f32.mrb[113].mxu1 }
 0x1d7   :  { %1949 = vadd.xlane.f32.xlu0 %v1725_v10  ;;  %v1478_v4 = vadd.f32 %v9462_v31, %v1212_v63  ;;  %v7242_v5 = vpop.f32.mrb[114].mxu1  ;;  %v1722_v10 = vmul.f32 %v9316_v59, %v7902_v55  ;;  %v1729_v63 = vmul.f32 %v9316_v59, %v7904_v50  ;;  %v7908_v55 = vpop.eup %7907 }
 0x1d8   :  { %v9464_v33 = vpop.xlane.xlu0 %1817  ;;  %1947 = vadd.xlane.f32.xlu1 %v1724_v61  ;;  %v9474_v9 = vadd.f32 %v7242_v5, %v9462_v31  ;;  %v1215_v61 = vpop.f32.mrb[115].mxu1  ;;  %7923 = vtanh.f32 %v1480_v1 }
 0x1d9   :  { %13042 = vst [vmem:[#allocation127_spill] sm:$0xff] %v9464_v33  ;;  %v9468_v54 = vpop.xlane.xlu1 %1799  ;;  %v9477_v58 = vadd.f32 %v9462_v31, %v1215_v61  ;;  %v1728_v33 = vmul.f32 %v9316_v59, %v7906_v42  ;;  %v7910_v5 = vpop.eup %7909  ;;  %7925 = vtanh.f32 %v9428_v18 }
 0x1da   :  { %v7912_v50 = vpop.eup %7911  ;;  %7927 = vtanh.f32 %v1478_v4 }
 0x1db   :  { %1961 = vadd.xlane.f32.xlu0 %v1731_v60  ;;  %v7914_v51 = vpop.eup %7913  ;;  %7929 = vtanh.f32 %v9449_v16 }
 0x1dc   :  { %v9479_v57 = vpop.xlane.xlu0 %1813  ;;  %1943 = vadd.xlane.f32.xlu1 %v1722_v10 }
 0x1dd   :  { %13043 = vst [vmem:[#allocation128_spill] sm:$0xff] %v9479_v57  ;;  %v9482_v38 = vpop.xlane.xlu1 %1811  ;;  %v7245_v60 = vpop.f32.mrb[116].mxu1  ;;  %v1735_v57 = vmul.f32 %v9316_v59, %v7908_v55 }
 0x1de   :  { %13044 = vst [vmem:[#allocation129_spill] sm:$0xff] %v9482_v38  ;;  %v1484_v10 = vadd.f32 %v7245_v60, %v9462_v31  ;;  %v1228_v61 = vpop.f32.mrb[117].mxu1 }
 0x1df   :  { %1957 = vadd.xlane.f32.xlu0 %v1729_v63  ;;  %v1482_v43 = vadd.f32 %v9462_v31, %v1228_v61  ;;  %v7246_v42 = vpop.f32.mrb[118].mxu1  ;;  %v1726_v63 = vmul.f32 %v9316_v59, %v7910_v5  ;;  %v1733_v61 = vmul.f32 %v9316_v59, %v7912_v50  ;;  %v7916_v5 = vpop.eup %7915 }
 0x1e0   :  { %v9486_v52 = vpop.xlane.xlu0 %1825  ;;  %1955 = vadd.xlane.f32.xlu1 %v1728_v33  ;;  %v9496_v38 = vadd.f32 %v7246_v42, %v9462_v31  ;;  %v1231_v33 = vpop.f32.mrb[119].mxu1  ;;  %7931 = vtanh.f32 %v1484_v10 }
 0x1e1   :  { %13045 = vst [vmem:[#allocation130_spill] sm:$0xff] %v9486_v52  ;;  %v9490_v48 = vpop.xlane.xlu1 %1807  ;;  %v9499_v13 = vadd.f32 %v9462_v31, %v1231_v33  ;;  %v1732_v52 = vmul.f32 %v9316_v59, %v7914_v51  ;;  %v7918_v42 = vpop.eup %7917  ;;  %7933 = vtanh.f32 %v9452_v56 }
 0x1e2   :  { %13046 = vst [vmem:[#allocation131_spill] sm:$0xff] %v9490_v48  ;;  %v7920_v50 = vpop.eup %7919  ;;  %7935 = vtanh.f32 %v1482_v43 }
 0x1e3   :  { %1969 = vadd.xlane.f32.xlu0 %v1735_v57  ;;  %v7922_v4 = vpop.eup %7921  ;;  %7937 = vtanh.f32 %v9474_v9 }
 0x1e4   :  { %v9501_v60 = vpop.xlane.xlu0 %1821  ;;  %1951 = vadd.xlane.f32.xlu1 %v1726_v63 }
 0x1e5   :  { %13047 = vst [vmem:[#allocation132_spill] sm:$0xff] %v9501_v60  ;;  %v9504_v55 = vpop.xlane.xlu1 %1819  ;;  %v7249_v57 = vpop.f32.mrb[120].mxu1  ;;  %v1739_v60 = vmul.f32 %v9316_v59, %v7916_v5 }
 0x1e6   :  { %13048 = vst [vmem:[#allocation133_spill] sm:$0xff] %v9504_v55  ;;  %v1488_v63 = vadd.f32 %v7249_v57, %v9462_v31  ;;  %v1244_v33 = vpop.f32.mrb[121].mxu1 }
 0x1e7   :  { %1965 = vadd.xlane.f32.xlu0 %v1733_v61  ;;  %v1486_v55 = vadd.f32 %v9462_v31, %v1244_v33  ;;  %v7250_v51 = vpop.f32.mrb[122].mxu1  ;;  %v1730_v61 = vmul.f32 %v9316_v59, %v7918_v42  ;;  %v1737_v33 = vmul.f32 %v9316_v59, %v7920_v50  ;;  %v7924_v42 = vpop.eup %7923 }
 0x1e8   :  { %v9508_v1 = vpop.xlane.xlu0 %1833  ;;  %1963 = vadd.xlane.f32.xlu1 %v1732_v52  ;;  %v9518_v48 = vadd.f32 %v7250_v51, %v9462_v31  ;;  %v1247_v52 = vpop.f32.mrb[123].mxu1  ;;  %7939 = vtanh.f32 %v1488_v63 }
 0x1e9   :  { %13049 = vst [vmem:[#allocation134_spill] sm:$0xff] %v9508_v1  ;;  %v9512_v18 = vpop.xlane.xlu1 %1815  ;;  %v9521_v16 = vadd.f32 %v9462_v31, %v1247_v52  ;;  %v1736_v1 = vmul.f32 %v9316_v59, %v7922_v4  ;;  %v7926_v51 = vpop.eup %7925  ;;  %7941 = vtanh.f32 %v9477_v58 }
 0x1ea   :  { %13050 = vst [vmem:[#allocation135_spill] sm:$0xff] %v9512_v18  ;;  %v7928_v50 = vpop.eup %7927  ;;  %7943 = vtanh.f32 %v1486_v55 }
 0x1eb   :  { %1977 = vadd.xlane.f32.xlu0 %v1739_v60  ;;  %v7930_v43 = vpop.eup %7929  ;;  %7945 = vtanh.f32 %v9496_v38 }
 0x1ec   :  { %v9523_v57 = vpop.xlane.xlu0 %1829  ;;  %1959 = vadd.xlane.f32.xlu1 %v1730_v61 }
 0x1ed   :  { %13051 = vst [vmem:[#allocation136_spill] sm:$0xff] %v9523_v57  ;;  %v9526_v5 = vpop.xlane.xlu1 %1827  ;;  %v7253_v60 = vpop.f32.mrb[124].mxu1  ;;  %v1743_v57 = vmul.f32 %v9316_v59, %v7924_v42 }
 0x1ee   :  { %13052 = vst [vmem:[#allocation137_spill] sm:$0xff] %v9526_v5  ;;  %v1492_v61 = vadd.f32 %v7253_v60, %v9462_v31  ;;  %v1260_v52 = vpop.f32.mrb[125].mxu1  ;;  %v1741_v60 = vmul.f32 %v9316_v59, %v7928_v50 }
 0x1ef   :  { %1973 = vadd.xlane.f32.xlu0 %v1737_v33  ;;  %v1490_v5 = vadd.f32 %v9462_v31, %v1260_v52  ;;  %v7254_v4 = vpop.f32.mrb[126].mxu1  ;;  %v1734_v33 = vmul.f32 %v9316_v59, %v7926_v51  ;;  %v7932_v52 = vpop.eup %7931  ;;  %v1740_v51 = vmul.f32 %v9316_v59, %v7930_v43 }
 0x1f0   :  { %v9530_v10 = vpop.xlane.xlu0 %1841  ;;  %1971 = vadd.xlane.f32.xlu1 %v1736_v1  ;;  %v1493_v18 = vadd.f32 %v7254_v4, %v9462_v31  ;;  %v1747_v63 = vmul.f32 %v9316_v59, %v7932_v52  ;;  %7947 = vtanh.f32 %v1492_v61 }
 0x1f1   :  { %13053 = vst [vmem:[#allocation138_spill] sm:$0xff] %v9530_v10  ;;  %v9534_v56 = vpop.xlane.xlu1 %1823  ;;  %v1263_v10 = vpop.f32.mrb[127].mxu1  ;;  %7949 = vtanh.f32 %v9499_v13 }
 0x1f2   :  { %13054 = vst [vmem:[#allocation139_spill] sm:$0xff] %v9534_v56  ;;  %v1491_v9 = vadd.f32 %v9462_v31, %v1263_v10  ;;  %v7934_v56 = vpop.eup %7933  ;;  %7951 = vtanh.f32 %v1490_v5 }
 0x1f3   :  { %1985 = vadd.xlane.f32.xlu0 %v1743_v57  ;;  %v7936_v58 = vpop.eup %7935  ;;  %v1738_v57 = vmul.f32 %v9316_v59, %v7934_v56  ;;  %7953 = vtanh.f32 %v9518_v48 }
 0x1f4   :  { %v9541_v1 = vpop.xlane.xlu0 %1837  ;;  %1967 = vadd.xlane.f32.xlu1 %v1734_v33  ;;  %v7938_v10 = vpop.eup %7937  ;;  %v1745_v33 = vmul.f32 %v9316_v59, %v7936_v58  ;;  %7955 = vtanh.f32 %v9521_v16 }
 0x1f5   :  { %v9544_v42 = vpop.xlane.xlu1 %1835  ;;  %v7940_v38 = vpop.eup %7939  ;;  %v1744_v43 = vmul.f32 %v9316_v59, %v7938_v10  ;;  %7957 = vtanh.f32 %v1493_v18 }
 0x1f6   :  { %v1751_v56 = vmul.f32 %v9316_v59, %v7940_v38  ;;  %7959 = vtanh.f32 %v1491_v9 }
 0x1f7   :  { %1981 = vadd.xlane.f32.xlu0 %v1741_v60  ;;  %v7942_v60 = vpop.eup %7941 }
 0x1f8   :  { %v9548_v4 = vpop.xlane.xlu0 %1849  ;;  %1979 = vadd.xlane.f32.xlu1 %v1740_v51  ;;  %v7944_v13 = vpop.eup %7943  ;;  %v1742_v51 = vmul.f32 %v9316_v59, %v7942_v60 }
 0x1f9   :  { %v9551_v31 = vpop.xlane.xlu1 %1831 }
 0x1fb   :  { %1993 = vadd.xlane.f32.xlu0 %v1747_v63  ;;  %v7946_v63 = vpop.eup %7945 }
 0x1fc   :  { %v9555_v50 = vpop.xlane.xlu0 %1845  ;;  %1975 = vadd.xlane.f32.xlu1 %v1738_v57  ;;  %v1749_v57 = vmul.f32 %v9316_v59, %v7944_v13  ;;  %v7948_v10 = vpop.eup %7947  ;;  %v1748_v48 = vmul.f32 %v9316_v59, %v7946_v63 }
 0x1fd   :  { %v9558_v55 = vpop.xlane.xlu1 %1843  ;;  %v1755_v60 = vmul.f32 %v9316_v59, %v7948_v10 }
 0x1ff   :  { %1989 = vadd.xlane.f32.xlu0 %v1745_v33  ;;  %v7950_v33 = vpop.eup %7949 }
 0x200   :  { %v9562_v52 = vpop.xlane.xlu0 %1857  ;;  %1987 = vadd.xlane.f32.xlu1 %v1744_v43  ;;  %v1746_v16 = vmul.f32 %v9316_v59, %v7950_v33 }
 0x201   :  { %13055 = vst [vmem:[#allocation140_spill] sm:$0xff] %v9562_v52  ;;  %v9565_v61 = vpop.xlane.xlu1 %1839 }
 0x203   :  { %2001 = vadd.xlane.f32.xlu0 %v1751_v56  ;;  %v7952_v56 = vpop.eup %7951 }
 0x204   :  { %v9569_v58 = vpop.xlane.xlu0 %1853  ;;  %1983 = vadd.xlane.f32.xlu1 %v1742_v51  ;;  %v7954_v51 = vpop.eup %7953  ;;  %v1753_v63 = vmul.f32 %v9316_v59, %v7952_v56 }
 0x205   :  { %v9572_v5 = vpop.xlane.xlu1 %1851  ;;  %v7956_v18 = vpop.eup %7955 }
 0x206   :  { %v1750_v33 = vmul.f32 %v9316_v59, %v7956_v18 }
 0x207   :  { %1997 = vadd.xlane.f32.xlu0 %v1749_v57  ;;  %v1752_v57 = vmul.f32 %v9316_v59, %v7954_v51 }
 0x208   :  { %v9576_v38 = vpop.xlane.xlu0 %1865  ;;  %1995 = vadd.xlane.f32.xlu1 %v1748_v48 }
 0x209   :  { %13056 = vst [vmem:[#allocation141_spill] sm:$0xff] %v9576_v38  ;;  %v9578_v43 = vpop.xlane.xlu1 %1847 }
 0x20b   :  { %2009 = vadd.xlane.f32.xlu0 %v1755_v60  ;;  %v7958_v60 = vpop.eup %7957 }
 0x20c   :  { %v9582_v52 = vpop.xlane.xlu0 %1861  ;;  %1991 = vadd.xlane.f32.xlu1 %v1746_v16  ;;  %v1756_v16 = vmul.f32 %v9316_v59, %v7958_v60  ;;  %v7960_v56 = vpop.eup %7959 }
 0x20d   :  { %13057 = vst [vmem:[#allocation142_spill] sm:$0xff] %v9582_v52  ;;  %v9584_v13 = vpop.xlane.xlu1 %1859 }
 0x20f   :  { %2005 = vadd.xlane.f32.xlu0 %v1753_v63  ;;  %v1754_v63 = vmul.f32 %v9316_v59, %v7960_v56 }
 0x210   :  { %v9588_v48 = vpop.xlane.xlu0 %1873  ;;  %2003 = vadd.xlane.f32.xlu1 %v1752_v57 }
 0x211   :  { %13058 = vst [vmem:[#allocation143_spill] sm:$0xff] %v9588_v48  ;;  %v9590_v10 = vpop.xlane.xlu1 %1855 }
 0x214   :  { %v9593_v38 = vpop.xlane.xlu0 %1869  ;;  %1999 = vadd.xlane.f32.xlu1 %v1750_v33 }
 0x215   :  { %13059 = vst [vmem:[#allocation144_spill] sm:$0xff] %v9593_v38  ;;  %v9595_v9 = vpop.xlane.xlu1 %1867 }
 0x218   :  { %v9598_v52 = vpop.xlane.xlu0 %1881  ;;  %2011 = vadd.xlane.f32.xlu1 %v1756_v16 }
 0x219   :  { %13060 = vst [vmem:[#allocation145_spill] sm:$0xff] %v9598_v52  ;;  %v9600_v51 = vpop.xlane.xlu1 %1863 }
 0x21c   :  { %v9603_v57 = vpop.xlane.xlu0 %1877  ;;  %2007 = vadd.xlane.f32.xlu1 %v1754_v63  ;;  %v9629_v63 = vadd.f32 %v8610_v15, %v9295_v21  ;;  %v9649_v15 = vadd.f32 %v8608_v14, %v9310_v20  ;;  %v9653_v21 = vadd.f32 %v8630_v24, %v9375_v7  ;;  %v9667_v14 = vadd.f32 %v8640_v28, %v9364_v8 }
 0x21d   :  { %v9605_v18 = vpop.xlane.xlu1 %1875  ;;  %v9691_v8 = vadd.f32 %v8628_v23, %v9320_v2  ;;  %v9705_v7 = vadd.f32 %v8635_v26, %v9361_v47  ;;  %v9709_v23 = vadd.f32 %v8658_v36, %v9419_v6  ;;  %v9723_v26 = vadd.f32 %v8668_v41, %v9411_v40  ;;  %v13084_v6 = vld [vmem:[#allocation122_spill] sm:$0xff] }
 0x21e   :  { %13066 = vst [vmem:[#allocation151_spill] sm:$0xff] %v9629_v63  ;;  %13068 = vst [vmem:[#allocation153_spill] sm:$0xff] %v9649_v15  ;;  %v9747_v40 = vadd.f32 %v8656_v35, %v9371_v39 }
 0x21f   :  { %13069 = vst [vmem:[#allocation154_spill] sm:$0xff] %v9653_v21  ;;  %13071 = vst [vmem:[#allocation156_spill] sm:$0xff] %v9667_v14 }
 0x220   :  { %v9607_v48 = vpop.xlane.xlu0 %1889  ;;  %13074 = vst [vmem:[#allocation159_spill] sm:$0xff] %v9691_v8  ;;  %13076 = vst [vmem:[#allocation161_spill] sm:$0xff] %v9705_v7 }
 0x221   :  { %13061 = vst [vmem:[#allocation146_spill] sm:$0xff] %v9607_v48  ;;  %v9609_v33 = vpop.xlane.xlu1 %1871  ;;  %13077 = vst [vmem:[#allocation162_spill] sm:$0xff] %v9709_v23 }
 0x222   :  { %13079 = vst [vmem:[#allocation164_spill] sm:$0xff] %v9723_v26  ;;  %13082 = vst [vmem:[#allocation167_spill] sm:$0xff] %v9747_v40 }
 0x224   :  { %v9611_v38 = vpop.xlane.xlu0 %1885 }
 0x225   :  { %13062 = vst [vmem:[#allocation147_spill] sm:$0xff] %v9611_v38  ;;  %v9613_v60 = vpop.xlane.xlu1 %1883  ;;  %2529 = vbcast.lane.b32.xlu0 %v8806_v0, 336 }
 0x228   :  { %v9616_v16 = vpop.xlane.xlu0 %1897 }
 0x229   :  { %13063 = vst [vmem:[#allocation148_spill] sm:$0xff] %v9616_v16  ;;  %v9618_v52 = vpop.xlane.xlu1 %1879  ;;  %2537 = vbcast.lane.b32.xlu0 %v8806_v0, 352  ;;  %v9639_v16 = vadd.f32 %v8626_v22, %v9348_v37  ;;  %v9677_v37 = vadd.f32 %v8618_v19, %v9335_v3  ;;  %v9695_v19 = vadd.f32 %v8654_v34, %v9389_v11 }
 0x22a   :  { %v9719_v11 = vadd.f32 %v8642_v29, %v9343_v53  ;;  %v9737_v29 = vadd.f32 %v8673_v44, %v9441_v62  ;;  %v13085_v62 = vld [vmem:[#allocation17_spill] sm:$0xff] }
 0x22b   :  { %13067 = vst [vmem:[#allocation152_spill] sm:$0xff] %v9639_v16  ;;  %13072 = vst [vmem:[#allocation157_spill] sm:$0xff] %v9677_v37 }
 0x22c   :  { %v9621_v59 = vpop.xlane.xlu0 %1893  ;;  %13075 = vst [vmem:[#allocation160_spill] sm:$0xff] %v9695_v19  ;;  %13078 = vst [vmem:[#allocation163_spill] sm:$0xff] %v9719_v11 }
 0x22d   :  { %13064 = vst [vmem:[#allocation149_spill] sm:$0xff] %v9621_v59  ;;  %v9623_v56 = vpop.xlane.xlu1 %1891  ;;  %2533 = vbcast.lane.b32.xlu1 %v8806_v0, 344  ;;  %2545 = vbcast.lane.b32.xlu0 %v8806_v0, 368  ;;  %13081 = vst [vmem:[#allocation166_spill] sm:$0xff] %v9737_v29 }
 0x22e   :  { %13065 = vst [vmem:[#allocation150_spill] sm:$0xff] %v9623_v56 }
 0x230   :  { %v9631_v48 = vpop.xlane.xlu0 %1905 }
 0x231   :  { %v9633_v38 = vpop.xlane.xlu1 %1887  ;;  %2541 = vbcast.lane.b32.xlu1 %v8806_v0, 360  ;;  %2937 = vperm.xlu0 %7567, %v9629_v63  }
 0x234   :  { %v9641_v59 = vpop.xlane.xlu0 %1901 }
 0x235   :  { %v9643_v56 = vpop.xlane.xlu1 %1899  ;;  %2549 = vbcast.lane.b32.xlu1 %v8806_v0, 376  ;;  %2946 = vperm.xlu0 %7567, %v9639_v16   ;;  %v9663_v0 = vadd.f32 %v8613_v17, %v9338_v27  ;;  %v9681_v17 = vadd.f32 %v8644_v30, %v9397_v25  ;;  %v9733_v25 = vadd.f32 %v8649_v32, %v9386_v45  ;;  %v13110_v16 = vld [vmem:[#allocation29_spill] sm:$0xff] }
 0x236   :  { %v9751_v32 = vadd.f32 %v8686_v49, %v9433_v12  ;;  %v13089_v12 = vld [vmem:[#allocation121_spill] sm:$0xff] }
 0x237   :  { %13070 = vst [vmem:[#allocation155_spill] sm:$0xff] %v9663_v0  ;;  %13073 = vst [vmem:[#allocation158_spill] sm:$0xff] %v9681_v17 }
 0x238   :  { %v9655_v63 = vpop.xlane.xlu0 %1913  ;;  %13080 = vst [vmem:[#allocation165_spill] sm:$0xff] %v9733_v25  ;;  %13083 = vst [vmem:[#allocation168_spill] sm:$0xff] %v9751_v32 }
 0x239   :  { %v9657_v22 = vpop.xlane.xlu1 %1895  ;;  %2940 = vperm.xlu1 %7568, %v9649_v15   ;;  %2952 = vperm.xlu0 %7567, %v9653_v21   ;;  %v13104_v21 = vld [vmem:[#allocation27_spill] sm:$0xff]  ;;  %v13122_v15 = vld [vmem:[#allocation33_spill] sm:$0xff] }
 0x23c   :  { %v9669_v20 = vpop.xlane.xlu0 %1909 }
 0x23d   :  { %v9671_v24 = vpop.xlane.xlu1 %1907  ;;  %2943 = vperm.xlu1 %7568, %v9663_v0   ;;  %2958 = vperm.xlu0 %7567, %v9667_v14   ;;  %v13101_v14 = vld [vmem:[#allocation20_spill] sm:$0xff]  ;;  %v13116_v0 = vld [vmem:[#allocation31_spill] sm:$0xff] }
 0x240   :  { %v9683_v27 = vpop.xlane.xlu0 %1921 }
 0x241   :  { %v9685_v28 = vpop.xlane.xlu1 %1903  ;;  %2949 = vperm.xlu1 %7568, %v9677_v37   ;;  %2964 = vperm.xlu0 %7567, %v9681_v17   ;;  %v13098_v17 = vld [vmem:[#allocation25_spill] sm:$0xff]  ;;  %v13107_v37 = vld [vmem:[#allocation22_spill] sm:$0xff] }
 0x244   :  { %v9697_v3 = vpop.xlane.xlu0 %1917 }
 0x245   :  { %v9699_v30 = vpop.xlane.xlu1 %1915  ;;  %2955 = vperm.xlu1 %7568, %v9691_v8   ;;  %2970 = vperm.xlu0 %7567, %v9695_v19   ;;  %v13095_v19 = vld [vmem:[#allocation19_spill] sm:$0xff] }
 0x248   :  { %v9711_v2 = vpop.xlane.xlu0 %1929 }
 0x249   :  { %v9713_v34 = vpop.xlane.xlu1 %1911  ;;  %2961 = vperm.xlu1 %7568, %v9705_v7   ;;  %2976 = vperm.xlu0 %7567, %v9709_v23   ;;  %v13090_v23 = vld [vmem:[#allocation18_spill] sm:$0xff]  ;;  %v13129_v7 = vld [vmem:[#allocation35_spill] sm:$0xff] }
 0x24c   :  { %v9725_v47 = vpop.xlane.xlu0 %1925 }
 0x24d   :  { %v9727_v36 = vpop.xlane.xlu1 %1923  ;;  %2967 = vperm.xlu1 %7568, %v9719_v11   ;;  %2982 = vperm.xlu0 %7567, %v9723_v26   ;;  %v9761_v26 = vadd.f32 %v13085_v62, %v13084_v6 }
 0x24f   :  { %13086 = vst [vmem:[#allocation122_spill] sm:$0xff] %v9761_v26 }
 0x250   :  { %v9739_v53 = vpop.xlane.xlu0 %1937 }
 0x251   :  { %v9741_v41 = vpop.xlane.xlu1 %1919  ;;  %2973 = vperm.xlu1 %7568, %v9733_v25   ;;  %2988 = vperm.xlu0 %7567, %v9737_v29   ;;  %v13087_v29 = vld [vmem:[#allocation21_spill] sm:$0xff]  ;;  %v9775_v25 = vadd.f32 %v13090_v23, %v13089_v12 }
 0x252   :  { %v9765_v35 = vadd.f32 %v13087_v29, %v9468_v54  ;;  %v13094_v29 = vld [vmem:[#allocation124_spill] sm:$0xff] }
 0x253   :  { %13091 = vst [vmem:[#allocation21_spill] sm:$0xff] %v9775_v25  ;;  %v9789_v11 = vadd.f32 %v13095_v19, %v13094_v29 }
 0x254   :  { %v9753_v45 = vpop.xlane.xlu0 %1933  ;;  %13088 = vst [vmem:[#allocation17_spill] sm:$0xff] %v9765_v35 }
 0x255   :  { %v9755_v44 = vpop.xlane.xlu1 %1931  ;;  %2979 = vperm.xlu1 %7568, %v9747_v40   ;;  %2994 = vperm.xlu0 %7567, %v9751_v32   ;;  %v13092_v32 = vld [vmem:[#allocation23_spill] sm:$0xff]  ;;  %13096 = vst [vmem:[#allocation18_spill] sm:$0xff] %v9789_v11 }
 0x256   :  { %v9779_v6 = vadd.f32 %v13092_v32, %v9457_v46  ;;  %v13100_v32 = vld [vmem:[#allocation123_spill] sm:$0xff] }
 0x257   :  { %v9803_v8 = vadd.f32 %v13101_v14, %v13100_v32 }
 0x258   :  { %v9767_v39 = vpop.xlane.xlu0 %1945  ;;  %13093 = vst [vmem:[#allocation121_spill] sm:$0xff] %v9779_v6 }
 0x259   :  { %v9769_v49 = vpop.xlane.xlu1 %1927  ;;  %2985 = vperm.xlu1 %7568, %v9761_v26   ;;  %3000 = vperm.xlu0 %7567, %v9765_v35   ;;  %v13097_v35 = vld [vmem:[#allocation131_spill] sm:$0xff]  ;;  %13102 = vst [vmem:[#allocation124_spill] sm:$0xff] %v9803_v8 }
 0x25a   :  { %v9793_v23 = vadd.f32 %v13098_v17, %v13097_v35  ;;  %v13106_v35 = vld [vmem:[#allocation126_spill] sm:$0xff] }
 0x25c   :  { %v9781_v62 = vpop.xlane.xlu0 %1941  ;;  %13099 = vst [vmem:[#allocation23_spill] sm:$0xff] %v9793_v23 }
 0x25d   :  { %v9783_v54 = vpop.xlane.xlu1 %1939  ;;  %2991 = vperm.xlu1 %7568, %v9775_v25   ;;  %3006 = vperm.xlu0 %7567, %v9779_v6   ;;  %v13103_v6 = vld [vmem:[#allocation129_spill] sm:$0xff] }
 0x25e   :  { %v9807_v19 = vadd.f32 %v13104_v21, %v13103_v6  ;;  %v13112_v6 = vld [vmem:[#allocation125_spill] sm:$0xff] }
 0x260   :  { %v9795_v12 = vpop.xlane.xlu0 %1953  ;;  %13105 = vst [vmem:[#allocation19_spill] sm:$0xff] %v9807_v19 }
 0x261   :  { %v9797_v46 = vpop.xlane.xlu1 %1935  ;;  %2997 = vperm.xlu1 %7568, %v9789_v11   ;;  %3012 = vperm.xlu0 %7567, %v9793_v23   ;;  %v9817_v11 = vadd.f32 %v13107_v37, %v13106_v35  ;;  %v13109_v23 = vld [vmem:[#allocation135_spill] sm:$0xff] }
 0x262   :  { %v9821_v14 = vadd.f32 %v13110_v16, %v13109_v23  ;;  %v13118_v23 = vld [vmem:[#allocation128_spill] sm:$0xff] }
 0x263   :  { %13108 = vst [vmem:[#allocation131_spill] sm:$0xff] %v9817_v11 }
 0x264   :  { %v9809_v29 = vpop.xlane.xlu0 %1949  ;;  %13111 = vst [vmem:[#allocation25_spill] sm:$0xff] %v9821_v14 }
 0x265   :  { %v9811_v17 = vpop.xlane.xlu1 %1947  ;;  %3003 = vperm.xlu1 %7568, %v9803_v8   ;;  %3018 = vperm.xlu0 %7567, %v9807_v19   ;;  %v13113_v8 = vld [vmem:[#allocation24_spill] sm:$0xff]  ;;  %v13115_v19 = vld [vmem:[#allocation133_spill] sm:$0xff] }
 0x266   :  { %v9831_v25 = vadd.f32 %v13113_v8, %v13112_v6  ;;  %v9835_v37 = vadd.f32 %v13116_v0, %v13115_v19  ;;  %v13125_v19 = vld [vmem:[#allocation127_spill] sm:$0xff] }
 0x268   :  { %v9823_v32 = vpop.xlane.xlu0 %1961  ;;  %13114 = vst [vmem:[#allocation123_spill] sm:$0xff] %v9831_v25  ;;  %13117 = vst [vmem:[#allocation20_spill] sm:$0xff] %v9835_v37 }
 0x269   :  { %v9825_v21 = vpop.xlane.xlu1 %1943  ;;  %3009 = vperm.xlu1 %7568, %v9817_v11   ;;  %3024 = vperm.xlu0 %7567, %v9821_v14   ;;  %v13119_v11 = vld [vmem:[#allocation26_spill] sm:$0xff]  ;;  %v13121_v14 = vld [vmem:[#allocation139_spill] sm:$0xff] }
 0x26a   :  { %v9845_v26 = vadd.f32 %v13119_v11, %v13118_v23  ;;  %v9849_v8 = vadd.f32 %v13122_v15, %v13121_v14  ;;  %v13132_v14 = vld [vmem:[#allocation132_spill] sm:$0xff] }
 0x26c   :  { %v9837_v35 = vpop.xlane.xlu0 %1957  ;;  %13120 = vst [vmem:[#allocation129_spill] sm:$0xff] %v9845_v26  ;;  %13123 = vst [vmem:[#allocation27_spill] sm:$0xff] %v9849_v8 }
 0x26d   :  { %v9839_v16 = vpop.xlane.xlu1 %1955  ;;  %3015 = vperm.xlu1 %7568, %v9831_v25   ;;  %3030 = vperm.xlu0 %7567, %v9835_v37   ;;  %v13126_v25 = vld [vmem:[#allocation28_spill] sm:$0xff]  ;;  %v13128_v37 = vld [vmem:[#allocation137_spill] sm:$0xff] }
 0x26e   :  { %v9859_v40 = vadd.f32 %v13126_v25, %v13125_v19  ;;  %v9863_v11 = vadd.f32 %v13129_v7, %v13128_v37  ;;  %v13138_v37 = vld [vmem:[#allocation130_spill] sm:$0xff] }
 0x270   :  { %v9851_v6 = vpop.xlane.xlu0 %1969  ;;  %13127 = vst [vmem:[#allocation22_spill] sm:$0xff] %v9859_v40  ;;  %13130 = vst [vmem:[#allocation135_spill] sm:$0xff] %v9863_v11 }
 0x271   :  { %13124 = vst [vmem:[#allocation126_spill] sm:$0xff] %v9851_v6  ;;  %v9853_v0 = vpop.xlane.xlu1 %1951  ;;  %3021 = vperm.xlu1 %7568, %v9845_v26   ;;  %3036 = vperm.xlu0 %7567, %v9849_v8   ;;  %v13133_v26 = vld [vmem:[#allocation30_spill] sm:$0xff]  ;;  %v13135_v8 = vld [vmem:[#allocation37_spill] sm:$0xff] }
 0x272   :  { %v9873_v6 = vadd.f32 %v13133_v26, %v13132_v14  ;;  %v9877_v25 = vadd.f32 %v13135_v8, %v9551_v31  ;;  %v13144_v8 = vld [vmem:[#allocation136_spill] sm:$0xff] }
 0x274   :  { %v9865_v23 = vpop.xlane.xlu0 %1965  ;;  %13134 = vst [vmem:[#allocation125_spill] sm:$0xff] %v9873_v6  ;;  %13136 = vst [vmem:[#allocation24_spill] sm:$0xff] %v9877_v25 }
 0x275   :  { %13131 = vst [vmem:[#allocation29_spill] sm:$0xff] %v9865_v23  ;;  %v9867_v15 = vpop.xlane.xlu1 %1963  ;;  %3027 = vperm.xlu1 %7568, %v9859_v40   ;;  %3042 = vperm.xlu0 %7567, %v9863_v11   ;;  %v13139_v40 = vld [vmem:[#allocation32_spill] sm:$0xff]  ;;  %v13141_v11 = vld [vmem:[#allocation39_spill] sm:$0xff] }
 0x276   :  { %v9887_v23 = vadd.f32 %v13139_v40, %v13138_v37  ;;  %v9891_v26 = vadd.f32 %v13141_v11, %v9544_v42  ;;  %v13150_v11 = vld [vmem:[#allocation134_spill] sm:$0xff] }
 0x278   :  { %v9879_v19 = vpop.xlane.xlu0 %1977  ;;  %13140 = vst [vmem:[#allocation31_spill] sm:$0xff] %v9887_v23  ;;  %13142 = vst [vmem:[#allocation128_spill] sm:$0xff] %v9891_v26 }
 0x279   :  { %13137 = vst [vmem:[#allocation133_spill] sm:$0xff] %v9879_v19  ;;  %v9881_v7 = vpop.xlane.xlu1 %1959  ;;  %3033 = vperm.xlu1 %7568, %v9873_v6   ;;  %3048 = vperm.xlu0 %7567, %v9877_v25   ;;  %v13145_v6 = vld [vmem:[#allocation34_spill] sm:$0xff]  ;;  %v13147_v25 = vld [vmem:[#allocation41_spill] sm:$0xff] }
 0x27a   :  { %v9901_v19 = vadd.f32 %v13145_v6, %v13144_v8  ;;  %v9905_v40 = vadd.f32 %v13147_v25, %v9565_v61  ;;  %v13155_v25 = vld [vmem:[#allocation38_spill] sm:$0xff] }
 0x27c   :  { %v9893_v14 = vpop.xlane.xlu0 %1973  ;;  %13146 = vst [vmem:[#allocation139_spill] sm:$0xff] %v9901_v19  ;;  %13148 = vst [vmem:[#allocation33_spill] sm:$0xff] %v9905_v40 }
 0x27d   :  { %13143 = vst [vmem:[#allocation26_spill] sm:$0xff] %v9893_v14  ;;  %v9895_v31 = vpop.xlane.xlu1 %1971  ;;  %3039 = vperm.xlu1 %7568, %v9887_v23   ;;  %3054 = vperm.xlu0 %7567, %v9891_v26   ;;  %v13151_v23 = vld [vmem:[#allocation36_spill] sm:$0xff]  ;;  %v13153_v26 = vld [vmem:[#allocation43_spill] sm:$0xff] }
 0x27e   :  { %v9915_v14 = vadd.f32 %v13151_v23, %v13150_v11  ;;  %v9919_v6 = vadd.f32 %v13153_v26, %v9558_v55  ;;  %v13159_v26 = vld [vmem:[#allocation138_spill] sm:$0xff] }
 0x280   :  { %v9907_v37 = vpop.xlane.xlu0 %1985  ;;  %13152 = vst [vmem:[#allocation28_spill] sm:$0xff] %v9915_v14  ;;  %13154 = vst [vmem:[#allocation137_spill] sm:$0xff] %v9919_v6 }
 0x281   :  { %13149 = vst [vmem:[#allocation127_spill] sm:$0xff] %v9907_v37  ;;  %v9909_v42 = vpop.xlane.xlu1 %1967  ;;  %3045 = vperm.xlu1 %7568, %v9901_v19   ;;  %3060 = vperm.xlu0 %7567, %v9905_v40   ;;  %v9929_v19 = vadd.f32 %v13155_v25, %v9541_v1  ;;  %v13157_v40 = vld [vmem:[#allocation45_spill] sm:$0xff] }
 0x282   :  { %v9933_v23 = vadd.f32 %v13157_v40, %v9578_v43  ;;  %v13164_v40 = vld [vmem:[#allocation42_spill] sm:$0xff] }
 0x283   :  { %13156 = vst [vmem:[#allocation35_spill] sm:$0xff] %v9929_v19 }
 0x284   :  { %v9921_v8 = vpop.xlane.xlu0 %1981  ;;  %13158 = vst [vmem:[#allocation132_spill] sm:$0xff] %v9933_v23 }
 0x285   :  { %v9923_v61 = vpop.xlane.xlu1 %1979  ;;  %3051 = vperm.xlu1 %7568, %v9915_v14   ;;  %3066 = vperm.xlu0 %7567, %v9919_v6   ;;  %v13160_v14 = vld [vmem:[#allocation40_spill] sm:$0xff]  ;;  %v13162_v6 = vld [vmem:[#allocation47_spill] sm:$0xff] }
 0x286   :  { %v9943_v37 = vadd.f32 %v13160_v14, %v13159_v26  ;;  %v9947_v1 = vadd.f32 %v13162_v6, %v9572_v5  ;;  %v13169_v6 = vld [vmem:[#allocation44_spill] sm:$0xff] }
 0x288   :  { %v9935_v11 = vpop.xlane.xlu0 %1993  ;;  %13161 = vst [vmem:[#allocation30_spill] sm:$0xff] %v9943_v37  ;;  %13163 = vst [vmem:[#allocation37_spill] sm:$0xff] %v9947_v1 }
 0x289   :  { %v9937_v55 = vpop.xlane.xlu1 %1975  ;;  %3057 = vperm.xlu1 %7568, %v9929_v19   ;;  %3072 = vperm.xlu0 %7567, %v9933_v23   ;;  %v9957_v19 = vadd.f32 %v13164_v40, %v9555_v50  ;;  %v13166_v23 = vld [vmem:[#allocation49_spill] sm:$0xff] }
 0x28a   :  { %v9961_v14 = vadd.f32 %v13166_v23, %v9590_v10  ;;  %v13173_v23 = vld [vmem:[#allocation46_spill] sm:$0xff] }
 0x28b   :  { %13165 = vst [vmem:[#allocation130_spill] sm:$0xff] %v9957_v19 }
 0x28c   :  { %v9949_v25 = vpop.xlane.xlu0 %1989  ;;  %13167 = vst [vmem:[#allocation32_spill] sm:$0xff] %v9961_v14 }
 0x28d   :  { %v9951_v43 = vpop.xlane.xlu1 %1987  ;;  %3063 = vperm.xlu1 %7568, %v9943_v37   ;;  %3078 = vperm.xlu0 %7567, %v9947_v1   ;;  %v9971_v37 = vadd.f32 %v13169_v6, %v9548_v4  ;;  %v13171_v1 = vld [vmem:[#allocation51_spill] sm:$0xff] }
 0x28e   :  { %v9975_v50 = vadd.f32 %v13171_v1, %v9584_v13  ;;  %v13178_v1 = vld [vmem:[#allocation140_spill] sm:$0xff] }
 0x28f   :  { %13170 = vst [vmem:[#allocation136_spill] sm:$0xff] %v9971_v37 }
 0x290   :  { %v9963_v26 = vpop.xlane.xlu0 %2001  ;;  %13172 = vst [vmem:[#allocation34_spill] sm:$0xff] %v9975_v50 }
 0x291   :  { %13168 = vst [vmem:[#allocation39_spill] sm:$0xff] %v9963_v26  ;;  %3069 = vperm.xlu1 %7568, %v9957_v19   ;;  %v9966_v5 = vpop.xlane.xlu1 %1983  ;;  %3084 = vperm.xlu0 %7567, %v9961_v14   ;;  %v9985_v19 = vadd.f32 %v13173_v23, %v9569_v58  ;;  %v13175_v14 = vld [vmem:[#allocation53_spill] sm:$0xff] }
 0x292   :  { %v9989_v4 = vadd.f32 %v13175_v14, %v9600_v51  ;;  %v13184_v14 = vld [vmem:[#allocation142_spill] sm:$0xff] }
 0x293   :  { %13174 = vst [vmem:[#allocation41_spill] sm:$0xff] %v9985_v19 }
 0x294   :  { %v9977_v40 = vpop.xlane.xlu0 %1997  ;;  %13176 = vst [vmem:[#allocation134_spill] sm:$0xff] %v9989_v4 }
 0x295   :  { %3075 = vperm.xlu1 %7568, %v9971_v37   ;;  %v9980_v10 = vpop.xlane.xlu1 %1995  ;;  %3090 = vperm.xlu0 %7567, %v9975_v50   ;;  %v13179_v37 = vld [vmem:[#allocation48_spill] sm:$0xff]  ;;  %v13181_v50 = vld [vmem:[#allocation55_spill] sm:$0xff] }
 0x296   :  { %v9999_v26 = vadd.f32 %v13179_v37, %v13178_v1  ;;  %v10003_v58 = vadd.f32 %v13181_v50, %v9595_v9  ;;  %v13190_v50 = vld [vmem:[#allocation141_spill] sm:$0xff] }
 0x298   :  { %v9991_v6 = vpop.xlane.xlu0 %2009  ;;  %13180 = vst [vmem:[#allocation43_spill] sm:$0xff] %v9999_v26  ;;  %13182 = vst [vmem:[#allocation38_spill] sm:$0xff] %v10003_v58 }
 0x299   :  { %13177 = vst [vmem:[#allocation36_spill] sm:$0xff] %v9991_v6  ;;  %3081 = vperm.xlu1 %7568, %v9985_v19   ;;  %v9994_v13 = vpop.xlane.xlu1 %1991  ;;  %3096 = vperm.xlu0 %7567, %v9989_v4   ;;  %v13185_v19 = vld [vmem:[#allocation50_spill] sm:$0xff]  ;;  %v13187_v4 = vld [vmem:[#allocation57_spill] sm:$0xff] }
 0x29a   :  { %v10013_v6 = vadd.f32 %v13185_v19, %v13184_v14  ;;  %v10017_v37 = vadd.f32 %v13187_v4, %v9609_v33  ;;  %v13196_v14 = vld [vmem:[#allocation144_spill] sm:$0xff] }
 0x29c   :  { %v10005_v23 = vpop.xlane.xlu0 %2005  ;;  %13186 = vst [vmem:[#allocation138_spill] sm:$0xff] %v10013_v6  ;;  %13188 = vst [vmem:[#allocation40_spill] sm:$0xff] %v10017_v37 }
 0x29d   :  { %13183 = vst [vmem:[#allocation45_spill] sm:$0xff] %v10005_v23  ;;  %3087 = vperm.xlu1 %7568, %v9999_v26   ;;  %v10008_v51 = vpop.xlane.xlu1 %2003  ;;  %3102 = vperm.xlu0 %7567, %v10003_v58   ;;  %v13191_v26 = vld [vmem:[#allocation52_spill] sm:$0xff]  ;;  %v13193_v58 = vld [vmem:[#allocation59_spill] sm:$0xff] }
 0x29e   :  { %v10027_v23 = vadd.f32 %v13191_v26, %v13190_v50  ;;  %v10031_v19 = vadd.f32 %v13193_v58, %v9605_v18  ;;  %v13201_v58 = vld [vmem:[#allocation143_spill] sm:$0xff]  ;;  %v13202_v50 = vld [vmem:[#allocation56_spill] sm:$0xff] }
 0x2a0   :  { %v10019_v1 = vpop.permute.xlu0 %2529  ;;  %13192 = vst [vmem:[#allocation42_spill] sm:$0xff] %v10027_v23  ;;  %13194 = vst [vmem:[#allocation49_spill] sm:$0xff] %v10031_v19 }
 0x2a1   :  { %13189 = vst [vmem:[#allocation47_spill] sm:$0xff] %v10019_v1  ;;  %3093 = vperm.xlu1 %7568, %v10013_v6   ;;  %v10022_v9 = vpop.xlane.xlu1 %1999  ;;  %3108 = vperm.xlu0 %7567, %v10017_v37   ;;  %v13197_v6 = vld [vmem:[#allocation54_spill] sm:$0xff]  ;;  %v13199_v37 = vld [vmem:[#allocation61_spill] sm:$0xff] }
 0x2a2   :  { %v10041_v1 = vadd.f32 %v13197_v6, %v13196_v14  ;;  %v10045_v26 = vadd.f32 %v13199_v37, %v9618_v52  ;;  %v13207_v37 = vld [vmem:[#allocation58_spill] sm:$0xff] }
 0x2a3   :  { %v10067_v14 = vadd.f32 %v13207_v37, %v9603_v57 }
 0x2a4   :  { %v10037_v4 = vpop.permute.xlu0 %2537  ;;  %13198 = vst [vmem:[#allocation51_spill] sm:$0xff] %v10041_v1  ;;  %13200 = vst [vmem:[#allocation46_spill] sm:$0xff] %v10045_v26 }
 0x2a5   :  { %3099 = vperm.xlu1 %7568, %v10027_v23   ;;  %v10034_v33 = vpop.xlane.xlu1 %2011  ;;  %3114 = vperm.xlu0 %7567, %v10031_v19   ;;  %13195 = vst [vmem:[#allocation44_spill] sm:$0xff] %v10037_v4  ;;  %v10053_v23 = vadd.f32 %v13202_v50, %v13201_v58  ;;  %v13204_v19 = vld [vmem:[#allocation64_spill] sm:$0xff]  ;;  %13208 = vst [vmem:[#allocation55_spill] sm:$0xff] %v10067_v14 }
 0x2a6   :  { %v10057_v4 = vadd.f32 %v13204_v19, %v9613_v60  ;;  %v13212_v19 = vld [vmem:[#allocation145_spill] sm:$0xff] }
 0x2a7   :  { %13203 = vst [vmem:[#allocation53_spill] sm:$0xff] %v10053_v23 }
 0x2a8   :  { %13205 = vst [vmem:[#allocation140_spill] sm:$0xff] %v10057_v4  ;;  %v10059_v6 = vpop.permute.xlu0 %2545 }
 0x2a9   :  { %3105 = vperm.xlu1 %7568, %v10041_v1   ;;  %v10048_v18 = vpop.xlane.xlu1 %2007  ;;  %3120 = vperm.xlu0 %7567, %v10045_v26   ;;  %13206 = vst [vmem:[#allocation48_spill] sm:$0xff] %v10059_v6  ;;  %v13209_v26 = vld [vmem:[#allocation66_spill] sm:$0xff]  ;;  %v13216_v6 = vld [vmem:[#allocation68_spill] sm:$0xff] }
 0x2aa   :  { %v10071_v58 = vadd.f32 %v13209_v26, %v9633_v38  ;;  %v13219_v26 = vld [vmem:[#allocation147_spill] sm:$0xff] }
 0x2ac   :  { %13210 = vst [vmem:[#allocation142_spill] sm:$0xff] %v10071_v58 }
 0x2ad   :  { %3111 = vperm.xlu1 %7568, %v10053_v23   ;;  %v10062_v52 = vpop.permute.xlu1 %2533  ;;  %3126 = vperm.xlu0 %7567, %v10057_v4   ;;  %v13213_v23 = vld [vmem:[#allocation60_spill] sm:$0xff]  ;;  %v13215_v4 = vld [vmem:[#allocation150_spill] sm:$0xff] }
 0x2ae   :  { %v10081_v1 = vadd.f32 %v13213_v23, %v13212_v19  ;;  %v10085_v57 = vadd.f32 %v13216_v6, %v13215_v4  ;;  %v13225_v6 = vld [vmem:[#allocation146_spill] sm:$0xff] }
 0x2b0   :  { %v10073_v50 = vpop.permute.xlu0 %2937  ;;  %13214 = vst [vmem:[#allocation57_spill] sm:$0xff] %v10081_v1  ;;  %13217 = vst [vmem:[#allocation141_spill] sm:$0xff] %v10085_v57 }
 0x2b1   :  { %13211 = vst [vmem:[#allocation50_spill] sm:$0xff] %v10073_v50  ;;  %3117 = vperm.xlu1 %7568, %v10067_v14   ;;  %v10076_v60 = vpop.permute.xlu1 %2541  ;;  %3132 = vperm.xlu0 %7567, %v10071_v58   ;;  %v13220_v14 = vld [vmem:[#allocation62_spill] sm:$0xff] }
 0x2b2   :  { %v10095_v50 = vadd.f32 %v13220_v14, %v13219_v26  ;;  %v13222_v58 = vld [vmem:[#allocation70_spill] sm:$0xff] }
 0x2b3   :  { %v10099_v23 = vadd.f32 %v13222_v58, %v9657_v22  ;;  %v13231_v58 = vld [vmem:[#allocation149_spill] sm:$0xff] }
 0x2b4   :  { %v10087_v37 = vpop.permute.xlu0 %2946  ;;  %13221 = vst [vmem:[#allocation59_spill] sm:$0xff] %v10095_v50 }
 0x2b5   :  { %13218 = vst [vmem:[#allocation52_spill] sm:$0xff] %v10087_v37  ;;  %3123 = vperm.xlu1 %7568, %v10081_v1   ;;  %v10090_v38 = vpop.permute.xlu1 %2549  ;;  %3138 = vperm.xlu0 %7567, %v10085_v57   ;;  %13223 = vst [vmem:[#allocation144_spill] sm:$0xff] %v10099_v23  ;;  %v13226_v1 = vld [vmem:[#allocation63_spill] sm:$0xff]  ;;  %v13228_v57 = vld [vmem:[#allocation72_spill] sm:$0xff] }
 0x2b6   :  { %v10109_v37 = vadd.f32 %v13226_v1, %v13225_v6  ;;  %v10113_v14 = vadd.f32 %v13228_v57, %v9643_v56  ;;  %v13236_v57 = vld [vmem:[#allocation148_spill] sm:$0xff] }
 0x2b8   :  { %v10101_v19 = vpop.permute.xlu0 %2952  ;;  %13227 = vst [vmem:[#allocation61_spill] sm:$0xff] %v10109_v37  ;;  %13229 = vst [vmem:[#allocation143_spill] sm:$0xff] %v10113_v14 }
 0x2b9   :  { %13224 = vst [vmem:[#allocation54_spill] sm:$0xff] %v10101_v19  ;;  %3129 = vperm.xlu1 %7568, %v10095_v50   ;;  %v10104_v4 = vpop.permute.xlu1 %2940  ;;  %3144 = vperm.xlu0 %7567, %v10099_v23   ;;  %v13232_v50 = vld [vmem:[#allocation65_spill] sm:$0xff]  ;;  %v13234_v23 = vld [vmem:[#allocation74_spill] sm:$0xff] }
 0x2ba   :  { %v10123_v19 = vadd.f32 %v13232_v50, %v13231_v58  ;;  %v10127_v1 = vadd.f32 %v13234_v23, %v9685_v28  ;;  %v13241_v23 = vld [vmem:[#allocation69_spill] sm:$0xff] }
 0x2bc   :  { %v10115_v26 = vpop.permute.xlu0 %2958  ;;  %13233 = vst [vmem:[#allocation64_spill] sm:$0xff] %v10123_v19  ;;  %13235 = vst [vmem:[#allocation58_spill] sm:$0xff] %v10127_v1 }
 0x2bd   :  { %13230 = vst [vmem:[#allocation56_spill] sm:$0xff] %v10115_v26  ;;  %3135 = vperm.xlu1 %7568, %v10109_v37   ;;  %v10118_v22 = vpop.permute.xlu1 %2943  ;;  %3150 = vperm.xlu0 %7567, %v10113_v14   ;;  %v13237_v37 = vld [vmem:[#allocation67_spill] sm:$0xff]  ;;  %v13239_v14 = vld [vmem:[#allocation76_spill] sm:$0xff] }
 0x2be   :  { %v10137_v26 = vadd.f32 %v13237_v37, %v13236_v57  ;;  %v10141_v50 = vadd.f32 %v13239_v14, %v9671_v24  ;;  %v13245_v14 = vld [vmem:[#allocation71_spill] sm:$0xff] }
 0x2c0   :  { %v10129_v6 = vpop.permute.xlu0 %2964  ;;  %13238 = vst [vmem:[#allocation66_spill] sm:$0xff] %v10137_v26  ;;  %13240 = vst [vmem:[#allocation145_spill] sm:$0xff] %v10141_v50 }
 0x2c1   :  { %3141 = vperm.xlu1 %7568, %v10123_v19   ;;  %v10132_v56 = vpop.permute.xlu1 %2949  ;;  %3156 = vperm.xlu0 %7567, %v10127_v1   ;;  %v10151_v19 = vadd.f32 %v13241_v23, %v9641_v59  ;;  %v13243_v1 = vld [vmem:[#allocation78_spill] sm:$0xff] }
 0x2c2   :  { %v10155_v37 = vadd.f32 %v13243_v1, %v9713_v34  ;;  %v13250_v1 = vld [vmem:[#allocation73_spill] sm:$0xff] }
 0x2c3   :  { %13242 = vst [vmem:[#allocation60_spill] sm:$0xff] %v10151_v19 }
 0x2c4   :  { %v10143_v58 = vpop.permute.xlu0 %2970  ;;  %13244 = vst [vmem:[#allocation150_spill] sm:$0xff] %v10155_v37 }
 0x2c5   :  { %3147 = vperm.xlu1 %7568, %v10137_v26   ;;  %v10146_v28 = vpop.permute.xlu1 %2955  ;;  %3162 = vperm.xlu0 %7567, %v10141_v50   ;;  %v10165_v26 = vadd.f32 %v13245_v14, %v9631_v48  ;;  %v13247_v50 = vld [vmem:[#allocation80_spill] sm:$0xff] }
 0x2c6   :  { %v10169_v59 = vadd.f32 %v13247_v50, %v9699_v30  ;;  %v13254_v50 = vld [vmem:[#allocation75_spill] sm:$0xff] }
 0x2c7   :  { %13246 = vst [vmem:[#allocation68_spill] sm:$0xff] %v10165_v26 }
 0x2c8   :  { %v10157_v57 = vpop.permute.xlu0 %2976  ;;  %13248 = vst [vmem:[#allocation147_spill] sm:$0xff] %v10169_v59 }
 0x2c9   :  { %3153 = vperm.xlu1 %7568, %v10151_v19   ;;  %v10160_v24 = vpop.permute.xlu1 %2961  ;;  %3168 = vperm.xlu0 %7567, %v10155_v37   ;;  %v10179_v19 = vadd.f32 %v13250_v1, %v9669_v20  ;;  %v13252_v37 = vld [vmem:[#allocation82_spill] sm:$0xff] }
 0x2ca   :  { %v10183_v48 = vadd.f32 %v13252_v37, %v9741_v41  ;;  %v13259_v37 = vld [vmem:[#allocation77_spill] sm:$0xff] }
 0x2cb   :  { %13251 = vst [vmem:[#allocation70_spill] sm:$0xff] %v10179_v19 }
 0x2cc   :  { %v10171_v23 = vpop.permute.xlu0 %2982  ;;  %13253 = vst [vmem:[#allocation146_spill] sm:$0xff] %v10183_v48 }
 0x2cd   :  { %13249 = vst [vmem:[#allocation62_spill] sm:$0xff] %v10171_v23  ;;  %3159 = vperm.xlu1 %7568, %v10165_v26   ;;  %v10174_v34 = vpop.permute.xlu1 %2967  ;;  %3174 = vperm.xlu0 %7567, %v10169_v59   ;;  %v10193_v26 = vadd.f32 %v13254_v50, %v9655_v63  ;;  %v13256_v59 = vld [vmem:[#allocation84_spill] sm:$0xff] }
 0x2ce   :  { %v10197_v20 = vadd.f32 %v13256_v59, %v9727_v36  ;;  %v13263_v59 = vld [vmem:[#allocation79_spill] sm:$0xff] }
 0x2cf   :  { %13255 = vst [vmem:[#allocation63_spill] sm:$0xff] %v10193_v26 }
 0x2d0   :  { %v10185_v14 = vpop.permute.xlu0 %2988  ;;  %13257 = vst [vmem:[#allocation72_spill] sm:$0xff] %v10197_v20 }
 0x2d1   :  { %3165 = vperm.xlu1 %7568, %v10179_v19   ;;  %v10188_v30 = vpop.permute.xlu1 %2973  ;;  %3180 = vperm.xlu0 %7567, %v10183_v48   ;;  %v10207_v19 = vadd.f32 %v13259_v37, %v9697_v3  ;;  %v13261_v48 = vld [vmem:[#allocation86_spill] sm:$0xff] }
 0x2d2   :  { %v10211_v63 = vadd.f32 %v13261_v48, %v9769_v49  ;;  %v13267_v48 = vld [vmem:[#allocation81_spill] sm:$0xff] }
 0x2d3   :  { %13260 = vst [vmem:[#allocation65_spill] sm:$0xff] %v10207_v19 }
 0x2d4   :  { %v10199_v1 = vpop.permute.xlu0 %2994  ;;  %13262 = vst [vmem:[#allocation74_spill] sm:$0xff] %v10211_v63 }
 0x2d5   :  { %3171 = vperm.xlu1 %7568, %v10193_v26   ;;  %v10202_v41 = vpop.permute.xlu1 %2979  ;;  %3186 = vperm.xlu0 %7567, %v10197_v20   ;;  %v10221_v26 = vadd.f32 %v13263_v59, %v9683_v27  ;;  %v13265_v20 = vld [vmem:[#allocation88_spill] sm:$0xff] }
 0x2d6   :  { %13258 = vst [vmem:[#allocation149_spill] sm:$0xff] %v10202_v41  ;;  %v10225_v3 = vadd.f32 %v13265_v20, %v9755_v44  ;;  %v13271_v20 = vld [vmem:[#allocation83_spill] sm:$0xff] }
 0x2d7   :  { %13264 = vst [vmem:[#allocation148_spill] sm:$0xff] %v10221_v26 }
 0x2d8   :  { %v10213_v50 = vpop.permute.xlu0 %3000  ;;  %13266 = vst [vmem:[#allocation67_spill] sm:$0xff] %v10225_v3 }
 0x2d9   :  { %3177 = vperm.xlu1 %7568, %v10207_v19   ;;  %v10216_v36 = vpop.permute.xlu1 %2985  ;;  %3192 = vperm.xlu0 %7567, %v10211_v63   ;;  %v10235_v19 = vadd.f32 %v13267_v48, %v9725_v47  ;;  %v13269_v63 = vld [vmem:[#allocation90_spill] sm:$0xff] }
 0x2da   :  { %v10239_v27 = vadd.f32 %v13269_v63, %v9797_v46  ;;  %v13276_v63 = vld [vmem:[#allocation85_spill] sm:$0xff] }
 0x2db   :  { %13268 = vst [vmem:[#allocation76_spill] sm:$0xff] %v10235_v19 }
 0x2dc   :  { %v10227_v37 = vpop.permute.xlu0 %3006  ;;  %13270 = vst [vmem:[#allocation69_spill] sm:$0xff] %v10239_v27 }
 0x2dd   :  { %3183 = vperm.xlu1 %7568, %v10221_v26   ;;  %v10230_v49 = vpop.permute.xlu1 %2991  ;;  %3198 = vperm.xlu0 %7567, %v10225_v3   ;;  %v10249_v26 = vadd.f32 %v13271_v20, %v9711_v2  ;;  %v13273_v3 = vld [vmem:[#allocation92_spill] sm:$0xff] }
 0x2de   :  { %v10253_v47 = vadd.f32 %v13273_v3, %v9783_v54  ;;  %v13281_v3 = vld [vmem:[#allocation87_spill] sm:$0xff] }
 0x2df   :  { %13272 = vst [vmem:[#allocation78_spill] sm:$0xff] %v10249_v26 }
 0x2e0   :  { %v10241_v59 = vpop.permute.xlu0 %3012  ;;  %13274 = vst [vmem:[#allocation71_spill] sm:$0xff] %v10253_v47 }
 0x2e1   :  { %3189 = vperm.xlu1 %7568, %v10235_v19   ;;  %v10244_v44 = vpop.permute.xlu1 %2997  ;;  %3204 = vperm.xlu0 %7567, %v10239_v27   ;;  %v10263_v19 = vadd.f32 %v13276_v63, %v9753_v45  ;;  %v13278_v27 = vld [vmem:[#allocation94_spill] sm:$0xff] }
 0x2e2   :  { %v10267_v2 = vadd.f32 %v13278_v27, %v9825_v21  ;;  %v13286_v27 = vld [vmem:[#allocation89_spill] sm:$0xff] }
 0x2e3   :  { %13277 = vst [vmem:[#allocation73_spill] sm:$0xff] %v10263_v19 }
 0x2e4   :  { %v10255_v48 = vpop.permute.xlu0 %3018  ;;  %13279 = vst [vmem:[#allocation82_spill] sm:$0xff] %v10267_v2 }
 0x2e5   :  { %13275 = vst [vmem:[#allocation80_spill] sm:$0xff] %v10255_v48  ;;  %3195 = vperm.xlu1 %7568, %v10249_v26   ;;  %v10258_v46 = vpop.permute.xlu1 %3003  ;;  %3210 = vperm.xlu0 %7567, %v10253_v47   ;;  %v10277_v26 = vadd.f32 %v13281_v3, %v9739_v53  ;;  %v13283_v47 = vld [vmem:[#allocation96_spill] sm:$0xff] }
 0x2e6   :  { %v10281_v45 = vadd.f32 %v13283_v47, %v9811_v17  ;;  %v13291_v47 = vld [vmem:[#allocation91_spill] sm:$0xff] }
 0x2e7   :  { %13282 = vst [vmem:[#allocation84_spill] sm:$0xff] %v10277_v26 }
 0x2e8   :  { %v10269_v20 = vpop.permute.xlu0 %3024  ;;  %13284 = vst [vmem:[#allocation77_spill] sm:$0xff] %v10281_v45 }
 0x2e9   :  { %13280 = vst [vmem:[#allocation75_spill] sm:$0xff] %v10269_v20  ;;  %3201 = vperm.xlu1 %7568, %v10263_v19   ;;  %v10272_v54 = vpop.permute.xlu1 %3009  ;;  %3216 = vperm.xlu0 %7567, %v10267_v2   ;;  %v10291_v19 = vadd.f32 %v13286_v27, %v9781_v62  ;;  %v13288_v2 = vld [vmem:[#allocation98_spill] sm:$0xff] }
 0x2ea   :  { %v10295_v53 = vadd.f32 %v13288_v2, %v9853_v0  ;;  %v13296_v2 = vld [vmem:[#allocation93_spill] sm:$0xff] }
 0x2eb   :  { %13287 = vst [vmem:[#allocation79_spill] sm:$0xff] %v10291_v19 }
 0x2ec   :  { %v10283_v63 = vpop.permute.xlu0 %3030  ;;  %13289 = vst [vmem:[#allocation88_spill] sm:$0xff] %v10295_v53 }
 0x2ed   :  { %13285 = vst [vmem:[#allocation86_spill] sm:$0xff] %v10283_v63  ;;  %3207 = vperm.xlu1 %7568, %v10277_v26   ;;  %v10286_v21 = vpop.permute.xlu1 %3015  ;;  %3222 = vperm.xlu0 %7567, %v10281_v45   ;;  %v10305_v26 = vadd.f32 %v13291_v47, %v9767_v39  ;;  %v13293_v45 = vld [vmem:[#allocation100_spill] sm:$0xff] }
 0x2ee   :  { %v10309_v62 = vadd.f32 %v13293_v45, %v9839_v16  ;;  %v13300_v45 = vld [vmem:[#allocation95_spill] sm:$0xff] }
 0x2ef   :  { %13292 = vst [vmem:[#allocation90_spill] sm:$0xff] %v10305_v26 }
 0x2f0   :  { %v10297_v3 = vpop.permute.xlu0 %3036  ;;  %13294 = vst [vmem:[#allocation83_spill] sm:$0xff] %v10309_v62 }
 0x2f1   :  { %3213 = vperm.xlu1 %7568, %v10291_v19   ;;  %v10300_v17 = vpop.permute.xlu1 %3021  ;;  %3228 = vperm.xlu0 %7567, %v10295_v53   ;;  %v10319_v19 = vadd.f32 %v13296_v2, %v9809_v29  ;;  %v13298_v53 = vld [vmem:[#allocation102_spill] sm:$0xff] }
 0x2f2   :  { %13290 = vst [vmem:[#allocation81_spill] sm:$0xff] %v10300_v17  ;;  %v10323_v39 = vadd.f32 %v13298_v53, %v9881_v7  ;;  %v13304_v53 = vld [vmem:[#allocation97_spill] sm:$0xff] }
 0x2f3   :  { %13297 = vst [vmem:[#allocation85_spill] sm:$0xff] %v10319_v19 }
 0x2f4   :  { %v10311_v27 = vpop.permute.xlu0 %3042  ;;  %13299 = vst [vmem:[#allocation94_spill] sm:$0xff] %v10323_v39 }
 0x2f5   :  { %3219 = vperm.xlu1 %7568, %v10305_v26   ;;  %v10314_v0 = vpop.permute.xlu1 %3027  ;;  %3234 = vperm.xlu0 %7567, %v10309_v62   ;;  %v10333_v26 = vadd.f32 %v13300_v45, %v9795_v12  ;;  %v13302_v62 = vld [vmem:[#allocation104_spill] sm:$0xff] }
 0x2f6   :  { %13295 = vst [vmem:[#allocation92_spill] sm:$0xff] %v10314_v0  ;;  %v10337_v29 = vadd.f32 %v13302_v62, %v9867_v15  ;;  %v13308_v62 = vld [vmem:[#allocation99_spill] sm:$0xff] }
 0x2f7   :  { %13301 = vst [vmem:[#allocation87_spill] sm:$0xff] %v10333_v26 }
 0x2f8   :  { %v10325_v47 = vpop.permute.xlu0 %3048  ;;  %13303 = vst [vmem:[#allocation96_spill] sm:$0xff] %v10337_v29 }
 0x2f9   :  { %3225 = vperm.xlu1 %7568, %v10319_v19   ;;  %v10328_v16 = vpop.permute.xlu1 %3033  ;;  %3240 = vperm.xlu0 %7567, %v10323_v39   ;;  %v10347_v19 = vadd.f32 %v13304_v53, %v9837_v35  ;;  %v13306_v39 = vld [vmem:[#allocation106_spill] sm:$0xff] }
 0x2fa   :  { %v10351_v12 = vadd.f32 %v13306_v39, %v9909_v42  ;;  %v13313_v39 = vld [vmem:[#allocation29_spill] sm:$0xff] }
 0x2fb   :  { %13305 = vst [vmem:[#allocation89_spill] sm:$0xff] %v10347_v19 }
 0x2fc   :  { %v10339_v2 = vpop.permute.xlu0 %3054  ;;  %13307 = vst [vmem:[#allocation98_spill] sm:$0xff] %v10351_v12 }
 0x2fd   :  { %3231 = vperm.xlu1 %7568, %v10333_v26   ;;  %v10342_v7 = vpop.permute.xlu1 %3039  ;;  %3246 = vperm.xlu0 %7567, %v10337_v29   ;;  %v10361_v26 = vadd.f32 %v13308_v62, %v9823_v32  ;;  %v13310_v29 = vld [vmem:[#allocation108_spill] sm:$0xff] }
 0x2fe   :  { %v10365_v35 = vadd.f32 %v13310_v29, %v9895_v31  ;;  %v13319_v29 = vld [vmem:[#allocation126_spill] sm:$0xff] }
 0x2ff   :  { %13309 = vst [vmem:[#allocation91_spill] sm:$0xff] %v10361_v26 }
 0x300   :  { %v10353_v45 = vpop.permute.xlu0 %3060  ;;  %13311 = vst [vmem:[#allocation100_spill] sm:$0xff] %v10365_v35 }
 0x301   :  { %3237 = vperm.xlu1 %7568, %v10347_v19   ;;  %v10356_v15 = vpop.permute.xlu1 %3045  ;;  %3252 = vperm.xlu0 %7567, %v10351_v12   ;;  %v13314_v19 = vld [vmem:[#allocation101_spill] sm:$0xff]  ;;  %v13316_v12 = vld [vmem:[#allocation110_spill] sm:$0xff] }
 0x302   :  { %v10375_v63 = vadd.f32 %v13314_v19, %v13313_v39  ;;  %v10379_v32 = vadd.f32 %v13316_v12, %v9937_v55  ;;  %v13325_v12 = vld [vmem:[#allocation26_spill] sm:$0xff] }
 0x304   :  { %v10367_v53 = vpop.permute.xlu0 %3066  ;;  %13315 = vst [vmem:[#allocation102_spill] sm:$0xff] %v10375_v63  ;;  %13317 = vst [vmem:[#allocation95_spill] sm:$0xff] %v10379_v32 }
 0x305   :  { %13312 = vst [vmem:[#allocation93_spill] sm:$0xff] %v10367_v53  ;;  %3243 = vperm.xlu1 %7568, %v10361_v26   ;;  %v10370_v42 = vpop.permute.xlu1 %3051  ;;  %3258 = vperm.xlu0 %7567, %v10365_v35   ;;  %v13320_v26 = vld [vmem:[#allocation103_spill] sm:$0xff]  ;;  %v13322_v35 = vld [vmem:[#allocation112_spill] sm:$0xff] }
 0x306   :  { %v10389_v20 = vadd.f32 %v13320_v26, %v13319_v29  ;;  %v10393_v19 = vadd.f32 %v13322_v35, %v9923_v61  ;;  %v13331_v35 = vld [vmem:[#allocation133_spill] sm:$0xff] }
 0x308   :  { %v10381_v62 = vpop.permute.xlu0 %3072  ;;  %13321 = vst [vmem:[#allocation97_spill] sm:$0xff] %v10389_v20  ;;  %13323 = vst [vmem:[#allocation106_spill] sm:$0xff] %v10393_v19 }
 0x309   :  { %13318 = vst [vmem:[#allocation104_spill] sm:$0xff] %v10381_v62  ;;  %3249 = vperm.xlu1 %7568, %v10375_v63   ;;  %v10384_v31 = vpop.permute.xlu1 %3057  ;;  %3264 = vperm.xlu0 %7567, %v10379_v32   ;;  %v13326_v63 = vld [vmem:[#allocation105_spill] sm:$0xff]  ;;  %v13328_v32 = vld [vmem:[#allocation114_spill] sm:$0xff] }
 0x30a   :  { %v10403_v62 = vadd.f32 %v13326_v63, %v13325_v12  ;;  %v10407_v26 = vadd.f32 %v13328_v32, %v9966_v5  ;;  %v13337_v32 = vld [vmem:[#allocation109_spill] sm:$0xff] }
 0x30c   :  { %v10395_v39 = vpop.permute.xlu0 %3078  ;;  %13327 = vst [vmem:[#allocation108_spill] sm:$0xff] %v10403_v62  ;;  %13329 = vst [vmem:[#allocation29_spill] sm:$0xff] %v10407_v26 }
 0x30d   :  { %13324 = vst [vmem:[#allocation99_spill] sm:$0xff] %v10395_v39  ;;  %3255 = vperm.xlu1 %7568, %v10389_v20   ;;  %v10398_v55 = vpop.permute.xlu1 %3063  ;;  %3270 = vperm.xlu0 %7567, %v10393_v19   ;;  %v13332_v20 = vld [vmem:[#allocation107_spill] sm:$0xff]  ;;  %v13334_v19 = vld [vmem:[#allocation116_spill] sm:$0xff] }
 0x30e   :  { %v10417_v39 = vadd.f32 %v13332_v20, %v13331_v35  ;;  %v10421_v63 = vadd.f32 %v13334_v19, %v9951_v43  ;;  %v13341_v19 = vld [vmem:[#allocation127_spill] sm:$0xff] }
 0x310   :  { %v10409_v29 = vpop.permute.xlu0 %3084  ;;  %13333 = vst [vmem:[#allocation110_spill] sm:$0xff] %v10417_v39  ;;  %13335 = vst [vmem:[#allocation126_spill] sm:$0xff] %v10421_v63 }
 0x311   :  { %3261 = vperm.xlu1 %7568, %v10403_v62   ;;  %v10412_v61 = vpop.permute.xlu1 %3069  ;;  %3276 = vperm.xlu0 %7567, %v10407_v26   ;;  %v10431_v62 = vadd.f32 %v13337_v32, %v9921_v8  ;;  %v13339_v26 = vld [vmem:[#allocation118_spill] sm:$0xff] }
 0x312   :  { %13330 = vst [vmem:[#allocation101_spill] sm:$0xff] %v10412_v61  ;;  %v10435_v20 = vadd.f32 %v13339_v26, %v9994_v13  ;;  %v13347_v26 = vld [vmem:[#allocation113_spill] sm:$0xff] }
 0x313   :  { %13338 = vst [vmem:[#allocation112_spill] sm:$0xff] %v10431_v62 }
 0x314   :  { %v10423_v12 = vpop.permute.xlu0 %3090  ;;  %13340 = vst [vmem:[#allocation26_spill] sm:$0xff] %v10435_v20 }
 0x315   :  { %3267 = vperm.xlu1 %7568, %v10417_v39   ;;  %v10426_v5 = vpop.permute.xlu1 %3075  ;;  %3282 = vperm.xlu0 %7567, %v10421_v63   ;;  %v13342_v39 = vld [vmem:[#allocation111_spill] sm:$0xff] }
 0x316   :  { %13336 = vst [vmem:[#allocation103_spill] sm:$0xff] %v10426_v5  ;;  %v10445_v5 = vadd.f32 %v13342_v39, %v13341_v19  ;;  %v13344_v63 = vld [vmem:[#allocation119_spill] sm:$0xff] }
 0x317   :  { %v10449_v8 = vadd.f32 %v13344_v63, %v9980_v10  ;;  %v13352_v63 = vld [vmem:[#allocation115_spill] sm:$0xff] }
 0x318   :  { %v10437_v35 = vpop.permute.xlu0 %3096  ;;  %13343 = vst [vmem:[#allocation105_spill] sm:$0xff] %v10445_v5 }
 0x319   :  { %v10439_v43 = vpop.permute.xlu1 %3081  ;;  %3273 = vperm.xlu1 %7568, %v10431_v62   ;;  %3288 = vperm.xlu0 %7567, %v10435_v20   ;;  %13345 = vst [vmem:[#allocation114_spill] sm:$0xff] %v10449_v8  ;;  %v10459_v62 = vadd.f32 %v13347_v26, %v9949_v25  ;;  %v13349_v20 = vld [vmem:[#allocation120_spill] sm:$0xff]  ;;  %v10477_v25 = vadd.f32 %v10062_v52, %v10008_v51  ;;  %v13361_v52 = vld [vmem:[#allocation39_spill] sm:$0xff] }
 0x31a   :  { %v10463_v39 = vadd.f32 %v13349_v20, %v10022_v9  ;;  %v13356_v20 = vld [vmem:[#allocation117_spill] sm:$0xff] }
 0x31b   :  { %13348 = vst [vmem:[#allocation107_spill] sm:$0xff] %v10459_v62  ;;  %13354 = vst [vmem:[#allocation127_spill] sm:$0xff] %v10477_v25 }
 0x31c   :  { %v10451_v32 = vpop.permute.xlu0 %3102  ;;  %13350 = vst [vmem:[#allocation116_spill] sm:$0xff] %v10463_v39 }
 0x31d   :  { %13346 = vst [vmem:[#allocation133_spill] sm:$0xff] %v10451_v32  ;;  %v10453_v13 = vpop.permute.xlu1 %3087  ;;  %3279 = vperm.xlu1 %7568, %v10445_v5   ;;  %3294 = vperm.xlu0 %7567, %v10449_v8   ;;  %v10473_v5 = vadd.f32 %v13352_v63, %v9935_v11  ;;  %v10487_v8 = vadd.f32 %v13356_v20, %v9977_v40 }
 0x31e   :  { %v10491_v11 = vadd.f32 %v10076_v60, %v10048_v18  ;;  %v10505_v40 = vadd.f32 %v10090_v38, %v10034_v33  ;;  %v13367_v60 = vld [vmem:[#allocation45_spill] sm:$0xff]  ;;  %v13372_v33 = vld [vmem:[#allocation36_spill] sm:$0xff] }
 0x31f   :  { %13353 = vst [vmem:[#allocation118_spill] sm:$0xff] %v10473_v5  ;;  %13357 = vst [vmem:[#allocation119_spill] sm:$0xff] %v10487_v8  ;;  %v13373_v38 = vld [vmem:[#allocation48_spill] sm:$0xff] }
 0x320   :  { %v10465_v19 = vpop.permute.xlu0 %3108  ;;  %13358 = vst [vmem:[#allocation113_spill] sm:$0xff] %v10491_v11  ;;  %13364 = vst [vmem:[#allocation39_spill] sm:$0xff] %v10505_v40 }
 0x321   :  { %13351 = vst [vmem:[#allocation109_spill] sm:$0xff] %v10465_v19  ;;  %v10467_v10 = vpop.permute.xlu1 %3093  ;;  %3285 = vperm.xlu1 %7568, %v10459_v62   ;;  %3300 = vperm.xlu0 %7567, %v10463_v39   ;;  %v13362_v39 = vld [vmem:[#allocation47_spill] sm:$0xff] }
 0x324   :  { %v10479_v26 = vpop.permute.xlu0 %3114 }
 0x325   :  { %13355 = vst [vmem:[#allocation111_spill] sm:$0xff] %v10479_v26  ;;  %v10481_v9 = vpop.permute.xlu1 %3099  ;;  %3291 = vperm.xlu1 %7568, %v10473_v5   ;;  %3306 = vperm.xlu0 %7567, %v10477_v25   ;;  %v10501_v5 = vadd.f32 %v13362_v39, %v13361_v52  ;;  %v13368_v25 = vld [vmem:[#allocation44_spill] sm:$0xff]  ;;  %v10524_v52 = vadd.f32 %v13373_v38, %v13372_v33 }
 0x327   :  { %13363 = vst [vmem:[#allocation117_spill] sm:$0xff] %v10501_v5  ;;  %13374 = vst [vmem:[#allocation36_spill] sm:$0xff] %v10524_v52 }
 0x328   :  { %v10493_v63 = vpop.permute.xlu0 %3120 }
 0x329   :  { %13359 = vst [vmem:[#allocation120_spill] sm:$0xff] %v10493_v63  ;;  %v10495_v51 = vpop.permute.xlu1 %3105  ;;  %3297 = vperm.xlu1 %7568, %v10487_v8   ;;  %3312 = vperm.xlu0 %7567, %v10491_v11   ;;  %v10515_v8 = vadd.f32 %v13368_v25, %v13367_v60 }
 0x32a   :  { %13360 = vst [vmem:[#allocation115_spill] sm:$0xff] %v10495_v51 }
 0x32b   :  { %13369 = vst [vmem:[#allocation45_spill] sm:$0xff] %v10515_v8 }
 0x32c   :  { %v10507_v20 = vpop.permute.xlu0 %3126 }
 0x32d   :  { %13365 = vst [vmem:[#allocation47_spill] sm:$0xff] %v10507_v20  ;;  %v10509_v18 = vpop.permute.xlu1 %3111  ;;  %3303 = vperm.xlu1 %7568, %v10501_v5   ;;  %3318 = vperm.xlu0 %7567, %v10505_v40  }
 0x32e   :  { %13366 = vst [vmem:[#allocation169_spill] sm:$0xff] %v10509_v18 }
 0x330   :  { %v10517_v11 = vpop.permute.xlu0 %3132 }
 0x331   :  { %13370 = vst [vmem:[#allocation44_spill] sm:$0xff] %v10517_v11  ;;  %v10519_v39 = vpop.permute.xlu1 %3117  ;;  %3309 = vperm.xlu1 %7568, %v10515_v8  }
 0x332   :  { %13371 = vst [vmem:[#allocation170_spill] sm:$0xff] %v10519_v39 }
 0x334   :  { %v10526_v62 = vpop.permute.xlu0 %3138 }
 0x335   :  { %13375 = vst [vmem:[#allocation48_spill] sm:$0xff] %v10526_v62  ;;  %v10528_v20 = vpop.permute.xlu1 %3123  ;;  %3315 = vperm.xlu1 %7568, %v10524_v52  }
 0x336   :  { %13376 = vst [vmem:[#allocation171_spill] sm:$0xff] %v10528_v20 }
 0x338   :  { %v10531_v40 = vpop.permute.xlu0 %3144 }
 0x339   :  { %13377 = vst [vmem:[#allocation172_spill] sm:$0xff] %v10531_v40  ;;  %v10533_v25 = vpop.permute.xlu1 %3129 }
 0x33a   :  { %13378 = vst [vmem:[#allocation173_spill] sm:$0xff] %v10533_v25 }
 0x33c   :  { %v10535_v60 = vpop.permute.xlu0 %3150 }
 0x33d   :  { %13379 = vst [vmem:[#allocation174_spill] sm:$0xff] %v10535_v60  ;;  %v10537_v5 = vpop.permute.xlu1 %3135 }
 0x33e   :  { %13380 = vst [vmem:[#allocation175_spill] sm:$0xff] %v10537_v5 }
 0x340   :  { %v10539_v63 = vpop.permute.xlu0 %3156 }
 0x341   :  { %13381 = vst [vmem:[#allocation176_spill] sm:$0xff] %v10539_v63  ;;  %v10541_v8 = vpop.permute.xlu1 %3141 }
 0x342   :  { %13382 = vst [vmem:[#allocation177_spill] sm:$0xff] %v10541_v8 }
 0x344   :  { %v10543_v33 = vpop.permute.xlu0 %3162 }
 0x345   :  { %13383 = vst [vmem:[#allocation178_spill] sm:$0xff] %v10543_v33  ;;  %v10545_v38 = vpop.permute.xlu1 %3147 }
 0x346   :  { %13384 = vst [vmem:[#allocation179_spill] sm:$0xff] %v10545_v38 }
 0x348   :  { %v10547_v62 = vpop.permute.xlu0 %3168 }
 0x349   :  { %13385 = vst [vmem:[#allocation180_spill] sm:$0xff] %v10547_v62  ;;  %v10549_v20 = vpop.permute.xlu1 %3153 }
 0x34a   :  { %13386 = vst [vmem:[#allocation181_spill] sm:$0xff] %v10549_v20 }
 0x34c   :  { %v10551_v52 = vpop.permute.xlu0 %3174 }
 0x34d   :  { %13387 = vst [vmem:[#allocation182_spill] sm:$0xff] %v10551_v52  ;;  %v10553_v40 = vpop.permute.xlu1 %3159 }
 0x34e   :  { %13388 = vst [vmem:[#allocation183_spill] sm:$0xff] %v10553_v40 }
 0x350   :  { %v10555_v11 = vpop.permute.xlu0 %3180 }
 0x351   :  { %13389 = vst [vmem:[#allocation184_spill] sm:$0xff] %v10555_v11  ;;  %v10557_v60 = vpop.permute.xlu1 %3165 }
 0x352   :  { %13390 = vst [vmem:[#allocation185_spill] sm:$0xff] %v10557_v60  ;;  %v13401_v60 = vlaneseq }
 0x354   :  { %v10559_v5 = vpop.permute.xlu0 %3186 }
 0x355   :  { %13391 = vst [vmem:[#allocation186_spill] sm:$0xff] %v10559_v5  ;;  %v10561_v63 = vpop.permute.xlu1 %3171  ;;  %v10580_v5 = vand.u32 127, %v13401_v60 }
 0x356   :  { %13392 = vst [vmem:[#allocation187_spill] sm:$0xff] %v10561_v63 }
 0x357   :  { %v3368_v60 = vadd.s32 4294967240, %v10580_v5  ;;  %v3361_v0 = vadd.s32 4294967248, %v10580_v5 }
 0x358   :  { %v10563_v8 = vpop.permute.xlu0 %3192 }
 0x359   :  { %13393 = vst [vmem:[#allocation188_spill] sm:$0xff] %v10563_v8  ;;  %v10565_v33 = vpop.permute.xlu1 %3177  ;;  %v3326_v8 = vadd.s32 4294967288, %v10580_v5 }
 0x35a   :  { %13394 = vst [vmem:[#allocation189_spill] sm:$0xff] %v10565_v33 }
 0x35c   :  { %v10567_v38 = vpop.permute.xlu0 %3198 }
 0x35d   :  { %13395 = vst [vmem:[#allocation190_spill] sm:$0xff] %v10567_v38  ;;  %v10569_v62 = vpop.permute.xlu1 %3183  ;;  %v3333_v38 = vadd.s32 4294967280, %v10580_v5 }
 0x35e   :  { %13396 = vst [vmem:[#allocation191_spill] sm:$0xff] %v10569_v62  ;;  %v3340_v62 = vadd.s32 4294967272, %v10580_v5 }
 0x360   :  { %v10571_v20 = vpop.permute.xlu0 %3204 }
 0x361   :  { %13397 = vst [vmem:[#allocation192_spill] sm:$0xff] %v10571_v20  ;;  %v10573_v52 = vpop.permute.xlu1 %3189 }
 0x362   :  { %13398 = vst [vmem:[#allocation193_spill] sm:$0xff] %v10573_v52  ;;  %v3354_v52 = vadd.s32 4294967256, %v10580_v5 }
 0x364   :  { %v10575_v40 = vpop.permute.xlu0 %3210 }
 0x365   :  { %13399 = vst [vmem:[#allocation194_spill] sm:$0xff] %v10575_v40  ;;  %v10577_v11 = vpop.permute.xlu1 %3195  ;;  %v13405_v40 = vld [vmem:[#allocation13_spill] sm:$0xff] }
 0x366   :  { %13400 = vst [vmem:[#allocation195_spill] sm:$0xff] %v10577_v11  ;;  %v10593_v25 = vsub.s32 %v3326_v8, %v13405_v40  ;;  %v10604_v26 = vsub.s32 %v10580_v5, %v13405_v40  ;;  %v10608_v39 = vsub.s32 %v3340_v62, %v13405_v40  ;;  %v3396_v8 = vadd.s32 4294967208, %v10580_v5 }
 0x367   :  { %v10622_v53 = vsub.s32 %v3368_v60, %v13405_v40  ;;  %v10643_v48 = vsub.s32 %v3361_v0, %v13405_v40  ;;  %v3389_v0 = vadd.s32 4294967216, %v10580_v5 }
 0x368   :  { %v10582_v63 = vpop.permute.xlu0 %3216  ;;  %13406 = vst [vmem:[#allocation13_spill] sm:$0xff] %v10593_v25  ;;  %13409 = vst [vmem:[#allocation201_spill] sm:$0xff] %v10608_v39  ;;  %v10636_v60 = vsub.s32 %v3396_v8, %v13405_v40 }
 0x369   :  { %13402 = vst [vmem:[#allocation196_spill] sm:$0xff] %v10582_v63  ;;  %v10585_v33 = vpop.permute.xlu1 %3201  ;;  %v10599_v63 = vsub.s32 %v3333_v38, %v13405_v40  ;;  %v3330_v38 = vrot.slane %v10104_v4, %v10593_v25  ;;  %13413 = vst [vmem:[#allocation205_spill] sm:$0xff] %v10622_v53 }
 0x36a   :  { %13403 = vst [vmem:[#allocation197_spill] sm:$0xff] %v10585_v33  ;;  %v3347_v33 = vadd.s32 4294967264, %v10580_v5  ;;  %13417 = vst [vmem:[#allocation207_spill] sm:$0xff] %v10636_v60 }
 0x36b   :  { %13408 = vst [vmem:[#allocation200_spill] sm:$0xff] %v10599_v63  ;;  %v3337_v62 = vrot.slane %v10118_v22, %v10599_v63  ;;  %v3375_v22 = vadd.s32 4294967232, %v10580_v5  ;;  %13419 = vst [vmem:[#allocation209_spill] sm:$0xff] %v10643_v48 }
 0x36c   :  { %v10589_v20 = vpop.permute.xlu0 %3222  ;;  %v10627_v23 = vsub.s32 %v3347_v33, %v13405_v40 }
 0x36d   :  { %13404 = vst [vmem:[#allocation198_spill] sm:$0xff] %v10589_v20  ;;  %v10595_v11 = vpop.permute.xlu1 %3207  ;;  %v3382_v20 = vadd.s32 4294967224, %v10580_v5 }
 0x36e   :  { %13407 = vst [vmem:[#allocation199_spill] sm:$0xff] %v10595_v11  ;;  %v10614_v11 = vsub.s32 %v3354_v52, %v13405_v40  ;;  %13414 = vst [vmem:[#allocation206_spill] sm:$0xff] %v10627_v23  ;;  %v3410_v52 = vadd.s32 4294967192, %v10580_v5  ;;  %v3351_v8 = vrot.slane %v10132_v56, %v10627_v23  ;;  %v3443_v56 = vrot.slane %v10230_v49, %v10599_v63 }
 0x36f   :  { %v10633_v4 = vsub.s32 %v3382_v20, %v13405_v40 }
 0x370   :  { %v10611_v19 = vpop.permute.xlu0 %3228  ;;  %13411 = vst [vmem:[#allocation203_spill] sm:$0xff] %v10614_v11  ;;  %v10652_v17 = vsub.s32 %v3410_v52, %v13405_v40  ;;  %v3513_v52 = vrot.slane %v10328_v16, %v10604_v26  ;;  %v3365_v16 = vrot.slane %v10146_v28, %v10643_v48 }
 0x371   :  { %13410 = vst [vmem:[#allocation202_spill] sm:$0xff] %v10611_v19  ;;  %v10619_v18 = vpop.permute.xlu1 %3213  ;;  %v13415_v19 = vld [vmem:[#allocation50_spill] sm:$0xff] }
 0x372   :  { %13412 = vst [vmem:[#allocation204_spill] sm:$0xff] %v10619_v18  ;;  %v3325_v61 = vrot.slane %v13415_v19, %v10604_v26  ;;  %13416 = vst [vmem:[#allocation50_spill] sm:$0xff] %v10633_v4  ;;  %v3424_v19 = vadd.s32 4294967176, %v10580_v5 }
 0x373   :  { %13421 = vst [vmem:[#allocation211_spill] sm:$0xff] %v10652_v17 }
 0x374   :  { %v10639_v18 = vpop.permute.xlu0 %3234  ;;  %v3332_v33 = vsel %vm3331_vm2, %v3330_v38, %v3325_v61  ;;  %v3434_v38 = vrot.slane %v10216_v36, %v10604_v26  ;;  %v10671_v51 = vsub.s32 %v3424_v19, %v13405_v40  ;;  %v3438_v36 = vrot.slane %v10185_v14, %v10593_v25  ;;  %v13427_v19 = vld [vmem:[#allocation54_spill] sm:$0xff] }
 0x375   :  { %13418 = vst [vmem:[#allocation208_spill] sm:$0xff] %v10639_v18  ;;  %v10646_v20 = vpop.permute.xlu1 %3219  ;;  %v3339_v32 = vsel %vm3338_vm3, %v3337_v62, %v3332_v33  ;;  %v13422_v18 = vld [vmem:[#allocation52_spill] sm:$0xff]  ;;  %v3403_v62 = vadd.s32 4294967200, %v10580_v5  ;;  %v3417_v14 = vadd.s32 4294967184, %v10580_v5 }
 0x376   :  { %13420 = vst [vmem:[#allocation210_spill] sm:$0xff] %v10646_v20  ;;  %v3344_v61 = vrot.slane %v13422_v18, %v10608_v39  ;;  %v10660_v20 = vsub.s32 %v3375_v22, %v13405_v40  ;;  %13425 = vst [vmem:[#allocation213_spill] sm:$0xff] %v10671_v51  ;;  %v3522_v22 = vrot.slane %v10342_v7, %v10599_v63 }
 0x377   :  { %v3439_v7 = vsel %vm3331_vm2, %v3438_v36, %v3434_v38  ;;  %v3532_v38 = vrot.slane %v10356_v15, %v10627_v23  ;;  %v3592_v36 = vrot.slane %v10439_v43, %v10604_v26  ;;  %v10718_v15 = vsub.s32 %v3417_v14, %v13405_v40 }
 0x378   :  { %13423 = vst [vmem:[#allocation52_spill] sm:$0xff] %v10660_v20  ;;  %v10667_v33 = vpop.permute.xlu0 %3240  ;;  %v3346_v18 = vsel %vm12838_vm4, %v3344_v61, %v3339_v32  ;;  %v3517_v32 = vrot.slane %v10297_v3, %v10593_v25  ;;  %v3358_v61 = vrot.slane %v13427_v19, %v10614_v11  ;;  %v3444_v28 = vsel %vm3338_vm3, %v3443_v56, %v3439_v7 }
 0x379   :  { %13424 = vst [vmem:[#allocation212_spill] sm:$0xff] %v10667_v33  ;;  %v10677_v41 = vpop.permute.xlu1 %3225  ;;  %v3353_v49 = vsel %vm12835_vm5, %v3351_v8, %v3346_v18  ;;  %v10687_v33 = vsub.s32 %v3389_v0, %v13405_v40  ;;  %v10692_v8 = vsub.s32 %v3403_v62, %v13405_v40  ;;  %v3453_v18 = vrot.slane %v10244_v44, %v10627_v23 }
 0x37a   :  { %13426 = vst [vmem:[#allocation214_spill] sm:$0xff] %v10677_v41  ;;  %v3518_v3 = vsel %vm3331_vm2, %v3517_v32, %v3513_v52  ;;  %v3360_v0 = vsel %vm12836_vm6, %v3358_v61, %v3353_v49  ;;  %v3448_v19 = vrot.slane %v10199_v1, %v10608_v39  ;;  %v3379_v44 = vrot.slane %v10160_v24, %v10660_v20  ;;  %v13430_v1 = vld [vmem:[#allocation56_spill] sm:$0xff] }
 0x37b   :  { %13428 = vst [vmem:[#allocation54_spill] sm:$0xff] %v10687_v33  ;;  %13429 = vst [vmem:[#allocation215_spill] sm:$0xff] %v10692_v8  ;;  %v3523_v5 = vsel %vm3338_vm3, %v3522_v22, %v3518_v3  ;;  %v3367_v56 = vsel %vm12837_vm7, %v3365_v16, %v3360_v0  ;;  %v3527_v52 = vrot.slane %v10311_v27, %v10608_v39 }
 0x37c   :  { %v10698_v41 = vpop.permute.xlu0 %3246  ;;  %v3372_v22 = vrot.slane %v13430_v1, %v10622_v53  ;;  %13431 = vst [vmem:[#allocation56_spill] sm:$0xff] %v10718_v15  ;;  %v3449_v49 = vsel %vm12838_vm4, %v3448_v19, %v3444_v28  ;;  %v3601_v16 = vrot.slane %v10453_v13, %v10599_v63  ;;  %v3463_v27 = vrot.slane %v10258_v46, %v10643_v48 }
 0x37d   :  { %v10706_v62 = vpop.permute.xlu1 %3231  ;;  %v3454_v24 = vsel %vm12835_vm5, %v3453_v18, %v3449_v49  ;;  %v3528_v32 = vsel %vm12838_vm4, %v3527_v52, %v3523_v5  ;;  %v3596_v43 = vrot.slane %v10409_v29, %v10593_v25  ;;  %v3458_v7 = vrot.slane %v10213_v50, %v10614_v11 }
 0x37e   :  { %v3374_v14 = vsel %vm3373_vm8, %v3372_v22, %v3367_v56  ;;  %v3533_v28 = vsel %vm12835_vm5, %v3532_v38, %v3528_v32  ;;  %v3542_v13 = vrot.slane %v10370_v42, %v10643_v48  ;;  %v3393_v3 = vrot.slane %v10174_v34, %v10687_v33 }
 0x37f   :  { %v3381_v46 = vsel %vm3380_vm9, %v3379_v44, %v3374_v14  ;;  %v3537_v29 = vrot.slane %v10325_v47, %v10614_v11  ;;  %v3597_v0 = vsel %vm3331_vm2, %v3596_v43, %v3592_v36  ;;  %v3386_v50 = vrot.slane %v10129_v6, %v10633_v4 }
 0x380   :  { %v10729_v61 = vpop.permute.xlu0 %3252  ;;  %v3459_v19 = vsel %vm12836_vm6, %v3458_v7, %v3454_v24  ;;  %v3602_v42 = vsel %vm3338_vm3, %v3601_v16, %v3597_v0  ;;  %v3611_v5 = vrot.slane %v10467_v10, %v10627_v23  ;;  %v3473_v34 = vrot.slane %v10272_v54, %v10660_v20 }
 0x381   :  { %v10737_v18 = vpop.permute.xlu1 %3237  ;;  %v3464_v38 = vsel %vm12837_vm7, %v3463_v27, %v3459_v19  ;;  %v3538_v47 = vsel %vm12836_vm6, %v3537_v29, %v3533_v28  ;;  %v3606_v56 = vrot.slane %v10423_v12, %v10608_v39  ;;  %v3388_v44 = vsel %vm3387_vm10, %v3386_v50, %v3381_v46 }
 0x382   :  { %v3468_v52 = vrot.slane %v10227_v37, %v10622_v53  ;;  %v3543_v10 = vsel %vm12837_vm7, %v3542_v13, %v3538_v47  ;;  %v3552_v36 = vrot.slane %v10384_v31, %v10660_v20  ;;  %v3395_v54 = vsel %vm3394_vm11, %v3393_v3, %v3388_v44  ;;  %v13432_v3 = vld [vmem:[#allocation149_spill] sm:$0xff]  ;;  %v13436_v47 = vld [vmem:[#allocation80_spill] sm:$0xff] }
 0x383   :  { %v3407_v22 = vrot.slane %v10188_v30, %v10692_v8  ;;  %v3547_v12 = vrot.slane %v10339_v2, %v10622_v53  ;;  %v3607_v49 = vsel %vm12838_vm4, %v3606_v56, %v3602_v42  ;;  %v3400_v37 = vrot.slane %v10143_v58, %v10636_v60 }
 0x384   :  { %v10757_v6 = vpop.permute.xlu0 %3258  ;;  %v3469_v16 = vsel %vm3373_vm8, %v3468_v52, %v3464_v38  ;;  %v3612_v24 = vsel %vm12835_vm5, %v3611_v5, %v3607_v49  ;;  %v3621_v31 = vrot.slane %v10481_v9, %v10643_v48  ;;  %v3483_v30 = vrot.slane %v10286_v21, %v10687_v33  ;;  %v13437_v52 = vld [vmem:[#allocation101_spill] sm:$0xff] }
 0x385   :  { %v10765_v1 = vpop.permute.xlu1 %3243  ;;  %v3474_v27 = vsel %vm3380_vm9, %v3473_v34, %v3469_v16  ;;  %v3548_v32 = vsel %vm3373_vm8, %v3547_v12, %v3543_v10  ;;  %v3616_v2 = vrot.slane %v10437_v35, %v10614_v11  ;;  %v3402_v58 = vsel %vm12839_vm12, %v3400_v37, %v3395_v54  ;;  %v13438_v54 = vld [vmem:[#allocation62_spill] sm:$0xff]  ;;  %v13439_v49 = vld [vmem:[#allocation93_spill] sm:$0xff] }
 0x386   :  { %v3478_v14 = vrot.slane %v10241_v59, %v10633_v4  ;;  %v3553_v7 = vsel %vm3380_vm9, %v3552_v36, %v3548_v32  ;;  %v3562_v9 = vrot.slane %v10398_v55, %v10687_v33  ;;  %v3414_v21 = vrot.slane %v10157_v57, %v10652_v17  ;;  %v13433_v55 = vld [vmem:[#allocation115_spill] sm:$0xff]  ;;  %v13434_v57 = vld [vmem:[#allocation81_spill] sm:$0xff] }
 0x387   :  { %v3409_v13 = vsel %vm3408_vm13, %v3407_v22, %v3402_v58  ;;  %v3557_v35 = vrot.slane %v10353_v45, %v10633_v4  ;;  %v3617_v46 = vsel %vm12836_vm6, %v3616_v2, %v3612_v24  ;;  %v3421_v59 = vrot.slane %v13432_v3, %v10718_v15  ;;  %v13435_v45 = vld [vmem:[#allocation133_spill] sm:$0xff]  ;;  %v13441_v58 = vld [vmem:[#allocation92_spill] sm:$0xff] }
 0x388   :  { %v10785_v43 = vpop.permute.xlu0 %3264  ;;  %v3479_v29 = vsel %vm3387_vm10, %v3478_v14, %v3474_v27  ;;  %v3622_v0 = vsel %vm12837_vm7, %v3621_v31, %v3617_v46  ;;  %v3631_v50 = vrot.slane %v13433_v55, %v10660_v20  ;;  %v3493_v42 = vrot.slane %v13434_v57, %v10692_v8 }
 0x389   :  { %v10793_v28 = vpop.permute.xlu1 %3249  ;;  %v3484_v19 = vsel %vm3394_vm11, %v3483_v30, %v3479_v29  ;;  %v3558_v5 = vsel %vm3387_vm10, %v3557_v35, %v3553_v7  ;;  %v3626_v38 = vrot.slane %v13435_v45, %v10622_v53  ;;  %v3488_v56 = vrot.slane %v13436_v47, %v10636_v60  ;;  %v13440_v30 = vld [vmem:[#allocation169_spill] sm:$0xff]  ;;  %v13443_v35 = vld [vmem:[#allocation75_spill] sm:$0xff]  ;;  %v13447_v47 = vld [vmem:[#allocation170_spill] sm:$0xff] }
 0x38a   :  { %v3563_v44 = vsel %vm3394_vm11, %v3562_v9, %v3558_v5  ;;  %v3572_v10 = vrot.slane %v13437_v52, %v10692_v8  ;;  %v3428_v22 = vrot.slane %v13438_v54, %v10671_v51  ;;  %v3416_v12 = vsel %vm3415_vm14, %v3414_v21, %v3409_v13  ;;  %v13442_v9 = vld [vmem:[#allocation109_spill] sm:$0xff] }
 0x38b   :  { %v3567_v37 = vrot.slane %v13439_v49, %v10636_v60  ;;  %v3627_v16 = vsel %vm3373_vm8, %v3626_v38, %v3622_v0  ;;  %v3423_v24 = vsel %vm3422_vm15, %v3421_v59, %v3416_v12  ;;  %v3489_v31 = vsel %vm12839_vm12, %v3488_v56, %v3484_v19  ;;  %v13444_v59 = vld [vmem:[#allocation103_spill] sm:$0xff] }
 0x38c   :  { %v10813_v34 = vpop.permute.xlu0 %3270  ;;  %v3632_v27 = vsel %vm3380_vm9, %v3631_v50, %v3627_v16  ;;  %v3641_v32 = vrot.slane %v13440_v30, %v10687_v33  ;;  %v3494_v2 = vsel %vm3408_vm13, %v3493_v42, %v3489_v31  ;;  %v3503_v14 = vrot.slane %v13441_v58, %v10718_v15  ;;  %v13445_v50 = vld [vmem:[#allocation104_spill] sm:$0xff]  ;;  %v13446_v42 = vld [vmem:[#allocation86_spill] sm:$0xff]  ;;  %v13451_v31 = vld [vmem:[#allocation175_spill] sm:$0xff] }
 0x38d   :  { %v10820_v36 = vpop.permute.xlu1 %3255  ;;  %v3568_v7 = vsel %vm12839_vm12, %v3567_v37, %v3563_v44  ;;  %v3636_v21 = vrot.slane %v13442_v9, %v10633_v4  ;;  %v3498_v46 = vrot.slane %v13443_v35, %v10652_v17  ;;  %v3582_v29 = vrot.slane %v13444_v59, %v10718_v15  ;;  %v13450_v37 = vld [vmem:[#allocation99_spill] sm:$0xff]  ;;  %v13452_v30 = vld [vmem:[#allocation189_spill] sm:$0xff]  ;;  %v13453_v58 = vld [vmem:[#allocation44_spill] sm:$0xff] }
 0x38e   :  { %v3573_v3 = vsel %vm3408_vm13, %v3572_v10, %v3568_v7  ;;  %v10849_v55 = vsel %vm3429_vm0, %v3428_v22, %v3423_v24  ;;  %v3577_v19 = vrot.slane %v13445_v50, %v10652_v17  ;;  %v3508_v5 = vrot.slane %v13446_v42, %v10671_v51  ;;  %v13448_v10 = vld [vmem:[#allocation111_spill] sm:$0xff]  ;;  %v13449_v22 = vld [vmem:[#allocation173_spill] sm:$0xff]  ;;  %v13455_v35 = vld [vmem:[#allocation214_spill] sm:$0xff] }
 0x38f   :  { %v3637_v57 = vsel %vm3387_vm10, %v3636_v21, %v3632_v27  ;;  %v3499_v45 = vsel %vm3415_vm14, %v3498_v46, %v3494_v2  ;;  %v3651_v56 = vrot.slane %v13447_v47, %v10692_v8  ;;  %v3646_v54 = vrot.slane %v13448_v10, %v10636_v60  ;;  %v13454_v9 = vld [vmem:[#allocation191_spill] sm:$0xff]  ;;  %v13457_v42 = vld [vmem:[#allocation120_spill] sm:$0xff]  ;;  %v13458_v47 = vld [vmem:[#allocation202_spill] sm:$0xff] }
 0x390   :  { %v10839_v13 = vpop.permute.xlu0 %3276  ;;  %v3642_v38 = vsel %vm3394_vm11, %v3641_v32, %v3637_v57  ;;  %v3504_v44 = vsel %vm3422_vm15, %v3503_v14, %v3499_v45  ;;  %v3578_v52 = vsel %vm3415_vm14, %v3577_v19, %v3573_v3  ;;  %v3671_v12 = vrot.slane %v13449_v22, %v10604_v26 }
 0x391   :  { %v10846_v0 = vpop.permute.xlu1 %3261  ;;  %v3587_v16 = vrot.slane %v13450_v37, %v10671_v51  ;;  %v3583_v24 = vsel %vm3422_vm15, %v3582_v29, %v3578_v52  ;;  %v3680_v27 = vrot.slane %v13451_v31, %v10599_v63  ;;  %v3750_v32 = vrot.slane %v13452_v30, %v10604_v26  ;;  %v13456_v29 = vld [vmem:[#allocation184_spill] sm:$0xff] }
 0x392   :  { %v3675_v14 = vrot.slane %v13453_v58, %v10593_v25  ;;  %v3647_v7 = vsel %vm12839_vm12, %v3646_v54, %v3642_v38  ;;  %v3759_v21 = vrot.slane %v13454_v9, %v10599_v63  ;;  %v3829_v46 = vrot.slane %v13455_v35, %v10604_v26  ;;  %v13462_v58 = vld [vmem:[#allocation186_spill] sm:$0xff]  ;;  %v13463_v9 = vld [vmem:[#allocation171_spill] sm:$0xff] }
 0x393   :  { %v10885_v3 = vsel %vm3429_vm0, %v3508_v5, %v3504_v44  ;;  %v3652_v59 = vsel %vm3408_vm13, %v3651_v56, %v3647_v7  ;;  %v3754_v50 = vrot.slane %v13456_v29, %v10593_v25  ;;  %v3838_v19 = vrot.slane %v10706_v62, %v10599_v63  ;;  %v13459_v56 = vld [vmem:[#allocation48_spill] sm:$0xff]  ;;  %v13460_v62 = vld [vmem:[#allocation177_spill] sm:$0xff] }
 0x394   :  { %v10866_v49 = vpop.permute.xlu0 %3282  ;;  %v10893_v57 = vsel %vm3429_vm0, %v3587_v16, %v3583_v24  ;;  %v3656_v45 = vrot.slane %v13457_v42, %v10652_v17  ;;  %v3676_v38 = vsel %vm3331_vm2, %v3675_v14, %v3671_v12  ;;  %v3833_v5 = vrot.slane %v13458_v47, %v10593_v25  ;;  %v13461_v24 = vld [vmem:[#allocation193_spill] sm:$0xff] }
 0x395   :  { %v10875_v2 = vpop.permute.xlu1 %3267  ;;  %v3685_v52 = vrot.slane %v13459_v56, %v10608_v39  ;;  %v3681_v10 = vsel %vm3338_vm3, %v3680_v27, %v3676_v38  ;;  %v3690_v54 = vrot.slane %v13460_v62, %v10627_v23  ;;  %v3755_v22 = vsel %vm3331_vm2, %v3754_v50, %v3750_v32 }
 0x396   :  { %v10909_v16 = vsel %vm3415_vm14, %v3656_v45, %v3652_v59  ;;  %v3760_v12 = vsel %vm3338_vm3, %v3759_v21, %v3755_v22  ;;  %v3769_v31 = vrot.slane %v13461_v24, %v10627_v23  ;;  %v3834_v30 = vsel %vm3331_vm2, %v3833_v5, %v3829_v46  ;;  %v13464_v21 = vld [vmem:[#allocation172_spill] sm:$0xff]  ;;  %v13466_v45 = vld [vmem:[#allocation179_spill] sm:$0xff] }
 0x397   :  { %v3764_v14 = vrot.slane %v13462_v58, %v10608_v39  ;;  %v3839_v27 = vsel %vm3338_vm3, %v3838_v19, %v3834_v30  ;;  %v3848_v7 = vrot.slane %v10737_v18, %v10627_v23  ;;  %v3661_v35 = vrot.slane %v13463_v9, %v10718_v15  ;;  %v13465_v46 = vld [vmem:[#allocation208_spill] sm:$0xff]  ;;  %v13469_v30 = vld [vmem:[#allocation174_spill] sm:$0xff] }
 0x398   :  { %v10900_v44 = vpop.permute.xlu0 %3288  ;;  %v3695_v59 = vrot.slane %v13464_v21, %v10614_v11  ;;  %v3686_v29 = vsel %vm12838_vm4, %v3685_v52, %v3681_v10  ;;  %v3843_v50 = vrot.slane %v13465_v46, %v10608_v39  ;;  %v3700_v18 = vrot.slane %v13466_v45, %v10643_v48  ;;  %v13467_v52 = vld [vmem:[#allocation195_spill] sm:$0xff]  ;;  %v13471_v46 = vld [vmem:[#allocation181_spill] sm:$0xff]  ;;  %v13487_v9 = vld [vmem:[#allocation182_spill] sm:$0xff] }
 0x399   :  { %v3274_v37 = vpop.permute.xlu1 %3273  ;;  %v3691_v19 = vsel %vm12835_vm5, %v3690_v54, %v3686_v29  ;;  %v3765_v38 = vsel %vm12838_vm4, %v3764_v14, %v3760_v12  ;;  %v3912_v47 = vrot.slane %v10839_v13, %v10593_v25  ;;  %v3779_v10 = vrot.slane %v13467_v52, %v10643_v48  ;;  %v13468_v54 = vld [vmem:[#allocation188_spill] sm:$0xff] }
 0x39a   :  { %v3908_v32 = vrot.slane %v3274_v37, %v10604_v26  ;;  %v3770_v56 = vsel %vm12835_vm5, %v3769_v31, %v3765_v38  ;;  %v3844_v62 = vsel %vm12838_vm4, %v3843_v50, %v3839_v27  ;;  %v3774_v37 = vrot.slane %v13468_v54, %v10614_v11  ;;  %v13470_v14 = vld [vmem:[#allocation212_spill] sm:$0xff] }
 0x39b   :  { %v3849_v24 = vsel %vm12835_vm5, %v3848_v7, %v3844_v62  ;;  %v3858_v12 = vrot.slane %v10765_v1, %v10643_v48  ;;  %v3705_v31 = vrot.slane %v13469_v30, %v10622_v53  ;;  %v3696_v58 = vsel %vm12836_vm6, %v3695_v59, %v3691_v19  ;;  %v13472_v59 = vld [vmem:[#allocation197_spill] sm:$0xff]  ;;  %v13475_v30 = vld [vmem:[#allocation183_spill] sm:$0xff] }
 0x39c   :  { %v10928_v42 = vpop.permute.xlu0 %3294  ;;  %v3913_v13 = vsel %vm3331_vm2, %v3912_v47, %v3908_v32  ;;  %v3853_v27 = vrot.slane %v13470_v14, %v10614_v11  ;;  %v3701_v29 = vsel %vm12837_vm7, %v3700_v18, %v3696_v58  ;;  %v3710_v7 = vrot.slane %v13471_v46, %v10660_v20  ;;  %v13477_v46 = vld [vmem:[#allocation192_spill] sm:$0xff] }
 0x39d   :  { %v3280_v5 = vpop.permute.xlu1 %3279  ;;  %v3775_v50 = vsel %vm12836_vm6, %v3774_v37, %v3770_v56  ;;  %v3922_v1 = vrot.slane %v10866_v49, %v10608_v39  ;;  %v3789_v19 = vrot.slane %v13472_v59, %v10660_v20  ;;  %v3868_v49 = vrot.slane %v10793_v28, %v10660_v20 }
 0x39e   :  { %v3917_v22 = vrot.slane %v3280_v5, %v10599_v63  ;;  %v3780_v45 = vsel %vm12837_vm7, %v3779_v10, %v3775_v50  ;;  %v3854_v38 = vsel %vm12836_vm6, %v3853_v27, %v3849_v24  ;;  %v13473_v5 = vld [vmem:[#allocation190_spill] sm:$0xff]  ;;  %v13474_v10 = vld [vmem:[#allocation176_spill] sm:$0xff]  ;;  %v3706_v54 = vsel %vm3373_vm8, %v3705_v31, %v3701_v29  ;;  %v13476_v31 = vld [vmem:[#allocation199_spill] sm:$0xff] }
 0x39f   :  { %v3784_v52 = vrot.slane %v13473_v5, %v10622_v53  ;;  %v3859_v56 = vsel %vm12837_vm7, %v3858_v12, %v3854_v38  ;;  %v3863_v37 = vrot.slane %v10698_v41, %v10622_v53  ;;  %v3720_v12 = vrot.slane %v13475_v30, %v10687_v33 }
 0x3a0   :  { %v3918_v21 = vsel %vm3338_vm3, %v3917_v22, %v3913_v13  ;;  %v10963_v47 = vpop.permute.xlu0 %3300  ;;  %v3715_v22 = vrot.slane %v13474_v10, %v10633_v4  ;;  %v3711_v13 = vsel %vm3380_vm9, %v3710_v7, %v3706_v54  ;;  %v3932_v28 = vrot.slane %v10900_v44, %v10614_v11 }
 0x3a1   :  { %v3286_v32 = vpop.permute.xlu1 %3285  ;;  %v3923_v62 = vsel %vm12838_vm4, %v3922_v1, %v3918_v21  ;;  %v3785_v58 = vsel %vm3373_vm8, %v3784_v52, %v3780_v45  ;;  %v3799_v21 = vrot.slane %v13476_v31, %v10687_v33  ;;  %v3864_v41 = vsel %vm3373_vm8, %v3863_v37, %v3859_v56  ;;  %v13479_v52 = vld [vmem:[#allocation185_spill] sm:$0xff] }
 0x3a2   :  { %v3927_v18 = vrot.slane %v3286_v32, %v10627_v23  ;;  %v3790_v27 = vsel %vm3380_vm9, %v3789_v19, %v3785_v58  ;;  %v3794_v7 = vrot.slane %v13477_v46, %v10633_v4  ;;  %v3869_v50 = vsel %vm3380_vm9, %v3868_v49, %v3864_v41  ;;  %v13478_v32 = vld [vmem:[#allocation178_spill] sm:$0xff]  ;;  %v13482_v58 = vld [vmem:[#allocation180_spill] sm:$0xff]  ;;  %v13483_v41 = vld [vmem:[#allocation187_spill] sm:$0xff] }
 0x3a3   :  { %v3878_v1 = vrot.slane %v10820_v36, %v10687_v33  ;;  %v3725_v45 = vrot.slane %v13478_v32, %v10636_v60  ;;  %v3716_v59 = vsel %vm3387_vm10, %v3715_v22, %v3711_v13  ;;  %v3873_v19 = vrot.slane %v10729_v61, %v10633_v4  ;;  %v13480_v61 = vld [vmem:[#allocation204_spill] sm:$0xff]  ;;  %v13622_v23 = vld [vmem:[#allocation71_spill] sm:$0xff] }
 0x3a4   :  { %v3928_v24 = vsel %vm12835_vm5, %v3927_v18, %v3923_v62  ;;  %v3307_v38 = vpop.permute.xlu0 %3306  ;;  %vm12840_vm5 = vcmask 1041409   ;;  %v3721_v5 = vsel %vm3394_vm11, %v3720_v12, %v3716_v59  ;;  %v3730_v56 = vrot.slane %v13479_v52, %v10692_v8  ;;  %v13485_v59 = vld [vmem:[#allocation196_spill] sm:$0xff] }
 0x3a5   :  { %v3292_v14 = vpop.permute.xlu1 %3291  ;;  %v3933_v44 = vsel %vm12836_vm6, %v3932_v28, %v3928_v24  ;;  %v3795_v36 = vsel %vm3387_vm10, %v3794_v7, %v3790_v27  ;;  %v3942_v49 = vrot.slane %v10928_v42, %v10622_v53  ;;  %vm12841_vm6 = vcmask 1042434   ;;  %v13481_v24 = vld [vmem:[#allocation194_spill] sm:$0xff] }
 0x3a6   :  { %v3937_v29 = vrot.slane %v3292_v14, %v10643_v48  ;;  %v3800_v10 = vsel %vm3394_vm11, %v3799_v21, %v3795_v36  ;;  %v3809_v22 = vrot.slane %v13480_v61, %v10692_v8  ;;  %v3874_v54 = vsel %vm3387_vm10, %v3873_v19, %v3869_v50  ;;  %v13615_v53 = vld [vmem:[#allocation118_spill] sm:$0xff]  ;;  %v13616_v48 = vld [vmem:[#allocation67_spill] sm:$0xff] }
 0x3a7   :  { %v3804_v13 = vrot.slane %v13481_v24, %v10636_v60  ;;  %v3879_v30 = vsel %vm3394_vm11, %v3878_v1, %v3874_v54  ;;  %v3888_v12 = vrot.slane %v10846_v0, %v10692_v8  ;;  %v3735_v28 = vrot.slane %v13482_v58, %v10652_v17  ;;  %v13484_v1 = vld [vmem:[#allocation210_spill] sm:$0xff] }
 0x3a8   :  { %v3938_v18 = vsel %vm12837_vm7, %v3937_v29, %v3933_v44  ;;  %vm3988_vm7 = vcmask 1043459   ;;  %v3726_v14 = vsel %vm12839_vm12, %v3725_v45, %v3721_v5  ;;  %v3883_v27 = vrot.slane %v10757_v6, %v10636_v60  ;;  %v3313_v32 = vpop.permute.xlu0 %3312 }
 0x3a9   :  { %v3298_v62 = vpop.permute.xlu1 %3297  ;;  %v3943_v42 = vsel %vm3373_vm8, %v3942_v49, %v3938_v18  ;;  %vm3990_vm4 = vcmask 1044484   ;;  %v3731_v21 = vsel %vm3408_vm13, %v3730_v56, %v3726_v14  ;;  %v3740_v29 = vrot.slane %v13483_v41, %v10718_v15 }
 0x3aa   :  { %v3947_v37 = vrot.slane %v3298_v62, %v10660_v20  ;;  %v3805_v0 = vsel %vm12839_vm12, %v3804_v13, %v3800_v10  ;;  %v3952_v46 = vrot.slane %v10963_v47, %v10633_v4  ;;  %v3819_v44 = vrot.slane %v13484_v1, %v10718_v15  ;;  %v13486_v62 = vld [vmem:[#allocation47_spill] sm:$0xff]  ;;  %v13488_v13 = vld [vmem:[#allocation198_spill] sm:$0xff]  ;;  %v11515_v20 = vld [vmem:[%s12674_s2 + $0x90] sm:$0xff]  }
 0x3ab   :  { %v3810_v50 = vsel %vm3408_vm13, %v3809_v22, %v3805_v0  ;;  %v3884_v6 = vsel %vm12839_vm12, %v3883_v27, %v3879_v30  ;;  %v3814_v19 = vrot.slane %v13485_v59, %v10652_v17  ;;  %v3898_v5 = vrot.slane %v10875_v2, %v10718_v15  ;;  %v13617_v4 = vld [vmem:[#allocation114_spill] sm:$0xff] }
 0x3ac   :  { %v3948_v31 = vsel %vm3380_vm9, %v3947_v37, %v3943_v42  ;;  %v3889_v18 = vsel %vm3408_vm13, %v3888_v12, %v3884_v6  ;;  %v3662_v52 = vsel %vm3422_vm15, %v3661_v35, %v10909_v16  ;;  %v3736_v56 = vsel %vm3415_vm14, %v3735_v28, %v3731_v21  ;;  %v3319_v14 = vpop.permute.xlu0 %3318 }
 0x3ad   :  { %v3304_v7 = vpop.permute.xlu1 %3303  ;;  %v3953_v47 = vsel %vm3387_vm10, %v3952_v46, %v3948_v31  ;;  %v3893_v36 = vrot.slane %v10785_v43, %v10652_v17  ;;  %v3666_v10 = vrot.slane %v13486_v62, %v10671_v51  ;;  %v3741_v2 = vsel %vm3422_vm15, %v3740_v29, %v3736_v56  ;;  %v13492_v62 = vld [vmem:[#allocation151_spill] sm:$0xff] }
 0x3ae   :  { %v3957_v45 = vrot.slane %v3304_v7, %v10687_v33  ;;  %v3815_v61 = vsel %vm3415_vm14, %v3814_v19, %v3810_v50  ;;  %v3962_v22 = vrot.slane %v3307_v38, %v10636_v60  ;;  %v3745_v16 = vrot.slane %v13487_v9, %v10671_v51  ;;  %v13611_v60 = vld [vmem:[#allocation74_spill] sm:$0xff] }
 0x3af   :  { %v3820_v35 = vsel %vm3422_vm15, %v3819_v44, %v3815_v61  ;;  %v3894_v37 = vsel %vm3415_vm14, %v3893_v36, %v3889_v18  ;;  %v3667_v24 = vsel %vm3429_vm0, %v3666_v10, %v3662_v52  ;;  %v3824_v30 = vrot.slane %v13488_v13, %v10671_v51  ;;  %v13490_v52 = vld [vmem:[#allocation15_spill] sm:$0xff]  ;;  %v13491_v36 = vld [vmem:[#allocation161_spill] sm:$0xff] }
 0x3b0   :  { %v3958_v49 = vsel %vm3394_vm11, %v3957_v45, %v3953_v47  ;;  %v3899_v12 = vsel %vm3422_vm15, %v3898_v5, %v3894_v37  ;;  %v3985_v38 = vsel %vm12840_vm5, %v10885_v3, %v10849_v55  ;;  %v3746_v58 = vsel %vm3429_vm0, %v3745_v16, %v3741_v2  ;;  %v13489_v5 = vld [vmem:[#allocation14_spill] sm:$0xff]  ;;  %v13493_v2 = vld [vmem:[#allocation167_spill] sm:$0xff] }
 0x3b1   :  { %v3310_v54 = vpop.permute.xlu1 %3309  ;;  %v3963_v42 = vsel %vm12839_vm12, %v3962_v22, %v3958_v49  ;;  %v3903_v28 = vrot.slane %v10813_v34, %v10671_v51  ;;  %v3987_v31 = vsel %vm12841_vm6, %v10893_v57, %v3985_v38  ;;  %v3972_v21 = vrot.slane %v3313_v32, %v10652_v17  ;;  %v11090_v32 = vld [vmem:[#allocation5] sm:$0xff]  ;;  %v13494_v22 = vld [vmem:[#allocation153_spill] sm:$0xff]  ;;  %v13495_v37 = vld [vmem:[#allocation122_spill] sm:$0xff] }
 0x3b2   :  { %v3967_v43 = vrot.slane %v3310_v54, %v10692_v8  ;;  %v3825_v29 = vsel %vm3429_vm0, %v3824_v30, %v3820_v35  ;;  %vm3992_vm12 = vcmask 1045509   ;;  %v3989_v3 = vsel %vm3988_vm7, %v3667_v24, %v3987_v31  ;;  %v13496_v13 = vld [vmem:[#allocation155_spill] sm:$0xff]  ;;  %v13499_v31 = vld [vmem:[#allocation18_spill] sm:$0xff] }
 0x3b3   :  { %v3904_v55 = vsel %vm3429_vm0, %v3903_v28, %v3899_v12  ;;  %vm12927_vm5 = vcmask 1046534   ;;  %v3982_v34 = vrot.slane %v3319_v14, %v10671_v51  ;;  %v3991_v7 = vsel %vm3990_vm4, %v3746_v58, %v3989_v3  ;;  %v13498_v28 = vld [vmem:[#allocation152_spill] sm:$0xff] }
 0x3b4   :  { %v3968_v27 = vsel %vm3408_vm13, %v3967_v43, %v3963_v42  ;;  %vm12920_vm6 = vcmask 1047559   ;;  %v3993_v50 = vsel %vm3992_vm12, %v3825_v29, %v3991_v7  ;;  %v13497_v42 = vld [vmem:[#allocation21_spill] sm:$0xff] }
 0x3b5   :  { %v3316_v41 = vpop.permute.xlu1 %3315  ;;  %v3973_v46 = vsel %vm3415_vm14, %v3972_v21, %v3968_v27  ;;  %v3995_v44 = vsel %vm12927_vm5, %v3904_v55, %v3993_v50  ;;  %v13500_v29 = vld [vmem:[#allocation157_spill] sm:$0xff]  ;;  %v13502_v50 = vld [vmem:[#allocation154_spill] sm:$0xff] }
 0x3b6   :  { %v3977_v0 = vrot.slane %v3316_v41, %v10718_v15  ;;  %v13610_v15 = vld [vmem:[#allocation26_spill] sm:$0xff] }
 0x3b8   :  { %v3978_v57 = vsel %vm3422_vm15, %v3977_v0, %v3973_v46  ;;  %v13501_v46 = vld [vmem:[#allocation124_spill] sm:$0xff] }
 0x3b9   :  { %v3983_v1 = vsel %vm3429_vm0, %v3982_v34, %v3978_v57 }
 0x3ba   :  { %v3997_v6 = vsel %vm12920_vm6, %v3983_v1, %v3995_v44  ;;  %vm13709_vm6 = vcmask 326912  }
 0x3bb   :  { %4004 = vmax.xlane.f32.xlu1 %v3997_v6  ;;  %4002 = vst [vmem:[%s12678_s13] sm:$0xff] %v3997_v6 }
 0x448   :  { %v4005_v45 = vpop.xlane.xlu1 %4004 }
 0x449   :  { %v11093_v59 = vmax.f32 %v11090_v32, %v4005_v45 }
 0x44b   :  { %v4007_v19 = vsub.f32 %v11090_v32, %v11093_v59  ;;  %6174 = vst.msk [vmem:[#allocation5] sm:$0xff] %vm12919_vm1, %v11093_v59  ;;  %4012 = vperm.xlu0 %7567, %v11093_v59   ;;  %v11373_v32 = vld [vmem:[%s12674_s2] sm:$0xff]   ;;  %v13607_v59 = vld [vmem:[#allocation72_spill] sm:$0xff]  ;;  %vm13707_vm1 = vcmask 261312  }
 0x4ca   :  { %v11100_v18 = vpop.permute.xlu0 %4012 }
 0x4cb   :  { %v11104_v47 = vrot.slane %v11100_v18, %v13489_v5  ;;  %v11108_v56 = vrot.slane %v11100_v18, %v13490_v52  ;;  %v11463_v52 = vld [vmem:[%s12674_s2 + $0x70] sm:$0xff]  }
 0x4cd   :  { %v4062_v49 = vsub.f32 %v13491_v36, %v11104_v47  ;;  %v4054_v10 = vsub.f32 %v13492_v62, %v11104_v47  ;;  %v4068_v61 = vsub.f32 %v13493_v2, %v11104_v47  ;;  %v4055_v54 = vsub.f32 %v13494_v22, %v11104_v47  ;;  %v13503_v36 = vld [vmem:[#allocation131_spill] sm:$0xff] }
 0x4ce   :  { %v4070_v43 = vsub.f32 %v13495_v37, %v11108_v56  ;;  %v4056_v30 = vsub.f32 %v13496_v13, %v11104_v47  ;;  %v4072_v38 = vsub.f32 %v13497_v42, %v11108_v56  ;;  %v4057_v14 = vsub.f32 %v13498_v28, %v11104_v47  ;;  %v13506_v37 = vld [vmem:[#allocation156_spill] sm:$0xff] }
 0x4cf   :  { %v4198_v9 = vmul.f32 1.442695, %v4062_v49  ;;  %v4182_v16 = vmul.f32 1.442695, %v4054_v10  ;;  %v4210_v35 = vmul.f32 1.442695, %v4068_v61  ;;  %v4074_v21 = vsub.f32 %v13499_v31, %v11108_v56 }
 0x4d0   :  { %v4184_v24 = vmul.f32 1.442695, %v4055_v54  ;;  %v4214_v12 = vmul.f32 1.442695, %v4070_v43  ;;  %v4186_v58 = vmul.f32 1.442695, %v4056_v30  ;;  %v4058_v0 = vsub.f32 %v13500_v29, %v11104_v47 }
 0x4d1   :  { %7961 = vpow2.f32 %v4198_v9  ;;  %v4218_v27 = vmul.f32 1.442695, %v4072_v38  ;;  %v4188_v41 = vmul.f32 1.442695, %v4057_v14  ;;  %v4222_v34 = vmul.f32 1.442695, %v4074_v21 }
 0x4d2   :  { %7963 = vpow2.f32 %v4182_v16  ;;  %v4076_v7 = vsub.f32 %v13501_v46, %v11108_v56  ;;  %v4190_v57 = vmul.f32 1.442695, %v4058_v0  ;;  %v4059_v1 = vsub.f32 %v13502_v50, %v11104_v47  ;;  %v13504_v10 = vld [vmem:[#allocation159_spill] sm:$0xff]  ;;  %v13509_v31 = vld [vmem:[#allocation16_spill] sm:$0xff]  ;;  %v13510_v29 = vld [vmem:[#allocation22_spill] sm:$0xff] }
 0x4d3   :  { %7965 = vpow2.f32 %v4210_v35  ;;  %v4078_v49 = vsub.f32 %v13503_v36, %v11108_v56  ;;  %v4060_v2 = vsub.f32 %v13504_v10, %v11104_v47  ;;  %v13505_v9 = vld [vmem:[#allocation123_spill] sm:$0xff]  ;;  %v4061_v43 = vsub.f32 %v13506_v37, %v11104_v47  ;;  %v13512_v50 = vld [vmem:[#allocation125_spill] sm:$0xff] }
 0x4d4   :  { %7967 = vpow2.f32 %v4184_v24  ;;  %v4226_v45 = vmul.f32 1.442695, %v4076_v7  ;;  %v4192_v62 = vmul.f32 1.442695, %v4059_v1  ;;  %v4080_v16 = vsub.f32 %v13505_v9, %v11108_v56  ;;  %v13514_v10 = vld [vmem:[#allocation31_spill] sm:$0xff] }
 0x4d5   :  { %7969 = vpow2.f32 %v4214_v12  ;;  %v4230_v54 = vmul.f32 1.442695, %v4078_v49  ;;  %v4194_v35 = vmul.f32 1.442695, %v4060_v2  ;;  %v13507_v12 = vld [vmem:[#allocation129_spill] sm:$0xff]  ;;  %v11148_v21 = vrot.slane %v11100_v18, %v13509_v31  ;;  %v13516_v37 = vld [vmem:[#allocation139_spill] sm:$0xff] }
 0x4d6   :  { %7971 = vpow2.f32 %v4186_v58  ;;  %v4234_v30 = vmul.f32 1.442695, %v4080_v16  ;;  %v4082_v42 = vsub.f32 %v13507_v12, %v11108_v56  ;;  %v4196_v38 = vmul.f32 1.442695, %v4061_v43  ;;  %v13508_v58 = vld [vmem:[#allocation158_spill] sm:$0xff] }
 0x4d7   :  { %7973 = vpow2.f32 %v4218_v27  ;;  %v4063_v28 = vsub.f32 %v13508_v58, %v11104_v47  ;;  %v4084_v0 = vsub.f32 %v13510_v29, %v11108_v56  ;;  %v4086_v1 = vsub.f32 %v13512_v50, %v11148_v21  ;;  %v13518_v58 = vld [vmem:[#allocation28_spill] sm:$0xff] }
 0x4d8   :  { %7975 = vpow2.f32 %v4188_v41  ;;  %v4238_v41 = vmul.f32 1.442695, %v4082_v42  ;;  %v4088_v2 = vsub.f32 %v13514_v10, %v11148_v21  ;;  %v4090_v43 = vsub.f32 %v13516_v37, %v11148_v21 }
 0x4d9   :  { %7977 = vpow2.f32 %v4222_v34 }
 0x4da   :  { %7979 = vpow2.f32 %v4190_v57  ;;  %v4242_v57 = vmul.f32 1.442695, %v4084_v0 }
 0x4db   :  { %v7962_v55 = vpop.eup %7961  ;;  %7981 = vpow2.f32 %v4226_v45 }
 0x4dc   :  { %v7964_v3 = vpop.eup %7963  ;;  %4593 = vperm.xlu1 %7568, %v7962_v55   ;;  %7983 = vpow2.f32 %v4192_v62  ;;  %v4200_v55 = vmul.f32 1.442695, %v4063_v28  ;;  %v4246_v62 = vmul.f32 1.442695, %v4086_v1  ;;  %v4092_v28 = vsub.f32 %v13518_v58, %v11148_v21 }
 0x4dd   :  { %4569 = vperm.xlu0 %7567, %v7964_v3   ;;  %v7966_v44 = vpop.eup %7965  ;;  %7985 = vpow2.f32 %v4230_v54  ;;  %v13511_v3 = vld [vmem:[#allocation163_spill] sm:$0xff] }
 0x4de   :  { %v7968_v6 = vpop.eup %7967  ;;  %7987 = vpow2.f32 %v4194_v35  ;;  %v4064_v34 = vsub.f32 %v13511_v3, %v11104_v47  ;;  %v4250_v35 = vmul.f32 1.442695, %v4088_v2  ;;  %v13520_v3 = vld [vmem:[#allocation35_spill] sm:$0xff] }
 0x4df   :  { %v7970_v61 = vpop.eup %7969  ;;  %7989 = vpow2.f32 %v4234_v30 }
 0x4e0   :  { %4611 = vperm.xlu1 %7568, %v7966_v44   ;;  %v7972_v22 = vpop.eup %7971  ;;  %7991 = vpow2.f32 %v4196_v38  ;;  %v4202_v44 = vmul.f32 1.442695, %v4064_v34  ;;  %v4254_v38 = vmul.f32 1.442695, %v4090_v43  ;;  %v4094_v34 = vsub.f32 %v13520_v3, %v11148_v21 }
 0x4e1   :  { %4572 = vperm.xlu0 %7567, %v7968_v6   ;;  %v7974_v24 = vpop.eup %7973  ;;  %7993 = vpow2.f32 %v4238_v41  ;;  %v13513_v6 = vld [vmem:[#allocation160_spill] sm:$0xff]  ;;  %v13526_v43 = vsub.s32 3, %v13405_v40 }
 0x4e2   :  { %v7976_v13 = vpop.eup %7975  ;;  %7995 = vpow2.f32 %v4200_v55  ;;  %v4065_v45 = vsub.f32 %v13513_v6, %v11104_v47  ;;  %v4258_v55 = vmul.f32 1.442695, %v4092_v28 }
 0x4e3   :  { %v7978_v14 = vpop.eup %7977  ;;  %7997 = vpow2.f32 %v4242_v57 }
 0x4e4   :  { %4617 = vperm.xlu1 %7568, %v7970_v61   ;;  %v7980_v27 = vpop.eup %7979  ;;  %7999 = vpow2.f32 %v4202_v44  ;;  %v4204_v61 = vmul.f32 1.442695, %v4065_v45  ;;  %v13522_v44 = vld [vmem:[#allocation30_spill] sm:$0xff] }
 0x4e5   :  { %4575 = vperm.xlu0 %7567, %v7972_v22   ;;  %v7982_v46 = vpop.eup %7981  ;;  %v13515_v22 = vld [vmem:[#allocation165_spill] sm:$0xff]  ;;  %8001 = vpow2.f32 %v4246_v62  ;;  %v4096_v6 = vsub.f32 %v13522_v44, %v11148_v21 }
 0x4e6   :  { %v7984_v7 = vpop.eup %7983  ;;  %v4066_v54 = vsub.f32 %v13515_v22, %v11104_v47  ;;  %8003 = vpow2.f32 %v4204_v61  ;;  %v13524_v61 = vld [vmem:[#allocation130_spill] sm:$0xff] }
 0x4e7   :  { %v7986_v36 = vpop.eup %7985  ;;  %8005 = vpow2.f32 %v4250_v35  ;;  %v4266_v2 = vmul.f32 1.442695, %v4096_v6  ;;  %v4098_v22 = vsub.f32 %v13524_v61, %v11148_v21 }
 0x4e8   :  { %4623 = vperm.xlu1 %7568, %v7974_v24   ;;  %v7988_v49 = vpop.eup %7987  ;;  %v4206_v24 = vmul.f32 1.442695, %v4066_v54 }
 0x4e9   :  { %4578 = vperm.xlu0 %7567, %v7976_v13   ;;  %v7990_v9 = vpop.eup %7989  ;;  %v13517_v13 = vld [vmem:[#allocation162_spill] sm:$0xff] }
 0x4ea   :  { %v7992_v16 = vpop.eup %7991  ;;  %v4067_v30 = vsub.f32 %v13517_v13, %v11104_v47  ;;  %8007 = vpow2.f32 %v4206_v24  ;;  %v11185_v24 = vrot.slane %v11100_v18, %v13526_v43  ;;  %v4270_v13 = vmul.f32 1.442695, %v4098_v22  ;;  %v13536_v43 = vld [vmem:[#allocation20_spill] sm:$0xff] }
 0x4eb   :  { %v7994_v12 = vpop.eup %7993  ;;  %8009 = vpow2.f32 %v4254_v38  ;;  %v13528_v38 = vld [vmem:[#allocation121_spill] sm:$0xff] }
 0x4ec   :  { %4629 = vperm.xlu1 %7568, %v7978_v14   ;;  %v7996_v42 = vpop.eup %7995  ;;  %v4208_v14 = vmul.f32 1.442695, %v4067_v30  ;;  %v13527_v30 = vld [vmem:[#allocation136_spill] sm:$0xff]  ;;  %v4077_v58 = vsub.f32 %v13528_v38, %v11108_v56  ;;  %v13537_v38 = vld [vmem:[#allocation51_spill] sm:$0xff] }
 0x4ed   :  { %4581 = vperm.xlu0 %7567, %v7980_v27   ;;  %v13519_v27 = vld [vmem:[#allocation164_spill] sm:$0xff]  ;;  %v7998_v29 = vpop.eup %7997 }
 0x4ee   :  { %v4069_v41 = vsub.f32 %v13519_v27, %v11104_v47  ;;  %v8000_v0 = vpop.eup %7999  ;;  %8011 = vpow2.f32 %v4208_v14  ;;  %v4262_v47 = vmul.f32 1.442695, %v4094_v34 }
 0x4ef   :  { %v8002_v50 = vpop.eup %8001  ;;  %8013 = vpow2.f32 %v4258_v55  ;;  %v13530_v55 = vld [vmem:[#allocation23_spill] sm:$0xff] }
 0x4f0   :  { %4635 = vperm.xlu1 %7568, %v7982_v46   ;;  %v4212_v46 = vmul.f32 1.442695, %v4069_v41  ;;  %v8004_v1 = vpop.eup %8003  ;;  %v13529_v41 = vld [vmem:[#allocation41_spill] sm:$0xff]  ;;  %v4079_v3 = vsub.f32 %v13530_v55, %v11108_v56 }
 0x4f1   :  { %4584 = vperm.xlu0 %7567, %v7984_v7   ;;  %v13521_v7 = vld [vmem:[#allocation166_spill] sm:$0xff]  ;;  %v8006_v62 = vpop.eup %8005 }
 0x4f2   :  { %v4071_v57 = vsub.f32 %v13521_v7, %v11108_v56  ;;  %8015 = vpow2.f32 %v4212_v46 }
 0x4f3   :  { %8017 = vpow2.f32 %v4262_v47  ;;  %v13532_v47 = vld [vmem:[#allocation19_spill] sm:$0xff] }
 0x4f4   :  { %4641 = vperm.xlu1 %7568, %v7986_v36   ;;  %v4216_v45 = vmul.f32 1.442695, %v4071_v57  ;;  %v13523_v36 = vld [vmem:[#allocation168_spill] sm:$0xff]  ;;  %v8008_v10 = vpop.eup %8007  ;;  %v13531_v57 = vld [vmem:[#allocation43_spill] sm:$0xff]  ;;  %v4081_v44 = vsub.f32 %v13532_v47, %v11108_v56 }
 0x4f5   :  { %4587 = vperm.xlu0 %7567, %v7988_v49   ;;  %v4073_v49 = vsub.f32 %v13523_v36, %v11108_v56  ;;  %v8010_v35 = vpop.eup %8009 }
 0x4f6   :  { %8019 = vpow2.f32 %v4216_v45 }
 0x4f7   :  { %v4220_v54 = vmul.f32 1.442695, %v4073_v49  ;;  %8021 = vpow2.f32 %v4266_v2  ;;  %v13533_v49 = vld [vmem:[#allocation138_spill] sm:$0xff]  ;;  %v13534_v2 = vld [vmem:[#allocation25_spill] sm:$0xff] }
 0x4f8   :  { %4647 = vperm.xlu1 %7568, %v7990_v9   ;;  %v13525_v9 = vld [vmem:[#allocation17_spill] sm:$0xff]  ;;  %v8012_v37 = vpop.eup %8011  ;;  %v4083_v61 = vsub.f32 %v13534_v2, %v11108_v56 }
 0x4f9   :  { %4590 = vperm.xlu0 %7567, %v7992_v16   ;;  %v4075_v16 = vsub.f32 %v13525_v9, %v11108_v56  ;;  %8023 = vpow2.f32 %v4220_v54  ;;  %v8014_v28 = vpop.eup %8013 }
 0x4fa   :  { %8025 = vpow2.f32 %v4270_v13  ;;  %v4085_v13 = vsub.f32 %v13536_v43, %v11108_v56 }
 0x4fc   :  { %4653 = vperm.xlu1 %7568, %v7994_v12   ;;  %v4100_v12 = vsub.f32 %v13527_v30, %v11148_v21  ;;  %v8016_v14 = vpop.eup %8015 }
 0x4fd   :  { %4596 = vperm.xlu0 %7567, %v7996_v42   ;;  %v4224_v42 = vmul.f32 1.442695, %v4075_v16  ;;  %v8018_v34 = vpop.eup %8017  ;;  %v13535_v16 = vld [vmem:[#allocation42_spill] sm:$0xff] }
 0x4fe   :  { %v4274_v27 = vmul.f32 1.442695, %v4100_v12 }
 0x4ff   :  { %8027 = vpow2.f32 %v4224_v42 }
 0x500   :  { %4659 = vperm.xlu1 %7568, %v7998_v29   ;;  %v4102_v29 = vsub.f32 %v13529_v41, %v11185_v24  ;;  %v8020_v46 = vpop.eup %8019  ;;  %8029 = vpow2.f32 %v4274_v27 }
 0x501   :  { %4599 = vperm.xlu0 %7567, %v8000_v0   ;;  %v4228_v0 = vmul.f32 1.442695, %v4077_v58  ;;  %v8022_v6 = vpop.eup %8021  ;;  %v4110_v58 = vsub.f32 %v13537_v38, %v11185_v24 }
 0x502   :  { %v4278_v7 = vmul.f32 1.442695, %v4102_v29 }
 0x503   :  { %8031 = vpow2.f32 %v4228_v0  ;;  %v8024_v45 = vpop.eup %8023  ;;  %v4294_v56 = vmul.f32 1.442695, %v4110_v58  ;;  %v13539_v0 = vld [vmem:[#allocation53_spill] sm:$0xff] }
 0x504   :  { %4665 = vperm.xlu1 %7568, %v8002_v50   ;;  %v4104_v50 = vsub.f32 %v13531_v57, %v11185_v24  ;;  %8033 = vpow2.f32 %v4278_v7  ;;  %v8026_v22 = vpop.eup %8025  ;;  %v4112_v55 = vsub.f32 %v13539_v0, %v11185_v24 }
 0x505   :  { %4602 = vperm.xlu0 %7567, %v8004_v1   ;;  %v4232_v1 = vmul.f32 1.442695, %v4079_v3 }
 0x506   :  { %v4282_v36 = vmul.f32 1.442695, %v4104_v50  ;;  %v4298_v50 = vmul.f32 1.442695, %v4112_v55 }
 0x507   :  { %8035 = vpow2.f32 %v4232_v1  ;;  %v13541_v1 = vld [vmem:[#allocation55_spill] sm:$0xff] }
 0x508   :  { %4671 = vperm.xlu1 %7568, %v8006_v62   ;;  %v4106_v62 = vsub.f32 %v13533_v49, %v11185_v24  ;;  %8037 = vpow2.f32 %v4282_v36  ;;  %v4114_v47 = vsub.f32 %v13541_v1, %v11185_v24 }
 0x509   :  { %4605 = vperm.xlu0 %7567, %v8008_v10   ;;  %v4236_v10 = vmul.f32 1.442695, %v4081_v44  ;;  %v8028_v54 = vpop.eup %8027 }
 0x50a   :  { %v4286_v9 = vmul.f32 1.442695, %v4106_v62  ;;  %v8030_v30 = vpop.eup %8029  ;;  %v13543_v62 = vsub.s32 4, %v13405_v40  ;;  %v4302_v2 = vmul.f32 1.442695, %v4114_v47 }
 0x50b   :  { %8039 = vpow2.f32 %v4236_v10 }
 0x50c   :  { %4677 = vperm.xlu1 %7568, %v8010_v35   ;;  %v4108_v35 = vsub.f32 %v13535_v16, %v11185_v24  ;;  %8041 = vpow2.f32 %v4286_v9  ;;  %v11222_v10 = vrot.slane %v11100_v18, %v13543_v62  ;;  %v13545_v9 = vld [vmem:[#allocation128_spill] sm:$0xff]  ;;  %v13553_v62 = vld [vmem:[#allocation37_spill] sm:$0xff] }
 0x50d   :  { %4608 = vperm.xlu0 %7567, %v8012_v37   ;;  %v4240_v37 = vmul.f32 1.442695, %v4083_v61  ;;  %v8032_v12 = vpop.eup %8031  ;;  %v13544_v61 = vld [vmem:[#allocation57_spill] sm:$0xff]  ;;  %v4093_v16 = vsub.f32 %v13545_v9, %v11148_v21  ;;  %v13554_v9 = vld [vmem:[#allocation60_spill] sm:$0xff] }
 0x50e   :  { %v4290_v42 = vmul.f32 1.442695, %v4108_v35  ;;  %v8034_v41 = vpop.eup %8033 }
 0x50f   :  { %8043 = vpow2.f32 %v4240_v37 }
 0x510   :  { %4683 = vperm.xlu1 %7568, %v8014_v28   ;;  %v4244_v28 = vmul.f32 1.442695, %v4085_v13  ;;  %8045 = vpow2.f32 %v4290_v42  ;;  %v13546_v13 = vld [vmem:[#allocation59_spill] sm:$0xff]  ;;  %v13547_v42 = vld [vmem:[#allocation33_spill] sm:$0xff] }
 0x511   :  { %4614 = vperm.xlu0 %7567, %v8016_v14   ;;  %v13538_v14 = vld [vmem:[#allocation27_spill] sm:$0xff]  ;;  %v8036_v29 = vpop.eup %8035  ;;  %v4095_v38 = vsub.f32 %v13547_v42, %v11148_v21 }
 0x512   :  { %v4087_v27 = vsub.f32 %v13538_v14, %v11148_v21  ;;  %8047 = vpow2.f32 %v4244_v28  ;;  %v8038_v7 = vpop.eup %8037 }
 0x513   :  { %8049 = vpow2.f32 %v4294_v56  ;;  %v13549_v56 = vld [vmem:[#allocation137_spill] sm:$0xff] }
 0x514   :  { %4689 = vperm.xlu1 %7568, %v8018_v34   ;;  %v4248_v3 = vmul.f32 1.442695, %v4087_v27  ;;  %v13540_v34 = vld [vmem:[#allocation135_spill] sm:$0xff]  ;;  %v13548_v27 = vld [vmem:[#allocation61_spill] sm:$0xff]  ;;  %v4097_v0 = vsub.f32 %v13549_v56, %v11148_v21 }
 0x515   :  { %4620 = vperm.xlu0 %7567, %v8020_v46   ;;  %v4089_v46 = vsub.f32 %v13540_v34, %v11148_v21  ;;  %v8040_v57 = vpop.eup %8039 }
 0x516   :  { %8051 = vpow2.f32 %v4248_v3  ;;  %v8042_v36 = vpop.eup %8041 }
 0x517   :  { %v4252_v44 = vmul.f32 1.442695, %v4089_v46  ;;  %8053 = vpow2.f32 %v4298_v50  ;;  %v13550_v46 = vld [vmem:[#allocation64_spill] sm:$0xff] }
 0x518   :  { %4695 = vperm.xlu1 %7568, %v8022_v6   ;;  %v13542_v6 = vld [vmem:[#allocation24_spill] sm:$0xff] }
 0x519   :  { %4626 = vperm.xlu0 %7567, %v8024_v45   ;;  %v4091_v45 = vsub.f32 %v13542_v6, %v11148_v21  ;;  %v8044_v49 = vpop.eup %8043  ;;  %8055 = vpow2.f32 %v4252_v44  ;;  %v13551_v50 = vld [vmem:[#allocation132_spill] sm:$0xff] }
 0x51a   :  { %v8046_v35 = vpop.eup %8045  ;;  %8057 = vpow2.f32 %v4302_v2  ;;  %v4099_v1 = vsub.f32 %v13551_v50, %v11148_v21  ;;  %v4101_v2 = vsub.f32 %v13553_v62, %v11148_v21 }
 0x51c   :  { %4701 = vperm.xlu1 %7568, %v8026_v22   ;;  %v4116_v22 = vsub.f32 %v13544_v61, %v11185_v24  ;;  %v8048_v37 = vpop.eup %8047 }
 0x51d   :  { %4632 = vperm.xlu0 %7567, %v8028_v54   ;;  %v4256_v54 = vmul.f32 1.442695, %v4091_v45  ;;  %v8050_v58 = vpop.eup %8049  ;;  %v13552_v45 = vld [vmem:[#allocation66_spill] sm:$0xff] }
 0x51e   :  { %v4306_v43 = vmul.f32 1.442695, %v4116_v22 }
 0x51f   :  { %8059 = vpow2.f32 %v4256_v54 }
 0x520   :  { %4707 = vperm.xlu1 %7568, %v8030_v30   ;;  %v4118_v30 = vsub.f32 %v13546_v13, %v11222_v10  ;;  %v8052_v28 = vpop.eup %8051  ;;  %8061 = vpow2.f32 %v4306_v43 }
 0x521   :  { %4638 = vperm.xlu0 %7567, %v8032_v12   ;;  %v4260_v12 = vmul.f32 1.442695, %v4093_v16  ;;  %v8054_v55 = vpop.eup %8053  ;;  %v4126_v16 = vsub.f32 %v13554_v9, %v11222_v10 }
 0x522   :  { %v4310_v14 = vmul.f32 1.442695, %v4118_v30 }
 0x523   :  { %8063 = vpow2.f32 %v4260_v12  ;;  %v8056_v3 = vpop.eup %8055  ;;  %v4326_v21 = vmul.f32 1.442695, %v4126_v16  ;;  %v13556_v12 = vld [vmem:[#allocation68_spill] sm:$0xff] }
 0x524   :  { %4713 = vperm.xlu1 %7568, %v8034_v41   ;;  %v4120_v41 = vsub.f32 %v13548_v27, %v11222_v10  ;;  %8065 = vpow2.f32 %v4310_v14  ;;  %v8058_v47 = vpop.eup %8057  ;;  %v4128_v42 = vsub.f32 %v13556_v12, %v11222_v10 }
 0x525   :  { %4644 = vperm.xlu0 %7567, %v8036_v29   ;;  %v4264_v29 = vmul.f32 1.442695, %v4095_v38 }
 0x526   :  { %v4314_v34 = vmul.f32 1.442695, %v4120_v41  ;;  %v4330_v41 = vmul.f32 1.442695, %v4128_v42 }
 0x527   :  { %8067 = vpow2.f32 %v4264_v29  ;;  %v13558_v29 = vld [vmem:[#allocation70_spill] sm:$0xff] }
 0x528   :  { %4719 = vperm.xlu1 %7568, %v8038_v7   ;;  %v4122_v7 = vsub.f32 %v13550_v46, %v11222_v10  ;;  %8069 = vpow2.f32 %v4314_v34  ;;  %v4130_v56 = vsub.f32 %v13558_v29, %v11222_v10 }
 0x529   :  { %4650 = vperm.xlu0 %7567, %v8040_v57   ;;  %v4268_v57 = vmul.f32 1.442695, %v4097_v0  ;;  %v8060_v44 = vpop.eup %8059 }
 0x52a   :  { %v4318_v6 = vmul.f32 1.442695, %v4122_v7  ;;  %v8062_v61 = vpop.eup %8061  ;;  %v13560_v7 = vsub.s32 5, %v13405_v40  ;;  %v4334_v50 = vmul.f32 1.442695, %v4130_v56 }
 0x52b   :  { %8071 = vpow2.f32 %v4268_v57 }
 0x52c   :  { %4725 = vperm.xlu1 %7568, %v8042_v36   ;;  %v4124_v36 = vsub.f32 %v13552_v45, %v11222_v10  ;;  %8073 = vpow2.f32 %v4318_v6  ;;  %v11259_v57 = vrot.slane %v11100_v18, %v13560_v7  ;;  %v13562_v6 = vld [vmem:[#allocation38_spill] sm:$0xff] }
 0x52d   :  { %4656 = vperm.xlu0 %7567, %v8044_v49   ;;  %v4272_v49 = vmul.f32 1.442695, %v4099_v1  ;;  %v8064_v22 = vpop.eup %8063  ;;  %v13561_v1 = vld [vmem:[#allocation63_spill] sm:$0xff]  ;;  %v4109_v45 = vsub.f32 %v13562_v6, %v11185_v24 }
 0x52e   :  { %v4322_v54 = vmul.f32 1.442695, %v4124_v36  ;;  %v8066_v13 = vpop.eup %8065  ;;  %v4145_v39 = vsub.f32 %v13622_v23, %v11259_v57 }
 0x52f   :  { %8075 = vpow2.f32 %v4272_v49 }
 0x530   :  { %4731 = vperm.xlu1 %7568, %v8046_v35   ;;  %v4276_v35 = vmul.f32 1.442695, %v4101_v2  ;;  %8077 = vpow2.f32 %v4322_v54  ;;  %v13563_v2 = vld [vmem:[#allocation65_spill] sm:$0xff]  ;;  %v13564_v54 = vld [vmem:[#allocation40_spill] sm:$0xff] }
 0x531   :  { %4662 = vperm.xlu0 %7567, %v8048_v37   ;;  %v13555_v37 = vld [vmem:[#allocation32_spill] sm:$0xff]  ;;  %v8068_v30 = vpop.eup %8067  ;;  %v4111_v9 = vsub.f32 %v13564_v54, %v11185_v24 }
 0x532   :  { %v4103_v43 = vsub.f32 %v13555_v37, %v11185_v24  ;;  %8079 = vpow2.f32 %v4276_v35  ;;  %v8070_v14 = vpop.eup %8069 }
 0x533   :  { %8081 = vpow2.f32 %v4326_v21  ;;  %v13566_v21 = vld [vmem:[#allocation49_spill] sm:$0xff] }
 0x534   :  { %4737 = vperm.xlu1 %7568, %v8050_v58   ;;  %v4280_v38 = vmul.f32 1.442695, %v4103_v43  ;;  %v13557_v58 = vld [vmem:[#allocation34_spill] sm:$0xff]  ;;  %v13565_v43 = vld [vmem:[#allocation148_spill] sm:$0xff]  ;;  %v4113_v12 = vsub.f32 %v13566_v21, %v11185_v24  ;;  %v13578_v21 = vld [vmem:[#allocation141_spill] sm:$0xff] }
 0x535   :  { %4668 = vperm.xlu0 %7567, %v8052_v28   ;;  %v4105_v28 = vsub.f32 %v13557_v58, %v11185_v24  ;;  %v8072_v27 = vpop.eup %8071 }
 0x536   :  { %8083 = vpow2.f32 %v4280_v38  ;;  %v8074_v34 = vpop.eup %8073 }
 0x537   :  { %v4284_v0 = vmul.f32 1.442695, %v4105_v28  ;;  %8085 = vpow2.f32 %v4330_v41  ;;  %v13567_v28 = vld [vmem:[#allocation76_spill] sm:$0xff]  ;;  %v13568_v41 = vld [vmem:[#allocation46_spill] sm:$0xff] }
 0x538   :  { %4743 = vperm.xlu1 %7568, %v8054_v55   ;;  %v13559_v55 = vld [vmem:[#allocation134_spill] sm:$0xff]  ;;  %v4115_v29 = vsub.f32 %v13568_v41, %v11185_v24 }
 0x539   :  { %4674 = vperm.xlu0 %7567, %v8056_v3   ;;  %v4107_v3 = vsub.f32 %v13559_v55, %v11185_v24  ;;  %v8076_v46 = vpop.eup %8075  ;;  %8087 = vpow2.f32 %v4284_v0 }
 0x53a   :  { %v8078_v36 = vpop.eup %8077  ;;  %8089 = vpow2.f32 %v4334_v50  ;;  %v4304_v50 = vmul.f32 1.442695, %v4115_v29 }
 0x53c   :  { %4749 = vperm.xlu1 %7568, %v8058_v47   ;;  %v4132_v47 = vsub.f32 %v13561_v1, %v11222_v10  ;;  %v8080_v49 = vpop.eup %8079  ;;  %v13570_v1 = vld [vmem:[#allocation140_spill] sm:$0xff] }
 0x53d   :  { %4680 = vperm.xlu0 %7567, %v8060_v44   ;;  %v4288_v44 = vmul.f32 1.442695, %v4107_v3  ;;  %v8082_v16 = vpop.eup %8081 }
 0x53e   :  { %v4338_v62 = vmul.f32 1.442695, %v4132_v47  ;;  %v4117_v47 = vsub.f32 %v13570_v1, %v11185_v24  ;;  %v13583_v1 = vsub.s32 6, %v13405_v40 }
 0x53f   :  { %8091 = vpow2.f32 %v4288_v44 }
 0x540   :  { %4755 = vperm.xlu1 %7568, %v8062_v61   ;;  %v4134_v61 = vsub.f32 %v13563_v2, %v11259_v57  ;;  %v8084_v35 = vpop.eup %8083  ;;  %8093 = vpow2.f32 %v4338_v62  ;;  %v13573_v62 = vld [vmem:[#allocation73_spill] sm:$0xff] }
 0x541   :  { %4686 = vperm.xlu0 %7567, %v8064_v22   ;;  %v4292_v22 = vmul.f32 1.442695, %v4109_v45  ;;  %v8086_v42 = vpop.eup %8085  ;;  %v4142_v2 = vsub.f32 %v13573_v62, %v11259_v57 }
 0x542   :  { %v4342_v37 = vmul.f32 1.442695, %v4134_v61  ;;  %v4308_v61 = vmul.f32 1.442695, %v4117_v47  ;;  %v11316_v47 = vrot.slane %v11100_v18, %v13583_v1  ;;  %v13590_v1 = vld [vmem:[#allocation145_spill] sm:$0xff] }
 0x543   :  { %8095 = vpow2.f32 %v4292_v22  ;;  %v8088_v38 = vpop.eup %8087  ;;  %v13574_v22 = vld [vmem:[#allocation142_spill] sm:$0xff] }
 0x544   :  { %4761 = vperm.xlu1 %7568, %v8066_v13   ;;  %v4136_v13 = vsub.f32 %v13565_v43, %v11259_v57  ;;  %8097 = vpow2.f32 %v4342_v37  ;;  %v8090_v56 = vpop.eup %8089  ;;  %v4119_v54 = vsub.f32 %v13574_v22, %v11222_v10  ;;  %v4358_v37 = vmul.f32 1.442695, %v4142_v2  ;;  %v13577_v43 = vld [vmem:[#allocation84_spill] sm:$0xff]  ;;  %v13585_v2 = vld [vmem:[#allocation143_spill] sm:$0xff] }
 0x545   :  { %4692 = vperm.xlu0 %7567, %v8068_v30   ;;  %v4296_v30 = vmul.f32 1.442695, %v4111_v9 }
 0x546   :  { %v4346_v58 = vmul.f32 1.442695, %v4136_v13  ;;  %v4144_v13 = vsub.f32 %v13577_v43, %v11259_v57  ;;  %v13586_v43 = vld [vmem:[#allocation85_spill] sm:$0xff] }
 0x547   :  { %8099 = vpow2.f32 %v4296_v30  ;;  %v4312_v30 = vmul.f32 1.442695, %v4119_v54 }
 0x548   :  { %4767 = vperm.xlu1 %7568, %v8070_v14   ;;  %v4138_v14 = vsub.f32 %v13567_v28, %v11259_v57  ;;  %8101 = vpow2.f32 %v4346_v58 }
 0x549   :  { %4698 = vperm.xlu0 %7567, %v8072_v27   ;;  %v4300_v27 = vmul.f32 1.442695, %v4113_v12  ;;  %v8092_v55 = vpop.eup %8091  ;;  %v4121_v12 = vsub.f32 %v13578_v21, %v11222_v10  ;;  %v13587_v21 = vld [vmem:[#allocation58_spill] sm:$0xff] }
 0x54a   :  { %v8094_v44 = vpop.eup %8093 }
 0x54b   :  { %8103 = vpow2.f32 %v4300_v27  ;;  %v13580_v27 = vld [vmem:[#allocation79_spill] sm:$0xff]  ;;  %v4316_v29 = vmul.f32 1.442695, %v4121_v12  ;;  %v4127_v12 = vsub.f32 %v13587_v21, %v11222_v10 }
 0x54c   :  { %4773 = vperm.xlu1 %7568, %v8074_v34   ;;  %v4350_v34 = vmul.f32 1.442695, %v4138_v14  ;;  %v4362_v14 = vmul.f32 1.442695, %v4144_v13  ;;  %v4146_v41 = vsub.f32 %v13580_v27, %v11259_v57  ;;  %v4150_v13 = vsub.f32 %v13586_v43, %v11316_v47 }
 0x54d   :  { %4704 = vperm.xlu0 %7567, %v8076_v46   ;;  %v13569_v46 = vld [vmem:[#allocation78_spill] sm:$0xff]  ;;  %v8096_v45 = vpop.eup %8095 }
 0x54e   :  { %v4140_v7 = vsub.f32 %v13569_v46, %v11259_v57  ;;  %8105 = vpow2.f32 %v4350_v34  ;;  %v8098_v9 = vpop.eup %8097 }
 0x54f   :  { %8107 = vpow2.f32 %v4304_v50 }
 0x550   :  { %4779 = vperm.xlu1 %7568, %v8078_v36  }
 0x551   :  { %4710 = vperm.xlu0 %7567, %v8080_v49   ;;  %v4354_v49 = vmul.f32 1.442695, %v4140_v7 }
 0x553   :  { %8109 = vpow2.f32 %v4354_v49 }
 0x554   :  { %4785 = vperm.xlu1 %7568, %v8082_v16   ;;  %v8100_v16 = vpop.eup %8099  ;;  %8111 = vpow2.f32 %v4308_v61  ;;  %v4125_v61 = vsub.f32 %v13585_v2, %v11222_v10 }
 0x555   :  { %4716 = vperm.xlu0 %7567, %v8084_v35   ;;  %8113 = vpow2.f32 %v4358_v37 }
 0x556   :  { %8115 = vpow2.f32 %v4312_v30  ;;  %v4324_v30 = vmul.f32 1.442695, %v4125_v61 }
 0x557   :  { %8117 = vpow2.f32 %v4362_v14 }
 0x558   :  { %4791 = vperm.xlu1 %7568, %v8086_v42   ;;  %v8102_v42 = vpop.eup %8101  ;;  %8119 = vpow2.f32 %v4316_v29 }
 0x559   :  { %4722 = vperm.xlu0 %7567, %v8088_v38   ;;  %v8104_v58 = vpop.eup %8103 }
 0x55a   :  { %v8106_v34 = vpop.eup %8105 }
 0x55b   :  { %v11277_v0 = vpop.permute.xlu1 %4593  ;;  %v8108_v7 = vpop.eup %8107 }
 0x55c   :  { %v11279_v3 = vpop.permute.xlu0 %4569  ;;  %4797 = vperm.xlu1 %7568, %v8090_v56   ;;  %v13581_v56 = vld [vmem:[#allocation144_spill] sm:$0xff] }
 0x55d   :  { %4728 = vperm.xlu0 %7567, %v8092_v55   ;;  %v4123_v55 = vsub.f32 %v13581_v56, %v11222_v10  ;;  %v8110_v22 = vpop.eup %8109  ;;  %v4374_v56 = vmul.f32 1.442695, %v4150_v13 }
 0x55f   :  { %v11285_v6 = vpop.permute.xlu1 %4611  ;;  %v4320_v62 = vmul.f32 1.442695, %v4123_v55  ;;  %v13589_v55 = vld [vmem:[#allocation87_spill] sm:$0xff] }
 0x560   :  { %13571 = vst [vmem:[#allocation149_spill] sm:$0xff] %v11285_v6  ;;  %v11287_v36 = vpop.permute.xlu0 %4572  ;;  %4803 = vperm.xlu1 %7568, %v8094_v44   ;;  %v4366_v44 = vmul.f32 1.442695, %v4146_v41  ;;  %v13588_v41 = vsub.s32 7, %v13405_v40 }
 0x561   :  { %13572 = vst [vmem:[#allocation115_spill] sm:$0xff] %v11287_v36  ;;  %4734 = vperm.xlu0 %7567, %v8096_v45   ;;  %v13584_v45 = vld [vmem:[#allocation90_spill] sm:$0xff] }
 0x562   :  { %v4148_v49 = vsub.f32 %v13584_v45, %v11259_v57  ;;  %8121 = vpow2.f32 %v4366_v44  ;;  %v11337_v29 = vrot.slane %v11100_v18, %v13588_v41  ;;  %v4129_v44 = vsub.f32 %v13590_v1, %v11222_v10  ;;  %v13593_v18 = vld [vmem:[#allocation29_spill] sm:$0xff] }
 0x563   :  { %v11293_v24 = vpop.permute.xlu1 %4617  ;;  %8123 = vpow2.f32 %v4320_v62 }
 0x564   :  { %13575 = vst [vmem:[#allocation81_spill] sm:$0xff] %v11293_v24  ;;  %v11295_v35 = vpop.permute.xlu0 %4575  ;;  %4809 = vperm.xlu1 %7568, %v8098_v9   ;;  %v8112_v9 = vpop.eup %8111  ;;  %v4370_v37 = vmul.f32 1.442695, %v4148_v49  ;;  %v4167_v61 = vsub.f32 %v13593_v18, %v11337_v29  ;;  %v4171_v17 = vsub.f32 %v13610_v15, %v11337_v29  ;;  %v11493_v15 = vld [vmem:[%s12674_s2 + $0x88] sm:$0xff]   ;;  %v4172_v51 = vsub.f32 %v13615_v53, %v11337_v29 }
 0x565   :  { %13576 = vst [vmem:[#allocation133_spill] sm:$0xff] %v11295_v35  ;;  %4740 = vperm.xlu0 %7567, %v8100_v16   ;;  %v4173_v11 = vsub.f32 %v13617_v4, %v11337_v29  ;;  %v13621_v4 = vld [vmem:[#allocation119_spill] sm:$0xff] }
 0x566   :  { %8125 = vpow2.f32 %v4370_v37  ;;  %v4416_v6 = vmul.f32 1.442695, %v4171_v17 }
 0x567   :  { %v11301_v38 = vpop.permute.xlu1 %4623  ;;  %8127 = vpow2.f32 %v4324_v30 }
 0x568   :  { %13579 = vst [vmem:[#allocation80_spill] sm:$0xff] %v11301_v38  ;;  %v11303_v28 = vpop.permute.xlu0 %4578  ;;  %4815 = vperm.xlu1 %7568, %v8102_v42   ;;  %v8114_v42 = vpop.eup %8113  ;;  %8129 = vpow2.f32 %v4374_v56  ;;  %v13598_v56 = vld [vmem:[#allocation147_spill] sm:$0xff] }
 0x569   :  { %4746 = vperm.xlu0 %7567, %v8104_v58   ;;  %v8116_v14 = vpop.eup %8115 }
 0x56a   :  { %v8118_v45 = vpop.eup %8117 }
 0x56b   :  { %v11309_v46 = vpop.permute.xlu1 %4629  ;;  %v8120_v62 = vpop.eup %8119 }
 0x56c   :  { %13582 = vst [vmem:[#allocation101_spill] sm:$0xff] %v11309_v46  ;;  %v11311_v50 = vpop.permute.xlu0 %4581  ;;  %4821 = vperm.xlu1 %7568, %v8106_v34   ;;  %v4152_v34 = vsub.f32 %v13589_v55, %v11316_v47  ;;  %v8122_v43 = vpop.eup %8121  ;;  %v4133_v55 = vsub.f32 %v13598_v56, %v11222_v10 }
 0x56d   :  { %4752 = vperm.xlu0 %7567, %v8108_v7   ;;  %v4328_v7 = vmul.f32 1.442695, %v4127_v12  ;;  %v8124_v30 = vpop.eup %8123  ;;  %v4408_v12 = vmul.f32 1.442695, %v4167_v61 }
 0x56e   :  { %v4378_v40 = vmul.f32 1.442695, %v4152_v34  ;;  %v4340_v61 = vmul.f32 1.442695, %v4133_v55 }
 0x56f   :  { %v11322_v54 = vpop.permute.xlu1 %4635  ;;  %8131 = vpow2.f32 %v4328_v7 }
 0x570   :  { %v11324_v16 = vpop.permute.xlu0 %4584  ;;  %4827 = vperm.xlu1 %7568, %v8110_v22   ;;  %v4332_v22 = vmul.f32 1.442695, %v4129_v44  ;;  %8133 = vpow2.f32 %v4378_v40  ;;  %v8126_v34 = vpop.eup %8125  ;;  %v4008_v44 = vmul.f32 1.442695, %v4007_v19  ;;  %v13601_v40 = vld [vmem:[#allocation126_spill] sm:$0xff]  ;;  %v4137_v19 = vsub.f32 %v13607_v59, %v11259_v57  ;;  %v11452_v59 = vld [vmem:[%s12674_s2 + $0x68] sm:$0xff]  }
 0x571   :  { %4758 = vperm.xlu0 %7567, %v8112_v9   ;;  %v13594_v9 = vld [vmem:[#allocation150_spill] sm:$0xff]  ;;  %v8128_v1 = vpop.eup %8127  ;;  %v4169_v18 = vsub.f32 %v13601_v40, %v11337_v29  ;;  %v13606_v40 = vld [vmem:[#allocation107_spill] sm:$0xff] }
 0x572   :  { %v4131_v37 = vsub.f32 %v13594_v9, %v11222_v10  ;;  %8135 = vpow2.f32 %v4332_v22  ;;  %v13602_v10 = vld [vmem:[#allocation146_spill] sm:$0xff]  ;;  %v8130_v9 = vpop.eup %8129 }
 0x573   :  { %v11330_v58 = vpop.permute.xlu1 %4641  ;;  %8137 = vpow2.f32 %v4408_v12  ;;  %v4135_v22 = vsub.f32 %v13602_v10, %v11259_v57  ;;  %v4170_v10 = vsub.f32 %v13606_v40, %v11337_v29  ;;  %v11425_v40 = vld [vmem:[%s12674_s2 + $0x10] sm:$0xff]  }
 0x574   :  { %v11332_v27 = vpop.permute.xlu0 %4587  ;;  %4833 = vperm.xlu1 %7568, %v8114_v42   ;;  %v13597_v42 = vld [vmem:[#allocation105_spill] sm:$0xff]  ;;  %v4336_v41 = vmul.f32 1.442695, %v4131_v37 }
 0x575   :  { %4764 = vperm.xlu0 %7567, %v8116_v14   ;;  %v4168_v14 = vsub.f32 %v13597_v42, %v11337_v29  ;;  %v11388_v42 = vld [vmem:[%s12674_s2 + $0x38] sm:$0xff]   ;;  %v4344_v12 = vmul.f32 1.442695, %v4135_v22  ;;  %v4414_v31 = vmul.f32 1.442695, %v4170_v10  ;;  %v11478_v10 = vld [vmem:[%s12674_s2 + $0x28] sm:$0xff]  }
 0x576   :  { %8139 = vpow2.f32 %v4336_v41  ;;  %13604 = vst [vmem:[#allocation104_spill] sm:$0xff] %v11388_v42  ;;  %v11394_v41 = vld [vmem:[%s12674_s2 + $0x40] sm:$0xff]   ;;  %v11431_v22 = vld [vmem:[%s12674_s2 + $0x58] sm:$0xff]  }
 0x577   :  { %v11343_v49 = vpop.permute.xlu1 %4647  ;;  %8141 = vpow2.f32 %v4008_v44  ;;  %v4412_v44 = vmul.f32 1.442695, %v4169_v18  ;;  %v11440_v18 = vld [vmem:[%s12674_s2 + $0x60] sm:$0xff]   ;;  %v5621_v23 = vunpack.c.h.bf16 %v11394_v41  ;;  %v5627_v42 = vunpack.c.h.bf16 %v11431_v22 }
 0x578   :  { %13591 = vst [vmem:[#allocation62_spill] sm:$0xff] %v11343_v49  ;;  %v11345_v2 = vpop.permute.xlu0 %4590  ;;  %4839 = vperm.xlu1 %7568, %v8118_v45  }
 0x579   :  { %13592 = vst [vmem:[#allocation93_spill] sm:$0xff] %v11345_v2  ;;  %4770 = vperm.xlu0 %7567, %v8120_v62   ;;  %v4410_v62 = vmul.f32 1.442695, %v4168_v14  ;;  %v11410_v14 = vld [vmem:[%s12674_s2 + $0x48] sm:$0xff]  }
 0x57b   :  { %v11351_v13 = vpop.permute.xlu1 %4653  ;;  %8143 = vpow2.f32 %v4410_v62  ;;  %v11419_v62 = vld [vmem:[%s12674_s2 + $0x50] sm:$0xff]  }
 0x57c   :  { %13595 = vst [vmem:[#allocation169_spill] sm:$0xff] %v11351_v13  ;;  %v11353_v21 = vpop.permute.xlu0 %4596  ;;  %4845 = vperm.xlu1 %7568, %v8122_v43   ;;  %v8132_v43 = vpop.eup %8131  ;;  %8145 = vpow2.f32 %v4340_v61  ;;  %v11446_v61 = vld [vmem:[%s12674_s2 + $0x18] sm:$0xff]  }
 0x57d   :  { %13596 = vst [vmem:[#allocation92_spill] sm:$0xff] %v11353_v21  ;;  %4776 = vperm.xlu0 %7567, %v8124_v30   ;;  %v11382_v30 = vld [vmem:[%s12674_s2 + $0x20] sm:$0xff]   ;;  %v8134_v56 = vpop.eup %8133  ;;  %8147 = vpow2.f32 %v4412_v44  ;;  %v11472_v44 = vld [vmem:[%s12674_s2 + $0x78] sm:$0xff]  }
 0x57e   :  { %8149 = vpow2.f32 %v4344_v12 }
 0x57f   :  { %v11359_v7 = vpop.permute.xlu1 %4659  ;;  %8151 = vpow2.f32 %v4414_v31  ;;  %v13619_v31 = vld [vmem:[#allocation69_spill] sm:$0xff] }
 0x580   :  { %13599 = vst [vmem:[#allocation109_spill] sm:$0xff] %v11359_v7  ;;  %v11364_v45 = vpop.permute.xlu0 %4599  ;;  %4851 = vperm.xlu1 %7568, %v8126_v34   ;;  %v11402_v34 = vld [vmem:[%s12674_s2 + $0x8] sm:$0xff]   ;;  %v4141_v7 = vsub.f32 %v13616_v48, %v11259_v57  ;;  %v4143_v17 = vsub.f32 %v13619_v31, %v11259_v57  ;;  %v13625_v31 = vld [vmem:[#allocation82_spill] sm:$0xff]  ;;  %v13626_v48 = vld [vmem:[#allocation117_spill] sm:$0xff] }
 0x581   :  { %13600 = vst [vmem:[#allocation75_spill] sm:$0xff] %v11364_v45  ;;  %4782 = vperm.xlu0 %7567, %v8128_v1   ;;  %v8136_v1 = vpop.eup %8135  ;;  %v4147_v63 = vsub.f32 %v13625_v31, %v11259_v57 }
 0x582   :  { %v8138_v33 = vpop.eup %8137  ;;  %v4360_v13 = vmul.f32 1.442695, %v4143_v17 }
 0x583   :  { %v11377_v37 = vpop.permute.xlu1 %4665 }
 0x584   :  { %13603 = vst [vmem:[#allocation103_spill] sm:$0xff] %v11377_v37  ;;  %v11397_v55 = vpop.permute.xlu0 %4602  ;;  %4857 = vperm.xlu1 %7568, %v8130_v9   ;;  %v4348_v9 = vmul.f32 1.442695, %v4137_v19  ;;  %v11499_v19 = vld [vmem:[%s12674_s2 + $0x30] sm:$0xff]  }
 0x585   :  { %13605 = vst [vmem:[#allocation86_spill] sm:$0xff] %v11397_v55  ;;  %4788 = vperm.xlu0 %7567, %v8132_v43   ;;  %13613 = vst [vmem:[#allocation99_spill] sm:$0xff] %v11499_v19  ;;  %v13627_v19 = vld [vmem:[#allocation77_spill] sm:$0xff]  ;;  %v4356_v55 = vmul.f32 1.442695, %v4141_v7 }
 0x586   :  { %8153 = vpow2.f32 %v4348_v9 }
 0x587   :  { %v11434_v43 = vpop.permute.xlu1 %4671  ;;  %8155 = vpow2.f32 %v4416_v6 }
 0x588   :  { %13608 = vst [vmem:[#allocation170_spill] sm:$0xff] %v11434_v43  ;;  %v11455_v5 = vpop.permute.xlu0 %4605  ;;  %4863 = vperm.xlu1 %7568, %v8134_v56   ;;  %v4139_v56 = vsub.f32 %v13611_v60, %v11259_v57  ;;  %v11484_v60 = vld [vmem:[%s12674_s2 + $0x80] sm:$0xff]  }
 0x589   :  { %13609 = vst [vmem:[#allocation111_spill] sm:$0xff] %v11455_v5  ;;  %4794 = vperm.xlu0 %7567, %v8136_v1   ;;  %v8140_v1 = vpop.eup %8139  ;;  %v13623_v5 = vld [vmem:[#allocation116_spill] sm:$0xff] }
 0x58a   :  { %v4352_v53 = vmul.f32 1.442695, %v4139_v56  ;;  %v4175_v43 = vsub.f32 %v13623_v5, %v11337_v29  ;;  %v4418_v56 = vmul.f32 1.442695, %v4172_v51  ;;  %v4420_v5 = vmul.f32 1.442695, %v4173_v11 }
 0x58b   :  { %v11487_v8 = vpop.permute.xlu1 %4677  ;;  %v11550_v11 = vmul.f32 1.442695, %v4145_v39 }
 0x58c   :  { %13612 = vst [vmem:[#allocation173_spill] sm:$0xff] %v11487_v8  ;;  %v11502_v12 = vpop.permute.xlu0 %4608  ;;  %4908 = vperm.xlu1 %7568, %v8138_v33   ;;  %v11510_v8 = vpop.eup %8141  ;;  %8157 = vpow2.f32 %v4352_v53  ;;  %v11552_v7 = vmul.f32 1.442695, %v4175_v43  ;;  %v5623_v43 = vunpack.c.h.bf16 %v11410_v14 }
 0x58d   :  { %13614 = vst [vmem:[#allocation175_spill] sm:$0xff] %v11502_v12  ;;  %4800 = vperm.xlu0 %7567, %v8140_v1   ;;  %13618 = vst [vmem:[#allocation189_spill] sm:$0xff] %v11510_v8  ;;  %v8144_v1 = vpop.eup %8143  ;;  %v4174_v8 = vsub.f32 %v13621_v4, %v11337_v29  ;;  %v4149_v4 = vsub.f32 %v13627_v19, %v11259_v57  ;;  %v13632_v57 = vunpack.c.l.bf16 %v11394_v41  ;;  %8159 = vpow2.f32 %v4418_v56 }
 0x58e   :  { %v8146_v33 = vpop.eup %8145  ;;  %8161 = vpow2.f32 %v4356_v55  ;;  %v13637_v55 = vld [vmem:[#allocation113_spill] sm:$0xff] }
 0x58f   :  { %v11521_v12 = vpop.permute.xlu1 %4683  ;;  %v8148_v25 = vpop.eup %8147  ;;  %v4422_v6 = vmul.f32 1.442695, %v4174_v8  ;;  %v11561_v37 = vmul.f32 1.442695, %v4149_v4  ;;  %v5876_v8 = vmul.f32 %v13632_v57, %v11293_v24  ;;  %v4179_v56 = vsub.f32 %v13637_v55, %v11337_v29  ;;  %v13640_v55 = vld [vmem:[#allocation83_spill] sm:$0xff] }
 0x590   :  { %13620 = vst [vmem:[#allocation44_spill] sm:$0xff] %v11521_v12  ;;  %v11529_v9 = vpop.permute.xlu0 %4614  ;;  %4911 = vperm.xlu1 %7568, %v8144_v1   ;;  %v4176_v12 = vsub.f32 %v13626_v48, %v11337_v29  ;;  %v13628_v1 = vld [vmem:[#allocation127_spill] sm:$0xff]  ;;  %v11545_v48 = vld [vmem:[%s12674_s2 + $0x98] sm:$0xff]   ;;  %8163 = vpow2.f32 %v4420_v5 }
 0x591   :  { %13624 = vst [vmem:[#allocation191_spill] sm:$0xff] %v11529_v9  ;;  %4806 = vperm.xlu0 %7567, %v8146_v33   ;;  %v4177_v51 = vsub.f32 %v13628_v1, %v11337_v29  ;;  %v13629_v9 = vld [vmem:[#allocation88_spill] sm:$0xff]  ;;  %v8150_v33 = vpop.eup %8149  ;;  %8165 = vpow2.f32 %v4360_v13 }
 0x592   :  { %v4151_v31 = vsub.f32 %v13629_v9, %v11316_v47  ;;  %v11557_v9 = vmul.f32 1.442695, %v4147_v63  ;;  %v11559_v1 = vmul.f32 1.442695, %v4176_v12  ;;  %v13633_v63 = vld [vmem:[#allocation45_spill] sm:$0xff]  ;;  %v8152_v4 = vpop.eup %8151  ;;  %8167 = vpow2.f32 %v4422_v6 }
 0x593   :  { %v11548_v19 = vpop.permute.xlu1 %4689  ;;  %v11568_v53 = vmul.f32 1.442695, %v4177_v51  ;;  %v4178_v12 = vsub.f32 %v13633_v63, %v11337_v29  ;;  %v8154_v51 = vpop.eup %8153  ;;  %v4153_v63 = vsub.f32 %v13640_v55, %v11316_v47  ;;  %8169 = vpow2.f32 %v11550_v11 }
 0x594   :  { %13630 = vst [vmem:[#allocation214_spill] sm:$0xff] %v11548_v19  ;;  %v11555_v17 = vpop.permute.xlu0 %4620  ;;  %4914 = vperm.xlu1 %7568, %v8148_v25   ;;  %v11570_v25 = vmul.f32 1.442695, %v4151_v31  ;;  %v13634_v19 = vunpack.c.l.bf16 %v11410_v14  ;;  %v11586_v31 = vld [vmem:[%s12674_s2 + $0xa0] sm:$0xff]   ;;  %v11592_v14 = vld [vmem:[%s12674_s2 + $0xa8] sm:$0xff]   ;;  %v8156_v55 = vpop.eup %8155  ;;  %v13655_v11 = vunpack.c.h.bf16 %v11402_v34  ;;  %8171 = vpow2.f32 %v11552_v7 }
 0x595   :  { %13631 = vst [vmem:[#allocation184_spill] sm:$0xff] %v11555_v17  ;;  %v5877_v39 = vmul.f32 %v5621_v23, %v11555_v17  ;;  %4812 = vperm.xlu0 %7567, %v8150_v33   ;;  %v13636_v23 = vld [vmem:[#allocation112_spill] sm:$0xff]  ;;  %8173 = vpow2.f32 %v11557_v9 }
 0x596   :  { %v5878_v41 = vmul.f32 %v13634_v19, %v11301_v38  ;;  %v4166_v33 = vsub.f32 %v13636_v23, %v11337_v29  ;;  %v11614_v23 = vmul.f32 1.442695, %v4178_v12  ;;  %v13644_v19 = vunpack.c.h.bf16 %v11373_v32  ;;  %v13647_v12 = vld [vmem:[#allocation36_spill] sm:$0xff] }
 0x597   :  { %v6009_v57 = vadd.f32 %v5877_v39, %v5876_v8  ;;  %v11577_v24 = vpop.permute.xlu1 %4695  ;;  %v11600_v39 = vld [vmem:[%s12674_s2 + $0xb0] sm:$0xff]   ;;  %8175 = vpow2.f32 %v11559_v1 }
 0x598   :  { %13635 = vst [vmem:[#allocation120_spill] sm:$0xff] %v11577_v24  ;;  %v11595_v8 = vpop.permute.xlu0 %4626  ;;  %4917 = vperm.xlu1 %7568, %v8152_v4   ;;  %13639 = vst [vmem:[#allocation48_spill] sm:$0xff] %v11600_v39  ;;  %v5625_v24 = vunpack.c.h.bf16 %v11419_v62  ;;  %v11610_v4 = vld [vmem:[%s12674_s2 + $0xb8] sm:$0xff]   ;;  %v11621_v5 = vmul.f32 1.442695, %v4166_v33  ;;  %v8158_v39 = vpop.eup %8157  ;;  %v4180_v33 = vsub.f32 %v13647_v12, %v11337_v29  ;;  %8177 = vpow2.f32 %v11561_v37 }
 0x599   :  { %13638 = vst [vmem:[#allocation202_spill] sm:$0xff] %v11595_v8  ;;  %v6010_v38 = vadd.f32 %v6009_v57, %v5878_v41  ;;  %v5879_v17 = vmul.f32 %v5623_v43, %v11595_v8  ;;  %4818 = vperm.xlu0 %7567, %v8154_v51   ;;  %13641 = vst [vmem:[#allocation177_spill] sm:$0xff] %v11610_v4  ;;  %v13642_v43 = vunpack.c.l.bf16 %v11419_v62  ;;  %v11623_v8 = vmul.f32 1.442695, %v4179_v56  ;;  %v11633_v62 = vld [vmem:[%s12674_s2 + $0xc0] sm:$0xff]   ;;  %v13651_v12 = vld [vmem:[#allocation94_spill] sm:$0xff] }
 0x59a   :  { %v5861_v4 = vmul.f32 %v13644_v19, %v11287_v36  ;;  %13646 = vst [vmem:[#allocation171_spill] sm:$0xff] %v11633_v62  ;;  %v13648_v19 = vld [vmem:[#allocation89_spill] sm:$0xff]  ;;  %8179 = vpow2.f32 %v11568_v53 }
 0x59b   :  { %v5880_v41 = vmul.f32 %v13642_v43, %v11309_v46  ;;  %v6011_v57 = vadd.f32 %v6010_v38, %v5879_v17  ;;  %v11619_v51 = vpop.permute.xlu1 %4701  ;;  %v11636_v17 = vmul.f32 1.442695, %v4153_v63  ;;  %v13649_v46 = vunpack.c.l.bf16 %v11373_v32  ;;  %v13653_v32 = vld [vmem:[#allocation91_spill] sm:$0xff] }
 0x59c   :  { %13643 = vst [vmem:[#allocation193_spill] sm:$0xff] %v11619_v51  ;;  %v11628_v13 = vpop.permute.xlu0 %4632  ;;  %4920 = vperm.xlu1 %7568, %v8156_v55   ;;  %v4154_v55 = vsub.f32 %v13648_v19, %v11316_v47  ;;  %v13650_v38 = vunpack.c.l.bf16 %v11402_v34  ;;  %v13657_v34 = vunpack.c.l.bf16 %v11425_v40  ;;  %8181 = vpow2.f32 %v11570_v25 }
 0x59d   :  { %13645 = vst [vmem:[#allocation186_spill] sm:$0xff] %v11628_v13  ;;  %v6012_v56 = vadd.f32 %v6011_v57, %v5880_v41  ;;  %v5881_v43 = vmul.f32 %v5625_v24, %v11628_v13  ;;  %4824 = vperm.xlu0 %7567, %v8158_v39   ;;  %v5860_v51 = vmul.f32 %v13649_v46, %v11279_v3  ;;  %v8160_v57 = vpop.eup %8159  ;;  %v13652_v24 = vunpack.c.l.bf16 %v11431_v22  ;;  %v13654_v13 = vld [vmem:[#allocation96_spill] sm:$0xff] }
 0x59e   :  { %v5862_v63 = vmul.f32 %v13650_v38, %v11295_v35  ;;  %v4155_v41 = vsub.f32 %v13651_v12, %v11316_v47  ;;  %v4156_v46 = vsub.f32 %v13653_v32, %v11316_v47  ;;  %v4157_v62 = vsub.f32 %v13654_v13, %v11316_v47  ;;  %v8162_v38 = vpop.eup %8161 }
 0x59f   :  { %v5882_v6 = vmul.f32 %v13652_v24, %v11322_v54  ;;  %v6013_v39 = vadd.f32 %v6012_v56, %v5881_v43  ;;  %v11655_v19 = vpop.permute.xlu1 %4707  ;;  %v5988_v35 = vadd.f32 %v5861_v4, %v5860_v51  ;;  %v5863_v12 = vmul.f32 %v13655_v11, %v11303_v28  ;;  %v8164_v32 = vpop.eup %8163 }
 0x5a0   :  { %v11664_v36 = vpop.permute.xlu0 %4638  ;;  %4923 = vperm.xlu1 %7568, %v8160_v57   ;;  %v5629_v22 = vunpack.c.h.bf16 %v11440_v18  ;;  %v11667_v56 = vmul.f32 1.442695, %v4180_v33  ;;  %v11671_v13 = vmul.f32 1.442695, %v4154_v55  ;;  %v5864_v51 = vmul.f32 %v13657_v34, %v11311_v50  ;;  %v8166_v9 = vpop.eup %8165 }
 0x5a1   :  { %13656 = vst [vmem:[#allocation172_spill] sm:$0xff] %v11664_v36  ;;  %v6014_v43 = vadd.f32 %v6013_v39, %v5882_v6  ;;  %v5883_v24 = vmul.f32 %v5627_v42, %v11664_v36  ;;  %4830 = vperm.xlu0 %7567, %v8162_v38   ;;  %v5989_v4 = vadd.f32 %v5988_v35, %v5862_v63  ;;  %v11677_v57 = vmul.f32 1.442695, %v4155_v41  ;;  %v11684_v42 = vld [vmem:[%s12674_s2 + $0xc8] sm:$0xff]   ;;  %v13658_v63 = vld [vmem:[#allocation102_spill] sm:$0xff] }
 0x5a2   :  { %v11687_v55 = vmul.f32 1.442695, %v4156_v46  ;;  %v11689_v35 = vmul.f32 1.442695, %v4157_v62  ;;  %v4158_v6 = vsub.f32 %v13658_v63, %v11316_v47  ;;  %v13659_v39 = vunpack.c.h.bf16 %v11425_v40  ;;  %v13661_v62 = vld [vmem:[#allocation98_spill] sm:$0xff] }
 0x5a3   :  { %v11679_v33 = vpop.permute.xlu1 %4713  ;;  %v5990_v41 = vadd.f32 %v5989_v4, %v5863_v12  ;;  %v6015_v11 = vadd.f32 %v6014_v43, %v5883_v24  ;;  %v4159_v63 = vsub.f32 %v13661_v62, %v11316_v47  ;;  %v13662_v12 = vld [vmem:[#allocation97_spill] sm:$0xff]  ;;  %v13663_v40 = vunpack.c.l.bf16 %v11440_v18 }
 0x5a4   :  { %v5865_v38 = vmul.f32 %v13659_v39, %v11324_v16  ;;  %v11696_v34 = vpop.permute.xlu0 %4644  ;;  %4926 = vperm.xlu1 %7568, %v8164_v32   ;;  %v4160_v4 = vsub.f32 %v13662_v12, %v11316_v47  ;;  %v13664_v24 = vunpack.c.l.bf16 %v11446_v61  ;;  %v8168_v32 = vpop.eup %8167  ;;  %v11715_v37 = vmul.f32 1.442695, %v4158_v6  ;;  %v13666_v39 = vld [vmem:[#allocation100_spill] sm:$0xff]  ;;  %v13670_v6 = vld [vmem:[#allocation95_spill] sm:$0xff] }
 0x5a5   :  { %13660 = vst [vmem:[#allocation208_spill] sm:$0xff] %v11696_v34  ;;  %4836 = vperm.xlu0 %7567, %v8166_v9   ;;  %v5991_v7 = vadd.f32 %v5990_v41, %v5864_v51  ;;  %v5884_v43 = vmul.f32 %v13663_v40, %v11330_v58  ;;  %v4161_v51 = vsub.f32 %v13666_v39, %v11316_v47  ;;  %v13667_v41 = vld [vmem:[#allocation108_spill] sm:$0xff]  ;;  %v8170_v62 = vpop.eup %8169  ;;  %v13668_v40 = vunpack.c.h.bf16 %v11446_v61  ;;  %v11737_v61 = vld [vmem:[%s12674_s2 + $0xd0] sm:$0xff]  }
 0x5a6   :  { %v5866_v1 = vmul.f32 %v13664_v24, %v11332_v27  ;;  %v4162_v18 = vsub.f32 %v13667_v41, %v11316_v47  ;;  %v5885_v46 = vmul.f32 %v5629_v22, %v11696_v34  ;;  %8183 = vpow2.f32 %v11614_v23  ;;  %v8172_v23 = vpop.eup %8171  ;;  %v13693_v34 = vld [vmem:[#allocation170_spill] sm:$0xff] }
 0x5a7   :  { %v11712_v9 = vpop.permute.xlu1 %4719  ;;  %v5992_v12 = vadd.f32 %v5991_v7, %v5865_v38  ;;  %v5867_v24 = vmul.f32 %v13668_v40, %v11345_v2  ;;  %v6016_v53 = vadd.f32 %v6015_v11, %v5884_v43  ;;  %v11728_v25 = vmul.f32 1.442695, %v4159_v63  ;;  %v13671_v7 = vld [vmem:[#allocation110_spill] sm:$0xff]  ;;  %v8174_v40 = vpop.eup %8173 }
 0x5a8   :  { %13665 = vst [vmem:[#allocation179_spill] sm:$0xff] %v11712_v9  ;;  %v11725_v36 = vpop.permute.xlu0 %4650  ;;  %4929 = vperm.xlu1 %7568, %v8168_v32   ;;  %v4163_v39 = vsub.f32 %v13670_v6, %v11316_v47  ;;  %v4164_v38 = vsub.f32 %v13671_v7, %v11316_v47  ;;  %8185 = vpow2.f32 %v11621_v5  ;;  %v11741_v11 = vmul.f32 1.442695, %v4160_v4 }
 0x5a9   :  { %13669 = vst [vmem:[#allocation195_spill] sm:$0xff] %v11725_v36  ;;  %4842 = vperm.xlu0 %7567, %v8170_v62   ;;  %v5993_v41 = vadd.f32 %v5992_v12, %v5866_v1  ;;  %8187 = vpow2.f32 %v11623_v8  ;;  %v11746_v43 = vmul.f32 1.442695, %v4161_v51  ;;  %v13673_v1 = vld [vmem:[#allocation106_spill] sm:$0xff]  ;;  %v13674_v62 = vld [vmem:[#allocation39_spill] sm:$0xff]  ;;  %v6017_v7 = vadd.f32 %v6016_v53, %v5885_v46 }
 0x5aa   :  { %v4165_v32 = vsub.f32 %v13673_v1, %v11316_v47  ;;  %v4181_v12 = vsub.f32 %v13674_v62, %v11337_v29  ;;  %8189 = vpow2.f32 %v11636_v17  ;;  %v11755_v5 = vmul.f32 1.442695, %v4162_v18  ;;  %v8176_v29 = vpop.eup %8175  ;;  %v11772_v18 = vld [vmem:[%s12674_s2 + $0xd8] sm:$0xff]  }
 0x5ab   :  { %v11743_v63 = vpop.permute.xlu1 %4725  ;;  %v5994_v6 = vadd.f32 %v5993_v41, %v5867_v24  ;;  %8191 = vpow2.f32 %v11667_v56  ;;  %v11759_v4 = vmul.f32 1.442695, %v4163_v39  ;;  %v11761_v47 = vmul.f32 1.442695, %v4164_v38  ;;  %v8178_v53 = vpop.eup %8177 }
 0x5ac   :  { %13672 = vst [vmem:[#allocation188_spill] sm:$0xff] %v11743_v63  ;;  %v11752_v22 = vpop.permute.xlu0 %4656  ;;  %4932 = vperm.xlu1 %7568, %v8172_v23   ;;  %v13676_v46 = vunpack.c.l.bf16 %v11382_v30  ;;  %v13677_v24 = vunpack.c.l.bf16 %v11452_v59  ;;  %8193 = vpow2.f32 %v11671_v13  ;;  %v11780_v41 = vmul.f32 1.442695, %v4165_v32  ;;  %v8180_v1 = vpop.eup %8179 }
 0x5ad   :  { %13675 = vst [vmem:[#allocation174_spill] sm:$0xff] %v11752_v22  ;;  %4848 = vperm.xlu0 %7567, %v8174_v40   ;;  %8195 = vpow2.f32 %v11677_v57  ;;  %v11782_v23 = vmul.f32 1.442695, %v4181_v12  ;;  %v13679_v40 = vunpack.c.h.bf16 %v11382_v30  ;;  %v13680_v13 = vunpack.c.h.bf16 %v11452_v59  ;;  %v8182_v38 = vpop.eup %8181  ;;  %v11795_v57 = vld [vmem:[%s12674_s2 + $0xe0] sm:$0xff]   ;;  %v11802_v12 = vld [vmem:[%s12674_s2 + $0xe8] sm:$0xff]   ;;  %v13687_v59 = vld [vmem:[#allocation13_spill] sm:$0xff] }
 0x5ae   :  { %v5868_v51 = vmul.f32 %v13676_v46, %v11277_v0  ;;  %v5886_v17 = vmul.f32 %v13677_v24, %v11343_v49  ;;  %v5637_v30 = vunpack.c.h.bf16 %v11484_v60  ;;  %8197 = vpow2.f32 %v11687_v55 }
 0x5af   :  { %v11776_v39 = vpop.permute.xlu1 %4731  ;;  %v5869_v46 = vmul.f32 %v13679_v40, %v11353_v21  ;;  %v5887_v56 = vmul.f32 %v13680_v13, %v11725_v36  ;;  %8199 = vpow2.f32 %v11689_v35  ;;  %v13686_v55 = vunpack.c.l.bf16 %v11484_v60 }
 0x5b0   :  { %13678 = vst [vmem:[#allocation212_spill] sm:$0xff] %v11776_v39  ;;  %v5995_v62 = vadd.f32 %v5994_v6, %v5868_v51  ;;  %v6018_v24 = vadd.f32 %v6017_v7, %v5886_v17  ;;  %v11790_v8 = vpop.permute.xlu0 %4662  ;;  %4935 = vperm.xlu1 %7568, %v8176_v29   ;;  %v5639_v6 = vunpack.c.h.bf16 %v11493_v15  ;;  %v11810_v7 = vld [vmem:[%s12674_s2 + $0xf0] sm:$0xff]   ;;  %v8184_v17 = vpop.eup %8183  ;;  %8201 = vpow2.f32 %v11715_v37  ;;  %v13692_v39 = vld [vmem:[#allocation200_spill] sm:$0xff] }
 0x5b1   :  { %13681 = vst [vmem:[#allocation181_spill] sm:$0xff] %v11790_v8  ;;  %4854 = vperm.xlu0 %7567, %v8178_v53   ;;  %13682 = vst [vmem:[#allocation197_spill] sm:$0xff] %v11810_v7  ;;  %v13683_v53 = vunpack.c.l.bf16 %v11478_v10  ;;  %8203 = vpow2.f32 %v11728_v25  ;;  %v13691_v25 = vunpack.c.h.bf16 %v11478_v10  ;;  %v5122_v49 = vrot.slane %v13693_v34, %v13692_v39  ;;  %v13697_v10 = vld [vmem:[#allocation99_spill] sm:$0xff] }
 0x5b2   :  { %v8186_v32 = vpop.eup %8185  ;;  %v5996_v36 = vadd.f32 %v5995_v62, %v5869_v46  ;;  %v6019_v29 = vadd.f32 %v6018_v24, %v5887_v56  ;;  %v13688_v56 = vld [vmem:[#allocation169_spill] sm:$0xff]  ;;  %v13690_v24 = vld [vmem:[#allocation86_spill] sm:$0xff]  ;;  %8205 = vpow2.f32 %v11741_v11  ;;  %v13699_v11 = vunpack.c.h.bf16 %v11463_v52 }
 0x5b3   :  { %v5870_v40 = vmul.f32 %v13683_v53, %v11364_v45  ;;  %v11818_v13 = vpop.permute.xlu1 %4737  ;;  %v8188_v51 = vpop.eup %8187  ;;  %v13685_v53 = vld [vmem:[#allocation103_spill] sm:$0xff]  ;;  %v5871_v35 = vmul.f32 %v13691_v25, %v13690_v24  ;;  %v13698_v25 = vunpack.c.l.bf16 %v13697_v10  ;;  %8207 = vpow2.f32 %v11746_v43 }
 0x5b4   :  { %13684 = vst [vmem:[#allocation190_spill] sm:$0xff] %v11818_v13  ;;  %v4669_v7 = vpop.permute.xlu0 %4668  ;;  %4938 = vperm.xlu1 %7568, %v8180_v1   ;;  %v5113_v45 = vrot.slane %v13685_v53, %v10604_v26  ;;  %v5892_v13 = vmul.f32 %v13686_v55, %v13685_v53  ;;  %v8190_v62 = vpop.eup %8189  ;;  %v13689_v1 = vunpack.c.l.bf16 %v11463_v52  ;;  %v5889_v9 = vmul.f32 %v13699_v11, %v11752_v22 }
 0x5b5   :  { %v5117_v21 = vrot.slane %v4669_v7, %v13687_v59  ;;  %v5893_v37 = vmul.f32 %v5637_v30, %v4669_v7  ;;  %4860 = vperm.xlu0 %7567, %v8182_v38   ;;  %v8192_v60 = vpop.eup %8191  ;;  %v5997_v55 = vadd.f32 %v5996_v36, %v5870_v40  ;;  %v13694_v30 = vunpack.c.l.bf16 %v11493_v15 }
 0x5b6   :  { %v5888_v46 = vmul.f32 %v13689_v1, %v13688_v56  ;;  %v8194_v1 = vpop.eup %8193  ;;  %v13696_v56 = vld [vmem:[#allocation111_spill] sm:$0xff]  ;;  %v13705_v52 = vunpack.c.h.bf16 %v13697_v10  ;;  %8209 = vpow2.f32 %v11755_v5 }
 0x5b7   :  { %v5894_v38 = vmul.f32 %v13694_v30, %v13693_v34  ;;  %v5118_v7 = vsel %vm3331_vm2, %v5117_v21, %v5113_v45  ;;  %v6030_v53 = vadd.f32 %v5893_v37, %v5892_v13  ;;  %v11844_v63 = vpop.permute.xlu1 %4743  ;;  %v5872_v24 = vmul.f32 %v13698_v25, %v13696_v56  ;;  %v11853_v15 = vpop.eup %8195  ;;  %v13700_v45 = vld [vmem:[#allocation201_spill] sm:$0xff]  ;;  %v13701_v37 = vld [vmem:[#allocation48_spill] sm:$0xff]  ;;  %v13702_v25 = vld [vmem:[#allocation206_spill] sm:$0xff] }
 0x5b8   :  { %13695 = vst [vmem:[#allocation176_spill] sm:$0xff] %v11844_v63  ;;  %v6020_v2 = vadd.f32 %v6019_v29, %v5888_v46  ;;  %v5123_v36 = vsel %vm3338_vm3, %v5122_v49, %v5118_v7  ;;  %v4675_v40 = vpop.permute.xlu0 %4674  ;;  %4941 = vperm.xlu1 %7568, %v8184_v17   ;;  %v5998_v63 = vadd.f32 %v5997_v55, %v5871_v35  ;;  %v13703_v29 = vld [vmem:[#allocation173_spill] sm:$0xff]  ;;  %v13704_v56 = vld [vmem:[#allocation175_spill] sm:$0xff]  ;;  %v11863_v49 = vpop.eup %8197  ;;  %v13706_v17 = vunpack.c.l.bf16 %v11515_v20 }
 0x5b9   :  { %v6031_v21 = vadd.f32 %v6030_v53, %v5894_v38  ;;  %v5127_v34 = vrot.slane %v4675_v40, %v13700_v45  ;;  %v5895_v13 = vmul.f32 %v5639_v6, %v4675_v40  ;;  %4905 = vperm.xlu0 %7567, %v8186_v32   ;;  %v5132_v46 = vrot.slane %v13703_v29, %v13702_v25  ;;  %v11872_v35 = vpop.eup %8199 }
 0x5ba   :  { %v5873_v11 = vmul.f32 %v13705_v52, %v13704_v56  ;;  %v5896_v38 = vmul.f32 %v13706_v17, %v13703_v29  ;;  %v5999_v55 = vadd.f32 %v5998_v63, %v5872_v24  ;;  %v6021_v53 = vadd.f32 %v6020_v2, %v5889_v9  ;;  %v11876_v40 = vpop.eup %8201  ;;  %v13710_v52 = vld [vmem:[#allocation203_spill] sm:$0xff]  ;;  %v13712_v2 = vld [vmem:[#allocation109_spill] sm:$0xff] }
 0x5bb   :  { %v5128_v32 = vsel %vm13707_vm1, %v5127_v34, %v5123_v36  ;;  %v6032_v6 = vadd.f32 %v6031_v21, %v5895_v13  ;;  %v11869_v7 = vpop.permute.xlu1 %4749  ;;  %8211 = vpow2.f32 %v11759_v4  ;;  %v13711_v21 = vunpack.c.h.bf16 %v11515_v20  ;;  %v11882_v5 = vpop.eup %8203  ;;  %v13714_v24 = vld [vmem:[#allocation209_spill] sm:$0xff]  ;;  %v13715_v4 = vld [vmem:[#allocation44_spill] sm:$0xff] }
 0x5bc   :  { %13708 = vst [vmem:[#allocation183_spill] sm:$0xff] %v11869_v7  ;;  %v5133_v10 = vsel %vm13709_vm6, %v5132_v46, %v5128_v32  ;;  %v4681_v43 = vpop.permute.xlu0 %4680  ;;  %4944 = vperm.xlu1 %7568, %v8188_v51   ;;  %8213 = vpow2.f32 %v11761_v47  ;;  %v13713_v9 = vunpack.c.l.bf16 %v11472_v44  ;;  %v6000_v51 = vadd.f32 %v5999_v55, %v5873_v11  ;;  %v13716_v46 = vld [vmem:[#allocation177_spill] sm:$0xff]  ;;  %v13721_v11 = vld [vmem:[#allocation104_spill] sm:$0xff] }
 0x5bd   :  { %v6033_v29 = vadd.f32 %v6032_v6, %v5896_v38  ;;  %v5137_v36 = vrot.slane %v4681_v43, %v13710_v52  ;;  %v5897_v34 = vmul.f32 %v13711_v21, %v4681_v43  ;;  %4866 = vperm.xlu0 %7567, %v8190_v62   ;;  %v5142_v13 = vrot.slane %v13715_v4, %v13714_v24  ;;  %v11897_v6 = vpop.eup %8205  ;;  %v13720_v43 = vld [vmem:[#allocation149_spill] sm:$0xff] }
 0x5be   :  { %v5890_v63 = vmul.f32 %v13713_v9, %v13712_v2  ;;  %v13717_v38 = vunpack.c.l.bf16 %v11545_v48  ;;  %vm13718_vm1 = vcmask 392512   ;;  %8215 = vpow2.f32 %v11780_v41 }
 0x5bf   :  { %v5138_v62 = vsel %vm13718_vm1, %v5137_v36, %v5133_v10  ;;  %v6034_v32 = vadd.f32 %v6033_v29, %v5897_v34  ;;  %v11894_v47 = vpop.permute.xlu1 %4755  ;;  %v13722_v55 = vunpack.c.l.bf16 %v13721_v11  ;;  %v13723_v17 = vunpack.c.h.bf16 %v11472_v44  ;;  %v13725_v29 = vld [vmem:[#allocation205_spill] sm:$0xff] }
 0x5c0   :  { %v5898_v20 = vmul.f32 %v13717_v38, %v13715_v4  ;;  %13719 = vst [vmem:[#allocation199_spill] sm:$0xff] %v11894_v47  ;;  %v6022_v9 = vadd.f32 %v6021_v53, %v5890_v63  ;;  %vm13724_vm6 = vcmask 458112   ;;  %v4687_v38 = vpop.permute.xlu0 %4686  ;;  %4947 = vperm.xlu1 %7568, %v8192_v60   ;;  %v13726_v41 = vunpack.c.h.bf16 %v11545_v48  ;;  %v13727_v47 = vld [vmem:[#allocation52_spill] sm:$0xff]  ;;  %v13734_v53 = vld [vmem:[#allocation171_spill] sm:$0xff] }
 0x5c1   :  { %v5874_v21 = vmul.f32 %v13722_v55, %v13720_v43  ;;  %v5891_v30 = vmul.f32 %v13723_v17, %v11790_v8  ;;  %v5143_v4 = vsel %vm13724_vm6, %v5142_v13, %v5138_v62  ;;  %v5147_v36 = vrot.slane %v4687_v38, %v13725_v29  ;;  %4869 = vperm.xlu0 %7567, %v8194_v1   ;;  %v13728_v55 = vld [vmem:[#allocation191_spill] sm:$0xff]  ;;  %v13730_v13 = vld [vmem:[#allocation214_spill] sm:$0xff] }
 0x5c2   :  { %v6035_v10 = vadd.f32 %v6034_v32, %v5898_v20  ;;  %v5899_v34 = vmul.f32 %v13726_v41, %v4687_v38  ;;  %8217 = vpow2.f32 %v11782_v23  ;;  %v13729_v44 = vunpack.c.h.bf16 %v13721_v11  ;;  %v13733_v11 = vld [vmem:[#allocation115_spill] sm:$0xff] }
 0x5c3   :  { %v6001_v63 = vadd.f32 %v6000_v51, %v5874_v21  ;;  %v5152_v60 = vrot.slane %v13730_v13, %v13727_v47  ;;  %v4955_v20 = vrot.slane %v11279_v3, %v10604_v26  ;;  %v13731_v48 = vunpack.c.l.bf16 %v11586_v31  ;;  %v11923_v32 = vpop.permute.xlu1 %4761  ;;  %v11925_v51 = vpop.eup %8207 }
 0x5c4   :  { %v5875_v17 = vmul.f32 %v13729_v44, %v13728_v55  ;;  %v5148_v23 = vsel %vm3373_vm8, %v5147_v36, %v5143_v4  ;;  %v6036_v62 = vadd.f32 %v6035_v10, %v5899_v34  ;;  %13732 = vst [vmem:[#allocation192_spill] sm:$0xff] %v11923_v32  ;;  %v4959_v21 = vrot.slane %v13733_v11, %v13687_v59  ;;  %v4693_v44 = vpop.permute.xlu0 %4692  ;;  %v11931_v43 = vpop.eup %8209  ;;  %v13740_v11 = vld [vmem:[#allocation120_spill] sm:$0xff] }
 0x5c5   :  { %v5900_v1 = vmul.f32 %v13731_v48, %v13730_v13  ;;  %v6023_v38 = vadd.f32 %v6022_v9, %v5891_v30  ;;  %v5153_v41 = vsel %vm3380_vm9, %v5152_v60, %v5148_v23  ;;  %v13735_v13 = vld [vmem:[#allocation50_spill] sm:$0xff]  ;;  %v13736_v4 = vunpack.c.h.bf16 %v11586_v31  ;;  %4872 = vperm.xlu0 %7567, %v11853_v15   ;;  %v11938_v34 = vpop.eup %8211  ;;  %v13738_v30 = vld [vmem:[#allocation133_spill] sm:$0xff] }
 0x5c6   :  { %v5157_v48 = vrot.slane %v4693_v44, %v13735_v13  ;;  %13737 = vst [vmem:[#allocation178_spill] sm:$0xff] %v11938_v34  ;;  %v4964_v9 = vrot.slane %v13738_v30, %v13692_v39  ;;  %v6002_v60 = vadd.f32 %v6001_v63, %v5875_v17  ;;  %v13739_v23 = vld [vmem:[#allocation54_spill] sm:$0xff]  ;;  %v13742_v31 = vunpack.c.l.bf16 %v11592_v14  ;;  %v13744_v17 = vld [vmem:[#allocation184_spill] sm:$0xff]  ;;  %v13756_v34 = vld [vmem:[#allocation211_spill] sm:$0xff] }
 0x5c7   :  { %v6037_v55 = vadd.f32 %v6036_v62, %v5900_v1  ;;  %v5901_v10 = vmul.f32 %v13736_v4, %v4693_v44  ;;  %v5162_v3 = vrot.slane %v13740_v11, %v13739_v23  ;;  %v11945_v62 = vpop.eup %8213  ;;  %v11951_v36 = vpop.permute.xlu1 %4767  ;;  %v4960_v63 = vsel %vm3331_vm2, %v4959_v21, %v4955_v20 }
 0x5c8   :  { %13741 = vst [vmem:[#allocation185_spill] sm:$0xff] %v11945_v62  ;;  %v5902_v44 = vmul.f32 %v13742_v31, %v13740_v11  ;;  %v5158_v15 = vsel %vm3387_vm10, %v5157_v48, %v5153_v41  ;;  %13743 = vst [vmem:[#allocation204_spill] sm:$0xff] %v11951_v36  ;;  %v5038_v30 = vrot.slane %v13744_v17, %v13687_v59  ;;  %v6024_v2 = vrot.slane %v6023_v38, 4  ;;  %v4699_v8 = vpop.permute.xlu0 %4698  ;;  %v11958_v7 = vpop.eup %8215  ;;  %v13746_v11 = vld [vmem:[#allocation81_spill] sm:$0xff]  ;;  %v13749_v17 = vld [vmem:[#allocation215_spill] sm:$0xff] }
 0x5c9   :  { %v6038_v4 = vadd.f32 %v6037_v55, %v5901_v10  ;;  %v5163_v1 = vsel %vm3394_vm11, %v5162_v3, %v5158_v15  ;;  %13745 = vst [vmem:[#allocation194_spill] sm:$0xff] %v11958_v7  ;;  %v5034_v31 = vrot.slane %v13746_v11, %v10604_v26  ;;  %v13747_v55 = vld [vmem:[#allocation207_spill] sm:$0xff]  ;;  %v13748_v10 = vunpack.c.h.bf16 %v11592_v14  ;;  %4875 = vperm.xlu0 %7567, %v11863_v49   ;;  %v13750_v36 = vld [vmem:[#allocation193_spill] sm:$0xff]  ;;  %v13752_v11 = vld [vmem:[#allocation80_spill] sm:$0xff] }
 0x5ca   :  { %v5167_v48 = vrot.slane %v4699_v8, %v13747_v55  ;;  %v4965_v20 = vsel %vm3338_vm3, %v4964_v9, %v4960_v63  ;;  %v6003_v21 = vrot.slane %v6002_v60, 4  ;;  %v5172_v3 = vrot.slane %v13750_v36, %v13749_v17 }
 0x5cb   :  { %v6039_v41 = vadd.f32 %v6038_v4, %v5902_v44  ;;  %v5903_v32 = vmul.f32 %v13748_v10, %v4699_v8  ;;  %v5043_v44 = vrot.slane %v13752_v11, %v13692_v39  ;;  %v13753_v4 = vunpack.c.l.bf16 %v13701_v37  ;;  %v11978_v10 = vpop.permute.xlu1 %4773  ;;  %v13755_v11 = vld [vmem:[#allocation202_spill] sm:$0xff] }
 0x5cc   :  { %v11970_v7 = vpop.eup %8217  ;;  %vm13754_vm1 = vcmask 786112   ;;  %v4969_v9 = vrot.slane %v11303_v28, %v13700_v45  ;;  %v5039_v63 = vsel %vm3331_vm2, %v5038_v30, %v5034_v31  ;;  %v6025_v15 = vadd.f32 %v6024_v2, %v6023_v38  ;;  %v4705_v62 = vpop.permute.xlu0 %4704  ;;  %v13758_v30 = vld [vmem:[#allocation56_spill] sm:$0xff] }
 0x5cd   :  { %13751 = vst [vmem:[#allocation180_spill] sm:$0xff] %v11970_v7  ;;  %v5904_v14 = vmul.f32 %v13753_v4, %v13750_v36  ;;  %v5168_v8 = vsel %vm13754_vm1, %v5167_v48, %v5163_v1  ;;  %v6040_v49 = vadd.f32 %v6039_v41, %v5903_v32  ;;  %v5048_v56 = vrot.slane %v13755_v11, %v13700_v45 }
 0x5ce   :  { %v5173_v7 = vsel %vm3408_vm13, %v5172_v3, %v5168_v8  ;;  %v5177_v36 = vrot.slane %v4705_v62, %v13756_v34  ;;  %v13757_v1 = vunpack.c.h.bf16 %v13701_v37  ;;  %4878 = vperm.xlu0 %7567, %v11872_v35   ;;  %v4974_v28 = vrot.slane %v11311_v50, %v13702_v25 }
 0x5cf   :  { %v6041_v22 = vadd.f32 %v6040_v49, %v5904_v14  ;;  %v6004_v41 = vadd.f32 %v6003_v21, %v6002_v60  ;;  %v5182_v2 = vrot.slane %v11655_v19, %v13758_v30  ;;  %v5663_v38 = vunpack.c.h.bf16 %v11802_v12  ;;  %v12001_v35 = vpop.permute.xlu1 %4779  ;;  %v13762_v49 = vld [vmem:[#allocation213_spill] sm:$0xff] }
 0x5d0   :  { %v5905_v32 = vmul.f32 %v13757_v1, %v4705_v62  ;;  %v4979_v31 = vrot.slane %v11324_v16, %v13710_v52  ;;  %v13759_v48 = vunpack.c.l.bf16 %v13716_v46  ;;  %v5178_v37 = vsel %vm3415_vm14, %v5177_v36, %v5173_v7  ;;  %v4711_v14 = vpop.permute.xlu0 %4710 }
 0x5d1   :  { %vm13760_vm6 = vcmask 261312   ;;  %v5044_v60 = vsel %vm3338_vm3, %v5043_v44, %v5039_v63  ;;  %v6026_v21 = vrot.slane %v6025_v15, 2  ;;  %v5183_v4 = vsel %vm3422_vm15, %v5182_v2, %v5178_v37 }
 0x5d2   :  { %v5906_v3 = vmul.f32 %v13759_v48, %v11655_v19  ;;  %v6042_v62 = vadd.f32 %v6041_v22, %v5905_v32  ;;  %v4970_v50 = vsel %vm13760_vm6, %v4969_v9, %v4965_v20  ;;  %vm13761_vm1 = vmmov %vm13760_vm6  ;;  %v5187_v11 = vrot.slane %v4711_v14, %v13762_v49  ;;  %4881 = vperm.xlu0 %7567, %v11876_v40   ;;  %v13764_v22 = vld [vmem:[#allocation101_spill] sm:$0xff]  ;;  %v13766_v9 = vld [vmem:[#allocation186_spill] sm:$0xff] }
 0x5d3   :  { %v5049_v8 = vsel %vm13761_vm1, %v5048_v56, %v5044_v60  ;;  %v13763_v19 = vunpack.c.h.bf16 %v13716_v46  ;;  %v5053_v7 = vrot.slane %v13764_v22, %v13702_v25  ;;  %vm13765_vm6 = vcmask 326912   ;;  %v12022_v2 = vpop.permute.xlu1 %4785 }
 0x5d4   :  { %v6043_v16 = vadd.f32 %v6042_v62, %v5906_v3  ;;  %v4975_v20 = vsel %vm13765_vm6, %v4974_v28, %v4970_v50  ;;  %v6005_v44 = vrot.slane %v6004_v41, 2  ;;  %v5058_v63 = vrot.slane %v13766_v9, %v13710_v52  ;;  %vm13768_vm5 = vmmov %vm13765_vm6  ;;  %v4717_v37 = vpop.permute.xlu0 %4716 }
 0x5d5   :  { %v5907_v1 = vmul.f32 %v13763_v19, %v4711_v14  ;;  %v5063_v56 = vrot.slane %v11322_v54, %v13714_v24  ;;  %vm13767_vm1 = vcmask 392512   ;;  %v12020_v32 = vsel %vm3429_vm0, %v5187_v11, %v5183_v4 }
 0x5d6   :  { %v4980_v36 = vsel %vm13767_vm1, %v4979_v31, %v4975_v20  ;;  %v4984_v40 = vrot.slane %v11332_v27, %v13714_v24  ;;  %v5054_v28 = vsel %vm13768_vm5, %v5053_v7, %v5049_v8  ;;  %v5192_v48 = vrot.slane %v11679_v33, %v10604_v26  ;;  %4884 = vperm.xlu0 %7567, %v11882_v5   ;;  %vm13771_vm5 = vmmov %vm13767_vm1 }
 0x5d7   :  { %v6044_v46 = vadd.f32 %v6043_v16, %v5907_v1  ;;  %v6027_v3 = vadd.f32 %v6026_v21, %v6025_v15  ;;  %v13769_v54 = vunpack.c.l.bf16 %v13734_v53  ;;  %v5196_v50 = vrot.slane %v4717_v37, %v13687_v59  ;;  %v13772_v15 = vld [vmem:[#allocation179_spill] sm:$0xff]  ;;  %v12045_v1 = vpop.permute.xlu1 %4791 }
 0x5d8   :  { %v13770_v60 = vunpack.c.h.bf16 %v13734_v53  ;;  %v5073_v27 = vrot.slane %v11330_v58, %v13727_v47  ;;  %v6006_v14 = vadd.f32 %v6005_v44, %v6004_v41  ;;  %v5059_v8 = vsel %vm13771_vm5, %v5058_v63, %v5054_v28  ;;  %v13775_v58 = vld [vmem:[#allocation172_spill] sm:$0xff]  ;;  %v4723_v20 = vpop.permute.xlu0 %4722 }
 0x5d9   :  { %v5908_v31 = vmul.f32 %v13769_v54, %v11679_v33  ;;  %v6045_v62 = vrot.slane %v6044_v46, 4  ;;  %v5201_v21 = vrot.slane %v13772_v15, %v13692_v39  ;;  %v13773_v33 = vunpack.c.l.bf16 %v11684_v42  ;;  %v13779_v54 = vld [vmem:[#allocation188_spill] sm:$0xff] }
 0x5da   :  { %v5909_v4 = vmul.f32 %v13770_v60, %v4717_v37  ;;  %v5197_v19 = vsel %vm3331_vm2, %v5196_v50, %v5192_v48  ;;  %vm13774_vm6 = vcmask 458112   ;;  %v5068_v41 = vrot.slane %v13775_v58, %v13725_v29  ;;  %4887 = vperm.xlu0 %7567, %v11897_v6   ;;  %v13777_v48 = vld [vmem:[#allocation93_spill] sm:$0xff]  ;;  %v13782_v6 = vld [vmem:[#allocation62_spill] sm:$0xff] }
 0x5db   :  { %v5910_v16 = vmul.f32 %v13773_v33, %v13772_v15  ;;  %v6046_v11 = vadd.f32 %v6045_v62, %v6044_v46  ;;  %v4985_v5 = vsel %vm13774_vm6, %v4984_v40, %v4980_v36  ;;  %v6028_v22 = vrot.slane %v6027_v3, 1  ;;  %vm13778_vm1 = vmmov %vm13774_vm6  ;;  %v12064_v15 = vpop.permute.xlu1 %4797 }
 0x5dc   :  { %v6051_v53 = vadd.f32 %v5909_v4, %v5908_v31  ;;  %v5202_v7 = vsel %vm3338_vm3, %v5201_v21, %v5197_v19  ;;  %v5206_v63 = vrot.slane %v4723_v20, %v13700_v45  ;;  %v13776_v46 = vunpack.c.h.bf16 %v11684_v42 }
 0x5dd   :  { %v6047_v44 = vrot.slane %v6046_v11, 2  ;;  %v4989_v37 = vrot.slane %v13777_v48, %v13725_v29  ;;  %v6007_v36 = vrot.slane %v6006_v14, 1  ;;  %v5064_v40 = vsel %vm13778_vm1, %v5063_v56, %v5059_v8  ;;  %v4729_v8 = vpop.permute.xlu0 %4728 }
 0x5de   :  { %v6052_v9 = vadd.f32 %v6051_v53, %v5910_v16  ;;  %v5911_v28 = vmul.f32 %v13776_v46, %v4723_v20  ;;  %v5211_v31 = vrot.slane %v13779_v54, %v13702_v25  ;;  %v13780_v62 = vunpack.c.l.bf16 %v11737_v61  ;;  %4890 = vperm.xlu0 %7567, %v11925_v51   ;;  %v13789_v51 = vld [vmem:[#allocation92_spill] sm:$0xff] }
 0x5df   :  { %v6048_v60 = vadd.f32 %v6047_v44, %v6046_v11  ;;  %vm13781_vm5 = vcmask 261312   ;;  %v5083_v21 = vrot.slane %v13782_v6, %v13739_v23  ;;  %v5069_v33 = vsel %vm3373_vm8, %v5068_v41, %v5064_v40  ;;  %v12083_v40 = vpop.permute.xlu1 %4803 }
 0x5e0   :  { %v5912_v50 = vmul.f32 %v13780_v62, %v13779_v54  ;;  %v5207_v4 = vsel %vm13781_vm5, %v5206_v63, %v5202_v7  ;;  %v6053_v42 = vadd.f32 %v6052_v9, %v5911_v28  ;;  %v6029_v16 = vadd.f32 %v6028_v22, %v6027_v3  ;;  %v13785_v9 = vld [vmem:[#allocation208_spill] sm:$0xff] }
 0x5e1   :  { %vm13783_vm6 = vcmask 326912   ;;  %v6049_v19 = vrot.slane %v6048_v60, 1  ;;  %v5216_v58 = vrot.slane %v4729_v8, %v13710_v52  ;;  %v13784_v11 = vunpack.c.h.bf16 %v11737_v61  ;;  %v13786_v3 = vld [vmem:[#allocation212_spill] sm:$0xff]  ;;  %v4735_v54 = vpop.permute.xlu0 %4734 }
 0x5e2   :  { %v5212_v56 = vsel %vm13783_vm6, %v5211_v31, %v5207_v4  ;;  %v6054_v53 = vadd.f32 %v6053_v42, %v5912_v50  ;;  %v4990_v7 = vsel %vm3373_vm8, %v4989_v37, %v4985_v5  ;;  %v6008_v44 = vadd.f32 %v6007_v36, %v6006_v14  ;;  %4893 = vperm.xlu0 %7567, %v11931_v43  }
 0x5e3   :  { %v5913_v20 = vmul.f32 %v13784_v11, %v4729_v8  ;;  %v5078_v63 = vrot.slane %v13785_v9, %v13735_v13  ;;  %v5221_v41 = vrot.slane %v13786_v3, %v13714_v24  ;;  %v13787_v22 = vunpack.c.l.bf16 %v11772_v18  ;;  %v12112_v11 = vpop.permute.xlu1 %4809  ;;  %v13800_v9 = vld [vmem:[#allocation86_spill] sm:$0xff] }
 0x5e4   :  { %v6050_v28 = vadd.f32 %v6049_v19, %v6048_v60  ;;  %vm13788_vm1 = vcmask 392512   ;;  %v4999_v5 = vrot.slane %v13789_v51, %v13735_v13  ;;  %v5074_v14 = vsel %vm3380_vm9, %v5073_v27, %v5069_v33  ;;  %v13795_v33 = vld [vmem:[#allocation195_spill] sm:$0xff]  ;;  %v13802_v51 = vld [vmem:[#allocation178_spill] sm:$0xff] }
 0x5e5   :  { %v5914_v46 = vmul.f32 %v13787_v22, %v13786_v3  ;;  %v5217_v48 = vsel %vm13788_vm1, %v5216_v58, %v5212_v56  ;;  %v6055_v61 = vadd.f32 %v6054_v53, %v5913_v20  ;;  %vm13790_vm5 = vcmask 1041409   ;;  %v13796_v56 = vld [vmem:[#allocation190_spill] sm:$0xff]  ;;  %v13799_v20 = vld [vmem:[#allocation169_spill] sm:$0xff] }
 0x5e6   :  { %v6164_v37 = vsel %vm13790_vm5, %v6029_v16, %v6008_v44  ;;  %vm13791_vm6 = vcmask 458112   ;;  %v5226_v62 = vrot.slane %v4735_v54, %v13725_v29  ;;  %v13792_v50 = vunpack.c.h.bf16 %v11772_v18  ;;  %v13797_v18 = vld [vmem:[#allocation75_spill] sm:$0xff]  ;;  %4896 = vperm.xlu0 %7567, %v13802_v51   ;;  %v13816_v51 = vld [vmem:[#allocation109_spill] sm:$0xff] }
 0x5e7   :  { %v5222_v36 = vsel %vm13791_vm6, %v5221_v41, %v5217_v48  ;;  %v6056_v31 = vadd.f32 %v6055_v61, %v5914_v46  ;;  %vm13793_vm1 = vcmask 1042434   ;;  %v13794_v42 = vrot.slane %v11277_v0, %v13727_v47  ;;  %v4741_v41 = vpop.permute.xlu0 %4740 }
 0x5e8   :  { %v5915_v60 = vmul.f32 %v13792_v50, %v4735_v54  ;;  %v12095_v4 = vsel %vm13793_vm1, %v6050_v28, %v6164_v37  ;;  %v5079_v6 = vsel %vm3387_vm10, %v5078_v63, %v5074_v14  ;;  %v5088_v16 = vrot.slane %v13795_v33, %v13747_v55  ;;  %v13803_v14 = vld [vmem:[#allocation111_spill] sm:$0xff] }
 0x5e9   :  { %v4995_v27 = vsel %vm3380_vm9, %v13794_v42, %v4990_v7  ;;  %v5231_v8 = vrot.slane %v13796_v56, %v13727_v47  ;;  %v5004_v19 = vrot.slane %v13797_v18, %v13739_v23  ;;  %v13798_v43 = vunpack.c.l.bf16 %v11795_v57  ;;  %v13809_v33 = vld [vmem:[#allocation175_spill] sm:$0xff]  ;;  %v13810_v18 = vld [vmem:[#allocation197_spill] sm:$0xff] }
 0x5ea   :  { %v5227_v58 = vsel %vm3373_vm8, %v5226_v62, %v5222_v36  ;;  %v6057_v0 = vadd.f32 %v6056_v31, %v5915_v60  ;;  %v5093_v7 = vrot.slane %v13799_v20, %v13749_v17  ;;  %v5000_v44 = vsel %vm3387_vm10, %v4999_v5, %v4995_v27  ;;  %v13805_v36 = vld [vmem:[#allocation174_spill] sm:$0xff]  ;;  %v13806_v31 = vld [vmem:[#allocation176_spill] sm:$0xff]  ;;  %v12137_v27 = vpop.permute.xlu1 %4815  ;;  %v13811_v20 = vld [vmem:[#allocation185_spill] sm:$0xff] }
 0x5eb   :  { %v5916_v53 = vmul.f32 %v13798_v43, %v13796_v56  ;;  %v5009_v63 = vrot.slane %v13800_v9, %v13747_v55  ;;  %v5232_v3 = vsel %vm3380_vm9, %v5231_v8, %v5227_v58  ;;  %v5084_v22 = vsel %vm3394_vm11, %v5083_v21, %v5079_v6  ;;  %v4747_v8 = vpop.permute.xlu0 %4746  ;;  %4899 = vperm.xlu0 %7567, %v13811_v20  }
 0x5ec   :  { %v5236_v28 = vrot.slane %v4741_v41, %v13735_v13  ;;  %v13801_v48 = vunpack.c.h.bf16 %v11795_v57  ;;  %v5014_v37 = vrot.slane %v13803_v14, %v13749_v17  ;;  %vm13804_vm5 = vcmask 786112  }
 0x5ed   :  { %v6058_v46 = vadd.f32 %v6057_v0, %v5916_v53  ;;  %v5089_v5 = vsel %vm13804_vm5, %v5088_v16, %v5084_v22  ;;  %v5098_v54 = vrot.slane %v13805_v36, %v13756_v34  ;;  %v5241_v62 = vrot.slane %v13806_v31, %v13739_v23  ;;  %vm13808_vm6 = vmmov %vm13804_vm5  ;;  %v13813_v22 = vld [vmem:[#allocation181_spill] sm:$0xff] }
 0x5ee   :  { %v5917_v61 = vmul.f32 %v13801_v48, %v4741_v41  ;;  %v5005_v21 = vsel %vm3394_vm11, %v5004_v19, %v5000_v44  ;;  %v13807_v50 = vunpack.c.l.bf16 %v11802_v12  ;;  %v5237_v60 = vsel %vm3387_vm10, %v5236_v28, %v5232_v3  ;;  %v8251_v41 = vld [vmem:[%s12674_s2 + $0xf8] sm:$0xff]   ;;  %vm13815_vm1 = vmmov %vm13804_vm5 }
 0x5ef   :  { %v5010_v6 = vsel %vm13808_vm6, %v5009_v63, %v5005_v21  ;;  %v5019_v16 = vrot.slane %v13809_v33, %v13756_v34  ;;  %v5242_v56 = vsel %vm3394_vm11, %v5241_v62, %v5237_v60  ;;  %v5665_v43 = vunpack.c.h.bf16 %v13810_v18  ;;  %v13812_v63 = vld [vmem:[#allocation183_spill] sm:$0xff]  ;;  %v4753_v36 = vpop.permute.xlu0 %4752  ;;  %v13818_v60 = vld [vmem:[#allocation194_spill] sm:$0xff] }
 0x5f0   :  { %v5918_v57 = vmul.f32 %v13807_v50, %v13806_v31  ;;  %v6059_v42 = vadd.f32 %v6058_v46, %v5917_v61  ;;  %v5094_v19 = vsel %vm3408_vm13, %v5093_v7, %v5089_v5  ;;  %v5246_v58 = vrot.slane %v4747_v8, %v13747_v55  ;;  %v12162_v61 = vpop.permute.xlu1 %4821  ;;  %v13817_v31 = vld [vmem:[#allocation191_spill] sm:$0xff]  ;;  %4902 = vperm.xlu0 %7567, %v13818_v60  }
 0x5f1   :  { %v5919_v0 = vmul.f32 %v5663_v38, %v4747_v8  ;;  %v5015_v44 = vsel %vm3408_vm13, %v5014_v37, %v5010_v6  ;;  %v5099_v9 = vsel %vm3415_vm14, %v5098_v54, %v5094_v19  ;;  %v5251_v3 = vrot.slane %v13812_v63, %v13749_v17 }
 0x5f2   :  { %v6060_v53 = vadd.f32 %v6059_v42, %v5918_v57  ;;  %v5666_v7 = vunpack.c.l.bf16 %v8251_v41  ;;  %v5108_v46 = vrot.slane %v13813_v22, %v13762_v49  ;;  %v13814_v12 = vunpack.c.l.bf16 %v13810_v18  ;;  %v13819_v42 = vld [vmem:[#allocation149_spill] sm:$0xff] }
 0x5f3   :  { %v5247_v28 = vsel %vm13815_vm1, %v5246_v58, %v5242_v56  ;;  %v5103_v14 = vrot.slane %v13816_v51, %v13758_v30  ;;  %v5020_v37 = vsel %vm3415_vm14, %v5019_v16, %v5015_v44  ;;  %v5667_v54 = vunpack.c.h.bf16 %v8251_v41  ;;  %v13820_v16 = vld [vmem:[#allocation199_spill] sm:$0xff] }
 0x5f4   :  { %v5920_v38 = vmul.f32 %v13814_v12, %v13812_v63  ;;  %v6061_v48 = vadd.f32 %v6060_v53, %v5919_v0  ;;  %v5252_v5 = vsel %vm3408_vm13, %v5251_v3, %v5247_v28  ;;  %v5029_v62 = vrot.slane %v13817_v31, %v13762_v49  ;;  %v12180_v58 = vpop.permute.xlu1 %4827  ;;  %v8252_v0 = vld [vmem:[%s12674_s2 + $0x100] sm:$0xff]  }
 0x5f5   :  { %v5256_v50 = vrot.slane %v4753_v36, %v13756_v34  ;;  %v5921_v57 = vmul.f32 %v5665_v43, %v4753_v36  ;;  %v5024_v6 = vrot.slane %v13819_v42, %v13758_v30  ;;  %v5104_v33 = vsel %vm3422_vm15, %v5103_v14, %v5099_v9  ;;  %v4759_v9 = vpop.permute.xlu0 %4758  ;;  %v13826_v42 = vld [vmem:[#allocation204_spill] sm:$0xff] }
 0x5f6   :  { %v6062_v21 = vadd.f32 %v6061_v48, %v5920_v38  ;;  %v5261_v56 = vrot.slane %v13820_v16, %v13758_v30  ;;  %v5109_v8 = vsel %vm3429_vm0, %v5108_v46, %v5104_v33  ;;  %v5922_v18 = vmul.f32 %v5666_v7, %v13820_v16  ;;  %v13821_v46 = vld [vmem:[#allocation180_spill] sm:$0xff]  ;;  %v8254_v33 = vld [vmem:[%s12674_s2 + $0x110] sm:$0xff]  }
 0x5f7   :  { %v5257_v19 = vsel %vm3415_vm14, %v5256_v50, %v5252_v5  ;;  %v5025_v43 = vsel %vm3422_vm15, %v5024_v6, %v5020_v37  ;;  %v5668_v20 = vunpack.c.l.bf16 %v8252_v0  ;;  %v5669_v63 = vunpack.c.h.bf16 %v8252_v0  ;;  %4950 = vperm.xlu0 %7567, %v13821_v46   ;;  %v8253_v38 = vld [vmem:[%s12674_s2 + $0x108] sm:$0xff]  }
 0x5f8   :  { %v6063_v53 = vadd.f32 %v6062_v21, %v5921_v57  ;;  %v5262_v44 = vsel %vm3422_vm15, %v5261_v56, %v5257_v19  ;;  %v5030_v3 = vsel %vm3429_vm0, %v5029_v62, %v5025_v43  ;;  %v5266_v7 = vrot.slane %v4759_v9, %v13762_v49  ;;  %v12197_v37 = vpop.permute.xlu1 %4833  ;;  %v13824_v5 = vld [vmem:[#allocation192_spill] sm:$0xff] }
 0x5f9   :  { %v5923_v22 = vmul.f32 %v5667_v54, %v4759_v9  ;;  %vm13822_vm5 = vcmask 1041409   ;;  %v5670_v28 = vunpack.c.l.bf16 %v8253_v38  ;;  %vm13823_vm6 = vcmask 1042434   ;;  %v4765_v31 = vpop.permute.xlu0 %4764 }
 0x5fa   :  { %v6064_v41 = vadd.f32 %v6063_v53, %v5922_v18  ;;  %v5584_v12 = vsel %vm13822_vm5, %v5109_v8, %v5030_v3  ;;  %v5267_v51 = vsel %vm3429_vm0, %v5266_v7, %v5262_v44  ;;  %v5271_v36 = vrot.slane %v13824_v5, %v10604_v26  ;;  %v8255_v7 = vld [vmem:[%s12674_s2 + $0x118] sm:$0xff]  }
 0x5fb   :  { %v5585_v48 = vsel %vm13823_vm6, %v12020_v32, %v5584_v12  ;;  %v5671_v62 = vunpack.c.h.bf16 %v8253_v38  ;;  %v5924_v21 = vmul.f32 %v5668_v20, %v13824_v5  ;;  %v5275_v57 = vrot.slane %v4765_v31, %v13687_v59  ;;  %v13825_v32 = vld [vmem:[#allocation189_spill] sm:$0xff] }
 0x5fc   :  { %v6065_v14 = vadd.f32 %v6064_v41, %v5923_v22  ;;  %v12202_v54 = vsel %vm3988_vm7, %v5267_v51, %v5585_v48  ;;  %v5925_v60 = vmul.f32 %v5669_v63, %v4765_v31  ;;  %5600 = vperm.xlu0 %7567, %v13825_v32   ;;  %v5280_v6 = vrot.slane %v13826_v42, %v13692_v39  ;;  %v12214_v53 = vpop.permute.xlu1 %4839 }
 0x5fd   :  { %v5672_v16 = vunpack.c.l.bf16 %v8254_v33  ;;  %v5926_v56 = vmul.f32 %v5670_v28, %v13826_v42  ;;  %v5276_v18 = vsel %vm3331_vm2, %v5275_v57, %v5271_v36  ;;  %v4771_v0 = vpop.permute.xlu0 %4770  ;;  %v5673_v20 = vunpack.c.h.bf16 %v8254_v33 }
 0x5fe   :  { %v6066_v50 = vrot.slane %v6065_v14, 4  ;;  %v6072_v19 = vadd.f32 %v5925_v60, %v5924_v21  ;;  %v5281_v43 = vsel %vm3338_vm3, %v5280_v6, %v5276_v18  ;;  %v5285_v63 = vrot.slane %v4771_v0, %v13700_v45 }
 0x5ff   :  { %v5927_v3 = vmul.f32 %v5671_v62, %v4771_v0  ;;  %v5290_v41 = vrot.slane %v11978_v10, %v13702_v25  ;;  %v5674_v22 = vunpack.c.l.bf16 %v8255_v7  ;;  %v5928_v46 = vmul.f32 %v5672_v16, %v11978_v10  ;;  %v8256_v10 = vld [vmem:[%s12674_s2 + $0x120] sm:$0xff]  }
 0x600   :  { %v6067_v8 = vadd.f32 %v6066_v50, %v6065_v14  ;;  %v6073_v9 = vadd.f32 %v6072_v19, %v5926_v56  ;;  %vm13827_vm1 = vcmask 261312   ;;  %v12225_v48 = vpop.permute.xlu1 %4845  ;;  %vm13828_vm5 = vcmask 326912  }
 0x601   :  { %v5286_v38 = vsel %vm13827_vm1, %v5285_v63, %v5281_v43  ;;  %v4777_v14 = vpop.permute.xlu0 %4776  ;;  %v5675_v5 = vunpack.c.h.bf16 %v8255_v7  ;;  %v5300_v50 = vrot.slane %v12001_v35, %v13714_v24  ;;  %v5676_v57 = vunpack.c.l.bf16 %v8256_v10 }
 0x602   :  { %v6068_v44 = vrot.slane %v6067_v8, 2  ;;  %v6074_v28 = vadd.f32 %v6073_v9, %v5927_v3  ;;  %v5291_v51 = vsel %vm13828_vm5, %v5290_v41, %v5286_v38  ;;  %v5295_v62 = vrot.slane %v4777_v14, %v13710_v52  ;;  %v8257_v9 = vld [vmem:[%s12674_s2 + $0x128] sm:$0xff]  }
 0x603   :  { %v5929_v21 = vmul.f32 %v5673_v20, %v4777_v14  ;;  %v5930_v60 = vmul.f32 %v5674_v22, %v12001_v35  ;;  %vm13829_vm6 = vcmask 392512   ;;  %vm13830_vm1 = vcmask 458112   ;;  %v8258_v14 = vld [vmem:[%s12674_s2 + $0x130] sm:$0xff]  }
 0x604   :  { %v6069_v12 = vadd.f32 %v6068_v44, %v6067_v8  ;;  %v6075_v31 = vadd.f32 %v6074_v28, %v5928_v46  ;;  %v5296_v6 = vsel %vm13829_vm6, %v5295_v62, %v5291_v51  ;;  %v12236_v16 = vpop.permute.xlu1 %4851  ;;  %v5677_v18 = vunpack.c.h.bf16 %v8256_v10 }
 0x605   :  { %v5301_v56 = vsel %vm13830_vm1, %v5300_v50, %v5296_v6  ;;  %v4783_v8 = vpop.permute.xlu0 %4782  ;;  %v5310_v35 = vrot.slane %v12022_v2, %v13727_v47  ;;  %v5932_v44 = vmul.f32 %v5676_v57, %v12022_v2  ;;  %v5678_v63 = vunpack.c.l.bf16 %v8257_v9 }
 0x606   :  { %v6070_v36 = vrot.slane %v6069_v12, 1  ;;  %v6076_v33 = vadd.f32 %v6075_v31, %v5929_v21  ;;  %v5305_v43 = vrot.slane %v4783_v8, %v13725_v29  ;;  %v5931_v0 = vmul.f32 %v5675_v5, %v4783_v8 }
 0x607   :  { %v5679_v28 = vunpack.c.h.bf16 %v8257_v9  ;;  %v5320_v2 = vrot.slane %v12045_v1, %v13739_v23  ;;  %v5934_v51 = vmul.f32 %v5678_v63, %v12045_v1  ;;  %v5680_v5 = vunpack.c.l.bf16 %v8258_v14 }
 0x608   :  { %v6071_v42 = vadd.f32 %v6070_v36, %v6069_v12  ;;  %v6077_v19 = vadd.f32 %v6076_v33, %v5930_v60  ;;  %v5306_v3 = vsel %vm3373_vm8, %v5305_v43, %v5301_v56  ;;  %v12251_v7 = vpop.permute.xlu1 %4857  ;;  %v5330_v1 = vrot.slane %v12064_v15, %v13749_v17  ;;  %v8259_v33 = vld [vmem:[%s12674_s2 + $0x138] sm:$0xff]  }
 0x609   :  { %v5311_v22 = vsel %vm3380_vm9, %v5310_v35, %v5306_v3  ;;  %v4789_v46 = vpop.permute.xlu0 %4788  ;;  %v5936_v6 = vmul.f32 %v5680_v5, %v12064_v15  ;;  %v5682_v56 = vunpack.c.l.bf16 %v8259_v33  ;;  %v5683_v63 = vunpack.c.h.bf16 %v8259_v33 }
 0x60a   :  { %v12242_v20 = vsel %vm3988_vm7, %v6071_v42, %v12095_v4  ;;  %v6078_v41 = vadd.f32 %v6077_v19, %v5931_v0  ;;  %v5315_v12 = vrot.slane %v4789_v46, %v13735_v13  ;;  %v5933_v38 = vmul.f32 %v5677_v18, %v4789_v46 }
 0x60b   :  { %v5681_v42 = vunpack.c.h.bf16 %v8258_v14  ;;  %vm13831_vm7 = vcmask 786112   ;;  %v5340_v15 = vrot.slane %v12083_v40, %v13758_v30  ;;  %v5938_v3 = vmul.f32 %v5682_v56, %v12083_v40  ;;  %v8261_v40 = vld [vmem:[%s12674_s2 + $0x148] sm:$0xff]  }
 0x60c   :  { %v6079_v4 = vadd.f32 %v6078_v41, %v5932_v44  ;;  %v5316_v36 = vsel %vm3387_vm10, %v5315_v12, %v5311_v22  ;;  %v12262_v62 = vpop.permute.xlu1 %4863  ;;  %vm13832_vm5 = vcmask 261312   ;;  %vm13833_vm6 = vcmask 326912  }
 0x60d   :  { %v5321_v21 = vsel %vm3394_vm11, %v5320_v2, %v5316_v36  ;;  %v4795_v50 = vpop.permute.xlu0 %4794  ;;  %v5686_v36 = vunpack.c.l.bf16 %v8261_v40  ;;  %vm13834_vm1 = vcmask 392512  }
 0x60e   :  { %v6080_v31 = vadd.f32 %v6079_v4, %v5933_v38  ;;  %v5325_v57 = vrot.slane %v4795_v50, %v13747_v55  ;;  %v5935_v60 = vmul.f32 %v5679_v28, %v4795_v50  ;;  %v8260_v4 = vld [vmem:[%s12674_s2 + $0x140] sm:$0xff]  }
 0x60f   :  { %v5684_v12 = vunpack.c.l.bf16 %v8260_v4  ;;  %v5685_v5 = vunpack.c.h.bf16 %v8260_v4 }
 0x610   :  { %v6081_v10 = vadd.f32 %v6080_v31, %v5934_v51  ;;  %v5326_v8 = vsel %vm13831_vm7, %v5325_v57, %v5321_v21  ;;  %v12273_v19 = vpop.permute.xlu1 %4908  ;;  %vm13835_vm7 = vcmask 458112  }
 0x611   :  { %v5331_v43 = vsel %vm3408_vm13, %v5330_v1, %v5326_v8  ;;  %v4801_v0 = vpop.permute.xlu0 %4800  ;;  %v5940_v1 = vmul.f32 %v5684_v12, %v12112_v11  ;;  %v5359_v8 = vrot.slane %v12137_v27, %v13692_v39  ;;  %v5369_v12 = vrot.slane %v12162_v61, %v13702_v25 }
 0x612   :  { %v6082_v18 = vadd.f32 %v6081_v10, %v5935_v60  ;;  %v5335_v44 = vrot.slane %v4801_v0, %v13756_v34  ;;  %v5937_v9 = vmul.f32 %v5681_v42, %v4801_v0  ;;  %v5350_v10 = vrot.slane %v12112_v11, %v10604_v26 }
 0x613   :  { %v5687_v60 = vunpack.c.h.bf16 %v8261_v40  ;;  %v5942_v0 = vmul.f32 %v5686_v36, %v12137_v27  ;;  %v8263_v27 = vld [vmem:[%s12674_s2 + $0x158] sm:$0xff]  }
 0x614   :  { %v6083_v35 = vadd.f32 %v6082_v18, %v5936_v6  ;;  %v5336_v41 = vsel %vm3415_vm14, %v5335_v44, %v5331_v43  ;;  %v12281_v46 = vpop.permute.xlu1 %4911  ;;  %v8262_v18 = vld [vmem:[%s12674_s2 + $0x150] sm:$0xff]   ;;  %v5691_v36 = vunpack.c.h.bf16 %v8263_v27 }
 0x615   :  { %v5341_v38 = vsel %vm3422_vm15, %v5340_v15, %v5336_v41  ;;  %v4807_v28 = vpop.permute.xlu0 %4806  ;;  %v5688_v43 = vunpack.c.l.bf16 %v8262_v18  ;;  %v5689_v15 = vunpack.c.h.bf16 %v8262_v18 }
 0x616   :  { %v6084_v22 = vadd.f32 %v6083_v35, %v5937_v9  ;;  %v5345_v51 = vrot.slane %v4807_v28, %v13762_v49  ;;  %v5939_v14 = vmul.f32 %v5683_v63, %v4807_v28 }
 0x617   :  { %v5944_v28 = vmul.f32 %v5688_v43, %v12162_v61  ;;  %v8264_v61 = vld [vmem:[%s12674_s2 + $0x160] sm:$0xff]  }
 0x618   :  { %v6085_v2 = vadd.f32 %v6084_v22, %v5938_v3  ;;  %v5346_v31 = vsel %vm3429_vm0, %v5345_v51, %v5341_v38  ;;  %v12292_v50 = vpop.permute.xlu1 %4914  ;;  %v5690_v38 = vunpack.c.l.bf16 %v8263_v27 }
 0x619   :  { %v4813_v57 = vpop.permute.xlu0 %4812  ;;  %v12298_v42 = vsel %vm3990_vm4, %v5346_v31, %v12202_v54 }
 0x61a   :  { %v6086_v21 = vadd.f32 %v6085_v2, %v5939_v14  ;;  %v5354_v33 = vrot.slane %v4813_v57, %v13687_v59  ;;  %v5941_v56 = vmul.f32 %v5685_v5, %v4813_v57 }
 0x61c   :  { %v6087_v6 = vrot.slane %v6086_v21, 4  ;;  %v5355_v54 = vsel %vm3331_vm2, %v5354_v33, %v5350_v10  ;;  %v6093_v44 = vadd.f32 %v5941_v56, %v5940_v1  ;;  %v12309_v9 = vpop.permute.xlu1 %4917  ;;  %v5692_v1 = vunpack.c.l.bf16 %v8264_v61 }
 0x61d   :  { %v5360_v11 = vsel %vm3338_vm3, %v5359_v8, %v5355_v54  ;;  %v4819_v63 = vpop.permute.xlu0 %4818  ;;  %v5946_v33 = vmul.f32 %v5690_v38, %v12180_v58 }
 0x61e   :  { %v6088_v35 = vadd.f32 %v6087_v6, %v6086_v21  ;;  %v6094_v41 = vadd.f32 %v6093_v44, %v5942_v0  ;;  %v5364_v22 = vrot.slane %v4819_v63, %v13700_v45  ;;  %v5943_v4 = vmul.f32 %v5687_v60, %v4819_v63 }
 0x61f   :  { %v5379_v60 = vrot.slane %v12180_v58, %v13714_v24  ;;  %v5948_v58 = vmul.f32 %v5692_v1, %v12197_v37 }
 0x620   :  { %v6089_v3 = vrot.slane %v6088_v35, 2  ;;  %v5365_v51 = vsel %vm13832_vm5, %v5364_v22, %v5360_v11  ;;  %v6095_v14 = vadd.f32 %v6094_v41, %v5943_v4  ;;  %v12327_v6 = vpop.permute.xlu1 %4920 }
 0x621   :  { %v5370_v5 = vsel %vm13833_vm6, %v5369_v12, %v5365_v51  ;;  %v4825_v40 = vpop.permute.xlu0 %4824 }
 0x622   :  { %v6090_v2 = vadd.f32 %v6089_v3, %v6088_v35  ;;  %v6096_v21 = vadd.f32 %v6095_v14, %v5944_v28  ;;  %v5374_v10 = vrot.slane %v4825_v40, %v13710_v52  ;;  %v5945_v57 = vmul.f32 %v5689_v15, %v4825_v40  ;;  %v8265_v3 = vld [vmem:[%s12674_s2 + $0x168] sm:$0xff]  }
 0x623   :  { %v5693_v35 = vunpack.c.h.bf16 %v8264_v61  ;;  %v5389_v15 = vrot.slane %v12197_v37, %v13727_v47  ;;  %v5694_v41 = vunpack.c.l.bf16 %v8265_v3  ;;  %v5695_v51 = vunpack.c.h.bf16 %v8265_v3 }
 0x624   :  { %v6091_v31 = vrot.slane %v6090_v2, 1  ;;  %v5375_v8 = vsel %vm13834_vm1, %v5374_v10, %v5370_v5  ;;  %v6097_v18 = vadd.f32 %v6096_v21, %v5945_v57  ;;  %v12344_v12 = vpop.permute.xlu1 %4923  ;;  %v5399_v37 = vrot.slane %v12214_v53, %v13739_v23  ;;  %v8266_v5 = vld [vmem:[%s12674_s2 + $0x170] sm:$0xff]  }
 0x625   :  { %v5380_v43 = vsel %vm13835_vm7, %v5379_v60, %v5375_v8  ;;  %v4831_v0 = vpop.permute.xlu0 %4830  ;;  %v5950_v14 = vmul.f32 %v5694_v41, %v12214_v53  ;;  %v5696_v40 = vunpack.c.l.bf16 %v8266_v5  ;;  %v5697_v1 = vunpack.c.h.bf16 %v8266_v5  ;;  %v8267_v8 = vld [vmem:[%s12674_s2 + $0x178] sm:$0xff]   ;;  %v8269_v5 = vld [vmem:[%s12674_s2 + $0x188] sm:$0xff]  }
 0x626   :  { %v6092_v56 = vadd.f32 %v6091_v31, %v6090_v2  ;;  %v6098_v54 = vadd.f32 %v6097_v18, %v5946_v33  ;;  %v5384_v44 = vrot.slane %v4831_v0, %v13725_v29  ;;  %v5947_v11 = vmul.f32 %v5691_v36, %v4831_v0 }
 0x627   :  { %v5409_v33 = vrot.slane %v12225_v48, %v13749_v17  ;;  %v5698_v18 = vunpack.c.l.bf16 %v8267_v8 }
 0x628   :  { %v12335_v63 = vsel %vm3990_vm4, %v6092_v56, %v12242_v20  ;;  %v5385_v22 = vsel %vm3373_vm8, %v5384_v44, %v5380_v43  ;;  %v6099_v4 = vadd.f32 %v6098_v54, %v5947_v11  ;;  %v12359_v53 = vpop.permute.xlu1 %4926  ;;  %v5952_v56 = vmul.f32 %v5696_v40, %v12225_v48 }
 0x629   :  { %v5390_v27 = vsel %vm3380_vm9, %v5389_v15, %v5385_v22  ;;  %v4837_v38 = vpop.permute.xlu0 %4836  ;;  %vm13836_vm4 = vcmask 786112   ;;  %v5954_v3 = vmul.f32 %v5698_v18, %v12236_v16  ;;  %v5419_v22 = vrot.slane %v12236_v16, %v13758_v30  ;;  %v8271_v18 = vld [vmem:[%s12674_s2 + $0x1c8] sm:$0xff]  }
 0x62a   :  { %v6100_v20 = vadd.f32 %v6099_v4, %v5948_v58  ;;  %v5394_v28 = vrot.slane %v4837_v38, %v13735_v13  ;;  %v5949_v2 = vmul.f32 %v5693_v35, %v4837_v38  ;;  %v5699_v58 = vunpack.c.h.bf16 %v8267_v8  ;;  %v8268_v4 = vld [vmem:[%s12674_s2 + $0x180] sm:$0xff]  }
 0x62b   :  { %v5702_v16 = vunpack.c.l.bf16 %v8269_v5 }
 0x62c   :  { %v5395_v36 = vsel %vm3387_vm10, %v5394_v28, %v5390_v27  ;;  %v6101_v31 = vadd.f32 %v6100_v20, %v5949_v2  ;;  %v5700_v27 = vunpack.c.l.bf16 %v8268_v4  ;;  %v12375_v38 = vpop.permute.xlu1 %4929 }
 0x62d   :  { %v5400_v21 = vsel %vm3394_vm11, %v5399_v37, %v5395_v36  ;;  %v4843_v10 = vpop.permute.xlu0 %4842  ;;  %v5701_v37 = vunpack.c.h.bf16 %v8268_v4  ;;  %v5958_v8 = vmul.f32 %v5702_v16, %v12262_v62 }
 0x62e   :  { %v6102_v57 = vadd.f32 %v6101_v31, %v5950_v14  ;;  %v5404_v60 = vrot.slane %v4843_v10, %v13747_v55  ;;  %v5951_v61 = vmul.f32 %v5695_v51, %v4843_v10  ;;  %v8270_v31 = vld [vmem:[%s12674_s2 + $0x1c0] sm:$0xff]  }
 0x630   :  { %v5405_v43 = vsel %vm13836_vm4, %v5404_v60, %v5400_v21  ;;  %v6103_v0 = vadd.f32 %v6102_v57, %v5951_v61  ;;  %v5717_v21 = vunpack.c.h.bf16 %v8270_v31  ;;  %v5956_v60 = vmul.f32 %v5700_v27, %v12251_v7 }
 0x631   :  { %v5410_v35 = vsel %vm3408_vm13, %v5409_v33, %v5405_v43  ;;  %v4849_v54 = vpop.permute.xlu0 %4848  ;;  %v5716_v33 = vunpack.c.l.bf16 %v8270_v31  ;;  %v5718_v43 = vunpack.c.l.bf16 %v8271_v18  ;;  %v8274_v31 = vld [vmem:[%s12674_s2 + $0x1d8] sm:$0xff]  }
 0x632   :  { %v6104_v44 = vadd.f32 %v6103_v0, %v5952_v56  ;;  %v5414_v11 = vrot.slane %v4849_v54, %v13756_v34  ;;  %v5953_v15 = vmul.f32 %v5697_v1, %v4849_v54  ;;  %v12394_v56 = vpop.permute.xlu1 %4932  ;;  %v5719_v54 = vunpack.c.h.bf16 %v8271_v18 }
 0x634   :  { %v5415_v48 = vsel %vm3415_vm14, %v5414_v11, %v5410_v35  ;;  %v6105_v41 = vadd.f32 %v6104_v44, %v5953_v15  ;;  %v5973_v44 = vmul.f32 %v5717_v21, %v12273_v19  ;;  %v5722_v21 = vunpack.c.l.bf16 %v8274_v31 }
 0x635   :  { %v4855_v20 = vpop.permute.xlu0 %4854  ;;  %v5420_v14 = vsel %vm3422_vm15, %v5419_v22, %v5415_v48  ;;  %v5974_v48 = vmul.f32 %v5718_v43, %v12281_v46 }
 0x636   :  { %v6106_v28 = vadd.f32 %v6105_v41, %v5954_v3  ;;  %v5424_v2 = vrot.slane %v4855_v20, %v13762_v49  ;;  %v5955_v51 = vmul.f32 %v5699_v58, %v4855_v20  ;;  %v5703_v3 = vunpack.c.h.bf16 %v8269_v5  ;;  %v8272_v41 = vld [vmem:[%s12674_s2 + $0x1d0] sm:$0xff]  }
 0x637   :  { %v5720_v22 = vunpack.c.l.bf16 %v8272_v41  ;;  %v5721_v20 = vunpack.c.h.bf16 %v8272_v41  ;;  %v8273_v5 = vld [vmem:[%s12674_s2 + $0x190] sm:$0xff]  }
 0x638   :  { %v5425_v40 = vsel %vm3429_vm0, %v5424_v2, %v5420_v14  ;;  %v6107_v36 = vadd.f32 %v6106_v28, %v5955_v51  ;;  %v12408_v28 = vpop.permute.xlu1 %4935  ;;  %v5975_v51 = vmul.f32 %v5719_v54, %v12292_v50  ;;  %v5704_v16 = vunpack.c.l.bf16 %v8273_v5 }
 0x639   :  { %v12386_v10 = vpop.permute.xlu0 %4860  ;;  %v12390_v57 = vsel %vm3992_vm12, %v5425_v40, %v12298_v42  ;;  %v5977_v18 = vmul.f32 %v5721_v20, %v12327_v6 }
 0x63a   :  { %v6108_v61 = vrot.slane %v6107_v36, 4  ;;  %v5957_v1 = vmul.f32 %v5701_v37, %v12386_v10 }
 0x63c   :  { %v6109_v0 = vadd.f32 %v6108_v61, %v6107_v36  ;;  %v6114_v35 = vadd.f32 %v5957_v1, %v5956_v60  ;;  %v5976_v36 = vmul.f32 %v5720_v22, %v12309_v9  ;;  %v5723_v1 = vunpack.c.h.bf16 %v8274_v31  ;;  %v12425_v54 = vpop.permute.xlu1 %4938 }
 0x63d   :  { %v12400_v42 = vpop.permute.xlu0 %4905 }
 0x63e   :  { %v6110_v11 = vrot.slane %v6109_v0, 2  ;;  %v5972_v15 = vmul.f32 %v5716_v33, %v12400_v42  ;;  %v6115_v58 = vadd.f32 %v6114_v35, %v5958_v8  ;;  %v5705_v35 = vunpack.c.h.bf16 %v8273_v5 }
 0x640   :  { %v6111_v4 = vadd.f32 %v6110_v11, %v6109_v0  ;;  %v6135_v27 = vadd.f32 %v5973_v44, %v5972_v15  ;;  %v5978_v11 = vmul.f32 %v5722_v21, %v12344_v12  ;;  %v8275_v15 = vld [vmem:[%s12674_s2 + $0x1e0] sm:$0xff]   ;;  %v12448_v21 = vpop.permute.xlu1 %4941 }
 0x641   :  { %v12410_v2 = vpop.permute.xlu0 %4866  ;;  %v5725_v41 = vunpack.c.h.bf16 %v8275_v15 }
 0x642   :  { %v6112_v37 = vrot.slane %v6111_v4, 1  ;;  %v6136_v14 = vadd.f32 %v6135_v27, %v5974_v48  ;;  %v5959_v40 = vmul.f32 %v5703_v3, %v12410_v2 }
 0x644   :  { %v6113_v60 = vadd.f32 %v6112_v37, %v6111_v4  ;;  %v6137_v61 = vadd.f32 %v6136_v14, %v5975_v51  ;;  %v6116_v33 = vadd.f32 %v6115_v58, %v5959_v40  ;;  %v5724_v58 = vunpack.c.l.bf16 %v8275_v15  ;;  %v8277_v37 = vld [vmem:[%s12674_s2 + $0x1e8] sm:$0xff]  }
 0x645   :  { %v12421_v8 = vpop.permute.xlu0 %4869  ;;  %v5979_v4 = vmul.f32 %v5723_v1, %v12359_v53  ;;  %v5726_v14 = vunpack.c.l.bf16 %v8277_v37  ;;  %v5727_v31 = vunpack.c.h.bf16 %v8277_v37  ;;  %v5512_v1 = vrot.slane %v12273_v19, %v13687_v59  ;;  %v12471_v37 = vpop.permute.xlu1 %4944 }
 0x646   :  { %v6138_v43 = vadd.f32 %v6137_v61, %v5976_v36  ;;  %v5960_v0 = vmul.f32 %v5704_v16, %v12421_v8  ;;  %v12429_v44 = vsel %vm3992_vm12, %v6113_v60, %v12335_v63  ;;  %v8276_v63 = vld [vmem:[%s12674_s2 + $0x198] sm:$0xff]   ;;  %v5980_v5 = vmul.f32 %v5724_v58, %v12375_v38  ;;  %vm13837_vm12 = vmmov %vm13832_vm5 }
 0x647   :  { %v5706_v51 = vunpack.c.l.bf16 %v8276_v63  ;;  %v5508_v16 = vrot.slane %v12400_v42, %v10604_v26  ;;  %v5707_v61 = vunpack.c.h.bf16 %v8276_v63  ;;  %v8278_v42 = vld [vmem:[%s12674_s2 + $0x1f0] sm:$0xff]   ;;  %vm13838_vm5 = vmmov %vm13833_vm6 }
 0x648   :  { %v6139_v3 = vadd.f32 %v6138_v43, %v5977_v18  ;;  %v6117_v48 = vadd.f32 %v6116_v33, %v5960_v0  ;;  %v5981_v33 = vmul.f32 %v5725_v41, %v12394_v56  ;;  %v5728_v0 = vunpack.c.l.bf16 %v8278_v42  ;;  %vm13839_vm6 = vmmov %vm13834_vm1 }
 0x649   :  { %v12435_v22 = vpop.permute.xlu0 %4872  ;;  %v5729_v19 = vunpack.c.h.bf16 %v8278_v42  ;;  %v5983_v41 = vmul.f32 %v5727_v31, %v12425_v54  ;;  %vm13840_vm1 = vmmov %vm13835_vm7 }
 0x64a   :  { %v6140_v27 = vadd.f32 %v6139_v3, %v5978_v11  ;;  %v5961_v20 = vmul.f32 %v5705_v35, %v12435_v22  ;;  %v5982_v35 = vmul.f32 %v5726_v14, %v12408_v28  ;;  %v5513_v11 = vsel %vm3331_vm2, %v5512_v1, %v5508_v16  ;;  %vm13842_vm7 = vmmov %vm13838_vm5 }
 0x64b   :  { %v5517_v3 = vrot.slane %v12281_v46, %v13692_v39  ;;  %v5522_v46 = vrot.slane %v12292_v50, %v13700_v45  ;;  %v5984_v14 = vmul.f32 %v5728_v0, %v12448_v21  ;;  %vm13844_vm4 = vmmov %vm13840_vm1 }
 0x64c   :  { %v6141_v40 = vadd.f32 %v6140_v27, %v5979_v4  ;;  %v6118_v36 = vadd.f32 %v6117_v48, %v5961_v20  ;;  %v8279_v20 = vld [vmem:[%s12674_s2 + $0x1a0] sm:$0xff]  }
 0x64d   :  { %v12450_v60 = vpop.permute.xlu0 %4875  ;;  %v5708_v63 = vunpack.c.l.bf16 %v8279_v20 }
 0x64e   :  { %v6142_v18 = vadd.f32 %v6141_v40, %v5980_v5  ;;  %v5962_v43 = vmul.f32 %v5706_v51, %v12450_v60  ;;  %v5518_v51 = vsel %vm3338_vm3, %v5517_v3, %v5513_v11 }
 0x64f   :  { %v5523_v31 = vsel %vm13837_vm12, %v5522_v46, %v5518_v51  ;;  %v5433_v51 = vrot.slane %v12386_v10, %v13687_v59  ;;  %v5443_v10 = vrot.slane %v12410_v2, %v13700_v45  ;;  %v5458_v45 = vrot.slane %v12450_v60, %v13714_v24 }
 0x650   :  { %v6143_v15 = vadd.f32 %v6142_v18, %v5981_v33  ;;  %v6119_v58 = vadd.f32 %v6118_v36, %v5962_v43  ;;  %v5709_v36 = vunpack.c.h.bf16 %v8279_v20  ;;  %v5527_v18 = vrot.slane %v12309_v9, %v13702_v25 }
 0x651   :  { %v12463_v48 = vpop.permute.xlu0 %4878 }
 0x652   :  { %v6144_v4 = vadd.f32 %v6143_v15, %v5982_v35  ;;  %v5963_v27 = vmul.f32 %v5707_v61, %v12463_v48  ;;  %v5985_v61 = vmul.f32 %v5729_v19, %v12471_v37  ;;  %v5528_v42 = vsel %vm13838_vm5, %v5527_v18, %v5523_v31  ;;  %v8280_v15 = vld [vmem:[%s12674_s2 + $0x1a8] sm:$0xff]  }
 0x653   :  { %v5532_v35 = vrot.slane %v12327_v6, %v13710_v52  ;;  %v5537_v19 = vrot.slane %v12344_v12, %v13714_v24  ;;  %v5542_v6 = vrot.slane %v12359_v53, %v13725_v29  ;;  %v8281_v12 = vld [vmem:[%s12674_s2 + $0x1b0] sm:$0xff]   ;;  %v5547_v31 = vrot.slane %v12375_v38, %v13727_v47  ;;  %v8282_v24 = vld [vmem:[%s12674_s2 + $0x1b8] sm:$0xff]  }
 0x654   :  { %v6145_v5 = vadd.f32 %v6144_v4, %v5983_v41  ;;  %v6120_v16 = vadd.f32 %v6119_v58, %v5963_v27  ;;  %v5710_v58 = vunpack.c.l.bf16 %v8280_v15  ;;  %v5711_v27 = vunpack.c.h.bf16 %v8280_v15 }
 0x655   :  { %v12476_v40 = vpop.permute.xlu0 %4881  ;;  %v5533_v3 = vsel %vm13839_vm6, %v5532_v35, %v5528_v42  ;;  %v5438_v18 = vrot.slane %v12262_v62, %v13692_v39  ;;  %v5453_v38 = vrot.slane %v12435_v22, %v13710_v52  ;;  %v5557_v39 = vrot.slane %v12408_v28, %v13739_v23 }
 0x656   :  { %v6146_v1 = vadd.f32 %v6145_v5, %v5984_v14  ;;  %v5964_v33 = vmul.f32 %v5708_v63, %v12476_v40  ;;  %v5538_v20 = vsel %vm13840_vm1, %v5537_v19, %v5533_v3  ;;  %v5468_v52 = vrot.slane %v12476_v40, %v13727_v47 }
 0x657   :  { %v5543_v14 = vsel %vm3373_vm8, %v5542_v6, %v5538_v20  ;;  %v5714_v60 = vunpack.c.l.bf16 %v8282_v24  ;;  %v5715_v19 = vunpack.c.h.bf16 %v8282_v24 }
 0x658   :  { %v12483_v43 = vadd.f32 %v6146_v1, %v5985_v61  ;;  %v6121_v50 = vadd.f32 %v6120_v16, %v5964_v33  ;;  %v5712_v16 = vunpack.c.l.bf16 %v8281_v12  ;;  %v5548_v59 = vsel %vm3380_vm9, %v5547_v31, %v5543_v14  ;;  %v4948_v14 = vpop.permute.xlu1 %4947 }
 0x659   :  { %v12486_v0 = vpop.permute.xlu0 %4884  ;;  %v5713_v33 = vunpack.c.h.bf16 %v8281_v12  ;;  %v5572_v12 = vrot.slane %v12471_v37, %v13756_v34 }
 0x65a   :  { %v5965_v11 = vmul.f32 %v5709_v36, %v12486_v0  ;;  %v5429_v36 = vrot.slane %v12251_v7, %v10604_v26  ;;  %v5448_v26 = vrot.slane %v12421_v8, %v13702_v25  ;;  %v5463_v25 = vrot.slane %v12463_v48, %v13725_v29 }
 0x65b   :  { %v5473_v15 = vrot.slane %v12486_v0, %v13735_v13  ;;  %v5562_v29 = vrot.slane %v12425_v54, %v13747_v55  ;;  %v5567_v54 = vrot.slane %v12448_v21, %v13749_v17 }
 0x65c   :  { %v6122_v9 = vadd.f32 %v6121_v50, %v5965_v11  ;;  %v5434_v61 = vsel %vm3331_vm2, %v5433_v51, %v5429_v36  ;;  %v5552_v50 = vrot.slane %v12394_v56, %v13735_v13  ;;  %vm13841_vm2 = vmmov %vm13837_vm12  ;;  %vm13845_vm12 = vcmask 786112  }
 0x65d   :  { %v4888_v41 = vpop.permute.xlu0 %4887  ;;  %v5439_v35 = vsel %vm3338_vm3, %v5438_v18, %v5434_v61  ;;  %vm13843_vm3 = vmmov %vm13839_vm6 }
 0x65e   :  { %v5966_v4 = vmul.f32 %v5710_v58, %v4888_v41  ;;  %v5553_v42 = vsel %vm3387_vm10, %v5552_v50, %v5548_v59  ;;  %v5444_v62 = vsel %vm13841_vm2, %v5443_v10, %v5439_v35  ;;  %v5478_v47 = vrot.slane %v4888_v41, %v13739_v23 }
 0x65f   :  { %v5449_v8 = vsel %vm13842_vm7, %v5448_v26, %v5444_v62  ;;  %v5558_v11 = vsel %vm3394_vm11, %v5557_v39, %v5553_v42 }
 0x660   :  { %v6123_v63 = vadd.f32 %v6122_v9, %v5966_v4  ;;  %v5454_v28 = vsel %vm13843_vm3, %v5453_v38, %v5449_v8  ;;  %v5563_v4 = vsel %vm13845_vm12, %v5562_v29, %v5558_v11 }
 0x661   :  { %v4891_v46 = vpop.permute.xlu0 %4890  ;;  %v5459_v48 = vsel %vm13844_vm4, %v5458_v45, %v5454_v28 }
 0x662   :  { %v5967_v5 = vmul.f32 %v5711_v27, %v4891_v46  ;;  %v5464_v58 = vsel %vm3373_vm8, %v5463_v25, %v5459_v48  ;;  %v5483_v3 = vrot.slane %v4891_v46, %v13747_v55  ;;  %v8283_v55 = vld [vmem:[%s12674_s2 + $0x1f8] sm:$0xff]   ;;  %v5568_v46 = vsel %vm3408_vm13, %v5567_v54, %v5563_v4  ;;  %vm13846_vm8 = vmmov %vm13845_vm12  ;;  %s8329_s2 = smov [#allocation2]  }
 0x663   :  { %v5469_v27 = vsel %vm3380_vm9, %v5468_v52, %v5464_v58  ;;  %v5730_v41 = vunpack.c.l.bf16 %v8283_v55  ;;  %v5731_v21 = vunpack.c.h.bf16 %v8283_v55  ;;  %v5573_v61 = vsel %vm3415_vm14, %v5572_v12, %v5568_v46  ;;  %s51_s15 = sshll.u32 %s8329_s2, 4  ;;  %s52_s15 = int_to_ptr.vmem [resolvable:$true] %s51_s15 }
 0x664   :  { %v6124_v53 = vadd.f32 %v6123_v63, %v5967_v5  ;;  %v5474_v20 = vsel %vm3387_vm10, %v5473_v15, %v5469_v27  ;;  %vm13847_vm9 = vcmask 1046534   ;;  %vm13848_vm10 = vcmask 1047559  }
 0x665   :  { %v4894_v1 = vpop.permute.xlu0 %4893  ;;  %v5479_v6 = vsel %vm3394_vm11, %v5478_v47, %v5474_v20  ;;  %v5986_v59 = vmul.f32 %v5730_v41, %v4948_v14  ;;  %vm13849_vm11 = vmmov %vm13847_vm9 }
 0x666   :  { %v5968_v7 = vmul.f32 %v5712_v16, %v4894_v1  ;;  %v5488_v13 = vrot.slane %v4894_v1, %v13749_v17  ;;  %v5484_v5 = vsel %vm13846_vm8, %v5483_v3, %v5479_v6 }
 0x668   :  { %v6125_v2 = vadd.f32 %v6124_v53, %v5968_v7  ;;  %v5489_v16 = vsel %vm3408_vm13, %v5488_v13, %v5484_v5 }
 0x669   :  { %v4897_v56 = vpop.permute.xlu0 %4896 }
 0x66a   :  { %v5969_v22 = vmul.f32 %v5713_v33, %v4897_v56  ;;  %v5493_v23 = vrot.slane %v4897_v56, %v13756_v34  ;;  %v5577_v33 = vrot.slane %v4948_v14, %v13758_v30  ;;  %v6148_v34 = vadd.f32 %v12483_v43, %v5986_v59 }
 0x66c   :  { %v6126_v40 = vadd.f32 %v6125_v2, %v5969_v22  ;;  %v5494_v53 = vsel %vm3415_vm14, %v5493_v23, %v5489_v16  ;;  %v5578_v38 = vsel %vm3422_vm15, %v5577_v33, %v5573_v61 }
 0x66d   :  { %v4900_v9 = vpop.permute.xlu0 %4899 }
 0x66e   :  { %v5970_v0 = vmul.f32 %v5714_v60, %v4900_v9  ;;  %v5498_v63 = vrot.slane %v4900_v9, %v13758_v30 }
 0x670   :  { %v6127_v51 = vadd.f32 %v6126_v40, %v5970_v0  ;;  %v5499_v10 = vsel %vm3422_vm15, %v5498_v63, %v5494_v53 }
 0x671   :  { %v4903_v17 = vpop.permute.xlu0 %4902 }
 0x672   :  { %v5503_v36 = vrot.slane %v4903_v17, %v13762_v49  ;;  %v5971_v31 = vmul.f32 %v5715_v19, %v4903_v17 }
 0x674   :  { %v6128_v1 = vadd.f32 %v6127_v51, %v5971_v31  ;;  %v5504_v50 = vsel %vm3429_vm0, %v5503_v36, %v5499_v10 }
 0x675   :  { %v5589_v2 = vsel %vm13847_vm9, %v5504_v50, %v12390_v57 }
 0x676   :  { %v4951_v18 = vpop.permute.xlu0 %4950  ;;  %v6129_v37 = vrot.slane %v6128_v1, 4 }
 0x677   :  { %v5582_v26 = vrot.slane %v4951_v18, %v13762_v49  ;;  %v5987_v7 = vmul.f32 %v5731_v21, %v4951_v18 }
 0x678   :  { %v6130_v42 = vadd.f32 %v6129_v37, %v6128_v1 }
 0x679   :  { %v6149_v35 = vadd.f32 %v6148_v34, %v5987_v7  ;;  %v5583_v45 = vsel %vm3429_vm0, %v5582_v26, %v5578_v38  ;;  %vm13850_vm0 = vmmov %vm13848_vm10 }
 0x67a   :  { %v5590_v30 = vsel %vm13848_vm10, %v5583_v45, %v5589_v2  ;;  %v6131_v39 = vrot.slane %v6130_v42, 2 }
 0x67b   :  { %v6150_v62 = vrot.slane %v6149_v35, 4  ;;  %5592 = vadd.xlane.f32.xlu1 %v5590_v30  ;;  %v5601_v60 = vpop.permute.xlu0 %5600 }
 0x67c   :  { %v6132_v25 = vadd.f32 %v6131_v39, %v6130_v42  ;;  %v5603_v28 = vmul.f32 0.0, %v5601_v60 }
 0x67d   :  { %v6151_v43 = vadd.f32 %v6150_v62, %v6149_v35 }
 0x67e   :  { %v6133_v56 = vrot.slane %v6132_v25, 1 }
 0x67f   :  { %v6152_v8 = vrot.slane %v6151_v43, 2 }
 0x680   :  { %v6134_v52 = vadd.f32 %v6133_v56, %v6132_v25 }
 0x681   :  { %v6153_v49 = vadd.f32 %v6152_v8, %v6151_v43 }
 0x682   :  { %v6169_v24 = vsel %vm13849_vm11, %v6134_v52, %v12429_v44 }
 0x683   :  { %v6154_v22 = vrot.slane %v6153_v49, 1 }
 0x685   :  { %v6155_v11 = vadd.f32 %v6154_v22, %v6153_v49 }
 0x687   :  { %v6170_v57 = vsel %vm13850_vm0, %v6155_v11, %v6169_v24 }
 0x688   :  { %v12580_v15 = vadd.f32 %v6170_v57, %v5603_v28 }
 0x689   :  { %8308 = shalt.err (!%p8305_p2)  }
 0x68a   :  { %s8309_s20 = scalar_lea.vmem %s52_s15, 18432  ;;  %p8314_p4 = scmp.lt.s32.totalorder %s52_s15, %s52_s15 }
 0x68b   :  { %p8310_p3 = scmp.ne.s32.totalorder %s52_s15, %s8309_s20  ;;  %p8315_p5 = scmp.lt.s32.totalorder %s8309_s20, %s8309_s20 }
 0x68d   :  { %p8316_p6 = por %p8315_p5, %p8314_p4 }
 0x68f   :  { %p8317_p7 = pnand %p8316_p6, %p8310_p3 }
 0x691   :  { %8320 = shalt.err (!%p8317_p7)  }
 0x692   :  { %54 = dma.hbm_to_vmem [thread:$0]  %s12680_s8, 18432, %s52_s15, [#allocation3]  ;;  %v4438_v44 = vld [vmem:[#allocation6] sm:$0xff]  ;;  %vm13851_vm13 = vcmask 7168  }
 0x693   :  { %v4439_v29 = vmul.f32 %v13825_v32, %v4438_v44 }
 0x708   :  { %v5593_v48 = vpop.xlane.xlu1 %5592 }
 0x709   :  { %v5594_v47 = vadd.f32 %v5593_v48, %v4439_v29 }
 0x70b   :  { %5596 = vst.msk [vmem:[#allocation6] sm:$0xff] %vm13851_vm13, %v5594_v47 }
 0x70c   :  { %8321 = dma.done.wait [#allocation3], 18432 }
 0x70d   :  { %8322 = vsyncadd [#allocation3], 4294948864  ;;  %v13852_v40 = vmov 0   ;;  %v13853_v58 = vmov 0.0   ;;  %v6254_v9 = vld [vmem:[#allocation2 + $0x188] sm:$0xff]  ;;  %v6257_v19 = vld [vmem:[#allocation2 + $0x1a0] sm:$0xff] }
 0x70e   :  { %8284 = vset.pattern.permute.xlu0 %v13852_v40  ;;  %6365 = vmatprep.mubr.f32.mxu0 %v13853_v58  ;;  %v6253_v4 = vld [vmem:[#allocation2 + $0x180] sm:$0xff]  ;;  %v6256_v27 = vld [vmem:[#allocation2 + $0x198] sm:$0xff]  ;;  %v7384_v13 = vpack.c.bf16 %v6257_v19, %v6254_v9  ;;  %v6263_v32 = vld [vmem:[#allocation2 + $0x1d0] sm:$0xff]  ;;  %v13854_v22 = vmov 0.0|0.0   ;;  %vm13855_vm14 = vmmov 0  }
 0x70f   :  { %v7386_v0 = vpack.c.bf16 %v6256_v27, %v6253_v4  ;;  %v6260_v54 = vld [vmem:[#allocation2 + $0x1b8] sm:$0xff]  ;;  %v6259_v20 = vld [vmem:[#allocation2 + $0x1b0] sm:$0xff]  ;;  %v6262_v55 = vld [vmem:[#allocation2 + $0x1c8] sm:$0xff] }
 0x710   :  { %v7388_v23 = vpack.c.bf16 %v6263_v32, %v6260_v54  ;;  %v6266_v41 = vld [vmem:[#allocation2 + $0x1e8] sm:$0xff]  ;;  %v6269_v6 = vld [vmem:[#allocation2 + $0x200] sm:$0xff]  ;;  %7385 = vmatprep.subr.bf16.mxu0 %v7384_v13  ;;  %v7390_v63 = vpack.c.bf16 %v6262_v55, %v6259_v20  ;;  %v6268_v14 = vld [vmem:[#allocation2 + $0x1f8] sm:$0xff] }
 0x711   :  { %7387 = vmatpush1.bf16.msra.mxu0 %v7386_v0  ;;  %v7392_v51 = vpack.c.bf16 %v6269_v6, %v6266_v41  ;;  %v6265_v46 = vld [vmem:[#allocation2 + $0x1e0] sm:$0xff]  ;;  %v6272_v5 = vld [vmem:[#allocation2 + $0x218] sm:$0xff]  ;;  %v6275_v17 = vld [vmem:[#allocation2 + $0x230] sm:$0xff] }
 0x712   :  { %v6182_v3 = vld [vmem:[#allocation6] sm:$0xff]  ;;  %7389 = vmatprep.subr.bf16.mxu0 %v7388_v23  ;;  %v7394_v21 = vpack.c.bf16 %v6268_v14, %v6265_v46  ;;  %v7396_v12 = vpack.c.bf16 %v6275_v17, %v6272_v5  ;;  %v6271_v16 = vld [vmem:[#allocation2 + $0x210] sm:$0xff]  ;;  %v6281_v61 = vld [vmem:[#allocation2 + $0x260] sm:$0xff] }
 0x713   :  { %8285 = vrcp.f32 %v6182_v3  ;;  %v6274_v36 = vld [vmem:[#allocation2 + $0x228] sm:$0xff]  ;;  %v6185_v59 = vld [vmem:[#allocation5] sm:$0xff]  ;;  %v6280_v18 = vld [vmem:[#allocation2 + $0x258] sm:$0xff] }
 0x714   :  { %v6278_v53 = vld [vmem:[#allocation2 + $0x248] sm:$0xff]  ;;  %v7398_v10 = vpack.c.bf16 %v6274_v36, %v6271_v16  ;;  %v6277_v33 = vld [vmem:[#allocation2 + $0x240] sm:$0xff]  ;;  %v6284_v50 = vld [vmem:[#allocation2 + $0x278] sm:$0xff] }
 0x715   :  { %7391 = vmatpush1.bf16.msra.mxu0 %v7390_v63  ;;  %v7400_v1 = vpack.c.bf16 %v6281_v61, %v6278_v53  ;;  %v6287_v34 = vld [vmem:[#allocation2 + $0x290] sm:$0xff]  ;;  %v7402_v37 = vpack.c.bf16 %v6280_v18, %v6277_v33  ;;  %v6286_v38 = vld [vmem:[#allocation2 + $0x288] sm:$0xff]  ;;  %v6293_v35 = vld [vmem:[#allocation2 + $0x2c0] sm:$0xff] }
 0x716   :  { %7393 = vmatprep.subr.bf16.mxu0 %v7392_v51  ;;  %v7404_v26 = vpack.c.bf16 %v6287_v34, %v6284_v50  ;;  %v6283_v7 = vld [vmem:[#allocation2 + $0x270] sm:$0xff]  ;;  %v6290_v42 = vld [vmem:[#allocation2 + $0x2a8] sm:$0xff]  ;;  %v6289_v30 = vld [vmem:[#allocation2 + $0x2a0] sm:$0xff] }
 0x717   :  { %v7406_v45 = vpack.c.bf16 %v6286_v38, %v6283_v7  ;;  %v7408_v2 = vpack.c.bf16 %v6293_v35, %v6290_v42  ;;  %v6292_v39 = vld [vmem:[#allocation2 + $0x2b8] sm:$0xff]  ;;  %v6299_v25 = vld [vmem:[#allocation2 + $0x2f0] sm:$0xff]  ;;  %v6298_v49 = vld [vmem:[#allocation2 + $0x2e8] sm:$0xff] }
 0x718   :  { %v6296_v62 = vld [vmem:[#allocation2 + $0x2d8] sm:$0xff]  ;;  %v7410_v43 = vpack.c.bf16 %v6292_v39, %v6289_v30  ;;  %v6295_v8 = vld [vmem:[#allocation2 + $0x2d0] sm:$0xff]  ;;  %v6258_v60 = vld [vmem:[#allocation2 + $0x1a8] sm:$0xff] }
 0x719   :  { %7395 = vmatpush1.bf16.msra.mxu0 %v7394_v21  ;;  %v7412_v56 = vpack.c.bf16 %v6299_v25, %v6296_v62  ;;  %v7414_v52 = vpack.c.bf16 %v6298_v49, %v6295_v8  ;;  %v6255_v24 = vld [vmem:[#allocation2 + $0x190] sm:$0xff]  ;;  %v6261_v44 = vld [vmem:[#allocation2 + $0x1c0] sm:$0xff]  ;;  %v6264_v29 = vld [vmem:[#allocation2 + $0x1d8] sm:$0xff] }
 0x71a   :  { %7397 = vmatprep.subr.bf16.mxu0 %v7396_v12  ;;  %v7417_v28 = vpack.c.bf16 %v6258_v60, %v6255_v24  ;;  %v6184_v48 = vld [vmem:[%s12678_s13] sm:$0xff]  ;;  %v7420_v40 = vpack.c.bf16 %v6264_v29, %v6261_v44  ;;  %v6267_v9 = vld [vmem:[#allocation2 + $0x1f0] sm:$0xff]  ;;  %v6276_v13 = vld [vmem:[#allocation2 + $0x238] sm:$0xff] }
 0x71b   :  { %v6273_v27 = vld [vmem:[#allocation2 + $0x220] sm:$0xff]  ;;  %v6279_v54 = vld [vmem:[#allocation2 + $0x250] sm:$0xff]  ;;  %v6282_v32 = vld [vmem:[#allocation2 + $0x268] sm:$0xff] }
 0x71c   :  { %v7426_v0 = vpack.c.bf16 %v6276_v13, %v6273_v27  ;;  %v7429_v20 = vpack.c.bf16 %v6282_v32, %v6279_v54  ;;  %v6285_v23 = vld [vmem:[#allocation2 + $0x280] sm:$0xff]  ;;  %v6288_v55 = vld [vmem:[#allocation2 + $0x298] sm:$0xff]  ;;  %v6291_v51 = vld [vmem:[#allocation2 + $0x2b0] sm:$0xff] }
 0x71d   :  { %v8286_v31 = vpop.eup %8285  ;;  %7399 = vmatpush1.bf16.msra.mxu0 %v7398_v10  ;;  %v7432_v63 = vpack.c.bf16 %v6288_v55, %v6285_v23  ;;  %v6294_v46 = vld [vmem:[#allocation2 + $0x2c8] sm:$0xff]  ;;  %v6297_v5 = vld [vmem:[#allocation2 + $0x2e0] sm:$0xff]  ;;  %v6300_v17 = vld [vmem:[#allocation2 + $0x2f8] sm:$0xff] }
 0x71e   :  { %6196 = vperm.xlu0 %8284, %v8286_v31   ;;  %7401 = vmatprep.subr.bf16.mxu0 %v7400_v1  ;;  %v7435_v14 = vpack.c.bf16 %v6294_v46, %v6291_v51  ;;  %v6206_v21 = vld [vmem:[#allocation2 + $0x8] sm:$0xff]  ;;  %v6209_v12 = vld [vmem:[#allocation2 + $0x20] sm:$0xff]  ;;  %v7438_v16 = vpack.c.bf16 %v6300_v17, %v6297_v5  ;;  %v6208_v53 = vld [vmem:[#allocation2 + $0x18] sm:$0xff] }
 0x71f   :  { %v7440_v36 = vpack.c.bf16 %v6209_v12, %v6206_v21  ;;  %v6205_v31 = vld [vmem:[#allocation2] sm:$0xff]  ;;  %v6212_v61 = vld [vmem:[#allocation2 + $0x38] sm:$0xff]  ;;  %v6211_v33 = vld [vmem:[#allocation2 + $0x30] sm:$0xff] }
 0x720   :  { %v7442_v10 = vpack.c.bf16 %v6208_v53, %v6205_v31  ;;  %v6214_v18 = vld [vmem:[#allocation2 + $0x48] sm:$0xff]  ;;  %v6221_v34 = vld [vmem:[#allocation2 + $0x80] sm:$0xff]  ;;  %v6220_v38 = vld [vmem:[#allocation2 + $0x78] sm:$0xff] }
 0x721   :  { %7403 = vmatpush1.bf16.msra.mxu0 %v7402_v37  ;;  %v6218_v50 = vld [vmem:[#allocation2 + $0x68] sm:$0xff]  ;;  %v7446_v37 = vpack.c.bf16 %v6214_v18, %v6211_v33  ;;  %v6217_v7 = vld [vmem:[#allocation2 + $0x60] sm:$0xff]  ;;  %v6224_v42 = vld [vmem:[#allocation2 + $0x98] sm:$0xff] }
 0x722   :  { %6188 = vperm.xlu0 %8284, %v6185_v59   ;;  %7405 = vmatprep.subr.bf16.mxu0 %v7404_v26  ;;  %v6215_v59 = vld [vmem:[#allocation2 + $0x50] sm:$0xff]  ;;  %v7448_v26 = vpack.c.bf16 %v6221_v34, %v6218_v50  ;;  %v6226_v39 = vld [vmem:[#allocation2 + $0xa8] sm:$0xff]  ;;  %v6233_v25 = vld [vmem:[#allocation2 + $0xe0] sm:$0xff] }
 0x723   :  { %v7444_v1 = vpack.c.bf16 %v6215_v59, %v6212_v61  ;;  %v6227_v35 = vld [vmem:[#allocation2 + $0xb0] sm:$0xff]  ;;  %v6230_v62 = vld [vmem:[#allocation2 + $0xc8] sm:$0xff]  ;;  %v6229_v8 = vld [vmem:[#allocation2 + $0xc0] sm:$0xff] }
 0x724   :  { %v6223_v30 = vld [vmem:[#allocation2 + $0x90] sm:$0xff]  ;;  %v6232_v49 = vld [vmem:[#allocation2 + $0xd8] sm:$0xff]  ;;  %v6238_v44 = vld [vmem:[#allocation2 + $0x108] sm:$0xff] }
 0x725   :  { %7407 = vmatpush1.bf16.msra.mxu0 %v7406_v45  ;;  %v7450_v45 = vpack.c.bf16 %v6220_v38, %v6217_v7  ;;  %v6239_v24 = vld [vmem:[#allocation2 + $0x110] sm:$0xff]  ;;  %v7458_v60 = vpack.c.bf16 %v6232_v49, %v6229_v8  ;;  %v6242_v29 = vld [vmem:[#allocation2 + $0x128] sm:$0xff]  ;;  %v6204_v23 = vld [vmem:[%s12679_s0] sm:$0xff] }
 0x726   :  { %7409 = vmatprep.subr.bf16.mxu0 %v7408_v2  ;;  %v7452_v2 = vpack.c.bf16 %v6227_v35, %v6224_v42  ;;  %v6247_v13 = vld [vmem:[#allocation2 + $0x150] sm:$0xff]  ;;  %v6222_v46 = vld [vmem:[#allocation2 + $0x88] sm:$0xff]  ;;  %v6225_v5 = vld [vmem:[#allocation2 + $0xa0] sm:$0xff] }
 0x727   :  { %v6207_v32 = vld [vmem:[#allocation2 + $0x10] sm:$0xff]  ;;  %v6228_v17 = vld [vmem:[#allocation2 + $0xb8] sm:$0xff]  ;;  %v6237_v31 = vld [vmem:[#allocation2 + $0x100] sm:$0xff] }
 0x728   :  { %v6219_v51 = vld [vmem:[#allocation2 + $0x70] sm:$0xff]  ;;  %v7482_v21 = vpack.c.bf16 %v6228_v17, %v6225_v5  ;;  %v6240_v53 = vld [vmem:[#allocation2 + $0x118] sm:$0xff]  ;;  %v6249_v33 = vld [vmem:[#allocation2 + $0x160] sm:$0xff] }
 0x729   :  { %7411 = vmatpush1.bf16.msra.mxu0 %v7410_v43  ;;  %v7454_v43 = vpack.c.bf16 %v6226_v39, %v6223_v30  ;;  %v6231_v12 = vld [vmem:[#allocation2 + $0xd0] sm:$0xff]  ;;  %v7488_v61 = vpack.c.bf16 %v6240_v53, %v6237_v31  ;;  %v6252_v18 = vld [vmem:[#allocation2 + $0x178] sm:$0xff]  ;;  %v6604_v50 = vld [vmem:[#allocation2 + $0x308] sm:$0xff] }
 0x72a   :  { %7413 = vmatprep.subr.bf16.mxu0 %v7412_v56  ;;  %v7456_v56 = vpack.c.bf16 %v6233_v25, %v6230_v62  ;;  %v6243_v59 = vld [vmem:[#allocation2 + $0x130] sm:$0xff]  ;;  %v6607_v34 = vld [vmem:[#allocation2 + $0x320] sm:$0xff]  ;;  %v6606_v38 = vld [vmem:[#allocation2 + $0x318] sm:$0xff] }
 0x72b   :  { %v6603_v7 = vld [vmem:[#allocation2 + $0x300] sm:$0xff]  ;;  %v6610_v42 = vld [vmem:[#allocation2 + $0x338] sm:$0xff]  ;;  %v6613_v35 = vld [vmem:[#allocation2 + $0x350] sm:$0xff] }
 0x72c   :  { %v6609_v30 = vld [vmem:[#allocation2 + $0x330] sm:$0xff]  ;;  %v6612_v39 = vld [vmem:[#allocation2 + $0x348] sm:$0xff]  ;;  %v6619_v25 = vld [vmem:[#allocation2 + $0x380] sm:$0xff] }
 0x72d   :  { %7415 = vmatpush1.bf16.msra.mxu0 %v7414_v52  ;;  %v6236_v52 = vld [vmem:[#allocation2 + $0xf8] sm:$0xff]  ;;  %v6616_v62 = vld [vmem:[#allocation2 + $0x368] sm:$0xff]  ;;  %v6615_v8 = vld [vmem:[#allocation2 + $0x360] sm:$0xff] }
 0x72e   :  { %7416 = vmatprep.subr.bf16.mxu0 %v13854_v22  ;;  %v6618_v49 = vld [vmem:[#allocation2 + $0x378] sm:$0xff]  ;;  %v6648_v5 = vld [vmem:[#allocation2 + $0x468] sm:$0xff]  ;;  %v6611_v31 = vld [vmem:[#allocation2 + $0x340] sm:$0xff] }
 0x72f   :  { %v6614_v53 = vld [vmem:[#allocation2 + $0x358] sm:$0xff] }
 0x79d   :  { %v6197_v11 = vpop.permute.xlu0 %6196 }
 0x79e   :  { %v12600_v57 = vmul.f32 %v6197_v11, %v12580_v15  ;;  %v6270_v15 = vld [vmem:[#allocation2 + $0x208] sm:$0xff] }
 0x79f   :  { %v7423_v4 = vpack.c.bf16 %v6270_v15, %v6267_v9  ;;  %v6244_v9 = vld [vmem:[#allocation2 + $0x138] sm:$0xff] }
 0x7a0   :  { %6366 = vmatmul.mubr.f32.vlgmr.msra.gmra.mrb[2].mxu0 %v12600_v57  ;;  %v6248_v15 = vld [vmem:[#allocation2 + $0x158] sm:$0xff] }
 0x7a1   :  { %7418 = vmatpush3.bf16.msra.mxu0 %v7417_v28  ;;  %v6189_v47 = vpop.permute.xlu0 %6188  ;;  %7287 = vmatprep.mubr.msk.f32.mxu0 %vm13855_vm14, %v13853_v58  ;;  %v6235_v28 = vld [vmem:[#allocation2 + $0xf0] sm:$0xff] }
 0x7a2   :  { %v6191_v3 = vsub.f32 %v6184_v48, %v6189_v47  ;;  %7419 = vmatprep.subr.bf16.mxu0 %v13854_v22  ;;  %v6245_v48 = vld [vmem:[#allocation2 + $0x140] sm:$0xff]  ;;  %v7462_v47 = vpack.c.bf16 %v6238_v44, %v6235_v28  ;;  %v6621_v28 = vld [vmem:[#allocation2 + $0x390] sm:$0xff]  ;;  %v6624_v44 = vld [vmem:[#allocation2 + $0x3a8] sm:$0xff] }
 0x7a4   :  { %v6192_v19 = vmul.f32 1.442695, %v6191_v3  ;;  %v6241_v3 = vld [vmem:[#allocation2 + $0x120] sm:$0xff] }
 0x7a5   :  { %7421 = vmatpush3.bf16.msra.mxu0 %v7420_v40  ;;  %v7464_v40 = vpack.c.bf16 %v6245_v48, %v6242_v29  ;;  %v6628_v29 = vld [vmem:[#allocation2 + $0x3c8] sm:$0xff]  ;;  %v6631_v48 = vld [vmem:[#allocation2 + $0x3e0] sm:$0xff] }
 0x7a6   :  { %8287 = vpow2.f32 %v6192_v19  ;;  %7422 = vmatprep.subr.bf16.mxu0 %v13854_v22  ;;  %v6251_v19 = vld [vmem:[#allocation2 + $0x170] sm:$0xff] }
 0x7a7   :  { %v7468_v27 = vpack.c.bf16 %v6251_v19, %v6248_v15  ;;  %v6634_v15 = vld [vmem:[#allocation2 + $0x3f8] sm:$0xff]  ;;  %v6637_v19 = vld [vmem:[#allocation2 + $0x410] sm:$0xff] }
 0x7a9   :  { %7424 = vmatpush3.bf16.msra.mxu0 %v7423_v4  ;;  %v7466_v4 = vpack.c.bf16 %v6244_v9, %v6241_v3  ;;  %v6627_v3 = vld [vmem:[#allocation2 + $0x3c0] sm:$0xff]  ;;  %v6630_v9 = vld [vmem:[#allocation2 + $0x3d8] sm:$0xff] }
 0x7aa   :  { %7425 = vmatprep.subr.bf16.mxu0 %v13854_v22 }
 0x7ad   :  { %7427 = vmatpush3.bf16.msra.mxu0 %v7426_v0  ;;  %v6250_v0 = vld [vmem:[#allocation2 + $0x168] sm:$0xff] }
 0x7ae   :  { %7428 = vmatprep.subr.bf16.mxu0 %v13854_v22  ;;  %v7470_v54 = vpack.c.bf16 %v6250_v0, %v6247_v13  ;;  %v6633_v13 = vld [vmem:[#allocation2 + $0x3f0] sm:$0xff]  ;;  %v6636_v0 = vld [vmem:[#allocation2 + $0x408] sm:$0xff] }
 0x7b0   :  { %v8288_v41 = vpop.eup %8287 }
 0x7b1   :  { %v6199_v6 = vmul.f32 %v8288_v41, %v6197_v11  ;;  %7430 = vmatpush3.bf16.msra.mxu0 %v7429_v20  ;;  %v7460_v11 = vpack.c.bf16 %v6239_v24, %v6236_v52  ;;  %v6210_v20 = vld [vmem:[#allocation2 + $0x28] sm:$0xff]  ;;  %v6213_v41 = vld [vmem:[#allocation2 + $0x40] sm:$0xff]  ;;  %v6622_v52 = vld [vmem:[#allocation2 + $0x398] sm:$0xff] }
 0x7b2   :  { %7431 = vmatprep.subr.bf16.mxu0 %v13854_v22  ;;  %v7473_v55 = vpack.c.bf16 %v6210_v20, %v6207_v32  ;;  %v6625_v24 = vld [vmem:[#allocation2 + $0x3b0] sm:$0xff]  ;;  %v6643_v32 = vld [vmem:[#allocation2 + $0x440] sm:$0xff]  ;;  %v7518_v20 = vpack.c.bf16 %v6636_v0, %v6633_v13  ;;  %v13858_v0 = vld [vmem:[#allocation16_spill] sm:$0xff] }
 0x7b3   :  { %6200 = vst [vmem:[%s12678_s13] sm:$0xff] %v6199_v6  ;;  %v6216_v6 = vld [vmem:[#allocation2 + $0x58] sm:$0xff] }
 0x7b5   :  { %7433 = vmatpush3.bf16.msra.mxu0 %v7432_v63  ;;  %v7476_v63 = vpack.c.bf16 %v6216_v6, %v6213_v41  ;;  %v6642_v41 = vld [vmem:[#allocation2 + $0x438] sm:$0xff] }
 0x7b6   :  { %7434 = vmatprep.subr.bf16.mxu0 %v13854_v22  ;;  %v6646_v6 = vld [vmem:[#allocation2 + $0x458] sm:$0xff] }
 0x7b9   :  { %7436 = vmatpush3.bf16.msra.mxu0 %v7435_v14  ;;  %v7479_v14 = vpack.c.bf16 %v6222_v46, %v6219_v51 }
 0x7ba   :  { %7437 = vmatprep.subr.bf16.mxu0 %v13854_v22 }
 0x7bd   :  { %7439 = vmatpush3.bf16.msra.mxu0 %v7438_v16  ;;  %v6234_v16 = vld [vmem:[#allocation2 + $0xe8] sm:$0xff] }
 0x7be   :  { %7441 = vmatprep.subr.bf16.mxu0 %v7440_v36  ;;  %v7485_v36 = vpack.c.bf16 %v6234_v16, %v6231_v12  ;;  %v6608_v12 = vld [vmem:[#allocation2 + $0x328] sm:$0xff]  ;;  %v12637_v16 = vld [vmem:[%s12675_s1] sm:$0xff] }
 0x7c0   :  { %7288 = vmatmul.mubr.f32.vlgmr.msra.gmra.mrb[4].mxu0 %v12600_v57 }
 0x7c1   :  { %7443 = vmatpush1.bf16.msra.mxu0 %v7442_v10  ;;  %6506 = vmatprep.mubr.f32.mxu0 %v13853_v58  ;;  %v6246_v10 = vld [vmem:[#allocation2 + $0x148] sm:$0xff] }
 0x7c2   :  { %7445 = vmatprep.subr.bf16.mxu0 %v7444_v1  ;;  %v7491_v1 = vpack.c.bf16 %v6246_v10, %v6243_v59  ;;  %v6617_v59 = vld [vmem:[#allocation2 + $0x370] sm:$0xff]  ;;  %v6620_v10 = vld [vmem:[#allocation2 + $0x388] sm:$0xff] }
 0x7c5   :  { %7447 = vmatpush1.bf16.msra.mxu0 %v7446_v37  ;;  %v7494_v37 = vpack.c.bf16 %v6252_v18, %v6249_v33  ;;  %v6623_v33 = vld [vmem:[#allocation2 + $0x3a0] sm:$0xff]  ;;  %v6626_v18 = vld [vmem:[#allocation2 + $0x3b8] sm:$0xff] }
 0x7c6   :  { %7449 = vmatprep.subr.bf16.mxu0 %v7448_v26  ;;  %v7496_v26 = vpack.c.bf16 %v6607_v34, %v6604_v50  ;;  %v7538_v50 = vpack.c.bf16 %v6626_v18, %v6623_v33  ;;  %v6629_v34 = vld [vmem:[#allocation2 + $0x3d0] sm:$0xff] }
 0x7c9   :  { %7451 = vmatpush1.bf16.msra.mxu0 %v7450_v45  ;;  %v7498_v45 = vpack.c.bf16 %v6606_v38, %v6603_v7  ;;  %v6638_v7 = vld [vmem:[#allocation2 + $0x418] sm:$0xff] }
 0x7ca   :  { %7453 = vmatprep.subr.bf16.mxu0 %v7452_v2  ;;  %v7500_v2 = vpack.c.bf16 %v6613_v35, %v6610_v42  ;;  %v6641_v42 = vld [vmem:[#allocation2 + $0x430] sm:$0xff]  ;;  %v6644_v35 = vld [vmem:[#allocation2 + $0x448] sm:$0xff] }
 0x7cd   :  { %7455 = vmatpush1.bf16.msra.mxu0 %v7454_v43  ;;  %v7502_v43 = vpack.c.bf16 %v6612_v39, %v6609_v30  ;;  %v6650_v30 = vld [vmem:[#allocation2 + $0x478] sm:$0xff] }
 0x7ce   :  { %7457 = vmatprep.subr.bf16.mxu0 %v7456_v56  ;;  %v7504_v56 = vpack.c.bf16 %v6619_v25, %v6616_v62 }
 0x7d1   :  { %7459 = vmatpush1.bf16.msra.mxu0 %v7458_v60  ;;  %v7506_v60 = vpack.c.bf16 %v6618_v49, %v6615_v8  ;;  %v6651_v49 = vld [vmem:[%s12682_s10] sm:$0x7] }
 0x7d2   :  { %7461 = vmatprep.subr.bf16.mxu0 %v7460_v11  ;;  %v7508_v11 = vpack.c.bf16 %v6625_v24, %v6622_v52  ;;  %v6583_v52 = vld [vmem:[%s12681_s9] sm:$0x7]  ;;  %v13856_v24 = vld [vmem:[#allocation14_spill] sm:$0xff] }
 0x7d5   :  { %7463 = vmatpush1.bf16.msra.mxu0 %v7462_v47  ;;  %v7510_v47 = vpack.c.bf16 %v6624_v44, %v6621_v28 }
 0x7d6   :  { %7465 = vmatprep.subr.bf16.mxu0 %v7464_v40  ;;  %v7512_v40 = vpack.c.bf16 %v6631_v48, %v6628_v29  ;;  %v13857_v48 = vld [vmem:[#allocation15_spill] sm:$0xff] }
 0x7d9   :  { %7467 = vmatpush1.bf16.msra.mxu0 %v7466_v4  ;;  %v7514_v4 = vpack.c.bf16 %v6630_v9, %v6627_v3 }
 0x7da   :  { %7469 = vmatprep.subr.bf16.mxu0 %v7468_v27  ;;  %v7516_v27 = vpack.c.bf16 %v6637_v19, %v6634_v15 }
 0x7dd   :  { %7471 = vmatpush1.bf16.msra.mxu0 %v7470_v54  ;;  %v6640_v54 = vld [vmem:[#allocation2 + $0x428] sm:$0xff] }
 0x7de   :  { %7472 = vmatprep.subr.bf16.mxu0 %v13854_v22 }
 0x7e0   :  { %6507 = vmatmul.mubr.f32.vlgmr.msra.gmra.mrb[2].mxu0 %v6204_v23 }
 0x7e1   :  { %7474 = vmatpush3.bf16.msra.mxu0 %v7473_v55  ;;  %7322 = vmatprep.mubr.msk.f32.mxu0 %vm13855_vm14, %v13853_v58  ;;  %v6639_v55 = vld [vmem:[#allocation2 + $0x420] sm:$0xff] }
 0x7e2   :  { %7475 = vmatprep.subr.bf16.mxu0 %v13854_v22  ;;  %v7522_v51 = vpack.c.bf16 %v6642_v41, %v6639_v55 }
 0x7e5   :  { %7477 = vmatpush3.bf16.msra.mxu0 %v7476_v63  ;;  %v6649_v63 = vld [vmem:[#allocation2 + $0x470] sm:$0xff] }
 0x7e6   :  { %7478 = vmatprep.subr.bf16.mxu0 %v13854_v22  ;;  %v7524_v46 = vpack.c.bf16 %v6649_v63, %v6646_v6 }
 0x7e9   :  { %7480 = vmatpush3.bf16.msra.mxu0 %v7479_v14  ;;  %v6645_v14 = vld [vmem:[#allocation2 + $0x450] sm:$0xff] }
 0x7ea   :  { %7481 = vmatprep.subr.bf16.mxu0 %v13854_v22  ;;  %v7526_v17 = vpack.c.bf16 %v6648_v5, %v6645_v14 }
 0x7ed   :  { %7483 = vmatpush3.bf16.msra.mxu0 %v7482_v21  ;;  %v6605_v21 = vld [vmem:[#allocation2 + $0x310] sm:$0xff] }
 0x7ee   :  { %7484 = vmatprep.subr.bf16.mxu0 %v13854_v22 }
 0x7f1   :  { %7486 = vmatpush3.bf16.msra.mxu0 %v7485_v36  ;;  %v7529_v36 = vpack.c.bf16 %v6608_v12, %v6605_v21 }
 0x7f2   :  { %7487 = vmatprep.subr.bf16.mxu0 %v13854_v22 }
 0x7f5   :  { %7489 = vmatpush3.bf16.msra.mxu0 %v7488_v61  ;;  %v7532_v61 = vpack.c.bf16 %v6614_v53, %v6611_v31 }
 0x7f6   :  { %7490 = vmatprep.subr.bf16.mxu0 %v13854_v22 }
 0x7f9   :  { %7492 = vmatpush3.bf16.msra.mxu0 %v7491_v1  ;;  %v7535_v1 = vpack.c.bf16 %v6620_v10, %v6617_v59 }
 0x7fa   :  { %7493 = vmatprep.subr.bf16.mxu0 %v13854_v22 }
 0x7fd   :  { %7495 = vmatpush3.bf16.msra.mxu0 %v7494_v37  ;;  %v6632_v37 = vld [vmem:[#allocation2 + $0x3e8] sm:$0xff] }
 0x7fe   :  { %7497 = vmatprep.subr.bf16.mxu0 %v7496_v26  ;;  %v7541_v26 = vpack.c.bf16 %v6632_v37, %v6629_v34 }
 0x800   :  { %7323 = vmatmul.mubr.f32.vlgmr.msra.gmra.mrb[6].mxu0 %v6204_v23  ;;  %v7520_v23 = vpack.c.bf16 %v6643_v32, %v6640_v54  ;;  %v6664_v54 = vrot.slane %v6651_v49, %v13858_v0  ;;  %v6596_v32 = vrot.slane %v6583_v52, %v13858_v0 }
 0x801   :  { %7499 = vmatpush1.bf16.msra.mxu0 %v7498_v45  ;;  %6732 = vmatprep.mubr.f32.mxu0 %v13853_v58  ;;  %v7547_v45 = vpack.c.bf16 %v6644_v35, %v6641_v42 }
 0x802   :  { %7501 = vmatprep.subr.bf16.mxu0 %v7500_v2  ;;  %v6647_v2 = vld [vmem:[#allocation2 + $0x460] sm:$0xff] }
 0x803   :  { %v7550_v39 = vpack.c.bf16 %v6650_v30, %v6647_v2 }
 0x805   :  { %7503 = vmatpush1.bf16.msra.mxu0 %v7502_v43 }
 0x806   :  { %7505 = vmatprep.subr.bf16.mxu0 %v7504_v56 }
 0x809   :  { %7507 = vmatpush1.bf16.msra.mxu0 %v7506_v60  ;;  %v6588_v60 = vrot.slane %v6583_v52, %v13856_v24 }
 0x80a   :  { %7509 = vmatprep.subr.bf16.mxu0 %v7508_v11 }
 0x80d   :  { %7511 = vmatpush1.bf16.msra.mxu0 %v7510_v47  ;;  %v6592_v47 = vrot.slane %v6583_v52, %v13857_v48 }
 0x80e   :  { %7513 = vmatprep.subr.bf16.mxu0 %v7512_v40  ;;  %v6660_v40 = vrot.slane %v6651_v49, %v13857_v48 }
 0x810   :  { %v7554_v9 = vadd.f32 %v6660_v40, %v6592_v47 }
 0x811   :  { %7515 = vmatpush1.bf16.msra.mxu0 %v7514_v4 }
 0x812   :  { %7517 = vmatprep.subr.bf16.mxu0 %v7516_v27 }
 0x815   :  { %7519 = vmatpush1.bf16.msra.mxu0 %v7518_v20 }
 0x816   :  { %7521 = vmatprep.subr.bf16.mxu0 %v7520_v23 }
 0x819   :  { %7523 = vmatpush1.bf16.msra.mxu0 %v7522_v51 }
 0x81a   :  { %7525 = vmatprep.subr.bf16.mxu0 %v7524_v46 }
 0x81d   :  { %7527 = vmatpush1.bf16.msra.mxu0 %v7526_v17 }
 0x81e   :  { %7528 = vmatprep.subr.bf16.mxu0 %v13854_v22 }
 0x820   :  { %6733 = vmatmul.mubr.f32.vlgmr.msra.gmra.mrb[2].mxu0 %v12637_v16 }
 0x821   :  { %7530 = vmatpush3.bf16.msra.mxu0 %v7529_v36  ;;  %7357 = vmatprep.mubr.msk.f32.mxu0 %vm13855_vm14, %v13853_v58  ;;  %v6635_v58 = vld [vmem:[#allocation2 + $0x400] sm:$0xff] }
 0x822   :  { %7531 = vmatprep.subr.bf16.mxu0 %v13854_v22  ;;  %v7544_v38 = vpack.c.bf16 %v6638_v7, %v6635_v58 }
 0x825   :  { %7533 = vmatpush3.bf16.msra.mxu0 %v7532_v61 }
 0x826   :  { %7534 = vmatprep.subr.bf16.mxu0 %v13854_v22 }
 0x829   :  { %7536 = vmatpush3.bf16.msra.mxu0 %v7535_v1 }
 0x82a   :  { %7537 = vmatprep.subr.bf16.mxu0 %v13854_v22 }
 0x82d   :  { %7539 = vmatpush3.bf16.msra.mxu0 %v7538_v50 }
 0x82e   :  { %7540 = vmatprep.subr.bf16.mxu0 %v13854_v22 }
 0x831   :  { %7542 = vmatpush3.bf16.msra.mxu0 %v7541_v26 }
 0x832   :  { %7543 = vmatprep.subr.bf16.mxu0 %v13854_v22 }
 0x835   :  { %7545 = vmatpush3.bf16.msra.mxu0 %v7544_v38 }
 0x836   :  { %7546 = vmatprep.subr.bf16.mxu0 %v13854_v22 }
 0x839   :  { %7548 = vmatpush3.bf16.msra.mxu0 %v7547_v45 }
 0x83a   :  { %7549 = vmatprep.subr.bf16.mxu0 %v13854_v22  ;;  %v6656_v22 = vrot.slane %v6651_v49, %v13856_v24 }
 0x83c   :  { %v7552_v11 = vadd.f32 %v6656_v22, %v6588_v60 }
 0x83d   :  { %7551 = vmatpush3.bf16.msra.mxu0 %v7550_v39 }
 0x840   :  { %7358 = vmatmul.mubr.f32.vlgmr.msra.gmra.mrb[8].mxu0 %v12637_v16 }
 0x893   :  { %v6438_v62 = vpop.f32.mrb[4].mxu0 }
 0x894   :  { %v7289_v25 = vpop.f32.mrb[5].mxu0 }
 0x8d3   :  { %v6579_v43 = vpop.f32.mrb[6].mxu0 }
 0x8d4   :  { %v6580_v56 = vadd.f32 %v6579_v43, %v6438_v62  ;;  %v7324_v8 = vpop.f32.mrb[7].mxu0 }
 0x8d6   :  { %v6602_v63 = vadd.f32 %v6596_v32, %v6580_v56 }
 0x8f3   :  { %v6734_v28 = vpop.f32.mrb[2].mxu0 }
 0x8f4   :  { %v7553_v44 = vadd.f32 %v7552_v11, %v6734_v28  ;;  %v6736_v29 = vpop.f32.mrb[3].mxu0 }
 0x8f5   :  { %v7555_v15 = vadd.f32 %v7554_v9, %v6736_v29 }
 0x8f6   :  { %v6928_v3 = vmul.f32 -1.442695, %v7553_v44 }
 0x8f7   :  { %v6929_v19 = vmul.f32 -1.442695, %v7555_v15 }
 0x8f8   :  { %8289 = vpow2.f32 %v6928_v3 }
 0x8f9   :  { %8291 = vpow2.f32 %v6929_v19 }
 0x902   :  { %v8290_v4 = vpop.eup %8289 }
 0x903   :  { %v6813_v27 = vadd.f32 1.0, %v8290_v4  ;;  %v8292_v13 = vpop.eup %8291 }
 0x904   :  { %v6820_v20 = vadd.f32 1.0, %v8292_v13 }
 0x905   :  { %8293 = vrcp.f32 %v6813_v27 }
 0x906   :  { %8295 = vrcp.f32 %v6820_v20 }
 0x90f   :  { %v8294_v6 = vpop.eup %8293 }
 0x910   :  { %v8296_v14 = vpop.eup %8295 }
 0x911   :  { %v6826_v5 = vsub.f32 1.0, %v8296_v14  ;;  %v6828_v21 = vmul.f32 %v8296_v14, %v12637_v16 }
 0x913   :  { %v6805_v23 = vpop.f32.mrb[8].mxu0 }
 0x914   :  { %v6806_v55 = vadd.f32 %v6805_v23, %v6664_v54  ;;  %v7359_v41 = vpop.f32.mrb[9].mxu0 }
 0x916   :  { %v6823_v51 = vmul.f32 %v8294_v6, %v6806_v55 }
 0x918   :  { %v6824_v46 = vadd.f32 %v6823_v51, %v6602_v63 }
 0x91a   :  { %8297 = vtanh.f32 %v6824_v46 }
 0x924   :  { %v8298_v17 = vpop.eup %8297 }
 0x925   :  { %v6827_v12 = vmul.f32 %v8298_v17, %v6826_v5 }
 0x927   :  { %v6829_v36 = vadd.f32 %v6828_v21, %v6827_v12 }
 0x929   :  { %6830 = vst [vmem:[%s12683_s11] sm:$0xff] %v6829_v36  ;;  %v6934_v31 = vpack.c.bf16 %v12600_v57, %v6829_v36 }
 0x92b   :  { %6935 = vst [vmem:[%s12684_s12] sm:$0xff] %v6934_v31  }
 0x92c   :  { %6847 = vsyncmov [#allocation3] }
 0x92f   :  { %s6848_s14 = vpop.sfrf %6847 }
 0x930   :  { %p6930_p8 = scmp.ne.s32.totalorder %s6848_s14, 0 }
 0x932   :  { %6852 = shalt.err (%p6930_p8)  }

</bundles_post_ra>
